<compile_context>
chip_gen: v6e
topology: v6e:2x2x1
jax: 0.10.0
libtpu: 0.0.40
codegen_flags: <defaults>
</compile_context>

<pallas_src>
import jax
import jax.numpy as jnp
from jax import lax
from jax.experimental import pallas as pl
from jax.experimental.pallas import tpu as pltpu

# dtype of MXU matmul operands (weights + casted activations). Accumulation, gate math
# and the h/c state stay float32.
MATMUL_DTYPE = jnp.bfloat16
# dtype used to stage the hoisted x-gate pre-activations and intermediate layer outputs
# through HBM (halves bandwidth). The pure-JAX reference mirrors this rounding.
GATE_DTYPE = jnp.bfloat16


# ------------------------------- small helpers --------------------------------

def _round_up(n, m):
    return ((n + m - 1) // m) * m


def _largest_divisor_at_most(n, cap):
    for d in range(min(n, cap), 0, -1):
        if n % d == 0:
            return d
    return 1


def _permute_ifgo_to_ifog(a):
    """Permute the 4H gate columns from PyTorch order (i,f,g,o) to (i,f,o,g)."""
    i, f, g, o = jnp.split(a, 4, axis=-1)
    return jnp.concatenate([i, f, o, g], axis=-1)


def _compiler_params(dim_semantics, est_bytes):
    limit = min(max(int(est_bytes * 1.3) + (2 << 20), 32 << 20), 64 << 20)
    return pltpu.CompilerParams(dimension_semantics=dim_semantics,
                                vmem_limit_bytes=limit)


# ------------------------------- Pallas kernels -------------------------------

def _make_proj_kernel(n_in):
    """Hoisted input projection for n_in input streams:
       gates = sum_k x_k @ W_k + (b_ih + b_hh), both directions in one (.., 8H) matmul.
       Outputs per-direction x-gate pre-activations in GATE_DTYPE."""
    def kernel(*refs):
        x_refs = refs[:n_in]
        w_refs = refs[n_in:2 * n_in]
        b_ref = refs[2 * n_in]
        gxf_ref = refs[2 * n_in + 1]
        gxb_ref = refs[2 * n_in + 2]
        h4 = gxf_ref.shape[-1]
        gates = b_ref[...]                                    # (1, 8H) f32, broadcasts
        for x_ref, w_ref in zip(x_refs, w_refs):
            gates = gates + jnp.dot(x_ref[...].astype(w_ref.dtype), w_ref[...],
                                    preferred_element_type=jnp.float32)
        gxf_ref[...] = gates[:, :h4].astype(gxf_ref.dtype)
        gxb_ref[...] = gates[:, h4:].astype(gxb_ref.dtype)
    return kernel


def _bilstm_rec_kernel(gxf_ref, gxb_ref, whf_ref, whb_ref,
                       outf_ref, outb_ref,
                       hf_scr, cf_scr, hb_scr, cb_scr):
    """Fused bidirectional LSTM recurrence over one block of T timesteps.

    gxf_ref: (T, B, 4H) fwd x-gates for time block g           (GATE_DTYPE)
    gxb_ref: (T, B, 4H) bwd x-gates for time block NG-1-g      (GATE_DTYPE)
    whf_ref/whb_ref: (H, 4H) per-direction recurrent weights   (MATMUL_DTYPE)
    outf_ref: (T, B, H) fwd output block for time block g
    outb_ref: (T, B, H) bwd output block for time block NG-1-g
    scratch: per-direction (B, H) float32 h/c state (full-width stores only).
    Gate column order is (i, f, o, g).
    """
    g = pl.program_id(0)
    t_blk = gxf_ref.shape[0]
    h4 = gxf_ref.shape[-1]
    h = h4 // 4

    @pl.when(g == 0)
    def _():
        hf_scr[...] = jnp.zeros_like(hf_scr)
        cf_scr[...] = jnp.zeros_like(cf_scr)
        hb_scr[...] = jnp.zeros_like(hb_scr)
        cb_scr[...] = jnp.zeros_like(cb_scr)

    w_f = whf_ref[...]
    w_b = whb_ref[...]

    def cell(gates, c_prev):
        # one contiguous sigmoid over 3H (i,f,o) + one tanh over H (g)
        sig = jax.nn.sigmoid(gates[:, :3 * h])
        i_g = sig[:, 0:h]
        f_g = sig[:, h:2 * h]
        o_g = sig[:, 2 * h:3 * h]
        g_g = jnp.tanh(gates[:, 3 * h:])
        c_new = f_g * c_prev + i_g * g_g
        h_new = o_g * jnp.tanh(c_new)
        return h_new, c_new

    def step(j, carry):
        # ---- forward direction: local time j ----
        hh_f = jnp.dot(hf_scr[...].astype(w_f.dtype), w_f,
                       preferred_element_type=jnp.float32)
        gates_f = gxf_ref[j].astype(jnp.float32) + hh_f
        h_f, c_f = cell(gates_f, cf_scr[...])
        hf_scr[...] = h_f
        cf_scr[...] = c_f
        outf_ref[j] = h_f.astype(outf_ref.dtype)
        # ---- backward direction: local time T-1-j (block is the mirrored time block) ----
        jb = t_blk - 1 - j
        hh_b = jnp.dot(hb_scr[...].astype(w_b.dtype), w_b,
                       preferred_element_type=jnp.float32)
        gates_b = gxb_ref[jb].astype(jnp.float32) + hh_b
        h_b, c_b = cell(gates_b, cb_scr[...])
        hb_scr[...] = h_b
        cb_scr[...] = c_b
        outb_ref[jb] = h_b.astype(outb_ref.dtype)
        return carry

    lax.fori_loop(0, t_blk, step, 0, unroll=True)


# --------------------------------- wrappers -----------------------------------

def _bilstm_layer(xs, layer_params, *, out_dtype, time_block=32,
                  vmem_budget=40 << 20):
    """One bidirectional LSTM layer.

    xs: list of time-major inputs — [(S, B, D)] for the first layer, or
        [(S, B, H) fwd, (S, B, H) bwd] for subsequent layers. B % 8 == 0.
    Returns (out_f, out_b), each (S, B, H) in out_dtype.
    """
    (w_ih_f, w_hh_f, b_f), (w_ih_b, w_hh_b, b_b) = layer_params
    S, B = xs[0].shape[0], xs[0].shape[1]
    H = w_hh_f.shape[0]
    H4, H8 = 4 * H, 8 * H
    itemsz = lambda dt: jnp.dtype(dt).itemsize

    # gate order (i,f,g,o) -> (i,f,o,g): contiguous sigmoid(3H) + tanh(H) in the kernel.
    w_ih_f, w_hh_f, b_f = (_permute_ifgo_to_ifog(a) for a in (w_ih_f, w_hh_f, b_f))
    w_ih_b, w_hh_b, b_b = (_permute_ifgo_to_ifog(a) for a in (w_ih_b, w_hh_b, b_b))

    # ---- hoisted input projection: one grid-blocked matmul for all timesteps & dirs ----
    n_in = len(xs)
    din_each = [int(x.shape[-1]) for x in xs]
    w_parts, row0 = [], 0
    for d in din_each:                     # split weight rows per input stream
        w_parts.append(jnp.concatenate([w_ih_f[row0:row0 + d],
                                        w_ih_b[row0:row0 + d]],
                                       axis=1).astype(MATMUL_DTYPE))   # (d, 8H)
        row0 += d
    b_cat = jnp.concatenate([b_f, b_b])[None, :].astype(jnp.float32)    # (1, 8H)

    SB = S * B
    RB = min(256, _round_up(SB, 8))
    SBp = _round_up(SB, RB)               # pad rows -> never a single giant block
    x2s = []
    for x in xs:
        x2 = x.reshape(SB, x.shape[-1])
        if SBp != SB:
            x2 = jnp.pad(x2, ((0, SBp - SB), (0, 0)))
        x2s.append(x2)

    est_proj = (sum(2 * RB * d * itemsz(x.dtype) for x, d in zip(x2s, din_each))
                + sum(2 * d * H8 * itemsz(MATMUL_DTYPE) for d in din_each)
                + 2 * H8 * 4
                + 2 * 2 * RB * H4 * itemsz(GATE_DTYPE))
    # TODO(synk): for very large H add a column grid axis over the 8H gate dim (v7x 64 MiB).
    gxf, gxb = pl.pallas_call(
        _make_proj_kernel(n_in),
        out_shape=(jax.ShapeDtypeStruct((SBp, H4), GATE_DTYPE),
                   jax.ShapeDtypeStruct((SBp, H4), GATE_DTYPE)),
        grid_spec=pltpu.PrefetchScalarGridSpec(
            num_scalar_prefetch=0,
            grid=(SBp // RB,),
            in_specs=([pl.BlockSpec((RB, d), lambda r: (r, 0)) for d in din_each]
                      + [pl.BlockSpec((d, H8), lambda r: (0, 0)) for d in din_each]
                      + [pl.BlockSpec((1, H8), lambda r: (0, 0))]),
            out_specs=[pl.BlockSpec((RB, H4), lambda r: (r, 0)),
                       pl.BlockSpec((RB, H4), lambda r: (r, 0))],
        ),
        compiler_params=_compiler_params(("parallel",), est_proj),
    )(*x2s, *w_parts, b_cat)
    if SBp != SB:
        gxf, gxb = gxf[:SB], gxb[:SB]
    gxf = gxf.reshape(S, B, H4)
    gxb = gxb.reshape(S, B, H4)

    # ---- fused bidirectional recurrence over time blocks ----
    whf = w_hh_f.astype(MATMUL_DTYPE)     # (H, 4H)
    whb = w_hh_b.astype(MATMUL_DTYPE)     # (H, 4H)

    def rec_bytes(T):
        gx = 2 * 2 * T * B * H4 * itemsz(GATE_DTYPE)          # gxf+gxb, double-buffered
        w = 2 * 2 * H * H4 * itemsz(MATMUL_DTYPE)             # whf+whb
        out = 2 * 2 * T * B * H * itemsz(out_dtype)            # outf+outb, double-buffered
        scr = 4 * B * H * 4
        return gx + w + out + scr

    T = _largest_divisor_at_most(S, max(1, time_block))
    while T > 1 and rec_bytes(T) > vmem_budget:               # re-derive for small VMEM (v7x)
        T = _largest_divisor_at_most(S, T - 1)
    NG = S // T

    out_f, out_b = pl.pallas_call(
        _bilstm_rec_kernel,
        out_shape=(jax.ShapeDtypeStruct((S, B, H), out_dtype),
                   jax.ShapeDtypeStruct((S, B, H), out_dtype)),
        grid_spec=pltpu.PrefetchScalarGridSpec(
            num_scalar_prefetch=0,
            grid=(NG,),
            in_specs=[
                pl.BlockSpec((T, B, H4), lambda g: (g, 0, 0)),            # fwd x-gates
                pl.BlockSpec((T, B, H4), lambda g: (NG - 1 - g, 0, 0)),   # bwd x-gates
                pl.BlockSpec((H, H4), lambda g: (0, 0)),                  # W_hh fwd
                pl.BlockSpec((H, H4), lambda g: (0, 0)),                  # W_hh bwd
            ],
            # per-direction, per-time-block outputs: pipelined writeback, no resident slab
            out_specs=[
                pl.BlockSpec((T, B, H), lambda g: (g, 0, 0)),
                pl.BlockSpec((T, B, H), lambda g: (NG - 1 - g, 0, 0)),
            ],
            scratch_shapes=[pltpu.VMEM((B, H), jnp.float32)] * 4,   # h_f, c_f, h_b, c_b
        ),
        compiler_params=_compiler_params(("arbitrary",), rec_bytes(T)),
    )(gxf, gxb, whf, whb)
    return out_f, out_b


def bilstm_forward(x, params):
    """x: (B, S, D_in) batch-first (PyTorch nn.LSTM convention). Returns (B, S, 2H) f32."""
    B, S, _ = x.shape
    # Pad batch to a multiple of 16 (bf16 packs 16 rows per sublane group fed to the MXU).
    Bp = _round_up(B, 16)
    if Bp != B:
        x = jnp.pad(x, ((0, Bp - B), (0, 0), (0, 0)))
    xs = [jnp.transpose(x, (1, 0, 2))]                 # time-major (S, Bp, D)
    n_layers = len(params)
    for li, layer_params in enumerate(params):
        last = (li == n_layers - 1)
        out_f, out_b = _bilstm_layer(xs, layer_params,
                                     out_dtype=jnp.float32 if last else GATE_DTYPE)
        xs = [out_f, out_b]                            # fed straight into the next layer
        # TODO(synk): inter-layer dropout (dropout=0.1) is training-only in nn.LSTM;
        # eval-mode forward (identity) is what is implemented here.
    out = jnp.concatenate(xs, axis=-1)                 # single lane-dense concat at the end
    out = jnp.transpose(out, (1, 0, 2))                # (Bp, S, 2H)
    return out[:B]


def init_bilstm_params(key, input_size, hidden_size, num_layers):
    """PyTorch-shaped params per layer/direction, stored transposed for the kernel:
    weight_ih -> (D_in, 4H), weight_hh -> (H, 4H), bias = b_ih + b_hh -> (4H,).
    Gate column order is PyTorch's (i, f, g, o)."""
    stdv = 1.0 / float(hidden_size) ** 0.5
    params = []
    in_size = input_size
    for _ in range(num_layers):
        layer = []
        for _ in range(2):   # forward, backward
            key, k1, k2, k3, k4 = jax.random.split(key, 5)
            w_ih = jax.random.uniform(k1, (in_size, 4 * hidden_size), jnp.float32, -stdv, stdv)
            w_hh = jax.random.uniform(k2, (hidden_size, 4 * hidden_size), jnp.float32, -stdv, stdv)
            b_ih = jax.random.uniform(k3, (4 * hidden_size,), jnp.float32, -stdv, stdv)
            b_hh = jax.random.uniform(k4, (4 * hidden_size,), jnp.float32, -stdv, stdv)
            layer.append((w_ih, w_hh, b_ih + b_hh))
        params.append(layer)
        in_size = 2 * hidden_size
    return params


# ---------------- pure-JAX reference (mirrors the kernel's reduced-precision staging) ----------------

def _lstm_ref_direction(x_tm, w_ih, w_hh, b, reverse):
    S, B, _ = x_tm.shape
    H = w_hh.shape[0]
    gx = jnp.einsum('sbd,dh->sbh', x_tm.astype(MATMUL_DTYPE), w_ih.astype(MATMUL_DTYPE),
                    preferred_element_type=jnp.float32) + b
    gx = gx.astype(GATE_DTYPE).astype(jnp.float32)   # mirrors bf16 gate staging
    xs = gx[::-1] if reverse else gx

    def step(carry, g_t):
        h, c = carry
        gates = g_t + jnp.dot(h.astype(MATMUL_DTYPE), w_hh.astype(MATMUL_DTYPE),
                              preferred_element_type=jnp.float32)
        i = jax.nn.sigmoid(gates[:, :H])
        f = jax.nn.sigmoid(gates[:, H:2 * H])
        g = jnp.tanh(gates[:, 2 * H:3 * H])
        o = jax.nn.sigmoid(gates[:, 3 * H:])
        c = f * c + i * g
        h = o * jnp.tanh(c)
        return (h, c), h

    init = (jnp.zeros((B, H), jnp.float32), jnp.zeros((B, H), jnp.float32))
    _, ys = lax.scan(step, init, xs)
    return ys[::-1] if reverse else ys


def bilstm_ref(x, params):
    h = jnp.transpose(x, (1, 0, 2))
    for layer in params:
        outs = [_lstm_ref_direction(h, w_ih, w_hh, b, reverse=(d == 1))
                for d, (w_ih, w_hh, b) in enumerate(layer)]
        h = jnp.concatenate(outs, axis=-1)
    return jnp.transpose(h, (1, 0, 2))


if __name__ == "__main__":
    B, S = 2, 8
    input_size, hidden_size, num_layers = 16, 32, 2

    key = jax.random.PRNGKey(0)
    kx, kp = jax.random.split(key)
    x = jax.random.normal(kx, (B, S, input_size), jnp.float32)
    params = init_bilstm_params(kp, input_size, hidden_size, num_layers)

    out = jax.jit(bilstm_forward)(x, params)
    out = jax.block_until_ready(out)
    assert out.shape == (B, S, 2 * hidden_size), out.shape

    ref = jax.block_until_ready(bilstm_ref(x, params))
    max_err = float(jnp.max(jnp.abs(out - ref)))
    assert jnp.allclose(out, ref, atol=5e-3, rtol=5e-3), max_err

    print("KERNEL_OK")
</pallas_src>

<mosaic_0001>
module attributes {stable_mosaic.version = 11 : i64} {
  func.func @kernel(%arg0: i32, %arg1: memref<128x16xf32, #tpu.memory_space<vmem>>, %arg2: memref<16x256xbf16, #tpu.memory_space<vmem>>, %arg3: memref<1x256xf32, #tpu.memory_space<vmem>>, %arg4: memref<128x128xbf16, #tpu.memory_space<vmem>>, %arg5: memref<128x128xbf16, #tpu.memory_space<vmem>>) attributes {dimension_semantics = [#tpu.dimension_semantics<parallel>], iteration_bounds = array<i64: 1>, scalar_prefetch = 0 : i64, scratch_operands = 0 : i64, tpu.core_type = #tpu.core_type<tc>, window_params = [{transform_indices = @transform_0, window_bounds = array<i64: 128, 16>}, {pipeline_mode = #tpu.pipeline_mode<synchronous>, transform_indices = @transform_1, window_bounds = array<i64: 16, 256>}, {pipeline_mode = #tpu.pipeline_mode<synchronous>, transform_indices = @transform_2, window_bounds = array<i64: 1, 256>}, {transform_indices = @transform_3, window_bounds = array<i64: 128, 128>}, {transform_indices = @transform_4, window_bounds = array<i64: 128, 128>}]} {
    %c0 = arith.constant 0 : index
    %c0_0 = arith.constant 0 : index
    %0 = vector.load %arg3[%c0, %c0_0] : memref<1x256xf32, #tpu.memory_space<vmem>>, vector<1x256xf32>
    %c0_1 = arith.constant 0 : index
    %c0_2 = arith.constant 0 : index
    %1 = vector.load %arg1[%c0_1, %c0_2] : memref<128x16xf32, #tpu.memory_space<vmem>>, vector<128x16xf32>
    %2 = arith.truncf %1 : vector<128x16xf32> to vector<128x16xbf16>
    %c0_3 = arith.constant 0 : index
    %c0_4 = arith.constant 0 : index
    %3 = vector.load %arg2[%c0_3, %c0_4] : memref<16x256xbf16, #tpu.memory_space<vmem>>, vector<16x256xbf16>
    %cst = arith.constant dense<0.000000e+00> : vector<128x256xf32>
    %4 = tpu.matmul %2, %3, %cst {dimension_numbers = #tpu.dot_dimension_numbers<[1], [0], [0], [1], [0, 0, 1, 1], [], []>} : vector<128x16xbf16>, vector<16x256xbf16>, vector<128x256xf32> -> vector<128x256xf32>
    %5 = vector.broadcast %0 : vector<1x256xf32> to vector<128x256xf32>
    %6 = arith.addf %5, %4 : vector<128x256xf32>
    %7 = vector.extract_strided_slice %6 {offsets = [0, 0], sizes = [128, 128], strides = [1, 1]} : vector<128x256xf32> to vector<128x128xf32>
    %8 = arith.truncf %7 : vector<128x128xf32> to vector<128x128xbf16>
    %c0_5 = arith.constant 0 : index
    %c0_6 = arith.constant 0 : index
    %9 = vector.load %arg4[%c0_5, %c0_6] : memref<128x128xbf16, #tpu.memory_space<vmem>>, vector<128x128xbf16>
    tpu.vector_store %arg4[%c0_5, %c0_6], %8 {strides = array<i32>} : memref<128x128xbf16, #tpu.memory_space<vmem>>, vector<128x128xbf16>,
    %10 = vector.extract_strided_slice %6 {offsets = [0, 128], sizes = [128, 128], strides = [1, 1]} : vector<128x256xf32> to vector<128x128xf32>
    %11 = arith.truncf %10 : vector<128x128xf32> to vector<128x128xbf16>
    %c0_7 = arith.constant 0 : index
    %c0_8 = arith.constant 0 : index
    %12 = vector.load %arg5[%c0_7, %c0_8] : memref<128x128xbf16, #tpu.memory_space<vmem>>, vector<128x128xbf16>
    tpu.vector_store %arg5[%c0_7, %c0_8], %11 {strides = array<i32>} : memref<128x128xbf16, #tpu.memory_space<vmem>>, vector<128x128xbf16>,
    return
  }
  func.func @transform_0(%arg0: i32) -> (i32, i32) {
    %c0_i32 = arith.constant 0 : i32
    %c0_i32_0 = arith.constant 0 : i32
    return %arg0, %c0_i32 : i32, i32
  }
  func.func @transform_1(%arg0: i32) -> (i32, i32) {
    %c0_i32 = arith.constant 0 : i32
    %c0_i32_0 = arith.constant 0 : i32
    %c0_i32_1 = arith.constant 0 : i32
    return %c0_i32, %c0_i32_0 : i32, i32
  }
  func.func @transform_2(%arg0: i32) -> (i32, i32) {
    %c0_i32 = arith.constant 0 : i32
    %c0_i32_0 = arith.constant 0 : i32
    %c0_i32_1 = arith.constant 0 : i32
    return %c0_i32, %c0_i32_0 : i32, i32
  }
  func.func @transform_3(%arg0: i32) -> (i32, i32) {
    %c0_i32 = arith.constant 0 : i32
    %c0_i32_0 = arith.constant 0 : i32
    return %arg0, %c0_i32 : i32, i32
  }
  func.func @transform_4(%arg0: i32) -> (i32, i32) {
    %c0_i32 = arith.constant 0 : i32
    %c0_i32_0 = arith.constant 0 : i32
    return %arg0, %c0_i32 : i32, i32
  }
}

module attributes {stable_mosaic.version = 11 : i64} {
  func.func @kernel(%arg0: i32, %arg1: memref<128x32xbf16, #tpu.memory_space<vmem>>, %arg2: memref<128x32xbf16, #tpu.memory_space<vmem>>, %arg3: memref<32x256xbf16, #tpu.memory_space<vmem>>, %arg4: memref<32x256xbf16, #tpu.memory_space<vmem>>, %arg5: memref<1x256xf32, #tpu.memory_space<vmem>>, %arg6: memref<128x128xbf16, #tpu.memory_space<vmem>>, %arg7: memref<128x128xbf16, #tpu.memory_space<vmem>>) attributes {dimension_semantics = [#tpu.dimension_semantics<parallel>], iteration_bounds = array<i64: 1>, scalar_prefetch = 0 : i64, scratch_operands = 0 : i64, tpu.core_type = #tpu.core_type<tc>, window_params = [{transform_indices = @transform_0, window_bounds = array<i64: 128, 32>}, {transform_indices = @transform_1, window_bounds = array<i64: 128, 32>}, {pipeline_mode = #tpu.pipeline_mode<synchronous>, transform_indices = @transform_2, window_bounds = array<i64: 32, 256>}, {pipeline_mode = #tpu.pipeline_mode<synchronous>, transform_indices = @transform_3, window_bounds = array<i64: 32, 256>}, {pipeline_mode = #tpu.pipeline_mode<synchronous>, transform_indices = @transform_4, window_bounds = array<i64: 1, 256>}, {transform_indices = @transform_5, window_bounds = array<i64: 128, 128>}, {transform_indices = @transform_6, window_bounds = array<i64: 128, 128>}]} {
    %c0 = arith.constant 0 : index
    %c0_0 = arith.constant 0 : index
    %0 = vector.load %arg5[%c0, %c0_0] : memref<1x256xf32, #tpu.memory_space<vmem>>, vector<1x256xf32>
    %c0_1 = arith.constant 0 : index
    %c0_2 = arith.constant 0 : index
    %1 = vector.load %arg1[%c0_1, %c0_2] : memref<128x32xbf16, #tpu.memory_space<vmem>>, vector<128x32xbf16>
    %c0_3 = arith.constant 0 : index
    %c0_4 = arith.constant 0 : index
    %2 = vector.load %arg3[%c0_3, %c0_4] : memref<32x256xbf16, #tpu.memory_space<vmem>>, vector<32x256xbf16>
    %cst = arith.constant dense<0.000000e+00> : vector<128x256xf32>
    %3 = tpu.matmul %1, %2, %cst {dimension_numbers = #tpu.dot_dimension_numbers<[1], [0], [0], [1], [0, 0, 1, 1], [], []>} : vector<128x32xbf16>, vector<32x256xbf16>, vector<128x256xf32> -> vector<128x256xf32>
    %4 = vector.broadcast %0 : vector<1x256xf32> to vector<128x256xf32>
    %5 = arith.addf %4, %3 : vector<128x256xf32>
    %c0_5 = arith.constant 0 : index
    %c0_6 = arith.constant 0 : index
    %6 = vector.load %arg2[%c0_5, %c0_6] : memref<128x32xbf16, #tpu.memory_space<vmem>>, vector<128x32xbf16>
    %c0_7 = arith.constant 0 : index
    %c0_8 = arith.constant 0 : index
    %7 = vector.load %arg4[%c0_7, %c0_8] : memref<32x256xbf16, #tpu.memory_space<vmem>>, vector<32x256xbf16>
    %cst_9 = arith.constant dense<0.000000e+00> : vector<128x256xf32>
    %8 = tpu.matmul %6, %7, %cst_9 {dimension_numbers = #tpu.dot_dimension_numbers<[1], [0], [0], [1], [0, 0, 1, 1], [], []>} : vector<128x32xbf16>, vector<32x256xbf16>, vector<128x256xf32> -> vector<128x256xf32>
    %9 = arith.addf %5, %8 : vector<128x256xf32>
    %10 = vector.extract_strided_slice %9 {offsets = [0, 0], sizes = [128, 128], strides = [1, 1]} : vector<128x256xf32> to vector<128x128xf32>
    %11 = arith.truncf %10 : vector<128x128xf32> to vector<128x128xbf16>
    %c0_10 = arith.constant 0 : index
    %c0_11 = arith.constant 0 : index
    %12 = vector.load %arg6[%c0_10, %c0_11] : memref<128x128xbf16, #tpu.memory_space<vmem>>, vector<128x128xbf16>
    tpu.vector_store %arg6[%c0_10, %c0_11], %11 {strides = array<i32>} : memref<128x128xbf16, #tpu.memory_space<vmem>>, vector<128x128xbf16>,
    %13 = vector.extract_strided_slice %9 {offsets = [0, 128], sizes = [128, 128], strides = [1, 1]} : vector<128x256xf32> to vector<128x128xf32>
    %14 = arith.truncf %13 : vector<128x128xf32> to vector<128x128xbf16>
    %c0_12 = arith.constant 0 : index
    %c0_13 = arith.constant 0 : index
    %15 = vector.load %arg7[%c0_12, %c0_13] : memref<128x128xbf16, #tpu.memory_space<vmem>>, vector<128x128xbf16>
    tpu.vector_store %arg7[%c0_12, %c0_13], %14 {strides = array<i32>} : memref<128x128xbf16, #tpu.memory_space<vmem>>, vector<128x128xbf16>,
    return
  }
  func.func @transform_0(%arg0: i32) -> (i32, i32) {
    %c0_i32 = arith.constant 0 : i32
    %c0_i32_0 = arith.constant 0 : i32
    return %arg0, %c0_i32 : i32, i32
  }
  func.func @transform_1(%arg0: i32) -> (i32, i32) {
    %c0_i32 = arith.constant 0 : i32
    %c0_i32_0 = arith.constant 0 : i32
    return %arg0, %c0_i32 : i32, i32
  }
  func.func @transform_2(%arg0: i32) -> (i32, i32) {
    %c0_i32 = arith.constant 0 : i32
    %c0_i32_0 = arith.constant 0 : i32
    %c0_i32_1 = arith.constant 0 : i32
    return %c0_i32, %c0_i32_0 : i32, i32
  }
  func.func @transform_3(%arg0: i32) -> (i32, i32) {
    %c0_i32 = arith.constant 0 : i32
    %c0_i32_0 = arith.constant 0 : i32
    %c0_i32_1 = arith.constant 0 : i32
    return %c0_i32, %c0_i32_0 : i32, i32
  }
  func.func @transform_4(%arg0: i32) -> (i32, i32) {
    %c0_i32 = arith.constant 0 : i32
    %c0_i32_0 = arith.constant 0 : i32
    %c0_i32_1 = arith.constant 0 : i32
    return %c0_i32, %c0_i32_0 : i32, i32
  }
  func.func @transform_5(%arg0: i32) -> (i32, i32) {
    %c0_i32 = arith.constant 0 : i32
    %c0_i32_0 = arith.constant 0 : i32
    return %arg0, %c0_i32 : i32, i32
  }
  func.func @transform_6(%arg0: i32) -> (i32, i32) {
    %c0_i32 = arith.constant 0 : i32
    %c0_i32_0 = arith.constant 0 : i32
    return %arg0, %c0_i32 : i32, i32
  }
}

module attributes {stable_mosaic.version = 11 : i64} {
  func.func @_bilstm_rec_kernel(%arg0: i32, %arg1: memref<8x16x128xbf16, #tpu.memory_space<vmem>>, %arg2: memref<8x16x128xbf16, #tpu.memory_space<vmem>>, %arg3: memref<32x128xbf16, #tpu.memory_space<vmem>>, %arg4: memref<32x128xbf16, #tpu.memory_space<vmem>>, %arg5: memref<8x16x32xbf16, #tpu.memory_space<vmem>>, %arg6: memref<8x16x32xbf16, #tpu.memory_space<vmem>>, %arg7: memref<16x32xf32, #tpu.memory_space<vmem>>, %arg8: memref<16x32xf32, #tpu.memory_space<vmem>>, %arg9: memref<16x32xf32, #tpu.memory_space<vmem>>, %arg10: memref<16x32xf32, #tpu.memory_space<vmem>>) attributes {dimension_semantics = [#tpu.dimension_semantics<arbitrary>], iteration_bounds = array<i64: 1>, scalar_prefetch = 0 : i64, scratch_operands = 4 : i64, tpu.core_type = #tpu.core_type<tc>, window_params = [{transform_indices = @transform_0, window_bounds = array<i64: 8, 16, 128>}, {transform_indices = @transform_1, window_bounds = array<i64: 8, 16, 128>}, {pipeline_mode = #tpu.pipeline_mode<synchronous>, transform_indices = @transform_2, window_bounds = array<i64: 32, 128>}, {pipeline_mode = #tpu.pipeline_mode<synchronous>, transform_indices = @transform_3, window_bounds = array<i64: 32, 128>}, {transform_indices = @transform_4, window_bounds = array<i64: 8, 16, 32>}, {transform_indices = @transform_5, window_bounds = array<i64: 8, 16, 32>}]} {
    %c0_i32 = arith.constant 0 : i32
    %0 = arith.cmpi eq, %arg0, %c0_i32 : i32
    %1 = arith.extui %0 : i1 to i32
    %c0_i32_0 = arith.constant 0 : i32
    %2 = arith.cmpi ne, %1, %c0_i32_0 : i32
    scf.if %2 {
      %cst_236 = arith.constant 0.000000e+00 : f32
      %525 = vector.broadcast %cst_236 : f32 to vector<16x32xf32>
      %c0_237 = arith.constant 0 : index
      %c0_238 = arith.constant 0 : index
      %526 = vector.load %arg7[%c0_237, %c0_238] : memref<16x32xf32, #tpu.memory_space<vmem>>, vector<16x32xf32>
      tpu.vector_store %arg7[%c0_237, %c0_238], %525 {strides = array<i32>} : memref<16x32xf32, #tpu.memory_space<vmem>>, vector<16x32xf32>,
      %cst_239 = arith.constant 0.000000e+00 : f32
      %527 = vector.broadcast %cst_239 : f32 to vector<16x32xf32>
      %c0_240 = arith.constant 0 : index
      %c0_241 = arith.constant 0 : index
      %528 = vector.load %arg8[%c0_240, %c0_241] : memref<16x32xf32, #tpu.memory_space<vmem>>, vector<16x32xf32>
      tpu.vector_store %arg8[%c0_240, %c0_241], %527 {strides = array<i32>} : memref<16x32xf32, #tpu.memory_space<vmem>>, vector<16x32xf32>,
      %cst_242 = arith.constant 0.000000e+00 : f32
      %529 = vector.broadcast %cst_242 : f32 to vector<16x32xf32>
      %c0_243 = arith.constant 0 : index
      %c0_244 = arith.constant 0 : index
      %530 = vector.load %arg9[%c0_243, %c0_244] : memref<16x32xf32, #tpu.memory_space<vmem>>, vector<16x32xf32>
      tpu.vector_store %arg9[%c0_243, %c0_244], %529 {strides = array<i32>} : memref<16x32xf32, #tpu.memory_space<vmem>>, vector<16x32xf32>,
      %cst_245 = arith.constant 0.000000e+00 : f32
      %531 = vector.broadcast %cst_245 : f32 to vector<16x32xf32>
      %c0_246 = arith.constant 0 : index
      %c0_247 = arith.constant 0 : index
      %532 = vector.load %arg10[%c0_246, %c0_247] : memref<16x32xf32, #tpu.memory_space<vmem>>, vector<16x32xf32>
      tpu.vector_store %arg10[%c0_246, %c0_247], %531 {strides = array<i32>} : memref<16x32xf32, #tpu.memory_space<vmem>>, vector<16x32xf32>,
    } else {
    }
    %c0 = arith.constant 0 : index
    %c0_1 = arith.constant 0 : index
    %3 = vector.load %arg3[%c0, %c0_1] : memref<32x128xbf16, #tpu.memory_space<vmem>>, vector<32x128xbf16>
    %c0_2 = arith.constant 0 : index
    %c0_3 = arith.constant 0 : index
    %4 = vector.load %arg4[%c0_2, %c0_3] : memref<32x128xbf16, #tpu.memory_space<vmem>>, vector<32x128xbf16>
    %c0_i32_4 = arith.constant 0 : i32
    %c0_5 = arith.constant 0 : index
    %c0_6 = arith.constant 0 : index
    %5 = vector.load %arg7[%c0_5, %c0_6] : memref<16x32xf32, #tpu.memory_space<vmem>>, vector<16x32xf32>
    %6 = arith.truncf %5 : vector<16x32xf32> to vector<16x32xbf16>
    %cst = arith.constant dense<0.000000e+00> : vector<16x128xf32>
    %7 = tpu.matmul %6, %3, %cst {dimension_numbers = #tpu.dot_dimension_numbers<[1], [0], [0], [1], [0, 0, 1, 1], [], []>} : vector<16x32xbf16>, vector<32x128xbf16>, vector<16x128xf32> -> vector<16x128xf32>
    %8 = arith.index_cast %c0_i32_4 : i32 to index
    %c0_7 = arith.constant 0 : index
    %c0_8 = arith.constant 0 : index
    %9 = vector.load %arg1[%8, %c0_7, %c0_8] : memref<8x16x128xbf16, #tpu.memory_space<vmem>>, vector<1x16x128xbf16>
    %10 = vector.shape_cast %9 : vector<1x16x128xbf16> to vector<16x128xbf16>
    %11 = arith.extf %10 : vector<16x128xbf16> to vector<16x128xf32>
    %12 = arith.addf %11, %7 : vector<16x128xf32>
    %c0_9 = arith.constant 0 : index
    %c0_10 = arith.constant 0 : index
    %13 = vector.load %arg8[%c0_9, %c0_10] : memref<16x32xf32, #tpu.memory_space<vmem>>, vector<16x32xf32>
    %14 = vector.extract_strided_slice %12 {offsets = [0, 0], sizes = [16, 96], strides = [1, 1]} : vector<16x128xf32> to vector<16x96xf32>
    %15 = arith.negf %14 : vector<16x96xf32>
    %16 = math.exp %15 : vector<16x96xf32>
    %cst_11 = arith.constant 1.000000e+00 : f32
    %17 = vector.broadcast %cst_11 : f32 to vector<16x96xf32>
    %18 = arith.addf %17, %16 : vector<16x96xf32>
    %19 = arith.divf %17, %18 : vector<16x96xf32>
    %20 = vector.extract_strided_slice %19 {offsets = [0, 0], sizes = [16, 32], strides = [1, 1]} : vector<16x96xf32> to vector<16x32xf32>
    %21 = vector.extract_strided_slice %19 {offsets = [0, 32], sizes = [16, 32], strides = [1, 1]} : vector<16x96xf32> to vector<16x32xf32>
    %22 = vector.extract_strided_slice %19 {offsets = [0, 64], sizes = [16, 32], strides = [1, 1]} : vector<16x96xf32> to vector<16x32xf32>
    %23 = vector.extract_strided_slice %12 {offsets = [0, 96], sizes = [16, 32], strides = [1, 1]} : vector<16x128xf32> to vector<16x32xf32>
    %24 = math.tanh %23 : vector<16x32xf32>
    %25 = arith.mulf %21, %13 : vector<16x32xf32>
    %26 = arith.mulf %20, %24 : vector<16x32xf32>
    %27 = arith.addf %25, %26 : vector<16x32xf32>
    %28 = math.tanh %27 : vector<16x32xf32>
    %29 = arith.mulf %22, %28 : vector<16x32xf32>
    %c0_12 = arith.constant 0 : index
    %c0_13 = arith.constant 0 : index
    %30 = vector.load %arg7[%c0_12, %c0_13] : memref<16x32xf32, #tpu.memory_space<vmem>>, vector<16x32xf32>
    tpu.vector_store %arg7[%c0_12, %c0_13], %29 {strides = array<i32>} : memref<16x32xf32, #tpu.memory_space<vmem>>, vector<16x32xf32>,
    %c0_14 = arith.constant 0 : index
    %c0_15 = arith.constant 0 : index
    %31 = vector.load %arg8[%c0_14, %c0_15] : memref<16x32xf32, #tpu.memory_space<vmem>>, vector<16x32xf32>
    tpu.vector_store %arg8[%c0_14, %c0_15], %27 {strides = array<i32>} : memref<16x32xf32, #tpu.memory_space<vmem>>, vector<16x32xf32>,
    %32 = arith.truncf %29 : vector<16x32xf32> to vector<16x32xbf16>
    %33 = arith.index_cast %c0_i32_4 : i32 to index
    %c0_16 = arith.constant 0 : index
    %c0_17 = arith.constant 0 : index
    %34 = vector.load %arg5[%33, %c0_16, %c0_17] : memref<8x16x32xbf16, #tpu.memory_space<vmem>>, vector<1x16x32xbf16>
    %35 = vector.shape_cast %34 : vector<1x16x32xbf16> to vector<16x32xbf16>
    %36 = vector.shape_cast %32 : vector<16x32xbf16> to vector<1x16x32xbf16>
    tpu.vector_store %arg5[%33, %c0_16, %c0_17], %36 {strides = array<i32>} : memref<8x16x32xbf16, #tpu.memory_space<vmem>>, vector<1x16x32xbf16>,
    %c7_i32 = arith.constant 7 : i32
    %37 = arith.subi %c7_i32, %c0_i32_4 : i32
    %c0_18 = arith.constant 0 : index
    %c0_19 = arith.constant 0 : index
    %38 = vector.load %arg9[%c0_18, %c0_19] : memref<16x32xf32, #tpu.memory_space<vmem>>, vector<16x32xf32>
    %39 = arith.truncf %38 : vector<16x32xf32> to vector<16x32xbf16>
    %cst_20 = arith.constant dense<0.000000e+00> : vector<16x128xf32>
    %40 = tpu.matmul %39, %4, %cst_20 {dimension_numbers = #tpu.dot_dimension_numbers<[1], [0], [0], [1], [0, 0, 1, 1], [], []>} : vector<16x32xbf16>, vector<32x128xbf16>, vector<16x128xf32> -> vector<16x128xf32>
    %41 = arith.index_cast %37 : i32 to index
    %c0_21 = arith.constant 0 : index
    %c0_22 = arith.constant 0 : index
    %42 = vector.load %arg2[%41, %c0_21, %c0_22] : memref<8x16x128xbf16, #tpu.memory_space<vmem>>, vector<1x16x128xbf16>
    %43 = vector.shape_cast %42 : vector<1x16x128xbf16> to vector<16x128xbf16>
    %44 = arith.extf %43 : vector<16x128xbf16> to vector<16x128xf32>
    %45 = arith.addf %44, %40 : vector<16x128xf32>
    %c0_23 = arith.constant 0 : index
    %c0_24 = arith.constant 0 : index
    %46 = vector.load %arg10[%c0_23, %c0_24] : memref<16x32xf32, #tpu.memory_space<vmem>>, vector<16x32xf32>
    %47 = vector.extract_strided_slice %45 {offsets = [0, 0], sizes = [16, 96], strides = [1, 1]} : vector<16x128xf32> to vector<16x96xf32>
    %48 = arith.negf %47 : vector<16x96xf32>
    %49 = math.exp %48 : vector<16x96xf32>
    %cst_25 = arith.constant 1.000000e+00 : f32
    %50 = vector.broadcast %cst_25 : f32 to vector<16x96xf32>
    %51 = arith.addf %50, %49 : vector<16x96xf32>
    %52 = arith.divf %50, %51 : vector<16x96xf32>
    %53 = vector.extract_strided_slice %52 {offsets = [0, 0], sizes = [16, 32], strides = [1, 1]} : vector<16x96xf32> to vector<16x32xf32>
    %54 = vector.extract_strided_slice %52 {offsets = [0, 32], sizes = [16, 32], strides = [1, 1]} : vector<16x96xf32> to vector<16x32xf32>
    %55 = vector.extract_strided_slice %52 {offsets = [0, 64], sizes = [16, 32], strides = [1, 1]} : vector<16x96xf32> to vector<16x32xf32>
    %56 = vector.extract_strided_slice %45 {offsets = [0, 96], sizes = [16, 32], strides = [1, 1]} : vector<16x128xf32> to vector<16x32xf32>
    %57 = math.tanh %56 : vector<16x32xf32>
    %58 = arith.mulf %54, %46 : vector<16x32xf32>
    %59 = arith.mulf %53, %57 : vector<16x32xf32>
    %60 = arith.addf %58, %59 : vector<16x32xf32>
    %61 = math.tanh %60 : vector<16x32xf32>
    %62 = arith.mulf %55, %61 : vector<16x32xf32>
    %c0_26 = arith.constant 0 : index
    %c0_27 = arith.constant 0 : index
    %63 = vector.load %arg9[%c0_26, %c0_27] : memref<16x32xf32, #tpu.memory_space<vmem>>, vector<16x32xf32>
    tpu.vector_store %arg9[%c0_26, %c0_27], %62 {strides = array<i32>} : memref<16x32xf32, #tpu.memory_space<vmem>>, vector<16x32xf32>,
    %c0_28 = arith.constant 0 : index
    %c0_29 = arith.constant 0 : index
    %64 = vector.load %arg10[%c0_28, %c0_29] : memref<16x32xf32, #tpu.memory_space<vmem>>, vector<16x32xf32>
    tpu.vector_store %arg10[%c0_28, %c0_29], %60 {strides = array<i32>} : memref<16x32xf32, #tpu.memory_space<vmem>>, vector<16x32xf32>,
    %65 = arith.truncf %62 : vector<16x32xf32> to vector<16x32xbf16>
    %66 = arith.index_cast %37 : i32 to index
    %c0_30 = arith.constant 0 : index
    %c0_31 = arith.constant 0 : index
    %67 = vector.load %arg6[%66, %c0_30, %c0_31] : memref<8x16x32xbf16, #tpu.memory_space<vmem>>, vector<1x16x32xbf16>
    %68 = vector.shape_cast %67 : vector<1x16x32xbf16> to vector<16x32xbf16>
    %69 = vector.shape_cast %65 : vector<16x32xbf16> to vector<1x16x32xbf16>
    tpu.vector_store %arg6[%66, %c0_30, %c0_31], %69 {strides = array<i32>} : memref<8x16x32xbf16, #tpu.memory_space<vmem>>, vector<1x16x32xbf16>,
    %c1_i32 = arith.constant 1 : i32
    %c0_32 = arith.constant 0 : index
    %c0_33 = arith.constant 0 : index
    %70 = vector.load %arg7[%c0_32, %c0_33] : memref<16x32xf32, #tpu.memory_space<vmem>>, vector<16x32xf32>
    %71 = arith.truncf %70 : vector<16x32xf32> to vector<16x32xbf16>
    %cst_34 = arith.constant dense<0.000000e+00> : vector<16x128xf32>
    %72 = tpu.matmul %71, %3, %cst_34 {dimension_numbers = #tpu.dot_dimension_numbers<[1], [0], [0], [1], [0, 0, 1, 1], [], []>} : vector<16x32xbf16>, vector<32x128xbf16>, vector<16x128xf32> -> vector<16x128xf32>
    %73 = arith.index_cast %c1_i32 : i32 to index
    %c0_35 = arith.constant 0 : index
    %c0_36 = arith.constant 0 : index
    %74 = vector.load %arg1[%73, %c0_35, %c0_36] : memref<8x16x128xbf16, #tpu.memory_space<vmem>>, vector<1x16x128xbf16>
    %75 = vector.shape_cast %74 : vector<1x16x128xbf16> to vector<16x128xbf16>
    %76 = arith.extf %75 : vector<16x128xbf16> to vector<16x128xf32>
    %77 = arith.addf %76, %72 : vector<16x128xf32>
    %c0_37 = arith.constant 0 : index
    %c0_38 = arith.constant 0 : index
    %78 = vector.load %arg8[%c0_37, %c0_38] : memref<16x32xf32, #tpu.memory_space<vmem>>, vector<16x32xf32>
    %79 = vector.extract_strided_slice %77 {offsets = [0, 0], sizes = [16, 96], strides = [1, 1]} : vector<16x128xf32> to vector<16x96xf32>
    %80 = arith.negf %79 : vector<16x96xf32>
    %81 = math.exp %80 : vector<16x96xf32>
    %cst_39 = arith.constant 1.000000e+00 : f32
    %82 = vector.broadcast %cst_39 : f32 to vector<16x96xf32>
    %83 = arith.addf %82, %81 : vector<16x96xf32>
    %84 = arith.divf %82, %83 : vector<16x96xf32>
    %85 = vector.extract_strided_slice %84 {offsets = [0, 0], sizes = [16, 32], strides = [1, 1]} : vector<16x96xf32> to vector<16x32xf32>
    %86 = vector.extract_strided_slice %84 {offsets = [0, 32], sizes = [16, 32], strides = [1, 1]} : vector<16x96xf32> to vector<16x32xf32>
    %87 = vector.extract_strided_slice %84 {offsets = [0, 64], sizes = [16, 32], strides = [1, 1]} : vector<16x96xf32> to vector<16x32xf32>
    %88 = vector.extract_strided_slice %77 {offsets = [0, 96], sizes = [16, 32], strides = [1, 1]} : vector<16x128xf32> to vector<16x32xf32>
    %89 = math.tanh %88 : vector<16x32xf32>
    %90 = arith.mulf %86, %78 : vector<16x32xf32>
    %91 = arith.mulf %85, %89 : vector<16x32xf32>
    %92 = arith.addf %90, %91 : vector<16x32xf32>
    %93 = math.tanh %92 : vector<16x32xf32>
    %94 = arith.mulf %87, %93 : vector<16x32xf32>
    %c0_40 = arith.constant 0 : index
    %c0_41 = arith.constant 0 : index
    %95 = vector.load %arg7[%c0_40, %c0_41] : memref<16x32xf32, #tpu.memory_space<vmem>>, vector<16x32xf32>
    tpu.vector_store %arg7[%c0_40, %c0_41], %94 {strides = array<i32>} : memref<16x32xf32, #tpu.memory_space<vmem>>, vector<16x32xf32>,
    %c0_42 = arith.constant 0 : index
    %c0_43 = arith.constant 0 : index
    %96 = vector.load %arg8[%c0_42, %c0_43] : memref<16x32xf32, #tpu.memory_space<vmem>>, vector<16x32xf32>
    tpu.vector_store %arg8[%c0_42, %c0_43], %92 {strides = array<i32>} : memref<16x32xf32, #tpu.memory_space<vmem>>, vector<16x32xf32>,
    %97 = arith.truncf %94 : vector<16x32xf32> to vector<16x32xbf16>
    %98 = arith.index_cast %c1_i32 : i32 to index
    %c0_44 = arith.constant 0 : index
    %c0_45 = arith.constant 0 : index
    %99 = vector.load %arg5[%98, %c0_44, %c0_45] : memref<8x16x32xbf16, #tpu.memory_space<vmem>>, vector<1x16x32xbf16>
    %100 = vector.shape_cast %99 : vector<1x16x32xbf16> to vector<16x32xbf16>
    %101 = vector.shape_cast %97 : vector<16x32xbf16> to vector<1x16x32xbf16>
    tpu.vector_store %arg5[%98, %c0_44, %c0_45], %101 {strides = array<i32>} : memref<8x16x32xbf16, #tpu.memory_space<vmem>>, vector<1x16x32xbf16>,
    %c7_i32_46 = arith.constant 7 : i32
    %102 = arith.subi %c7_i32_46, %c1_i32 : i32
    %c0_47 = arith.constant 0 : index
    %c0_48 = arith.constant 0 : index
    %103 = vector.load %arg9[%c0_47, %c0_48] : memref<16x32xf32, #tpu.memory_space<vmem>>, vector<16x32xf32>
    %104 = arith.truncf %103 : vector<16x32xf32> to vector<16x32xbf16>
    %cst_49 = arith.constant dense<0.000000e+00> : vector<16x128xf32>
    %105 = tpu.matmul %104, %4, %cst_49 {dimension_numbers = #tpu.dot_dimension_numbers<[1], [0], [0], [1], [0, 0, 1, 1], [], []>} : vector<16x32xbf16>, vector<32x128xbf16>, vector<16x128xf32> -> vector<16x128xf32>
    %106 = arith.index_cast %102 : i32 to index
    %c0_50 = arith.constant 0 : index
    %c0_51 = arith.constant 0 : index
    %107 = vector.load %arg2[%106, %c0_50, %c0_51] : memref<8x16x128xbf16, #tpu.memory_space<vmem>>, vector<1x16x128xbf16>
    %108 = vector.shape_cast %107 : vector<1x16x128xbf16> to vector<16x128xbf16>
    %109 = arith.extf %108 : vector<16x128xbf16> to vector<16x128xf32>
    %110 = arith.addf %109, %105 : vector<16x128xf32>
    %c0_52 = arith.constant 0 : index
    %c0_53 = arith.constant 0 : index
    %111 = vector.load %arg10[%c0_52, %c0_53] : memref<16x32xf32, #tpu.memory_space<vmem>>, vector<16x32xf32>
    %112 = vector.extract_strided_slice %110 {offsets = [0, 0], sizes = [16, 96], strides = [1, 1]} : vector<16x128xf32> to vector<16x96xf32>
    %113 = arith.negf %112 : vector<16x96xf32>
    %114 = math.exp %113 : vector<16x96xf32>
    %cst_54 = arith.constant 1.000000e+00 : f32
    %115 = vector.broadcast %cst_54 : f32 to vector<16x96xf32>
    %116 = arith.addf %115, %114 : vector<16x96xf32>
    %117 = arith.divf %115, %116 : vector<16x96xf32>
    %118 = vector.extract_strided_slice %117 {offsets = [0, 0], sizes = [16, 32], strides = [1, 1]} : vector<16x96xf32> to vector<16x32xf32>
    %119 = vector.extract_strided_slice %117 {offsets = [0, 32], sizes = [16, 32], strides = [1, 1]} : vector<16x96xf32> to vector<16x32xf32>
    %120 = vector.extract_strided_slice %117 {offsets = [0, 64], sizes = [16, 32], strides = [1, 1]} : vector<16x96xf32> to vector<16x32xf32>
    %121 = vector.extract_strided_slice %110 {offsets = [0, 96], sizes = [16, 32], strides = [1, 1]} : vector<16x128xf32> to vector<16x32xf32>
    %122 = math.tanh %121 : vector<16x32xf32>
    %123 = arith.mulf %119, %111 : vector<16x32xf32>
    %124 = arith.mulf %118, %122 : vector<16x32xf32>
    %125 = arith.addf %123, %124 : vector<16x32xf32>
    %126 = math.tanh %125 : vector<16x32xf32>
    %127 = arith.mulf %120, %126 : vector<16x32xf32>
    %c0_55 = arith.constant 0 : index
    %c0_56 = arith.constant 0 : index
    %128 = vector.load %arg9[%c0_55, %c0_56] : memref<16x32xf32, #tpu.memory_space<vmem>>, vector<16x32xf32>
    tpu.vector_store %arg9[%c0_55, %c0_56], %127 {strides = array<i32>} : memref<16x32xf32, #tpu.memory_space<vmem>>, vector<16x32xf32>,
    %c0_57 = arith.constant 0 : index
    %c0_58 = arith.constant 0 : index
    %129 = vector.load %arg10[%c0_57, %c0_58] : memref<16x32xf32, #tpu.memory_space<vmem>>, vector<16x32xf32>
    tpu.vector_store %arg10[%c0_57, %c0_58], %125 {strides = array<i32>} : memref<16x32xf32, #tpu.memory_space<vmem>>, vector<16x32xf32>,
    %130 = arith.truncf %127 : vector<16x32xf32> to vector<16x32xbf16>
    %131 = arith.index_cast %102 : i32 to index
    %c0_59 = arith.constant 0 : index
    %c0_60 = arith.constant 0 : index
    %132 = vector.load %arg6[%131, %c0_59, %c0_60] : memref<8x16x32xbf16, #tpu.memory_space<vmem>>, vector<1x16x32xbf16>
    %133 = vector.shape_cast %132 : vector<1x16x32xbf16> to vector<16x32xbf16>
    %134 = vector.shape_cast %130 : vector<16x32xbf16> to vector<1x16x32xbf16>
    tpu.vector_store %arg6[%131, %c0_59, %c0_60], %134 {strides = array<i32>} : memref<8x16x32xbf16, #tpu.memory_space<vmem>>, vector<1x16x32xbf16>,
    %c2_i32 = arith.constant 2 : i32
    %c0_61 = arith.constant 0 : index
    %c0_62 = arith.constant 0 : index
    %135 = vector.load %arg7[%c0_61, %c0_62] : memref<16x32xf32, #tpu.memory_space<vmem>>, vector<16x32xf32>
    %136 = arith.truncf %135 : vector<16x32xf32> to vector<16x32xbf16>
    %cst_63 = arith.constant dense<0.000000e+00> : vector<16x128xf32>
    %137 = tpu.matmul %136, %3, %cst_63 {dimension_numbers = #tpu.dot_dimension_numbers<[1], [0], [0], [1], [0, 0, 1, 1], [], []>} : vector<16x32xbf16>, vector<32x128xbf16>, vector<16x128xf32> -> vector<16x128xf32>
    %138 = arith.index_cast %c2_i32 : i32 to index
    %c0_64 = arith.constant 0 : index
    %c0_65 = arith.constant 0 : index
    %139 = vector.load %arg1[%138, %c0_64, %c0_65] : memref<8x16x128xbf16, #tpu.memory_space<vmem>>, vector<1x16x128xbf16>
    %140 = vector.shape_cast %139 : vector<1x16x128xbf16> to vector<16x128xbf16>
    %141 = arith.extf %140 : vector<16x128xbf16> to vector<16x128xf32>
    %142 = arith.addf %141, %137 : vector<16x128xf32>
    %c0_66 = arith.constant 0 : index
    %c0_67 = arith.constant 0 : index
    %143 = vector.load %arg8[%c0_66, %c0_67] : memref<16x32xf32, #tpu.memory_space<vmem>>, vector<16x32xf32>
    %144 = vector.extract_strided_slice %142 {offsets = [0, 0], sizes = [16, 96], strides = [1, 1]} : vector<16x128xf32> to vector<16x96xf32>
    %145 = arith.negf %144 : vector<16x96xf32>
    %146 = math.exp %145 : vector<16x96xf32>
    %cst_68 = arith.constant 1.000000e+00 : f32
    %147 = vector.broadcast %cst_68 : f32 to vector<16x96xf32>
    %148 = arith.addf %147, %146 : vector<16x96xf32>
    %149 = arith.divf %147, %148 : vector<16x96xf32>
    %150 = vector.extract_strided_slice %149 {offsets = [0, 0], sizes = [16, 32], strides = [1, 1]} : vector<16x96xf32> to vector<16x32xf32>
    %151 = vector.extract_strided_slice %149 {offsets = [0, 32], sizes = [16, 32], strides = [1, 1]} : vector<16x96xf32> to vector<16x32xf32>
    %152 = vector.extract_strided_slice %149 {offsets = [0, 64], sizes = [16, 32], strides = [1, 1]} : vector<16x96xf32> to vector<16x32xf32>
    %153 = vector.extract_strided_slice %142 {offsets = [0, 96], sizes = [16, 32], strides = [1, 1]} : vector<16x128xf32> to vector<16x32xf32>
    %154 = math.tanh %153 : vector<16x32xf32>
    %155 = arith.mulf %151, %143 : vector<16x32xf32>
    %156 = arith.mulf %150, %154 : vector<16x32xf32>
    %157 = arith.addf %155, %156 : vector<16x32xf32>
    %158 = math.tanh %157 : vector<16x32xf32>
    %159 = arith.mulf %152, %158 : vector<16x32xf32>
    %c0_69 = arith.constant 0 : index
    %c0_70 = arith.constant 0 : index
    %160 = vector.load %arg7[%c0_69, %c0_70] : memref<16x32xf32, #tpu.memory_space<vmem>>, vector<16x32xf32>
    tpu.vector_store %arg7[%c0_69, %c0_70], %159 {strides = array<i32>} : memref<16x32xf32, #tpu.memory_space<vmem>>, vector<16x32xf32>,
    %c0_71 = arith.constant 0 : index
    %c0_72 = arith.constant 0 : index
    %161 = vector.load %arg8[%c0_71, %c0_72] : memref<16x32xf32, #tpu.memory_space<vmem>>, vector<16x32xf32>
    tpu.vector_store %arg8[%c0_71, %c0_72], %157 {strides = array<i32>} : memref<16x32xf32, #tpu.memory_space<vmem>>, vector<16x32xf32>,
    %162 = arith.truncf %159 : vector<16x32xf32> to vector<16x32xbf16>
    %163 = arith.index_cast %c2_i32 : i32 to index
    %c0_73 = arith.constant 0 : index
    %c0_74 = arith.constant 0 : index
    %164 = vector.load %arg5[%163, %c0_73, %c0_74] : memref<8x16x32xbf16, #tpu.memory_space<vmem>>, vector<1x16x32xbf16>
    %165 = vector.shape_cast %164 : vector<1x16x32xbf16> to vector<16x32xbf16>
    %166 = vector.shape_cast %162 : vector<16x32xbf16> to vector<1x16x32xbf16>
    tpu.vector_store %arg5[%163, %c0_73, %c0_74], %166 {strides = array<i32>} : memref<8x16x32xbf16, #tpu.memory_space<vmem>>, vector<1x16x32xbf16>,
    %c7_i32_75 = arith.constant 7 : i32
    %167 = arith.subi %c7_i32_75, %c2_i32 : i32
    %c0_76 = arith.constant 0 : index
    %c0_77 = arith.constant 0 : index
    %168 = vector.load %arg9[%c0_76, %c0_77] : memref<16x32xf32, #tpu.memory_space<vmem>>, vector<16x32xf32>
    %169 = arith.truncf %168 : vector<16x32xf32> to vector<16x32xbf16>
    %cst_78 = arith.constant dense<0.000000e+00> : vector<16x128xf32>
    %170 = tpu.matmul %169, %4, %cst_78 {dimension_numbers = #tpu.dot_dimension_numbers<[1], [0], [0], [1], [0, 0, 1, 1], [], []>} : vector<16x32xbf16>, vector<32x128xbf16>, vector<16x128xf32> -> vector<16x128xf32>
    %171 = arith.index_cast %167 : i32 to index
    %c0_79 = arith.constant 0 : index
    %c0_80 = arith.constant 0 : index
    %172 = vector.load %arg2[%171, %c0_79, %c0_80] : memref<8x16x128xbf16, #tpu.memory_space<vmem>>, vector<1x16x128xbf16>
    %173 = vector.shape_cast %172 : vector<1x16x128xbf16> to vector<16x128xbf16>
    %174 = arith.extf %173 : vector<16x128xbf16> to vector<16x128xf32>
    %175 = arith.addf %174, %170 : vector<16x128xf32>
    %c0_81 = arith.constant 0 : index
    %c0_82 = arith.constant 0 : index
    %176 = vector.load %arg10[%c0_81, %c0_82] : memref<16x32xf32, #tpu.memory_space<vmem>>, vector<16x32xf32>
    %177 = vector.extract_strided_slice %175 {offsets = [0, 0], sizes = [16, 96], strides = [1, 1]} : vector<16x128xf32> to vector<16x96xf32>
    %178 = arith.negf %177 : vector<16x96xf32>
    %179 = math.exp %178 : vector<16x96xf32>
    %cst_83 = arith.constant 1.000000e+00 : f32
    %180 = vector.broadcast %cst_83 : f32 to vector<16x96xf32>
    %181 = arith.addf %180, %179 : vector<16x96xf32>
    %182 = arith.divf %180, %181 : vector<16x96xf32>
    %183 = vector.extract_strided_slice %182 {offsets = [0, 0], sizes = [16, 32], strides = [1, 1]} : vector<16x96xf32> to vector<16x32xf32>
    %184 = vector.extract_strided_slice %182 {offsets = [0, 32], sizes = [16, 32], strides = [1, 1]} : vector<16x96xf32> to vector<16x32xf32>
    %185 = vector.extract_strided_slice %182 {offsets = [0, 64], sizes = [16, 32], strides = [1, 1]} : vector<16x96xf32> to vector<16x32xf32>
    %186 = vector.extract_strided_slice %175 {offsets = [0, 96], sizes = [16, 32], strides = [1, 1]} : vector<16x128xf32> to vector<16x32xf32>
    %187 = math.tanh %186 : vector<16x32xf32>
    %188 = arith.mulf %184, %176 : vector<16x32xf32>
    %189 = arith.mulf %183, %187 : vector<16x32xf32>
    %190 = arith.addf %188, %189 : vector<16x32xf32>
    %191 = math.tanh %190 : vector<16x32xf32>
    %192 = arith.mulf %185, %191 : vector<16x32xf32>
    %c0_84 = arith.constant 0 : index
    %c0_85 = arith.constant 0 : index
    %193 = vector.load %arg9[%c0_84, %c0_85] : memref<16x32xf32, #tpu.memory_space<vmem>>, vector<16x32xf32>
    tpu.vector_store %arg9[%c0_84, %c0_85], %192 {strides = array<i32>} : memref<16x32xf32, #tpu.memory_space<vmem>>, vector<16x32xf32>,
    %c0_86 = arith.constant 0 : index
    %c0_87 = arith.constant 0 : index
    %194 = vector.load %arg10[%c0_86, %c0_87] : memref<16x32xf32, #tpu.memory_space<vmem>>, vector<16x32xf32>
    tpu.vector_store %arg10[%c0_86, %c0_87], %190 {strides = array<i32>} : memref<16x32xf32, #tpu.memory_space<vmem>>, vector<16x32xf32>,
    %195 = arith.truncf %192 : vector<16x32xf32> to vector<16x32xbf16>
    %196 = arith.index_cast %167 : i32 to index
    %c0_88 = arith.constant 0 : index
    %c0_89 = arith.constant 0 : index
    %197 = vector.load %arg6[%196, %c0_88, %c0_89] : memref<8x16x32xbf16, #tpu.memory_space<vmem>>, vector<1x16x32xbf16>
    %198 = vector.shape_cast %197 : vector<1x16x32xbf16> to vector<16x32xbf16>
    %199 = vector.shape_cast %195 : vector<16x32xbf16> to vector<1x16x32xbf16>
    tpu.vector_store %arg6[%196, %c0_88, %c0_89], %199 {strides = array<i32>} : memref<8x16x32xbf16, #tpu.memory_space<vmem>>, vector<1x16x32xbf16>,
    %c3_i32 = arith.constant 3 : i32
    %c0_90 = arith.constant 0 : index
    %c0_91 = arith.constant 0 : index
    %200 = vector.load %arg7[%c0_90, %c0_91] : memref<16x32xf32, #tpu.memory_space<vmem>>, vector<16x32xf32>
    %201 = arith.truncf %200 : vector<16x32xf32> to vector<16x32xbf16>
    %cst_92 = arith.constant dense<0.000000e+00> : vector<16x128xf32>
    %202 = tpu.matmul %201, %3, %cst_92 {dimension_numbers = #tpu.dot_dimension_numbers<[1], [0], [0], [1], [0, 0, 1, 1], [], []>} : vector<16x32xbf16>, vector<32x128xbf16>, vector<16x128xf32> -> vector<16x128xf32>
    %203 = arith.index_cast %c3_i32 : i32 to index
    %c0_93 = arith.constant 0 : index
    %c0_94 = arith.constant 0 : index
    %204 = vector.load %arg1[%203, %c0_93, %c0_94] : memref<8x16x128xbf16, #tpu.memory_space<vmem>>, vector<1x16x128xbf16>
    %205 = vector.shape_cast %204 : vector<1x16x128xbf16> to vector<16x128xbf16>
    %206 = arith.extf %205 : vector<16x128xbf16> to vector<16x128xf32>
    %207 = arith.addf %206, %202 : vector<16x128xf32>
    %c0_95 = arith.constant 0 : index
    %c0_96 = arith.constant 0 : index
    %208 = vector.load %arg8[%c0_95, %c0_96] : memref<16x32xf32, #tpu.memory_space<vmem>>, vector<16x32xf32>
    %209 = vector.extract_strided_slice %207 {offsets = [0, 0], sizes = [16, 96], strides = [1, 1]} : vector<16x128xf32> to vector<16x96xf32>
    %210 = arith.negf %209 : vector<16x96xf32>
    %211 = math.exp %210 : vector<16x96xf32>
    %cst_97 = arith.constant 1.000000e+00 : f32
    %212 = vector.broadcast %cst_97 : f32 to vector<16x96xf32>
    %213 = arith.addf %212, %211 : vector<16x96xf32>
    %214 = arith.divf %212, %213 : vector<16x96xf32>
    %215 = vector.extract_strided_slice %214 {offsets = [0, 0], sizes = [16, 32], strides = [1, 1]} : vector<16x96xf32> to vector<16x32xf32>
    %216 = vector.extract_strided_slice %214 {offsets = [0, 32], sizes = [16, 32], strides = [1, 1]} : vector<16x96xf32> to vector<16x32xf32>
    %217 = vector.extract_strided_slice %214 {offsets = [0, 64], sizes = [16, 32], strides = [1, 1]} : vector<16x96xf32> to vector<16x32xf32>
    %218 = vector.extract_strided_slice %207 {offsets = [0, 96], sizes = [16, 32], strides = [1, 1]} : vector<16x128xf32> to vector<16x32xf32>
    %219 = math.tanh %218 : vector<16x32xf32>
    %220 = arith.mulf %216, %208 : vector<16x32xf32>
    %221 = arith.mulf %215, %219 : vector<16x32xf32>
    %222 = arith.addf %220, %221 : vector<16x32xf32>
    %223 = math.tanh %222 : vector<16x32xf32>
    %224 = arith.mulf %217, %223 : vector<16x32xf32>
    %c0_98 = arith.constant 0 : index
    %c0_99 = arith.constant 0 : index
    %225 = vector.load %arg7[%c0_98, %c0_99] : memref<16x32xf32, #tpu.memory_space<vmem>>, vector<16x32xf32>
    tpu.vector_store %arg7[%c0_98, %c0_99], %224 {strides = array<i32>} : memref<16x32xf32, #tpu.memory_space<vmem>>, vector<16x32xf32>,
    %c0_100 = arith.constant 0 : index
    %c0_101 = arith.constant 0 : index
    %226 = vector.load %arg8[%c0_100, %c0_101] : memref<16x32xf32, #tpu.memory_space<vmem>>, vector<16x32xf32>
    tpu.vector_store %arg8[%c0_100, %c0_101], %222 {strides = array<i32>} : memref<16x32xf32, #tpu.memory_space<vmem>>, vector<16x32xf32>,
    %227 = arith.truncf %224 : vector<16x32xf32> to vector<16x32xbf16>
    %228 = arith.index_cast %c3_i32 : i32 to index
    %c0_102 = arith.constant 0 : index
    %c0_103 = arith.constant 0 : index
    %229 = vector.load %arg5[%228, %c0_102, %c0_103] : memref<8x16x32xbf16, #tpu.memory_space<vmem>>, vector<1x16x32xbf16>
    %230 = vector.shape_cast %229 : vector<1x16x32xbf16> to vector<16x32xbf16>
    %231 = vector.shape_cast %227 : vector<16x32xbf16> to vector<1x16x32xbf16>
    tpu.vector_store %arg5[%228, %c0_102, %c0_103], %231 {strides = array<i32>} : memref<8x16x32xbf16, #tpu.memory_space<vmem>>, vector<1x16x32xbf16>,
    %c7_i32_104 = arith.constant 7 : i32
    %232 = arith.subi %c7_i32_104, %c3_i32 : i32
    %c0_105 = arith.constant 0 : index
    %c0_106 = arith.constant 0 : index
    %233 = vector.load %arg9[%c0_105, %c0_106] : memref<16x32xf32, #tpu.memory_space<vmem>>, vector<16x32xf32>
    %234 = arith.truncf %233 : vector<16x32xf32> to vector<16x32xbf16>
    %cst_107 = arith.constant dense<0.000000e+00> : vector<16x128xf32>
    %235 = tpu.matmul %234, %4, %cst_107 {dimension_numbers = #tpu.dot_dimension_numbers<[1], [0], [0], [1], [0, 0, 1, 1], [], []>} : vector<16x32xbf16>, vector<32x128xbf16>, vector<16x128xf32> -> vector<16x128xf32>
    %236 = arith.index_cast %232 : i32 to index
    %c0_108 = arith.constant 0 : index
    %c0_109 = arith.constant 0 : index
    %237 = vector.load %arg2[%236, %c0_108, %c0_109] : memref<8x16x128xbf16, #tpu.memory_space<vmem>>, vector<1x16x128xbf16>
    %238 = vector.shape_cast %237 : vector<1x16x128xbf16> to vector<16x128xbf16>
    %239 = arith.extf %238 : vector<16x128xbf16> to vector<16x128xf32>
    %240 = arith.addf %239, %235 : vector<16x128xf32>
    %c0_110 = arith.constant 0 : index
    %c0_111 = arith.constant 0 : index
    %241 = vector.load %arg10[%c0_110, %c0_111] : memref<16x32xf32, #tpu.memory_space<vmem>>, vector<16x32xf32>
    %242 = vector.extract_strided_slice %240 {offsets = [0, 0], sizes = [16, 96], strides = [1, 1]} : vector<16x128xf32> to vector<16x96xf32>
    %243 = arith.negf %242 : vector<16x96xf32>
    %244 = math.exp %243 : vector<16x96xf32>
    %cst_112 = arith.constant 1.000000e+00 : f32
    %245 = vector.broadcast %cst_112 : f32 to vector<16x96xf32>
    %246 = arith.addf %245, %244 : vector<16x96xf32>
    %247 = arith.divf %245, %246 : vector<16x96xf32>
    %248 = vector.extract_strided_slice %247 {offsets = [0, 0], sizes = [16, 32], strides = [1, 1]} : vector<16x96xf32> to vector<16x32xf32>
    %249 = vector.extract_strided_slice %247 {offsets = [0, 32], sizes = [16, 32], strides = [1, 1]} : vector<16x96xf32> to vector<16x32xf32>
    %250 = vector.extract_strided_slice %247 {offsets = [0, 64], sizes = [16, 32], strides = [1, 1]} : vector<16x96xf32> to vector<16x32xf32>
    %251 = vector.extract_strided_slice %240 {offsets = [0, 96], sizes = [16, 32], strides = [1, 1]} : vector<16x128xf32> to vector<16x32xf32>
    %252 = math.tanh %251 : vector<16x32xf32>
    %253 = arith.mulf %249, %241 : vector<16x32xf32>
    %254 = arith.mulf %248, %252 : vector<16x32xf32>
    %255 = arith.addf %253, %254 : vector<16x32xf32>
    %256 = math.tanh %255 : vector<16x32xf32>
    %257 = arith.mulf %250, %256 : vector<16x32xf32>
    %c0_113 = arith.constant 0 : index
    %c0_114 = arith.constant 0 : index
    %258 = vector.load %arg9[%c0_113, %c0_114] : memref<16x32xf32, #tpu.memory_space<vmem>>, vector<16x32xf32>
    tpu.vector_store %arg9[%c0_113, %c0_114], %257 {strides = array<i32>} : memref<16x32xf32, #tpu.memory_space<vmem>>, vector<16x32xf32>,
    %c0_115 = arith.constant 0 : index
    %c0_116 = arith.constant 0 : index
    %259 = vector.load %arg10[%c0_115, %c0_116] : memref<16x32xf32, #tpu.memory_space<vmem>>, vector<16x32xf32>
    tpu.vector_store %arg10[%c0_115, %c0_116], %255 {strides = array<i32>} : memref<16x32xf32, #tpu.memory_space<vmem>>, vector<16x32xf32>,
    %260 = arith.truncf %257 : vector<16x32xf32> to vector<16x32xbf16>
    %261 = arith.index_cast %232 : i32 to index
    %c0_117 = arith.constant 0 : index
    %c0_118 = arith.constant 0 : index
    %262 = vector.load %arg6[%261, %c0_117, %c0_118] : memref<8x16x32xbf16, #tpu.memory_space<vmem>>, vector<1x16x32xbf16>
    %263 = vector.shape_cast %262 : vector<1x16x32xbf16> to vector<16x32xbf16>
    %264 = vector.shape_cast %260 : vector<16x32xbf16> to vector<1x16x32xbf16>
    tpu.vector_store %arg6[%261, %c0_117, %c0_118], %264 {strides = array<i32>} : memref<8x16x32xbf16, #tpu.memory_space<vmem>>, vector<1x16x32xbf16>,
    %c4_i32 = arith.constant 4 : i32
    %c0_119 = arith.constant 0 : index
    %c0_120 = arith.constant 0 : index
    %265 = vector.load %arg7[%c0_119, %c0_120] : memref<16x32xf32, #tpu.memory_space<vmem>>, vector<16x32xf32>
    %266 = arith.truncf %265 : vector<16x32xf32> to vector<16x32xbf16>
    %cst_121 = arith.constant dense<0.000000e+00> : vector<16x128xf32>
    %267 = tpu.matmul %266, %3, %cst_121 {dimension_numbers = #tpu.dot_dimension_numbers<[1], [0], [0], [1], [0, 0, 1, 1], [], []>} : vector<16x32xbf16>, vector<32x128xbf16>, vector<16x128xf32> -> vector<16x128xf32>
    %268 = arith.index_cast %c4_i32 : i32 to index
    %c0_122 = arith.constant 0 : index
    %c0_123 = arith.constant 0 : index
    %269 = vector.load %arg1[%268, %c0_122, %c0_123] : memref<8x16x128xbf16, #tpu.memory_space<vmem>>, vector<1x16x128xbf16>
    %270 = vector.shape_cast %269 : vector<1x16x128xbf16> to vector<16x128xbf16>
    %271 = arith.extf %270 : vector<16x128xbf16> to vector<16x128xf32>
    %272 = arith.addf %271, %267 : vector<16x128xf32>
    %c0_124 = arith.constant 0 : index
    %c0_125 = arith.constant 0 : index
    %273 = vector.load %arg8[%c0_124, %c0_125] : memref<16x32xf32, #tpu.memory_space<vmem>>, vector<16x32xf32>
    %274 = vector.extract_strided_slice %272 {offsets = [0, 0], sizes = [16, 96], strides = [1, 1]} : vector<16x128xf32> to vector<16x96xf32>
    %275 = arith.negf %274 : vector<16x96xf32>
    %276 = math.exp %275 : vector<16x96xf32>
    %cst_126 = arith.constant 1.000000e+00 : f32
    %277 = vector.broadcast %cst_126 : f32 to vector<16x96xf32>
    %278 = arith.addf %277, %276 : vector<16x96xf32>
    %279 = arith.divf %277, %278 : vector<16x96xf32>
    %280 = vector.extract_strided_slice %279 {offsets = [0, 0], sizes = [16, 32], strides = [1, 1]} : vector<16x96xf32> to vector<16x32xf32>
    %281 = vector.extract_strided_slice %279 {offsets = [0, 32], sizes = [16, 32], strides = [1, 1]} : vector<16x96xf32> to vector<16x32xf32>
    %282 = vector.extract_strided_slice %279 {offsets = [0, 64], sizes = [16, 32], strides = [1, 1]} : vector<16x96xf32> to vector<16x32xf32>
    %283 = vector.extract_strided_slice %272 {offsets = [0, 96], sizes = [16, 32], strides = [1, 1]} : vector<16x128xf32> to vector<16x32xf32>
    %284 = math.tanh %283 : vector<16x32xf32>
    %285 = arith.mulf %281, %273 : vector<16x32xf32>
    %286 = arith.mulf %280, %284 : vector<16x32xf32>
    %287 = arith.addf %285, %286 : vector<16x32xf32>
    %288 = math.tanh %287 : vector<16x32xf32>
    %289 = arith.mulf %282, %288 : vector<16x32xf32>
    %c0_127 = arith.constant 0 : index
    %c0_128 = arith.constant 0 : index
    %290 = vector.load %arg7[%c0_127, %c0_128] : memref<16x32xf32, #tpu.memory_space<vmem>>, vector<16x32xf32>
    tpu.vector_store %arg7[%c0_127, %c0_128], %289 {strides = array<i32>} : memref<16x32xf32, #tpu.memory_space<vmem>>, vector<16x32xf32>,
    %c0_129 = arith.constant 0 : index
    %c0_130 = arith.constant 0 : index
    %291 = vector.load %arg8[%c0_129, %c0_130] : memref<16x32xf32, #tpu.memory_space<vmem>>, vector<16x32xf32>
    tpu.vector_store %arg8[%c0_129, %c0_130], %287 {strides = array<i32>} : memref<16x32xf32, #tpu.memory_space<vmem>>, vector<16x32xf32>,
    %292 = arith.truncf %289 : vector<16x32xf32> to vector<16x32xbf16>
    %293 = arith.index_cast %c4_i32 : i32 to index
    %c0_131 = arith.constant 0 : index
    %c0_132 = arith.constant 0 : index
    %294 = vector.load %arg5[%293, %c0_131, %c0_132] : memref<8x16x32xbf16, #tpu.memory_space<vmem>>, vector<1x16x32xbf16>
    %295 = vector.shape_cast %294 : vector<1x16x32xbf16> to vector<16x32xbf16>
    %296 = vector.shape_cast %292 : vector<16x32xbf16> to vector<1x16x32xbf16>
    tpu.vector_store %arg5[%293, %c0_131, %c0_132], %296 {strides = array<i32>} : memref<8x16x32xbf16, #tpu.memory_space<vmem>>, vector<1x16x32xbf16>,
    %c7_i32_133 = arith.constant 7 : i32
    %297 = arith.subi %c7_i32_133, %c4_i32 : i32
    %c0_134 = arith.constant 0 : index
    %c0_135 = arith.constant 0 : index
    %298 = vector.load %arg9[%c0_134, %c0_135] : memref<16x32xf32, #tpu.memory_space<vmem>>, vector<16x32xf32>
    %299 = arith.truncf %298 : vector<16x32xf32> to vector<16x32xbf16>
    %cst_136 = arith.constant dense<0.000000e+00> : vector<16x128xf32>
    %300 = tpu.matmul %299, %4, %cst_136 {dimension_numbers = #tpu.dot_dimension_numbers<[1], [0], [0], [1], [0, 0, 1, 1], [], []>} : vector<16x32xbf16>, vector<32x128xbf16>, vector<16x128xf32> -> vector<16x128xf32>
    %301 = arith.index_cast %297 : i32 to index
    %c0_137 = arith.constant 0 : index
    %c0_138 = arith.constant 0 : index
    %302 = vector.load %arg2[%301, %c0_137, %c0_138] : memref<8x16x128xbf16, #tpu.memory_space<vmem>>, vector<1x16x128xbf16>
    %303 = vector.shape_cast %302 : vector<1x16x128xbf16> to vector<16x128xbf16>
    %304 = arith.extf %303 : vector<16x128xbf16> to vector<16x128xf32>
    %305 = arith.addf %304, %300 : vector<16x128xf32>
    %c0_139 = arith.constant 0 : index
    %c0_140 = arith.constant 0 : index
    %306 = vector.load %arg10[%c0_139, %c0_140] : memref<16x32xf32, #tpu.memory_space<vmem>>, vector<16x32xf32>
    %307 = vector.extract_strided_slice %305 {offsets = [0, 0], sizes = [16, 96], strides = [1, 1]} : vector<16x128xf32> to vector<16x96xf32>
    %308 = arith.negf %307 : vector<16x96xf32>
    %309 = math.exp %308 : vector<16x96xf32>
    %cst_141 = arith.constant 1.000000e+00 : f32
    %310 = vector.broadcast %cst_141 : f32 to vector<16x96xf32>
    %311 = arith.addf %310, %309 : vector<16x96xf32>
    %312 = arith.divf %310, %311 : vector<16x96xf32>
    %313 = vector.extract_strided_slice %312 {offsets = [0, 0], sizes = [16, 32], strides = [1, 1]} : vector<16x96xf32> to vector<16x32xf32>
    %314 = vector.extract_strided_slice %312 {offsets = [0, 32], sizes = [16, 32], strides = [1, 1]} : vector<16x96xf32> to vector<16x32xf32>
    %315 = vector.extract_strided_slice %312 {offsets = [0, 64], sizes = [16, 32], strides = [1, 1]} : vector<16x96xf32> to vector<16x32xf32>
    %316 = vector.extract_strided_slice %305 {offsets = [0, 96], sizes = [16, 32], strides = [1, 1]} : vector<16x128xf32> to vector<16x32xf32>
    %317 = math.tanh %316 : vector<16x32xf32>
    %318 = arith.mulf %314, %306 : vector<16x32xf32>
    %319 = arith.mulf %313, %317 : vector<16x32xf32>
    %320 = arith.addf %318, %319 : vector<16x32xf32>
    %321 = math.tanh %320 : vector<16x32xf32>
    %322 = arith.mulf %315, %321 : vector<16x32xf32>
    %c0_142 = arith.constant 0 : index
    %c0_143 = arith.constant 0 : index
    %323 = vector.load %arg9[%c0_142, %c0_143] : memref<16x32xf32, #tpu.memory_space<vmem>>, vector<16x32xf32>
    tpu.vector_store %arg9[%c0_142, %c0_143], %322 {strides = array<i32>} : memref<16x32xf32, #tpu.memory_space<vmem>>, vector<16x32xf32>,
    %c0_144 = arith.constant 0 : index
    %c0_145 = arith.constant 0 : index
    %324 = vector.load %arg10[%c0_144, %c0_145] : memref<16x32xf32, #tpu.memory_space<vmem>>, vector<16x32xf32>
    tpu.vector_store %arg10[%c0_144, %c0_145], %320 {strides = array<i32>} : memref<16x32xf32, #tpu.memory_space<vmem>>, vector<16x32xf32>,
    %325 = arith.truncf %322 : vector<16x32xf32> to vector<16x32xbf16>
    %326 = arith.index_cast %297 : i32 to index
    %c0_146 = arith.constant 0 : index
    %c0_147 = arith.constant 0 : index
    %327 = vector.load %arg6[%326, %c0_146, %c0_147] : memref<8x16x32xbf16, #tpu.memory_space<vmem>>, vector<1x16x32xbf16>
    %328 = vector.shape_cast %327 : vector<1x16x32xbf16> to vector<16x32xbf16>
    %329 = vector.shape_cast %325 : vector<16x32xbf16> to vector<1x16x32xbf16>
    tpu.vector_store %arg6[%326, %c0_146, %c0_147], %329 {strides = array<i32>} : memref<8x16x32xbf16, #tpu.memory_space<vmem>>, vector<1x16x32xbf16>,
    %c5_i32 = arith.constant 5 : i32
    %c0_148 = arith.constant 0 : index
    %c0_149 = arith.constant 0 : index
    %330 = vector.load %arg7[%c0_148, %c0_149] : memref<16x32xf32, #tpu.memory_space<vmem>>, vector<16x32xf32>
    %331 = arith.truncf %330 : vector<16x32xf32> to vector<16x32xbf16>
    %cst_150 = arith.constant dense<0.000000e+00> : vector<16x128xf32>
    %332 = tpu.matmul %331, %3, %cst_150 {dimension_numbers = #tpu.dot_dimension_numbers<[1], [0], [0], [1], [0, 0, 1, 1], [], []>} : vector<16x32xbf16>, vector<32x128xbf16>, vector<16x128xf32> -> vector<16x128xf32>
    %333 = arith.index_cast %c5_i32 : i32 to index
    %c0_151 = arith.constant 0 : index
    %c0_152 = arith.constant 0 : index
    %334 = vector.load %arg1[%333, %c0_151, %c0_152] : memref<8x16x128xbf16, #tpu.memory_space<vmem>>, vector<1x16x128xbf16>
    %335 = vector.shape_cast %334 : vector<1x16x128xbf16> to vector<16x128xbf16>
    %336 = arith.extf %335 : vector<16x128xbf16> to vector<16x128xf32>
    %337 = arith.addf %336, %332 : vector<16x128xf32>
    %c0_153 = arith.constant 0 : index
    %c0_154 = arith.constant 0 : index
    %338 = vector.load %arg8[%c0_153, %c0_154] : memref<16x32xf32, #tpu.memory_space<vmem>>, vector<16x32xf32>
    %339 = vector.extract_strided_slice %337 {offsets = [0, 0], sizes = [16, 96], strides = [1, 1]} : vector<16x128xf32> to vector<16x96xf32>
    %340 = arith.negf %339 : vector<16x96xf32>
    %341 = math.exp %340 : vector<16x96xf32>
    %cst_155 = arith.constant 1.000000e+00 : f32
    %342 = vector.broadcast %cst_155 : f32 to vector<16x96xf32>
    %343 = arith.addf %342, %341 : vector<16x96xf32>
    %344 = arith.divf %342, %343 : vector<16x96xf32>
    %345 = vector.extract_strided_slice %344 {offsets = [0, 0], sizes = [16, 32], strides = [1, 1]} : vector<16x96xf32> to vector<16x32xf32>
    %346 = vector.extract_strided_slice %344 {offsets = [0, 32], sizes = [16, 32], strides = [1, 1]} : vector<16x96xf32> to vector<16x32xf32>
    %347 = vector.extract_strided_slice %344 {offsets = [0, 64], sizes = [16, 32], strides = [1, 1]} : vector<16x96xf32> to vector<16x32xf32>
    %348 = vector.extract_strided_slice %337 {offsets = [0, 96], sizes = [16, 32], strides = [1, 1]} : vector<16x128xf32> to vector<16x32xf32>
    %349 = math.tanh %348 : vector<16x32xf32>
    %350 = arith.mulf %346, %338 : vector<16x32xf32>
    %351 = arith.mulf %345, %349 : vector<16x32xf32>
    %352 = arith.addf %350, %351 : vector<16x32xf32>
    %353 = math.tanh %352 : vector<16x32xf32>
    %354 = arith.mulf %347, %353 : vector<16x32xf32>
    %c0_156 = arith.constant 0 : index
    %c0_157 = arith.constant 0 : index
    %355 = vector.load %arg7[%c0_156, %c0_157] : memref<16x32xf32, #tpu.memory_space<vmem>>, vector<16x32xf32>
    tpu.vector_store %arg7[%c0_156, %c0_157], %354 {strides = array<i32>} : memref<16x32xf32, #tpu.memory_space<vmem>>, vector<16x32xf32>,
    %c0_158 = arith.constant 0 : index
    %c0_159 = arith.constant 0 : index
    %356 = vector.load %arg8[%c0_158, %c0_159] : memref<16x32xf32, #tpu.memory_space<vmem>>, vector<16x32xf32>
    tpu.vector_store %arg8[%c0_158, %c0_159], %352 {strides = array<i32>} : memref<16x32xf32, #tpu.memory_space<vmem>>, vector<16x32xf32>,
    %357 = arith.truncf %354 : vector<16x32xf32> to vector<16x32xbf16>
    %358 = arith.index_cast %c5_i32 : i32 to index
    %c0_160 = arith.constant 0 : index
    %c0_161 = arith.constant 0 : index
    %359 = vector.load %arg5[%358, %c0_160, %c0_161] : memref<8x16x32xbf16, #tpu.memory_space<vmem>>, vector<1x16x32xbf16>
    %360 = vector.shape_cast %359 : vector<1x16x32xbf16> to vector<16x32xbf16>
    %361 = vector.shape_cast %357 : vector<16x32xbf16> to vector<1x16x32xbf16>
    tpu.vector_store %arg5[%358, %c0_160, %c0_161], %361 {strides = array<i32>} : memref<8x16x32xbf16, #tpu.memory_space<vmem>>, vector<1x16x32xbf16>,
    %c7_i32_162 = arith.constant 7 : i32
    %362 = arith.subi %c7_i32_162, %c5_i32 : i32
    %c0_163 = arith.constant 0 : index
    %c0_164 = arith.constant 0 : index
    %363 = vector.load %arg9[%c0_163, %c0_164] : memref<16x32xf32, #tpu.memory_space<vmem>>, vector<16x32xf32>
    %364 = arith.truncf %363 : vector<16x32xf32> to vector<16x32xbf16>
    %cst_165 = arith.constant dense<0.000000e+00> : vector<16x128xf32>
    %365 = tpu.matmul %364, %4, %cst_165 {dimension_numbers = #tpu.dot_dimension_numbers<[1], [0], [0], [1], [0, 0, 1, 1], [], []>} : vector<16x32xbf16>, vector<32x128xbf16>, vector<16x128xf32> -> vector<16x128xf32>
    %366 = arith.index_cast %362 : i32 to index
    %c0_166 = arith.constant 0 : index
    %c0_167 = arith.constant 0 : index
    %367 = vector.load %arg2[%366, %c0_166, %c0_167] : memref<8x16x128xbf16, #tpu.memory_space<vmem>>, vector<1x16x128xbf16>
    %368 = vector.shape_cast %367 : vector<1x16x128xbf16> to vector<16x128xbf16>
    %369 = arith.extf %368 : vector<16x128xbf16> to vector<16x128xf32>
    %370 = arith.addf %369, %365 : vector<16x128xf32>
    %c0_168 = arith.constant 0 : index
    %c0_169 = arith.constant 0 : index
    %371 = vector.load %arg10[%c0_168, %c0_169] : memref<16x32xf32, #tpu.memory_space<vmem>>, vector<16x32xf32>
    %372 = vector.extract_strided_slice %370 {offsets = [0, 0], sizes = [16, 96], strides = [1, 1]} : vector<16x128xf32> to vector<16x96xf32>
    %373 = arith.negf %372 : vector<16x96xf32>
    %374 = math.exp %373 : vector<16x96xf32>
    %cst_170 = arith.constant 1.000000e+00 : f32
    %375 = vector.broadcast %cst_170 : f32 to vector<16x96xf32>
    %376 = arith.addf %375, %374 : vector<16x96xf32>
    %377 = arith.divf %375, %376 : vector<16x96xf32>
    %378 = vector.extract_strided_slice %377 {offsets = [0, 0], sizes = [16, 32], strides = [1, 1]} : vector<16x96xf32> to vector<16x32xf32>
    %379 = vector.extract_strided_slice %377 {offsets = [0, 32], sizes = [16, 32], strides = [1, 1]} : vector<16x96xf32> to vector<16x32xf32>
    %380 = vector.extract_strided_slice %377 {offsets = [0, 64], sizes = [16, 32], strides = [1, 1]} : vector<16x96xf32> to vector<16x32xf32>
    %381 = vector.extract_strided_slice %370 {offsets = [0, 96], sizes = [16, 32], strides = [1, 1]} : vector<16x128xf32> to vector<16x32xf32>
    %382 = math.tanh %381 : vector<16x32xf32>
    %383 = arith.mulf %379, %371 : vector<16x32xf32>
    %384 = arith.mulf %378, %382 : vector<16x32xf32>
    %385 = arith.addf %383, %384 : vector<16x32xf32>
    %386 = math.tanh %385 : vector<16x32xf32>
    %387 = arith.mulf %380, %386 : vector<16x32xf32>
    %c0_171 = arith.constant 0 : index
    %c0_172 = arith.constant 0 : index
    %388 = vector.load %arg9[%c0_171, %c0_172] : memref<16x32xf32, #tpu.memory_space<vmem>>, vector<16x32xf32>
    tpu.vector_store %arg9[%c0_171, %c0_172], %387 {strides = array<i32>} : memref<16x32xf32, #tpu.memory_space<vmem>>, vector<16x32xf32>,
    %c0_173 = arith.constant 0 : index
    %c0_174 = arith.constant 0 : index
    %389 = vector.load %arg10[%c0_173, %c0_174] : memref<16x32xf32, #tpu.memory_space<vmem>>, vector<16x32xf32>
    tpu.vector_store %arg10[%c0_173, %c0_174], %385 {strides = array<i32>} : memref<16x32xf32, #tpu.memory_space<vmem>>, vector<16x32xf32>,
    %390 = arith.truncf %387 : vector<16x32xf32> to vector<16x32xbf16>
    %391 = arith.index_cast %362 : i32 to index
    %c0_175 = arith.constant 0 : index
    %c0_176 = arith.constant 0 : index
    %392 = vector.load %arg6[%391, %c0_175, %c0_176] : memref<8x16x32xbf16, #tpu.memory_space<vmem>>, vector<1x16x32xbf16>
    %393 = vector.shape_cast %392 : vector<1x16x32xbf16> to vector<16x32xbf16>
    %394 = vector.shape_cast %390 : vector<16x32xbf16> to vector<1x16x32xbf16>
    tpu.vector_store %arg6[%391, %c0_175, %c0_176], %394 {strides = array<i32>} : memref<8x16x32xbf16, #tpu.memory_space<vmem>>, vector<1x16x32xbf16>,
    %c6_i32 = arith.constant 6 : i32
    %c0_177 = arith.constant 0 : index
    %c0_178 = arith.constant 0 : index
    %395 = vector.load %arg7[%c0_177, %c0_178] : memref<16x32xf32, #tpu.memory_space<vmem>>, vector<16x32xf32>
    %396 = arith.truncf %395 : vector<16x32xf32> to vector<16x32xbf16>
    %cst_179 = arith.constant dense<0.000000e+00> : vector<16x128xf32>
    %397 = tpu.matmul %396, %3, %cst_179 {dimension_numbers = #tpu.dot_dimension_numbers<[1], [0], [0], [1], [0, 0, 1, 1], [], []>} : vector<16x32xbf16>, vector<32x128xbf16>, vector<16x128xf32> -> vector<16x128xf32>
    %398 = arith.index_cast %c6_i32 : i32 to index
    %c0_180 = arith.constant 0 : index
    %c0_181 = arith.constant 0 : index
    %399 = vector.load %arg1[%398, %c0_180, %c0_181] : memref<8x16x128xbf16, #tpu.memory_space<vmem>>, vector<1x16x128xbf16>
    %400 = vector.shape_cast %399 : vector<1x16x128xbf16> to vector<16x128xbf16>
    %401 = arith.extf %400 : vector<16x128xbf16> to vector<16x128xf32>
    %402 = arith.addf %401, %397 : vector<16x128xf32>
    %c0_182 = arith.constant 0 : index
    %c0_183 = arith.constant 0 : index
    %403 = vector.load %arg8[%c0_182, %c0_183] : memref<16x32xf32, #tpu.memory_space<vmem>>, vector<16x32xf32>
    %404 = vector.extract_strided_slice %402 {offsets = [0, 0], sizes = [16, 96], strides = [1, 1]} : vector<16x128xf32> to vector<16x96xf32>
    %405 = arith.negf %404 : vector<16x96xf32>
    %406 = math.exp %405 : vector<16x96xf32>
    %cst_184 = arith.constant 1.000000e+00 : f32
    %407 = vector.broadcast %cst_184 : f32 to vector<16x96xf32>
    %408 = arith.addf %407, %406 : vector<16x96xf32>
    %409 = arith.divf %407, %408 : vector<16x96xf32>
    %410 = vector.extract_strided_slice %409 {offsets = [0, 0], sizes = [16, 32], strides = [1, 1]} : vector<16x96xf32> to vector<16x32xf32>
    %411 = vector.extract_strided_slice %409 {offsets = [0, 32], sizes = [16, 32], strides = [1, 1]} : vector<16x96xf32> to vector<16x32xf32>
    %412 = vector.extract_strided_slice %409 {offsets = [0, 64], sizes = [16, 32], strides = [1, 1]} : vector<16x96xf32> to vector<16x32xf32>
    %413 = vector.extract_strided_slice %402 {offsets = [0, 96], sizes = [16, 32], strides = [1, 1]} : vector<16x128xf32> to vector<16x32xf32>
    %414 = math.tanh %413 : vector<16x32xf32>
    %415 = arith.mulf %411, %403 : vector<16x32xf32>
    %416 = arith.mulf %410, %414 : vector<16x32xf32>
    %417 = arith.addf %415, %416 : vector<16x32xf32>
    %418 = math.tanh %417 : vector<16x32xf32>
    %419 = arith.mulf %412, %418 : vector<16x32xf32>
    %c0_185 = arith.constant 0 : index
    %c0_186 = arith.constant 0 : index
    %420 = vector.load %arg7[%c0_185, %c0_186] : memref<16x32xf32, #tpu.memory_space<vmem>>, vector<16x32xf32>
    tpu.vector_store %arg7[%c0_185, %c0_186], %419 {strides = array<i32>} : memref<16x32xf32, #tpu.memory_space<vmem>>, vector<16x32xf32>,
    %c0_187 = arith.constant 0 : index
    %c0_188 = arith.constant 0 : index
    %421 = vector.load %arg8[%c0_187, %c0_188] : memref<16x32xf32, #tpu.memory_space<vmem>>, vector<16x32xf32>
    tpu.vector_store %arg8[%c0_187, %c0_188], %417 {strides = array<i32>} : memref<16x32xf32, #tpu.memory_space<vmem>>, vector<16x32xf32>,
    %422 = arith.truncf %419 : vector<16x32xf32> to vector<16x32xbf16>
    %423 = arith.index_cast %c6_i32 : i32 to index
    %c0_189 = arith.constant 0 : index
    %c0_190 = arith.constant 0 : index
    %424 = vector.load %arg5[%423, %c0_189, %c0_190] : memref<8x16x32xbf16, #tpu.memory_space<vmem>>, vector<1x16x32xbf16>
    %425 = vector.shape_cast %424 : vector<1x16x32xbf16> to vector<16x32xbf16>
    %426 = vector.shape_cast %422 : vector<16x32xbf16> to vector<1x16x32xbf16>
    tpu.vector_store %arg5[%423, %c0_189, %c0_190], %426 {strides = array<i32>} : memref<8x16x32xbf16, #tpu.memory_space<vmem>>, vector<1x16x32xbf16>,
    %c7_i32_191 = arith.constant 7 : i32
    %427 = arith.subi %c7_i32_191, %c6_i32 : i32
    %c0_192 = arith.constant 0 : index
    %c0_193 = arith.constant 0 : index
    %428 = vector.load %arg9[%c0_192, %c0_193] : memref<16x32xf32, #tpu.memory_space<vmem>>, vector<16x32xf32>
    %429 = arith.truncf %428 : vector<16x32xf32> to vector<16x32xbf16>
    %cst_194 = arith.constant dense<0.000000e+00> : vector<16x128xf32>
    %430 = tpu.matmul %429, %4, %cst_194 {dimension_numbers = #tpu.dot_dimension_numbers<[1], [0], [0], [1], [0, 0, 1, 1], [], []>} : vector<16x32xbf16>, vector<32x128xbf16>, vector<16x128xf32> -> vector<16x128xf32>
    %431 = arith.index_cast %427 : i32 to index
    %c0_195 = arith.constant 0 : index
    %c0_196 = arith.constant 0 : index
    %432 = vector.load %arg2[%431, %c0_195, %c0_196] : memref<8x16x128xbf16, #tpu.memory_space<vmem>>, vector<1x16x128xbf16>
    %433 = vector.shape_cast %432 : vector<1x16x128xbf16> to vector<16x128xbf16>
    %434 = arith.extf %433 : vector<16x128xbf16> to vector<16x128xf32>
    %435 = arith.addf %434, %430 : vector<16x128xf32>
    %c0_197 = arith.constant 0 : index
    %c0_198 = arith.constant 0 : index
    %436 = vector.load %arg10[%c0_197, %c0_198] : memref<16x32xf32, #tpu.memory_space<vmem>>, vector<16x32xf32>
    %437 = vector.extract_strided_slice %435 {offsets = [0, 0], sizes = [16, 96], strides = [1, 1]} : vector<16x128xf32> to vector<16x96xf32>
    %438 = arith.negf %437 : vector<16x96xf32>
    %439 = math.exp %438 : vector<16x96xf32>
    %cst_199 = arith.constant 1.000000e+00 : f32
    %440 = vector.broadcast %cst_199 : f32 to vector<16x96xf32>
    %441 = arith.addf %440, %439 : vector<16x96xf32>
    %442 = arith.divf %440, %441 : vector<16x96xf32>
    %443 = vector.extract_strided_slice %442 {offsets = [0, 0], sizes = [16, 32], strides = [1, 1]} : vector<16x96xf32> to vector<16x32xf32>
    %444 = vector.extract_strided_slice %442 {offsets = [0, 32], sizes = [16, 32], strides = [1, 1]} : vector<16x96xf32> to vector<16x32xf32>
    %445 = vector.extract_strided_slice %442 {offsets = [0, 64], sizes = [16, 32], strides = [1, 1]} : vector<16x96xf32> to vector<16x32xf32>
    %446 = vector.extract_strided_slice %435 {offsets = [0, 96], sizes = [16, 32], strides = [1, 1]} : vector<16x128xf32> to vector<16x32xf32>
    %447 = math.tanh %446 : vector<16x32xf32>
    %448 = arith.mulf %444, %436 : vector<16x32xf32>
    %449 = arith.mulf %443, %447 : vector<16x32xf32>
    %450 = arith.addf %448, %449 : vector<16x32xf32>
    %451 = math.tanh %450 : vector<16x32xf32>
    %452 = arith.mulf %445, %451 : vector<16x32xf32>
    %c0_200 = arith.constant 0 : index
    %c0_201 = arith.constant 0 : index
    %453 = vector.load %arg9[%c0_200, %c0_201] : memref<16x32xf32, #tpu.memory_space<vmem>>, vector<16x32xf32>
    tpu.vector_store %arg9[%c0_200, %c0_201], %452 {strides = array<i32>} : memref<16x32xf32, #tpu.memory_space<vmem>>, vector<16x32xf32>,
    %c0_202 = arith.constant 0 : index
    %c0_203 = arith.constant 0 : index
    %454 = vector.load %arg10[%c0_202, %c0_203] : memref<16x32xf32, #tpu.memory_space<vmem>>, vector<16x32xf32>
    tpu.vector_store %arg10[%c0_202, %c0_203], %450 {strides = array<i32>} : memref<16x32xf32, #tpu.memory_space<vmem>>, vector<16x32xf32>,
    %455 = arith.truncf %452 : vector<16x32xf32> to vector<16x32xbf16>
    %456 = arith.index_cast %427 : i32 to index
    %c0_204 = arith.constant 0 : index
    %c0_205 = arith.constant 0 : index
    %457 = vector.load %arg6[%456, %c0_204, %c0_205] : memref<8x16x32xbf16, #tpu.memory_space<vmem>>, vector<1x16x32xbf16>
    %458 = vector.shape_cast %457 : vector<1x16x32xbf16> to vector<16x32xbf16>
    %459 = vector.shape_cast %455 : vector<16x32xbf16> to vector<1x16x32xbf16>
    tpu.vector_store %arg6[%456, %c0_204, %c0_205], %459 {strides = array<i32>} : memref<8x16x32xbf16, #tpu.memory_space<vmem>>, vector<1x16x32xbf16>,
    %c7_i32_206 = arith.constant 7 : i32
    %c0_207 = arith.constant 0 : index
    %c0_208 = arith.constant 0 : index
    %460 = vector.load %arg7[%c0_207, %c0_208] : memref<16x32xf32, #tpu.memory_space<vmem>>, vector<16x32xf32>
    %461 = arith.truncf %460 : vector<16x32xf32> to vector<16x32xbf16>
    %cst_209 = arith.constant dense<0.000000e+00> : vector<16x128xf32>
    %462 = tpu.matmul %461, %3, %cst_209 {dimension_numbers = #tpu.dot_dimension_numbers<[1], [0], [0], [1], [0, 0, 1, 1], [], []>} : vector<16x32xbf16>, vector<32x128xbf16>, vector<16x128xf32> -> vector<16x128xf32>
    %463 = arith.index_cast %c7_i32_206 : i32 to index
    %c0_210 = arith.constant 0 : index
    %c0_211 = arith.constant 0 : index
    %464 = vector.load %arg1[%463, %c0_210, %c0_211] : memref<8x16x128xbf16, #tpu.memory_space<vmem>>, vector<1x16x128xbf16>
    %465 = vector.shape_cast %464 : vector<1x16x128xbf16> to vector<16x128xbf16>
    %466 = arith.extf %465 : vector<16x128xbf16> to vector<16x128xf32>
    %467 = arith.addf %466, %462 : vector<16x128xf32>
    %c0_212 = arith.constant 0 : index
    %c0_213 = arith.constant 0 : index
    %468 = vector.load %arg8[%c0_212, %c0_213] : memref<16x32xf32, #tpu.memory_space<vmem>>, vector<16x32xf32>
    %469 = vector.extract_strided_slice %467 {offsets = [0, 0], sizes = [16, 96], strides = [1, 1]} : vector<16x128xf32> to vector<16x96xf32>
    %470 = arith.negf %469 : vector<16x96xf32>
    %471 = math.exp %470 : vector<16x96xf32>
    %cst_214 = arith.constant 1.000000e+00 : f32
    %472 = vector.broadcast %cst_214 : f32 to vector<16x96xf32>
    %473 = arith.addf %472, %471 : vector<16x96xf32>
    %474 = arith.divf %472, %473 : vector<16x96xf32>
    %475 = vector.extract_strided_slice %474 {offsets = [0, 0], sizes = [16, 32], strides = [1, 1]} : vector<16x96xf32> to vector<16x32xf32>
    %476 = vector.extract_strided_slice %474 {offsets = [0, 32], sizes = [16, 32], strides = [1, 1]} : vector<16x96xf32> to vector<16x32xf32>
    %477 = vector.extract_strided_slice %474 {offsets = [0, 64], sizes = [16, 32], strides = [1, 1]} : vector<16x96xf32> to vector<16x32xf32>
    %478 = vector.extract_strided_slice %467 {offsets = [0, 96], sizes = [16, 32], strides = [1, 1]} : vector<16x128xf32> to vector<16x32xf32>
    %479 = math.tanh %478 : vector<16x32xf32>
    %480 = arith.mulf %476, %468 : vector<16x32xf32>
    %481 = arith.mulf %475, %479 : vector<16x32xf32>
    %482 = arith.addf %480, %481 : vector<16x32xf32>
    %483 = math.tanh %482 : vector<16x32xf32>
    %484 = arith.mulf %477, %483 : vector<16x32xf32>
    %c0_215 = arith.constant 0 : index
    %c0_216 = arith.constant 0 : index
    %485 = vector.load %arg7[%c0_215, %c0_216] : memref<16x32xf32, #tpu.memory_space<vmem>>, vector<16x32xf32>
    tpu.vector_store %arg7[%c0_215, %c0_216], %484 {strides = array<i32>} : memref<16x32xf32, #tpu.memory_space<vmem>>, vector<16x32xf32>,
    %c0_217 = arith.constant 0 : index
    %c0_218 = arith.constant 0 : index
    %486 = vector.load %arg8[%c0_217, %c0_218] : memref<16x32xf32, #tpu.memory_space<vmem>>, vector<16x32xf32>
    tpu.vector_store %arg8[%c0_217, %c0_218], %482 {strides = array<i32>} : memref<16x32xf32, #tpu.memory_space<vmem>>, vector<16x32xf32>,
    %487 = arith.truncf %484 : vector<16x32xf32> to vector<16x32xbf16>
    %488 = arith.index_cast %c7_i32_206 : i32 to index
    %c0_219 = arith.constant 0 : index
    %c0_220 = arith.constant 0 : index
    %489 = vector.load %arg5[%488, %c0_219, %c0_220] : memref<8x16x32xbf16, #tpu.memory_space<vmem>>, vector<1x16x32xbf16>
    %490 = vector.shape_cast %489 : vector<1x16x32xbf16> to vector<16x32xbf16>
    %491 = vector.shape_cast %487 : vector<16x32xbf16> to vector<1x16x32xbf16>
    tpu.vector_store %arg5[%488, %c0_219, %c0_220], %491 {strides = array<i32>} : memref<8x16x32xbf16, #tpu.memory_space<vmem>>, vector<1x16x32xbf16>,
    %c7_i32_221 = arith.constant 7 : i32
    %492 = arith.subi %c7_i32_221, %c7_i32_206 : i32
    %c0_222 = arith.constant 0 : index
    %c0_223 = arith.constant 0 : index
    %493 = vector.load %arg9[%c0_222, %c0_223] : memref<16x32xf32, #tpu.memory_space<vmem>>, vector<16x32xf32>
    %494 = arith.truncf %493 : vector<16x32xf32> to vector<16x32xbf16>
    %cst_224 = arith.constant dense<0.000000e+00> : vector<16x128xf32>
    %495 = tpu.matmul %494, %4, %cst_224 {dimension_numbers = #tpu.dot_dimension_numbers<[1], [0], [0], [1], [0, 0, 1, 1], [], []>} : vector<16x32xbf16>, vector<32x128xbf16>, vector<16x128xf32> -> vector<16x128xf32>
    %496 = arith.index_cast %492 : i32 to index
    %c0_225 = arith.constant 0 : index
    %c0_226 = arith.constant 0 : index
    %497 = vector.load %arg2[%496, %c0_225, %c0_226] : memref<8x16x128xbf16, #tpu.memory_space<vmem>>, vector<1x16x128xbf16>
    %498 = vector.shape_cast %497 : vector<1x16x128xbf16> to vector<16x128xbf16>
    %499 = arith.extf %498 : vector<16x128xbf16> to vector<16x128xf32>
    %500 = arith.addf %499, %495 : vector<16x128xf32>
    %c0_227 = arith.constant 0 : index
    %c0_228 = arith.constant 0 : index
    %501 = vector.load %arg10[%c0_227, %c0_228] : memref<16x32xf32, #tpu.memory_space<vmem>>, vector<16x32xf32>
    %502 = vector.extract_strided_slice %500 {offsets = [0, 0], sizes = [16, 96], strides = [1, 1]} : vector<16x128xf32> to vector<16x96xf32>
    %503 = arith.negf %502 : vector<16x96xf32>
    %504 = math.exp %503 : vector<16x96xf32>
    %cst_229 = arith.constant 1.000000e+00 : f32
    %505 = vector.broadcast %cst_229 : f32 to vector<16x96xf32>
    %506 = arith.addf %505, %504 : vector<16x96xf32>
    %507 = arith.divf %505, %506 : vector<16x96xf32>
    %508 = vector.extract_strided_slice %507 {offsets = [0, 0], sizes = [16, 32], strides = [1, 1]} : vector<16x96xf32> to vector<16x32xf32>
    %509 = vector.extract_strided_slice %507 {offsets = [0, 32], sizes = [16, 32], strides = [1, 1]} : vector<16x96xf32> to vector<16x32xf32>
    %510 = vector.extract_strided_slice %507 {offsets = [0, 64], sizes = [16, 32], strides = [1, 1]} : vector<16x96xf32> to vector<16x32xf32>
    %511 = vector.extract_strided_slice %500 {offsets = [0, 96], sizes = [16, 32], strides = [1, 1]} : vector<16x128xf32> to vector<16x32xf32>
    %512 = math.tanh %511 : vector<16x32xf32>
    %513 = arith.mulf %509, %501 : vector<16x32xf32>
    %514 = arith.mulf %508, %512 : vector<16x32xf32>
    %515 = arith.addf %513, %514 : vector<16x32xf32>
    %516 = math.tanh %515 : vector<16x32xf32>
    %517 = arith.mulf %510, %516 : vector<16x32xf32>
    %c0_230 = arith.constant 0 : index
    %c0_231 = arith.constant 0 : index
    %518 = vector.load %arg9[%c0_230, %c0_231] : memref<16x32xf32, #tpu.memory_space<vmem>>, vector<16x32xf32>
    tpu.vector_store %arg9[%c0_230, %c0_231], %517 {strides = array<i32>} : memref<16x32xf32, #tpu.memory_space<vmem>>, vector<16x32xf32>,
    %c0_232 = arith.constant 0 : index
    %c0_233 = arith.constant 0 : index
    %519 = vector.load %arg10[%c0_232, %c0_233] : memref<16x32xf32, #tpu.memory_space<vmem>>, vector<16x32xf32>
    tpu.vector_store %arg10[%c0_232, %c0_233], %515 {strides = array<i32>} : memref<16x32xf32, #tpu.memory_space<vmem>>, vector<16x32xf32>,
    %520 = arith.truncf %517 : vector<16x32xf32> to vector<16x32xbf16>
    %521 = arith.index_cast %492 : i32 to index
    %c0_234 = arith.constant 0 : index
    %c0_235 = arith.constant 0 : index
    %522 = vector.load %arg6[%521, %c0_234, %c0_235] : memref<8x16x32xbf16, #tpu.memory_space<vmem>>, vector<1x16x32xbf16>
    %523 = vector.shape_cast %522 : vector<1x16x32xbf16> to vector<16x32xbf16>
    %524 = vector.shape_cast %520 : vector<16x32xbf16> to vector<1x16x32xbf16>
    tpu.vector_store %arg6[%521, %c0_234, %c0_235], %524 {strides = array<i32>} : memref<8x16x32xbf16, #tpu.memory_space<vmem>>, vector<1x16x32xbf16>,
    %c8_i32 = arith.constant 8 : i32
    return
  }
  func.func @transform_0(%arg0: i32) -> (i32, i32, i32) {
    %c0_i32 = arith.constant 0 : i32
    %c0_i32_0 = arith.constant 0 : i32
    %c0_i32_1 = arith.constant 0 : i32
    return %arg0, %c0_i32, %c0_i32_0 : i32, i32, i32
  }
  func.func @transform_1(%arg0: i32) -> (i32, i32, i32) {
    %c0_i32 = arith.constant 0 : i32
    %0 = arith.subi %c0_i32, %arg0 : i32
    %c0_i32_0 = arith.constant 0 : i32
    %c0_i32_1 = arith.constant 0 : i32
    %c0_i32_2 = arith.constant 0 : i32
    return %0, %c0_i32_0, %c0_i32_1 : i32, i32, i32
  }
  func.func @transform_2(%arg0: i32) -> (i32, i32) {
    %c0_i32 = arith.constant 0 : i32
    %c0_i32_0 = arith.constant 0 : i32
    %c0_i32_1 = arith.constant 0 : i32
    return %c0_i32, %c0_i32_0 : i32, i32
  }
  func.func @transform_3(%arg0: i32) -> (i32, i32) {
    %c0_i32 = arith.constant 0 : i32
    %c0_i32_0 = arith.constant 0 : i32
    %c0_i32_1 = arith.constant 0 : i32
    return %c0_i32, %c0_i32_0 : i32, i32
  }
  func.func @transform_4(%arg0: i32) -> (i32, i32, i32) {
    %c0_i32 = arith.constant 0 : i32
    %c0_i32_0 = arith.constant 0 : i32
    %c0_i32_1 = arith.constant 0 : i32
    return %arg0, %c0_i32, %c0_i32_0 : i32, i32, i32
  }
  func.func @transform_5(%arg0: i32) -> (i32, i32, i32) {
    %c0_i32 = arith.constant 0 : i32
    %0 = arith.subi %c0_i32, %arg0 : i32
    %c0_i32_0 = arith.constant 0 : i32
    %c0_i32_1 = arith.constant 0 : i32
    %c0_i32_2 = arith.constant 0 : i32
    return %0, %c0_i32_0, %c0_i32_1 : i32, i32, i32
  }
}

module attributes {stable_mosaic.version = 11 : i64} {
  func.func @_bilstm_rec_kernel(%arg0: i32, %arg1: memref<8x16x128xbf16, #tpu.memory_space<vmem>>, %arg2: memref<8x16x128xbf16, #tpu.memory_space<vmem>>, %arg3: memref<32x128xbf16, #tpu.memory_space<vmem>>, %arg4: memref<32x128xbf16, #tpu.memory_space<vmem>>, %arg5: memref<8x16x32xf32, #tpu.memory_space<vmem>>, %arg6: memref<8x16x32xf32, #tpu.memory_space<vmem>>, %arg7: memref<16x32xf32, #tpu.memory_space<vmem>>, %arg8: memref<16x32xf32, #tpu.memory_space<vmem>>, %arg9: memref<16x32xf32, #tpu.memory_space<vmem>>, %arg10: memref<16x32xf32, #tpu.memory_space<vmem>>) attributes {dimension_semantics = [#tpu.dimension_semantics<arbitrary>], iteration_bounds = array<i64: 1>, scalar_prefetch = 0 : i64, scratch_operands = 4 : i64, tpu.core_type = #tpu.core_type<tc>, window_params = [{transform_indices = @transform_0, window_bounds = array<i64: 8, 16, 128>}, {transform_indices = @transform_1, window_bounds = array<i64: 8, 16, 128>}, {pipeline_mode = #tpu.pipeline_mode<synchronous>, transform_indices = @transform_2, window_bounds = array<i64: 32, 128>}, {pipeline_mode = #tpu.pipeline_mode<synchronous>, transform_indices = @transform_3, window_bounds = array<i64: 32, 128>}, {transform_indices = @transform_4, window_bounds = array<i64: 8, 16, 32>}, {transform_indices = @transform_5, window_bounds = array<i64: 8, 16, 32>}]} {
    %c0_i32 = arith.constant 0 : i32
    %0 = arith.cmpi eq, %arg0, %c0_i32 : i32
    %1 = arith.extui %0 : i1 to i32
    %c0_i32_0 = arith.constant 0 : i32
    %2 = arith.cmpi ne, %1, %c0_i32_0 : i32
    scf.if %2 {
      %cst_236 = arith.constant 0.000000e+00 : f32
      %509 = vector.broadcast %cst_236 : f32 to vector<16x32xf32>
      %c0_237 = arith.constant 0 : index
      %c0_238 = arith.constant 0 : index
      %510 = vector.load %arg7[%c0_237, %c0_238] : memref<16x32xf32, #tpu.memory_space<vmem>>, vector<16x32xf32>
      tpu.vector_store %arg7[%c0_237, %c0_238], %509 {strides = array<i32>} : memref<16x32xf32, #tpu.memory_space<vmem>>, vector<16x32xf32>,
      %cst_239 = arith.constant 0.000000e+00 : f32
      %511 = vector.broadcast %cst_239 : f32 to vector<16x32xf32>
      %c0_240 = arith.constant 0 : index
      %c0_241 = arith.constant 0 : index
      %512 = vector.load %arg8[%c0_240, %c0_241] : memref<16x32xf32, #tpu.memory_space<vmem>>, vector<16x32xf32>
      tpu.vector_store %arg8[%c0_240, %c0_241], %511 {strides = array<i32>} : memref<16x32xf32, #tpu.memory_space<vmem>>, vector<16x32xf32>,
      %cst_242 = arith.constant 0.000000e+00 : f32
      %513 = vector.broadcast %cst_242 : f32 to vector<16x32xf32>
      %c0_243 = arith.constant 0 : index
      %c0_244 = arith.constant 0 : index
      %514 = vector.load %arg9[%c0_243, %c0_244] : memref<16x32xf32, #tpu.memory_space<vmem>>, vector<16x32xf32>
      tpu.vector_store %arg9[%c0_243, %c0_244], %513 {strides = array<i32>} : memref<16x32xf32, #tpu.memory_space<vmem>>, vector<16x32xf32>,
      %cst_245 = arith.constant 0.000000e+00 : f32
      %515 = vector.broadcast %cst_245 : f32 to vector<16x32xf32>
      %c0_246 = arith.constant 0 : index
      %c0_247 = arith.constant 0 : index
      %516 = vector.load %arg10[%c0_246, %c0_247] : memref<16x32xf32, #tpu.memory_space<vmem>>, vector<16x32xf32>
      tpu.vector_store %arg10[%c0_246, %c0_247], %515 {strides = array<i32>} : memref<16x32xf32, #tpu.memory_space<vmem>>, vector<16x32xf32>,
    } else {
    }
    %c0 = arith.constant 0 : index
    %c0_1 = arith.constant 0 : index
    %3 = vector.load %arg3[%c0, %c0_1] : memref<32x128xbf16, #tpu.memory_space<vmem>>, vector<32x128xbf16>
    %c0_2 = arith.constant 0 : index
    %c0_3 = arith.constant 0 : index
    %4 = vector.load %arg4[%c0_2, %c0_3] : memref<32x128xbf16, #tpu.memory_space<vmem>>, vector<32x128xbf16>
    %c0_i32_4 = arith.constant 0 : i32
    %c0_5 = arith.constant 0 : index
    %c0_6 = arith.constant 0 : index
    %5 = vector.load %arg7[%c0_5, %c0_6] : memref<16x32xf32, #tpu.memory_space<vmem>>, vector<16x32xf32>
    %6 = arith.truncf %5 : vector<16x32xf32> to vector<16x32xbf16>
    %cst = arith.constant dense<0.000000e+00> : vector<16x128xf32>
    %7 = tpu.matmul %6, %3, %cst {dimension_numbers = #tpu.dot_dimension_numbers<[1], [0], [0], [1], [0, 0, 1, 1], [], []>} : vector<16x32xbf16>, vector<32x128xbf16>, vector<16x128xf32> -> vector<16x128xf32>
    %8 = arith.index_cast %c0_i32_4 : i32 to index
    %c0_7 = arith.constant 0 : index
    %c0_8 = arith.constant 0 : index
    %9 = vector.load %arg1[%8, %c0_7, %c0_8] : memref<8x16x128xbf16, #tpu.memory_space<vmem>>, vector<1x16x128xbf16>
    %10 = vector.shape_cast %9 : vector<1x16x128xbf16> to vector<16x128xbf16>
    %11 = arith.extf %10 : vector<16x128xbf16> to vector<16x128xf32>
    %12 = arith.addf %11, %7 : vector<16x128xf32>
    %c0_9 = arith.constant 0 : index
    %c0_10 = arith.constant 0 : index
    %13 = vector.load %arg8[%c0_9, %c0_10] : memref<16x32xf32, #tpu.memory_space<vmem>>, vector<16x32xf32>
    %14 = vector.extract_strided_slice %12 {offsets = [0, 0], sizes = [16, 96], strides = [1, 1]} : vector<16x128xf32> to vector<16x96xf32>
    %15 = arith.negf %14 : vector<16x96xf32>
    %16 = math.exp %15 : vector<16x96xf32>
    %cst_11 = arith.constant 1.000000e+00 : f32
    %17 = vector.broadcast %cst_11 : f32 to vector<16x96xf32>
    %18 = arith.addf %17, %16 : vector<16x96xf32>
    %19 = arith.divf %17, %18 : vector<16x96xf32>
    %20 = vector.extract_strided_slice %19 {offsets = [0, 0], sizes = [16, 32], strides = [1, 1]} : vector<16x96xf32> to vector<16x32xf32>
    %21 = vector.extract_strided_slice %19 {offsets = [0, 32], sizes = [16, 32], strides = [1, 1]} : vector<16x96xf32> to vector<16x32xf32>
    %22 = vector.extract_strided_slice %19 {offsets = [0, 64], sizes = [16, 32], strides = [1, 1]} : vector<16x96xf32> to vector<16x32xf32>
    %23 = vector.extract_strided_slice %12 {offsets = [0, 96], sizes = [16, 32], strides = [1, 1]} : vector<16x128xf32> to vector<16x32xf32>
    %24 = math.tanh %23 : vector<16x32xf32>
    %25 = arith.mulf %21, %13 : vector<16x32xf32>
    %26 = arith.mulf %20, %24 : vector<16x32xf32>
    %27 = arith.addf %25, %26 : vector<16x32xf32>
    %28 = math.tanh %27 : vector<16x32xf32>
    %29 = arith.mulf %22, %28 : vector<16x32xf32>
    %c0_12 = arith.constant 0 : index
    %c0_13 = arith.constant 0 : index
    %30 = vector.load %arg7[%c0_12, %c0_13] : memref<16x32xf32, #tpu.memory_space<vmem>>, vector<16x32xf32>
    tpu.vector_store %arg7[%c0_12, %c0_13], %29 {strides = array<i32>} : memref<16x32xf32, #tpu.memory_space<vmem>>, vector<16x32xf32>,
    %c0_14 = arith.constant 0 : index
    %c0_15 = arith.constant 0 : index
    %31 = vector.load %arg8[%c0_14, %c0_15] : memref<16x32xf32, #tpu.memory_space<vmem>>, vector<16x32xf32>
    tpu.vector_store %arg8[%c0_14, %c0_15], %27 {strides = array<i32>} : memref<16x32xf32, #tpu.memory_space<vmem>>, vector<16x32xf32>,
    %32 = arith.index_cast %c0_i32_4 : i32 to index
    %c0_16 = arith.constant 0 : index
    %c0_17 = arith.constant 0 : index
    %33 = vector.load %arg5[%32, %c0_16, %c0_17] : memref<8x16x32xf32, #tpu.memory_space<vmem>>, vector<1x16x32xf32>
    %34 = vector.shape_cast %33 : vector<1x16x32xf32> to vector<16x32xf32>
    %35 = vector.shape_cast %29 : vector<16x32xf32> to vector<1x16x32xf32>
    tpu.vector_store %arg5[%32, %c0_16, %c0_17], %35 {strides = array<i32>} : memref<8x16x32xf32, #tpu.memory_space<vmem>>, vector<1x16x32xf32>,
    %c7_i32 = arith.constant 7 : i32
    %36 = arith.subi %c7_i32, %c0_i32_4 : i32
    %c0_18 = arith.constant 0 : index
    %c0_19 = arith.constant 0 : index
    %37 = vector.load %arg9[%c0_18, %c0_19] : memref<16x32xf32, #tpu.memory_space<vmem>>, vector<16x32xf32>
    %38 = arith.truncf %37 : vector<16x32xf32> to vector<16x32xbf16>
    %cst_20 = arith.constant dense<0.000000e+00> : vector<16x128xf32>
    %39 = tpu.matmul %38, %4, %cst_20 {dimension_numbers = #tpu.dot_dimension_numbers<[1], [0], [0], [1], [0, 0, 1, 1], [], []>} : vector<16x32xbf16>, vector<32x128xbf16>, vector<16x128xf32> -> vector<16x128xf32>
    %40 = arith.index_cast %36 : i32 to index
    %c0_21 = arith.constant 0 : index
    %c0_22 = arith.constant 0 : index
    %41 = vector.load %arg2[%40, %c0_21, %c0_22] : memref<8x16x128xbf16, #tpu.memory_space<vmem>>, vector<1x16x128xbf16>
    %42 = vector.shape_cast %41 : vector<1x16x128xbf16> to vector<16x128xbf16>
    %43 = arith.extf %42 : vector<16x128xbf16> to vector<16x128xf32>
    %44 = arith.addf %43, %39 : vector<16x128xf32>
    %c0_23 = arith.constant 0 : index
    %c0_24 = arith.constant 0 : index
    %45 = vector.load %arg10[%c0_23, %c0_24] : memref<16x32xf32, #tpu.memory_space<vmem>>, vector<16x32xf32>
    %46 = vector.extract_strided_slice %44 {offsets = [0, 0], sizes = [16, 96], strides = [1, 1]} : vector<16x128xf32> to vector<16x96xf32>
    %47 = arith.negf %46 : vector<16x96xf32>
    %48 = math.exp %47 : vector<16x96xf32>
    %cst_25 = arith.constant 1.000000e+00 : f32
    %49 = vector.broadcast %cst_25 : f32 to vector<16x96xf32>
    %50 = arith.addf %49, %48 : vector<16x96xf32>
    %51 = arith.divf %49, %50 : vector<16x96xf32>
    %52 = vector.extract_strided_slice %51 {offsets = [0, 0], sizes = [16, 32], strides = [1, 1]} : vector<16x96xf32> to vector<16x32xf32>
    %53 = vector.extract_strided_slice %51 {offsets = [0, 32], sizes = [16, 32], strides = [1, 1]} : vector<16x96xf32> to vector<16x32xf32>
    %54 = vector.extract_strided_slice %51 {offsets = [0, 64], sizes = [16, 32], strides = [1, 1]} : vector<16x96xf32> to vector<16x32xf32>
    %55 = vector.extract_strided_slice %44 {offsets = [0, 96], sizes = [16, 32], strides = [1, 1]} : vector<16x128xf32> to vector<16x32xf32>
    %56 = math.tanh %55 : vector<16x32xf32>
    %57 = arith.mulf %53, %45 : vector<16x32xf32>
    %58 = arith.mulf %52, %56 : vector<16x32xf32>
    %59 = arith.addf %57, %58 : vector<16x32xf32>
    %60 = math.tanh %59 : vector<16x32xf32>
    %61 = arith.mulf %54, %60 : vector<16x32xf32>
    %c0_26 = arith.constant 0 : index
    %c0_27 = arith.constant 0 : index
    %62 = vector.load %arg9[%c0_26, %c0_27] : memref<16x32xf32, #tpu.memory_space<vmem>>, vector<16x32xf32>
    tpu.vector_store %arg9[%c0_26, %c0_27], %61 {strides = array<i32>} : memref<16x32xf32, #tpu.memory_space<vmem>>, vector<16x32xf32>,
    %c0_28 = arith.constant 0 : index
    %c0_29 = arith.constant 0 : index
    %63 = vector.load %arg10[%c0_28, %c0_29] : memref<16x32xf32, #tpu.memory_space<vmem>>, vector<16x32xf32>
    tpu.vector_store %arg10[%c0_28, %c0_29], %59 {strides = array<i32>} : memref<16x32xf32, #tpu.memory_space<vmem>>, vector<16x32xf32>,
    %64 = arith.index_cast %36 : i32 to index
    %c0_30 = arith.constant 0 : index
    %c0_31 = arith.constant 0 : index
    %65 = vector.load %arg6[%64, %c0_30, %c0_31] : memref<8x16x32xf32, #tpu.memory_space<vmem>>, vector<1x16x32xf32>
    %66 = vector.shape_cast %65 : vector<1x16x32xf32> to vector<16x32xf32>
    %67 = vector.shape_cast %61 : vector<16x32xf32> to vector<1x16x32xf32>
    tpu.vector_store %arg6[%64, %c0_30, %c0_31], %67 {strides = array<i32>} : memref<8x16x32xf32, #tpu.memory_space<vmem>>, vector<1x16x32xf32>,
    %c1_i32 = arith.constant 1 : i32
    %c0_32 = arith.constant 0 : index
    %c0_33 = arith.constant 0 : index
    %68 = vector.load %arg7[%c0_32, %c0_33] : memref<16x32xf32, #tpu.memory_space<vmem>>, vector<16x32xf32>
    %69 = arith.truncf %68 : vector<16x32xf32> to vector<16x32xbf16>
    %cst_34 = arith.constant dense<0.000000e+00> : vector<16x128xf32>
    %70 = tpu.matmul %69, %3, %cst_34 {dimension_numbers = #tpu.dot_dimension_numbers<[1], [0], [0], [1], [0, 0, 1, 1], [], []>} : vector<16x32xbf16>, vector<32x128xbf16>, vector<16x128xf32> -> vector<16x128xf32>
    %71 = arith.index_cast %c1_i32 : i32 to index
    %c0_35 = arith.constant 0 : index
    %c0_36 = arith.constant 0 : index
    %72 = vector.load %arg1[%71, %c0_35, %c0_36] : memref<8x16x128xbf16, #tpu.memory_space<vmem>>, vector<1x16x128xbf16>
    %73 = vector.shape_cast %72 : vector<1x16x128xbf16> to vector<16x128xbf16>
    %74 = arith.extf %73 : vector<16x128xbf16> to vector<16x128xf32>
    %75 = arith.addf %74, %70 : vector<16x128xf32>
    %c0_37 = arith.constant 0 : index
    %c0_38 = arith.constant 0 : index
    %76 = vector.load %arg8[%c0_37, %c0_38] : memref<16x32xf32, #tpu.memory_space<vmem>>, vector<16x32xf32>
    %77 = vector.extract_strided_slice %75 {offsets = [0, 0], sizes = [16, 96], strides = [1, 1]} : vector<16x128xf32> to vector<16x96xf32>
    %78 = arith.negf %77 : vector<16x96xf32>
    %79 = math.exp %78 : vector<16x96xf32>
    %cst_39 = arith.constant 1.000000e+00 : f32
    %80 = vector.broadcast %cst_39 : f32 to vector<16x96xf32>
    %81 = arith.addf %80, %79 : vector<16x96xf32>
    %82 = arith.divf %80, %81 : vector<16x96xf32>
    %83 = vector.extract_strided_slice %82 {offsets = [0, 0], sizes = [16, 32], strides = [1, 1]} : vector<16x96xf32> to vector<16x32xf32>
    %84 = vector.extract_strided_slice %82 {offsets = [0, 32], sizes = [16, 32], strides = [1, 1]} : vector<16x96xf32> to vector<16x32xf32>
    %85 = vector.extract_strided_slice %82 {offsets = [0, 64], sizes = [16, 32], strides = [1, 1]} : vector<16x96xf32> to vector<16x32xf32>
    %86 = vector.extract_strided_slice %75 {offsets = [0, 96], sizes = [16, 32], strides = [1, 1]} : vector<16x128xf32> to vector<16x32xf32>
    %87 = math.tanh %86 : vector<16x32xf32>
    %88 = arith.mulf %84, %76 : vector<16x32xf32>
    %89 = arith.mulf %83, %87 : vector<16x32xf32>
    %90 = arith.addf %88, %89 : vector<16x32xf32>
    %91 = math.tanh %90 : vector<16x32xf32>
    %92 = arith.mulf %85, %91 : vector<16x32xf32>
    %c0_40 = arith.constant 0 : index
    %c0_41 = arith.constant 0 : index
    %93 = vector.load %arg7[%c0_40, %c0_41] : memref<16x32xf32, #tpu.memory_space<vmem>>, vector<16x32xf32>
    tpu.vector_store %arg7[%c0_40, %c0_41], %92 {strides = array<i32>} : memref<16x32xf32, #tpu.memory_space<vmem>>, vector<16x32xf32>,
    %c0_42 = arith.constant 0 : index
    %c0_43 = arith.constant 0 : index
    %94 = vector.load %arg8[%c0_42, %c0_43] : memref<16x32xf32, #tpu.memory_space<vmem>>, vector<16x32xf32>
    tpu.vector_store %arg8[%c0_42, %c0_43], %90 {strides = array<i32>} : memref<16x32xf32, #tpu.memory_space<vmem>>, vector<16x32xf32>,
    %95 = arith.index_cast %c1_i32 : i32 to index
    %c0_44 = arith.constant 0 : index
    %c0_45 = arith.constant 0 : index
    %96 = vector.load %arg5[%95, %c0_44, %c0_45] : memref<8x16x32xf32, #tpu.memory_space<vmem>>, vector<1x16x32xf32>
    %97 = vector.shape_cast %96 : vector<1x16x32xf32> to vector<16x32xf32>
    %98 = vector.shape_cast %92 : vector<16x32xf32> to vector<1x16x32xf32>
    tpu.vector_store %arg5[%95, %c0_44, %c0_45], %98 {strides = array<i32>} : memref<8x16x32xf32, #tpu.memory_space<vmem>>, vector<1x16x32xf32>,
    %c7_i32_46 = arith.constant 7 : i32
    %99 = arith.subi %c7_i32_46, %c1_i32 : i32
    %c0_47 = arith.constant 0 : index
    %c0_48 = arith.constant 0 : index
    %100 = vector.load %arg9[%c0_47, %c0_48] : memref<16x32xf32, #tpu.memory_space<vmem>>, vector<16x32xf32>
    %101 = arith.truncf %100 : vector<16x32xf32> to vector<16x32xbf16>
    %cst_49 = arith.constant dense<0.000000e+00> : vector<16x128xf32>
    %102 = tpu.matmul %101, %4, %cst_49 {dimension_numbers = #tpu.dot_dimension_numbers<[1], [0], [0], [1], [0, 0, 1, 1], [], []>} : vector<16x32xbf16>, vector<32x128xbf16>, vector<16x128xf32> -> vector<16x128xf32>
    %103 = arith.index_cast %99 : i32 to index
    %c0_50 = arith.constant 0 : index
    %c0_51 = arith.constant 0 : index
    %104 = vector.load %arg2[%103, %c0_50, %c0_51] : memref<8x16x128xbf16, #tpu.memory_space<vmem>>, vector<1x16x128xbf16>
    %105 = vector.shape_cast %104 : vector<1x16x128xbf16> to vector<16x128xbf16>
    %106 = arith.extf %105 : vector<16x128xbf16> to vector<16x128xf32>
    %107 = arith.addf %106, %102 : vector<16x128xf32>
    %c0_52 = arith.constant 0 : index
    %c0_53 = arith.constant 0 : index
    %108 = vector.load %arg10[%c0_52, %c0_53] : memref<16x32xf32, #tpu.memory_space<vmem>>, vector<16x32xf32>
    %109 = vector.extract_strided_slice %107 {offsets = [0, 0], sizes = [16, 96], strides = [1, 1]} : vector<16x128xf32> to vector<16x96xf32>
    %110 = arith.negf %109 : vector<16x96xf32>
    %111 = math.exp %110 : vector<16x96xf32>
    %cst_54 = arith.constant 1.000000e+00 : f32
    %112 = vector.broadcast %cst_54 : f32 to vector<16x96xf32>
    %113 = arith.addf %112, %111 : vector<16x96xf32>
    %114 = arith.divf %112, %113 : vector<16x96xf32>
    %115 = vector.extract_strided_slice %114 {offsets = [0, 0], sizes = [16, 32], strides = [1, 1]} : vector<16x96xf32> to vector<16x32xf32>
    %116 = vector.extract_strided_slice %114 {offsets = [0, 32], sizes = [16, 32], strides = [1, 1]} : vector<16x96xf32> to vector<16x32xf32>
    %117 = vector.extract_strided_slice %114 {offsets = [0, 64], sizes = [16, 32], strides = [1, 1]} : vector<16x96xf32> to vector<16x32xf32>
    %118 = vector.extract_strided_slice %107 {offsets = [0, 96], sizes = [16, 32], strides = [1, 1]} : vector<16x128xf32> to vector<16x32xf32>
    %119 = math.tanh %118 : vector<16x32xf32>
    %120 = arith.mulf %116, %108 : vector<16x32xf32>
    %121 = arith.mulf %115, %119 : vector<16x32xf32>
    %122 = arith.addf %120, %121 : vector<16x32xf32>
    %123 = math.tanh %122 : vector<16x32xf32>
    %124 = arith.mulf %117, %123 : vector<16x32xf32>
    %c0_55 = arith.constant 0 : index
    %c0_56 = arith.constant 0 : index
    %125 = vector.load %arg9[%c0_55, %c0_56] : memref<16x32xf32, #tpu.memory_space<vmem>>, vector<16x32xf32>
    tpu.vector_store %arg9[%c0_55, %c0_56], %124 {strides = array<i32>} : memref<16x32xf32, #tpu.memory_space<vmem>>, vector<16x32xf32>,
    %c0_57 = arith.constant 0 : index
    %c0_58 = arith.constant 0 : index
    %126 = vector.load %arg10[%c0_57, %c0_58] : memref<16x32xf32, #tpu.memory_space<vmem>>, vector<16x32xf32>
    tpu.vector_store %arg10[%c0_57, %c0_58], %122 {strides = array<i32>} : memref<16x32xf32, #tpu.memory_space<vmem>>, vector<16x32xf32>,
    %127 = arith.index_cast %99 : i32 to index
    %c0_59 = arith.constant 0 : index
    %c0_60 = arith.constant 0 : index
    %128 = vector.load %arg6[%127, %c0_59, %c0_60] : memref<8x16x32xf32, #tpu.memory_space<vmem>>, vector<1x16x32xf32>
    %129 = vector.shape_cast %128 : vector<1x16x32xf32> to vector<16x32xf32>
    %130 = vector.shape_cast %124 : vector<16x32xf32> to vector<1x16x32xf32>
    tpu.vector_store %arg6[%127, %c0_59, %c0_60], %130 {strides = array<i32>} : memref<8x16x32xf32, #tpu.memory_space<vmem>>, vector<1x16x32xf32>,
    %c2_i32 = arith.constant 2 : i32
    %c0_61 = arith.constant 0 : index
    %c0_62 = arith.constant 0 : index
    %131 = vector.load %arg7[%c0_61, %c0_62] : memref<16x32xf32, #tpu.memory_space<vmem>>, vector<16x32xf32>
    %132 = arith.truncf %131 : vector<16x32xf32> to vector<16x32xbf16>
    %cst_63 = arith.constant dense<0.000000e+00> : vector<16x128xf32>
    %133 = tpu.matmul %132, %3, %cst_63 {dimension_numbers = #tpu.dot_dimension_numbers<[1], [0], [0], [1], [0, 0, 1, 1], [], []>} : vector<16x32xbf16>, vector<32x128xbf16>, vector<16x128xf32> -> vector<16x128xf32>
    %134 = arith.index_cast %c2_i32 : i32 to index
    %c0_64 = arith.constant 0 : index
    %c0_65 = arith.constant 0 : index
    %135 = vector.load %arg1[%134, %c0_64, %c0_65] : memref<8x16x128xbf16, #tpu.memory_space<vmem>>, vector<1x16x128xbf16>
    %136 = vector.shape_cast %135 : vector<1x16x128xbf16> to vector<16x128xbf16>
    %137 = arith.extf %136 : vector<16x128xbf16> to vector<16x128xf32>
    %138 = arith.addf %137, %133 : vector<16x128xf32>
    %c0_66 = arith.constant 0 : index
    %c0_67 = arith.constant 0 : index
    %139 = vector.load %arg8[%c0_66, %c0_67] : memref<16x32xf32, #tpu.memory_space<vmem>>, vector<16x32xf32>
    %140 = vector.extract_strided_slice %138 {offsets = [0, 0], sizes = [16, 96], strides = [1, 1]} : vector<16x128xf32> to vector<16x96xf32>
    %141 = arith.negf %140 : vector<16x96xf32>
    %142 = math.exp %141 : vector<16x96xf32>
    %cst_68 = arith.constant 1.000000e+00 : f32
    %143 = vector.broadcast %cst_68 : f32 to vector<16x96xf32>
    %144 = arith.addf %143, %142 : vector<16x96xf32>
    %145 = arith.divf %143, %144 : vector<16x96xf32>
    %146 = vector.extract_strided_slice %145 {offsets = [0, 0], sizes = [16, 32], strides = [1, 1]} : vector<16x96xf32> to vector<16x32xf32>
    %147 = vector.extract_strided_slice %145 {offsets = [0, 32], sizes = [16, 32], strides = [1, 1]} : vector<16x96xf32> to vector<16x32xf32>
    %148 = vector.extract_strided_slice %145 {offsets = [0, 64], sizes = [16, 32], strides = [1, 1]} : vector<16x96xf32> to vector<16x32xf32>
    %149 = vector.extract_strided_slice %138 {offsets = [0, 96], sizes = [16, 32], strides = [1, 1]} : vector<16x128xf32> to vector<16x32xf32>
    %150 = math.tanh %149 : vector<16x32xf32>
    %151 = arith.mulf %147, %139 : vector<16x32xf32>
    %152 = arith.mulf %146, %150 : vector<16x32xf32>
    %153 = arith.addf %151, %152 : vector<16x32xf32>
    %154 = math.tanh %153 : vector<16x32xf32>
    %155 = arith.mulf %148, %154 : vector<16x32xf32>
    %c0_69 = arith.constant 0 : index
    %c0_70 = arith.constant 0 : index
    %156 = vector.load %arg7[%c0_69, %c0_70] : memref<16x32xf32, #tpu.memory_space<vmem>>, vector<16x32xf32>
    tpu.vector_store %arg7[%c0_69, %c0_70], %155 {strides = array<i32>} : memref<16x32xf32, #tpu.memory_space<vmem>>, vector<16x32xf32>,
    %c0_71 = arith.constant 0 : index
    %c0_72 = arith.constant 0 : index
    %157 = vector.load %arg8[%c0_71, %c0_72] : memref<16x32xf32, #tpu.memory_space<vmem>>, vector<16x32xf32>
    tpu.vector_store %arg8[%c0_71, %c0_72], %153 {strides = array<i32>} : memref<16x32xf32, #tpu.memory_space<vmem>>, vector<16x32xf32>,
    %158 = arith.index_cast %c2_i32 : i32 to index
    %c0_73 = arith.constant 0 : index
    %c0_74 = arith.constant 0 : index
    %159 = vector.load %arg5[%158, %c0_73, %c0_74] : memref<8x16x32xf32, #tpu.memory_space<vmem>>, vector<1x16x32xf32>
    %160 = vector.shape_cast %159 : vector<1x16x32xf32> to vector<16x32xf32>
    %161 = vector.shape_cast %155 : vector<16x32xf32> to vector<1x16x32xf32>
    tpu.vector_store %arg5[%158, %c0_73, %c0_74], %161 {strides = array<i32>} : memref<8x16x32xf32, #tpu.memory_space<vmem>>, vector<1x16x32xf32>,
    %c7_i32_75 = arith.constant 7 : i32
    %162 = arith.subi %c7_i32_75, %c2_i32 : i32
    %c0_76 = arith.constant 0 : index
    %c0_77 = arith.constant 0 : index
    %163 = vector.load %arg9[%c0_76, %c0_77] : memref<16x32xf32, #tpu.memory_space<vmem>>, vector<16x32xf32>
    %164 = arith.truncf %163 : vector<16x32xf32> to vector<16x32xbf16>
    %cst_78 = arith.constant dense<0.000000e+00> : vector<16x128xf32>
    %165 = tpu.matmul %164, %4, %cst_78 {dimension_numbers = #tpu.dot_dimension_numbers<[1], [0], [0], [1], [0, 0, 1, 1], [], []>} : vector<16x32xbf16>, vector<32x128xbf16>, vector<16x128xf32> -> vector<16x128xf32>
    %166 = arith.index_cast %162 : i32 to index
    %c0_79 = arith.constant 0 : index
    %c0_80 = arith.constant 0 : index
    %167 = vector.load %arg2[%166, %c0_79, %c0_80] : memref<8x16x128xbf16, #tpu.memory_space<vmem>>, vector<1x16x128xbf16>
    %168 = vector.shape_cast %167 : vector<1x16x128xbf16> to vector<16x128xbf16>
    %169 = arith.extf %168 : vector<16x128xbf16> to vector<16x128xf32>
    %170 = arith.addf %169, %165 : vector<16x128xf32>
    %c0_81 = arith.constant 0 : index
    %c0_82 = arith.constant 0 : index
    %171 = vector.load %arg10[%c0_81, %c0_82] : memref<16x32xf32, #tpu.memory_space<vmem>>, vector<16x32xf32>
    %172 = vector.extract_strided_slice %170 {offsets = [0, 0], sizes = [16, 96], strides = [1, 1]} : vector<16x128xf32> to vector<16x96xf32>
    %173 = arith.negf %172 : vector<16x96xf32>
    %174 = math.exp %173 : vector<16x96xf32>
    %cst_83 = arith.constant 1.000000e+00 : f32
    %175 = vector.broadcast %cst_83 : f32 to vector<16x96xf32>
    %176 = arith.addf %175, %174 : vector<16x96xf32>
    %177 = arith.divf %175, %176 : vector<16x96xf32>
    %178 = vector.extract_strided_slice %177 {offsets = [0, 0], sizes = [16, 32], strides = [1, 1]} : vector<16x96xf32> to vector<16x32xf32>
    %179 = vector.extract_strided_slice %177 {offsets = [0, 32], sizes = [16, 32], strides = [1, 1]} : vector<16x96xf32> to vector<16x32xf32>
    %180 = vector.extract_strided_slice %177 {offsets = [0, 64], sizes = [16, 32], strides = [1, 1]} : vector<16x96xf32> to vector<16x32xf32>
    %181 = vector.extract_strided_slice %170 {offsets = [0, 96], sizes = [16, 32], strides = [1, 1]} : vector<16x128xf32> to vector<16x32xf32>
    %182 = math.tanh %181 : vector<16x32xf32>
    %183 = arith.mulf %179, %171 : vector<16x32xf32>
    %184 = arith.mulf %178, %182 : vector<16x32xf32>
    %185 = arith.addf %183, %184 : vector<16x32xf32>
    %186 = math.tanh %185 : vector<16x32xf32>
    %187 = arith.mulf %180, %186 : vector<16x32xf32>
    %c0_84 = arith.constant 0 : index
    %c0_85 = arith.constant 0 : index
    %188 = vector.load %arg9[%c0_84, %c0_85] : memref<16x32xf32, #tpu.memory_space<vmem>>, vector<16x32xf32>
    tpu.vector_store %arg9[%c0_84, %c0_85], %187 {strides = array<i32>} : memref<16x32xf32, #tpu.memory_space<vmem>>, vector<16x32xf32>,
    %c0_86 = arith.constant 0 : index
    %c0_87 = arith.constant 0 : index
    %189 = vector.load %arg10[%c0_86, %c0_87] : memref<16x32xf32, #tpu.memory_space<vmem>>, vector<16x32xf32>
    tpu.vector_store %arg10[%c0_86, %c0_87], %185 {strides = array<i32>} : memref<16x32xf32, #tpu.memory_space<vmem>>, vector<16x32xf32>,
    %190 = arith.index_cast %162 : i32 to index
    %c0_88 = arith.constant 0 : index
    %c0_89 = arith.constant 0 : index
    %191 = vector.load %arg6[%190, %c0_88, %c0_89] : memref<8x16x32xf32, #tpu.memory_space<vmem>>, vector<1x16x32xf32>
    %192 = vector.shape_cast %191 : vector<1x16x32xf32> to vector<16x32xf32>
    %193 = vector.shape_cast %187 : vector<16x32xf32> to vector<1x16x32xf32>
    tpu.vector_store %arg6[%190, %c0_88, %c0_89], %193 {strides = array<i32>} : memref<8x16x32xf32, #tpu.memory_space<vmem>>, vector<1x16x32xf32>,
    %c3_i32 = arith.constant 3 : i32
    %c0_90 = arith.constant 0 : index
    %c0_91 = arith.constant 0 : index
    %194 = vector.load %arg7[%c0_90, %c0_91] : memref<16x32xf32, #tpu.memory_space<vmem>>, vector<16x32xf32>
    %195 = arith.truncf %194 : vector<16x32xf32> to vector<16x32xbf16>
    %cst_92 = arith.constant dense<0.000000e+00> : vector<16x128xf32>
    %196 = tpu.matmul %195, %3, %cst_92 {dimension_numbers = #tpu.dot_dimension_numbers<[1], [0], [0], [1], [0, 0, 1, 1], [], []>} : vector<16x32xbf16>, vector<32x128xbf16>, vector<16x128xf32> -> vector<16x128xf32>
    %197 = arith.index_cast %c3_i32 : i32 to index
    %c0_93 = arith.constant 0 : index
    %c0_94 = arith.constant 0 : index
    %198 = vector.load %arg1[%197, %c0_93, %c0_94] : memref<8x16x128xbf16, #tpu.memory_space<vmem>>, vector<1x16x128xbf16>
    %199 = vector.shape_cast %198 : vector<1x16x128xbf16> to vector<16x128xbf16>
    %200 = arith.extf %199 : vector<16x128xbf16> to vector<16x128xf32>
    %201 = arith.addf %200, %196 : vector<16x128xf32>
    %c0_95 = arith.constant 0 : index
    %c0_96 = arith.constant 0 : index
    %202 = vector.load %arg8[%c0_95, %c0_96] : memref<16x32xf32, #tpu.memory_space<vmem>>, vector<16x32xf32>
    %203 = vector.extract_strided_slice %201 {offsets = [0, 0], sizes = [16, 96], strides = [1, 1]} : vector<16x128xf32> to vector<16x96xf32>
    %204 = arith.negf %203 : vector<16x96xf32>
    %205 = math.exp %204 : vector<16x96xf32>
    %cst_97 = arith.constant 1.000000e+00 : f32
    %206 = vector.broadcast %cst_97 : f32 to vector<16x96xf32>
    %207 = arith.addf %206, %205 : vector<16x96xf32>
    %208 = arith.divf %206, %207 : vector<16x96xf32>
    %209 = vector.extract_strided_slice %208 {offsets = [0, 0], sizes = [16, 32], strides = [1, 1]} : vector<16x96xf32> to vector<16x32xf32>
    %210 = vector.extract_strided_slice %208 {offsets = [0, 32], sizes = [16, 32], strides = [1, 1]} : vector<16x96xf32> to vector<16x32xf32>
    %211 = vector.extract_strided_slice %208 {offsets = [0, 64], sizes = [16, 32], strides = [1, 1]} : vector<16x96xf32> to vector<16x32xf32>
    %212 = vector.extract_strided_slice %201 {offsets = [0, 96], sizes = [16, 32], strides = [1, 1]} : vector<16x128xf32> to vector<16x32xf32>
    %213 = math.tanh %212 : vector<16x32xf32>
    %214 = arith.mulf %210, %202 : vector<16x32xf32>
    %215 = arith.mulf %209, %213 : vector<16x32xf32>
    %216 = arith.addf %214, %215 : vector<16x32xf32>
    %217 = math.tanh %216 : vector<16x32xf32>
    %218 = arith.mulf %211, %217 : vector<16x32xf32>
    %c0_98 = arith.constant 0 : index
    %c0_99 = arith.constant 0 : index
    %219 = vector.load %arg7[%c0_98, %c0_99] : memref<16x32xf32, #tpu.memory_space<vmem>>, vector<16x32xf32>
    tpu.vector_store %arg7[%c0_98, %c0_99], %218 {strides = array<i32>} : memref<16x32xf32, #tpu.memory_space<vmem>>, vector<16x32xf32>,
    %c0_100 = arith.constant 0 : index
    %c0_101 = arith.constant 0 : index
    %220 = vector.load %arg8[%c0_100, %c0_101] : memref<16x32xf32, #tpu.memory_space<vmem>>, vector<16x32xf32>
    tpu.vector_store %arg8[%c0_100, %c0_101], %216 {strides = array<i32>} : memref<16x32xf32, #tpu.memory_space<vmem>>, vector<16x32xf32>,
    %221 = arith.index_cast %c3_i32 : i32 to index
    %c0_102 = arith.constant 0 : index
    %c0_103 = arith.constant 0 : index
    %222 = vector.load %arg5[%221, %c0_102, %c0_103] : memref<8x16x32xf32, #tpu.memory_space<vmem>>, vector<1x16x32xf32>
    %223 = vector.shape_cast %222 : vector<1x16x32xf32> to vector<16x32xf32>
    %224 = vector.shape_cast %218 : vector<16x32xf32> to vector<1x16x32xf32>
    tpu.vector_store %arg5[%221, %c0_102, %c0_103], %224 {strides = array<i32>} : memref<8x16x32xf32, #tpu.memory_space<vmem>>, vector<1x16x32xf32>,
    %c7_i32_104 = arith.constant 7 : i32
    %225 = arith.subi %c7_i32_104, %c3_i32 : i32
    %c0_105 = arith.constant 0 : index
    %c0_106 = arith.constant 0 : index
    %226 = vector.load %arg9[%c0_105, %c0_106] : memref<16x32xf32, #tpu.memory_space<vmem>>, vector<16x32xf32>
    %227 = arith.truncf %226 : vector<16x32xf32> to vector<16x32xbf16>
    %cst_107 = arith.constant dense<0.000000e+00> : vector<16x128xf32>
    %228 = tpu.matmul %227, %4, %cst_107 {dimension_numbers = #tpu.dot_dimension_numbers<[1], [0], [0], [1], [0, 0, 1, 1], [], []>} : vector<16x32xbf16>, vector<32x128xbf16>, vector<16x128xf32> -> vector<16x128xf32>
    %229 = arith.index_cast %225 : i32 to index
    %c0_108 = arith.constant 0 : index
    %c0_109 = arith.constant 0 : index
    %230 = vector.load %arg2[%229, %c0_108, %c0_109] : memref<8x16x128xbf16, #tpu.memory_space<vmem>>, vector<1x16x128xbf16>
    %231 = vector.shape_cast %230 : vector<1x16x128xbf16> to vector<16x128xbf16>
    %232 = arith.extf %231 : vector<16x128xbf16> to vector<16x128xf32>
    %233 = arith.addf %232, %228 : vector<16x128xf32>
    %c0_110 = arith.constant 0 : index
    %c0_111 = arith.constant 0 : index
    %234 = vector.load %arg10[%c0_110, %c0_111] : memref<16x32xf32, #tpu.memory_space<vmem>>, vector<16x32xf32>
    %235 = vector.extract_strided_slice %233 {offsets = [0, 0], sizes = [16, 96], strides = [1, 1]} : vector<16x128xf32> to vector<16x96xf32>
    %236 = arith.negf %235 : vector<16x96xf32>
    %237 = math.exp %236 : vector<16x96xf32>
    %cst_112 = arith.constant 1.000000e+00 : f32
    %238 = vector.broadcast %cst_112 : f32 to vector<16x96xf32>
    %239 = arith.addf %238, %237 : vector<16x96xf32>
    %240 = arith.divf %238, %239 : vector<16x96xf32>
    %241 = vector.extract_strided_slice %240 {offsets = [0, 0], sizes = [16, 32], strides = [1, 1]} : vector<16x96xf32> to vector<16x32xf32>
    %242 = vector.extract_strided_slice %240 {offsets = [0, 32], sizes = [16, 32], strides = [1, 1]} : vector<16x96xf32> to vector<16x32xf32>
    %243 = vector.extract_strided_slice %240 {offsets = [0, 64], sizes = [16, 32], strides = [1, 1]} : vector<16x96xf32> to vector<16x32xf32>
    %244 = vector.extract_strided_slice %233 {offsets = [0, 96], sizes = [16, 32], strides = [1, 1]} : vector<16x128xf32> to vector<16x32xf32>
    %245 = math.tanh %244 : vector<16x32xf32>
    %246 = arith.mulf %242, %234 : vector<16x32xf32>
    %247 = arith.mulf %241, %245 : vector<16x32xf32>
    %248 = arith.addf %246, %247 : vector<16x32xf32>
    %249 = math.tanh %248 : vector<16x32xf32>
    %250 = arith.mulf %243, %249 : vector<16x32xf32>
    %c0_113 = arith.constant 0 : index
    %c0_114 = arith.constant 0 : index
    %251 = vector.load %arg9[%c0_113, %c0_114] : memref<16x32xf32, #tpu.memory_space<vmem>>, vector<16x32xf32>
    tpu.vector_store %arg9[%c0_113, %c0_114], %250 {strides = array<i32>} : memref<16x32xf32, #tpu.memory_space<vmem>>, vector<16x32xf32>,
    %c0_115 = arith.constant 0 : index
    %c0_116 = arith.constant 0 : index
    %252 = vector.load %arg10[%c0_115, %c0_116] : memref<16x32xf32, #tpu.memory_space<vmem>>, vector<16x32xf32>
    tpu.vector_store %arg10[%c0_115, %c0_116], %248 {strides = array<i32>} : memref<16x32xf32, #tpu.memory_space<vmem>>, vector<16x32xf32>,
    %253 = arith.index_cast %225 : i32 to index
    %c0_117 = arith.constant 0 : index
    %c0_118 = arith.constant 0 : index
    %254 = vector.load %arg6[%253, %c0_117, %c0_118] : memref<8x16x32xf32, #tpu.memory_space<vmem>>, vector<1x16x32xf32>
    %255 = vector.shape_cast %254 : vector<1x16x32xf32> to vector<16x32xf32>
    %256 = vector.shape_cast %250 : vector<16x32xf32> to vector<1x16x32xf32>
    tpu.vector_store %arg6[%253, %c0_117, %c0_118], %256 {strides = array<i32>} : memref<8x16x32xf32, #tpu.memory_space<vmem>>, vector<1x16x32xf32>,
    %c4_i32 = arith.constant 4 : i32
    %c0_119 = arith.constant 0 : index
    %c0_120 = arith.constant 0 : index
    %257 = vector.load %arg7[%c0_119, %c0_120] : memref<16x32xf32, #tpu.memory_space<vmem>>, vector<16x32xf32>
    %258 = arith.truncf %257 : vector<16x32xf32> to vector<16x32xbf16>
    %cst_121 = arith.constant dense<0.000000e+00> : vector<16x128xf32>
    %259 = tpu.matmul %258, %3, %cst_121 {dimension_numbers = #tpu.dot_dimension_numbers<[1], [0], [0], [1], [0, 0, 1, 1], [], []>} : vector<16x32xbf16>, vector<32x128xbf16>, vector<16x128xf32> -> vector<16x128xf32>
    %260 = arith.index_cast %c4_i32 : i32 to index
    %c0_122 = arith.constant 0 : index
    %c0_123 = arith.constant 0 : index
    %261 = vector.load %arg1[%260, %c0_122, %c0_123] : memref<8x16x128xbf16, #tpu.memory_space<vmem>>, vector<1x16x128xbf16>
    %262 = vector.shape_cast %261 : vector<1x16x128xbf16> to vector<16x128xbf16>
    %263 = arith.extf %262 : vector<16x128xbf16> to vector<16x128xf32>
    %264 = arith.addf %263, %259 : vector<16x128xf32>
    %c0_124 = arith.constant 0 : index
    %c0_125 = arith.constant 0 : index
    %265 = vector.load %arg8[%c0_124, %c0_125] : memref<16x32xf32, #tpu.memory_space<vmem>>, vector<16x32xf32>
    %266 = vector.extract_strided_slice %264 {offsets = [0, 0], sizes = [16, 96], strides = [1, 1]} : vector<16x128xf32> to vector<16x96xf32>
    %267 = arith.negf %266 : vector<16x96xf32>
    %268 = math.exp %267 : vector<16x96xf32>
    %cst_126 = arith.constant 1.000000e+00 : f32
    %269 = vector.broadcast %cst_126 : f32 to vector<16x96xf32>
    %270 = arith.addf %269, %268 : vector<16x96xf32>
    %271 = arith.divf %269, %270 : vector<16x96xf32>
    %272 = vector.extract_strided_slice %271 {offsets = [0, 0], sizes = [16, 32], strides = [1, 1]} : vector<16x96xf32> to vector<16x32xf32>
    %273 = vector.extract_strided_slice %271 {offsets = [0, 32], sizes = [16, 32], strides = [1, 1]} : vector<16x96xf32> to vector<16x32xf32>
    %274 = vector.extract_strided_slice %271 {offsets = [0, 64], sizes = [16, 32], strides = [1, 1]} : vector<16x96xf32> to vector<16x32xf32>
    %275 = vector.extract_strided_slice %264 {offsets = [0, 96], sizes = [16, 32], strides = [1, 1]} : vector<16x128xf32> to vector<16x32xf32>
    %276 = math.tanh %275 : vector<16x32xf32>
    %277 = arith.mulf %273, %265 : vector<16x32xf32>
    %278 = arith.mulf %272, %276 : vector<16x32xf32>
    %279 = arith.addf %277, %278 : vector<16x32xf32>
    %280 = math.tanh %279 : vector<16x32xf32>
    %281 = arith.mulf %274, %280 : vector<16x32xf32>
    %c0_127 = arith.constant 0 : index
    %c0_128 = arith.constant 0 : index
    %282 = vector.load %arg7[%c0_127, %c0_128] : memref<16x32xf32, #tpu.memory_space<vmem>>, vector<16x32xf32>
    tpu.vector_store %arg7[%c0_127, %c0_128], %281 {strides = array<i32>} : memref<16x32xf32, #tpu.memory_space<vmem>>, vector<16x32xf32>,
    %c0_129 = arith.constant 0 : index
    %c0_130 = arith.constant 0 : index
    %283 = vector.load %arg8[%c0_129, %c0_130] : memref<16x32xf32, #tpu.memory_space<vmem>>, vector<16x32xf32>
    tpu.vector_store %arg8[%c0_129, %c0_130], %279 {strides = array<i32>} : memref<16x32xf32, #tpu.memory_space<vmem>>, vector<16x32xf32>,
    %284 = arith.index_cast %c4_i32 : i32 to index
    %c0_131 = arith.constant 0 : index
    %c0_132 = arith.constant 0 : index
    %285 = vector.load %arg5[%284, %c0_131, %c0_132] : memref<8x16x32xf32, #tpu.memory_space<vmem>>, vector<1x16x32xf32>
    %286 = vector.shape_cast %285 : vector<1x16x32xf32> to vector<16x32xf32>
    %287 = vector.shape_cast %281 : vector<16x32xf32> to vector<1x16x32xf32>
    tpu.vector_store %arg5[%284, %c0_131, %c0_132], %287 {strides = array<i32>} : memref<8x16x32xf32, #tpu.memory_space<vmem>>, vector<1x16x32xf32>,
    %c7_i32_133 = arith.constant 7 : i32
    %288 = arith.subi %c7_i32_133, %c4_i32 : i32
    %c0_134 = arith.constant 0 : index
    %c0_135 = arith.constant 0 : index
    %289 = vector.load %arg9[%c0_134, %c0_135] : memref<16x32xf32, #tpu.memory_space<vmem>>, vector<16x32xf32>
    %290 = arith.truncf %289 : vector<16x32xf32> to vector<16x32xbf16>
    %cst_136 = arith.constant dense<0.000000e+00> : vector<16x128xf32>
    %291 = tpu.matmul %290, %4, %cst_136 {dimension_numbers = #tpu.dot_dimension_numbers<[1], [0], [0], [1], [0, 0, 1, 1], [], []>} : vector<16x32xbf16>, vector<32x128xbf16>, vector<16x128xf32> -> vector<16x128xf32>
    %292 = arith.index_cast %288 : i32 to index
    %c0_137 = arith.constant 0 : index
    %c0_138 = arith.constant 0 : index
    %293 = vector.load %arg2[%292, %c0_137, %c0_138] : memref<8x16x128xbf16, #tpu.memory_space<vmem>>, vector<1x16x128xbf16>
    %294 = vector.shape_cast %293 : vector<1x16x128xbf16> to vector<16x128xbf16>
    %295 = arith.extf %294 : vector<16x128xbf16> to vector<16x128xf32>
    %296 = arith.addf %295, %291 : vector<16x128xf32>
    %c0_139 = arith.constant 0 : index
    %c0_140 = arith.constant 0 : index
    %297 = vector.load %arg10[%c0_139, %c0_140] : memref<16x32xf32, #tpu.memory_space<vmem>>, vector<16x32xf32>
    %298 = vector.extract_strided_slice %296 {offsets = [0, 0], sizes = [16, 96], strides = [1, 1]} : vector<16x128xf32> to vector<16x96xf32>
    %299 = arith.negf %298 : vector<16x96xf32>
    %300 = math.exp %299 : vector<16x96xf32>
    %cst_141 = arith.constant 1.000000e+00 : f32
    %301 = vector.broadcast %cst_141 : f32 to vector<16x96xf32>
    %302 = arith.addf %301, %300 : vector<16x96xf32>
    %303 = arith.divf %301, %302 : vector<16x96xf32>
    %304 = vector.extract_strided_slice %303 {offsets = [0, 0], sizes = [16, 32], strides = [1, 1]} : vector<16x96xf32> to vector<16x32xf32>
    %305 = vector.extract_strided_slice %303 {offsets = [0, 32], sizes = [16, 32], strides = [1, 1]} : vector<16x96xf32> to vector<16x32xf32>
    %306 = vector.extract_strided_slice %303 {offsets = [0, 64], sizes = [16, 32], strides = [1, 1]} : vector<16x96xf32> to vector<16x32xf32>
    %307 = vector.extract_strided_slice %296 {offsets = [0, 96], sizes = [16, 32], strides = [1, 1]} : vector<16x128xf32> to vector<16x32xf32>
    %308 = math.tanh %307 : vector<16x32xf32>
    %309 = arith.mulf %305, %297 : vector<16x32xf32>
    %310 = arith.mulf %304, %308 : vector<16x32xf32>
    %311 = arith.addf %309, %310 : vector<16x32xf32>
    %312 = math.tanh %311 : vector<16x32xf32>
    %313 = arith.mulf %306, %312 : vector<16x32xf32>
    %c0_142 = arith.constant 0 : index
    %c0_143 = arith.constant 0 : index
    %314 = vector.load %arg9[%c0_142, %c0_143] : memref<16x32xf32, #tpu.memory_space<vmem>>, vector<16x32xf32>
    tpu.vector_store %arg9[%c0_142, %c0_143], %313 {strides = array<i32>} : memref<16x32xf32, #tpu.memory_space<vmem>>, vector<16x32xf32>,
    %c0_144 = arith.constant 0 : index
    %c0_145 = arith.constant 0 : index
    %315 = vector.load %arg10[%c0_144, %c0_145] : memref<16x32xf32, #tpu.memory_space<vmem>>, vector<16x32xf32>
    tpu.vector_store %arg10[%c0_144, %c0_145], %311 {strides = array<i32>} : memref<16x32xf32, #tpu.memory_space<vmem>>, vector<16x32xf32>,
    %316 = arith.index_cast %288 : i32 to index
    %c0_146 = arith.constant 0 : index
    %c0_147 = arith.constant 0 : index
    %317 = vector.load %arg6[%316, %c0_146, %c0_147] : memref<8x16x32xf32, #tpu.memory_space<vmem>>, vector<1x16x32xf32>
    %318 = vector.shape_cast %317 : vector<1x16x32xf32> to vector<16x32xf32>
    %319 = vector.shape_cast %313 : vector<16x32xf32> to vector<1x16x32xf32>
    tpu.vector_store %arg6[%316, %c0_146, %c0_147], %319 {strides = array<i32>} : memref<8x16x32xf32, #tpu.memory_space<vmem>>, vector<1x16x32xf32>,
    %c5_i32 = arith.constant 5 : i32
    %c0_148 = arith.constant 0 : index
    %c0_149 = arith.constant 0 : index
    %320 = vector.load %arg7[%c0_148, %c0_149] : memref<16x32xf32, #tpu.memory_space<vmem>>, vector<16x32xf32>
    %321 = arith.truncf %320 : vector<16x32xf32> to vector<16x32xbf16>
    %cst_150 = arith.constant dense<0.000000e+00> : vector<16x128xf32>
    %322 = tpu.matmul %321, %3, %cst_150 {dimension_numbers = #tpu.dot_dimension_numbers<[1], [0], [0], [1], [0, 0, 1, 1], [], []>} : vector<16x32xbf16>, vector<32x128xbf16>, vector<16x128xf32> -> vector<16x128xf32>
    %323 = arith.index_cast %c5_i32 : i32 to index
    %c0_151 = arith.constant 0 : index
    %c0_152 = arith.constant 0 : index
    %324 = vector.load %arg1[%323, %c0_151, %c0_152] : memref<8x16x128xbf16, #tpu.memory_space<vmem>>, vector<1x16x128xbf16>
    %325 = vector.shape_cast %324 : vector<1x16x128xbf16> to vector<16x128xbf16>
    %326 = arith.extf %325 : vector<16x128xbf16> to vector<16x128xf32>
    %327 = arith.addf %326, %322 : vector<16x128xf32>
    %c0_153 = arith.constant 0 : index
    %c0_154 = arith.constant 0 : index
    %328 = vector.load %arg8[%c0_153, %c0_154] : memref<16x32xf32, #tpu.memory_space<vmem>>, vector<16x32xf32>
    %329 = vector.extract_strided_slice %327 {offsets = [0, 0], sizes = [16, 96], strides = [1, 1]} : vector<16x128xf32> to vector<16x96xf32>
    %330 = arith.negf %329 : vector<16x96xf32>
    %331 = math.exp %330 : vector<16x96xf32>
    %cst_155 = arith.constant 1.000000e+00 : f32
    %332 = vector.broadcast %cst_155 : f32 to vector<16x96xf32>
    %333 = arith.addf %332, %331 : vector<16x96xf32>
    %334 = arith.divf %332, %333 : vector<16x96xf32>
    %335 = vector.extract_strided_slice %334 {offsets = [0, 0], sizes = [16, 32], strides = [1, 1]} : vector<16x96xf32> to vector<16x32xf32>
    %336 = vector.extract_strided_slice %334 {offsets = [0, 32], sizes = [16, 32], strides = [1, 1]} : vector<16x96xf32> to vector<16x32xf32>
    %337 = vector.extract_strided_slice %334 {offsets = [0, 64], sizes = [16, 32], strides = [1, 1]} : vector<16x96xf32> to vector<16x32xf32>
    %338 = vector.extract_strided_slice %327 {offsets = [0, 96], sizes = [16, 32], strides = [1, 1]} : vector<16x128xf32> to vector<16x32xf32>
    %339 = math.tanh %338 : vector<16x32xf32>
    %340 = arith.mulf %336, %328 : vector<16x32xf32>
    %341 = arith.mulf %335, %339 : vector<16x32xf32>
    %342 = arith.addf %340, %341 : vector<16x32xf32>
    %343 = math.tanh %342 : vector<16x32xf32>
    %344 = arith.mulf %337, %343 : vector<16x32xf32>
    %c0_156 = arith.constant 0 : index
    %c0_157 = arith.constant 0 : index
    %345 = vector.load %arg7[%c0_156, %c0_157] : memref<16x32xf32, #tpu.memory_space<vmem>>, vector<16x32xf32>
    tpu.vector_store %arg7[%c0_156, %c0_157], %344 {strides = array<i32>} : memref<16x32xf32, #tpu.memory_space<vmem>>, vector<16x32xf32>,
    %c0_158 = arith.constant 0 : index
    %c0_159 = arith.constant 0 : index
    %346 = vector.load %arg8[%c0_158, %c0_159] : memref<16x32xf32, #tpu.memory_space<vmem>>, vector<16x32xf32>
    tpu.vector_store %arg8[%c0_158, %c0_159], %342 {strides = array<i32>} : memref<16x32xf32, #tpu.memory_space<vmem>>, vector<16x32xf32>,
    %347 = arith.index_cast %c5_i32 : i32 to index
    %c0_160 = arith.constant 0 : index
    %c0_161 = arith.constant 0 : index
    %348 = vector.load %arg5[%347, %c0_160, %c0_161] : memref<8x16x32xf32, #tpu.memory_space<vmem>>, vector<1x16x32xf32>
    %349 = vector.shape_cast %348 : vector<1x16x32xf32> to vector<16x32xf32>
    %350 = vector.shape_cast %344 : vector<16x32xf32> to vector<1x16x32xf32>
    tpu.vector_store %arg5[%347, %c0_160, %c0_161], %350 {strides = array<i32>} : memref<8x16x32xf32, #tpu.memory_space<vmem>>, vector<1x16x32xf32>,
    %c7_i32_162 = arith.constant 7 : i32
    %351 = arith.subi %c7_i32_162, %c5_i32 : i32
    %c0_163 = arith.constant 0 : index
    %c0_164 = arith.constant 0 : index
    %352 = vector.load %arg9[%c0_163, %c0_164] : memref<16x32xf32, #tpu.memory_space<vmem>>, vector<16x32xf32>
    %353 = arith.truncf %352 : vector<16x32xf32> to vector<16x32xbf16>
    %cst_165 = arith.constant dense<0.000000e+00> : vector<16x128xf32>
    %354 = tpu.matmul %353, %4, %cst_165 {dimension_numbers = #tpu.dot_dimension_numbers<[1], [0], [0], [1], [0, 0, 1, 1], [], []>} : vector<16x32xbf16>, vector<32x128xbf16>, vector<16x128xf32> -> vector<16x128xf32>
    %355 = arith.index_cast %351 : i32 to index
    %c0_166 = arith.constant 0 : index
    %c0_167 = arith.constant 0 : index
    %356 = vector.load %arg2[%355, %c0_166, %c0_167] : memref<8x16x128xbf16, #tpu.memory_space<vmem>>, vector<1x16x128xbf16>
    %357 = vector.shape_cast %356 : vector<1x16x128xbf16> to vector<16x128xbf16>
    %358 = arith.extf %357 : vector<16x128xbf16> to vector<16x128xf32>
    %359 = arith.addf %358, %354 : vector<16x128xf32>
    %c0_168 = arith.constant 0 : index
    %c0_169 = arith.constant 0 : index
    %360 = vector.load %arg10[%c0_168, %c0_169] : memref<16x32xf32, #tpu.memory_space<vmem>>, vector<16x32xf32>
    %361 = vector.extract_strided_slice %359 {offsets = [0, 0], sizes = [16, 96], strides = [1, 1]} : vector<16x128xf32> to vector<16x96xf32>
    %362 = arith.negf %361 : vector<16x96xf32>
    %363 = math.exp %362 : vector<16x96xf32>
    %cst_170 = arith.constant 1.000000e+00 : f32
    %364 = vector.broadcast %cst_170 : f32 to vector<16x96xf32>
    %365 = arith.addf %364, %363 : vector<16x96xf32>
    %366 = arith.divf %364, %365 : vector<16x96xf32>
    %367 = vector.extract_strided_slice %366 {offsets = [0, 0], sizes = [16, 32], strides = [1, 1]} : vector<16x96xf32> to vector<16x32xf32>
    %368 = vector.extract_strided_slice %366 {offsets = [0, 32], sizes = [16, 32], strides = [1, 1]} : vector<16x96xf32> to vector<16x32xf32>
    %369 = vector.extract_strided_slice %366 {offsets = [0, 64], sizes = [16, 32], strides = [1, 1]} : vector<16x96xf32> to vector<16x32xf32>
    %370 = vector.extract_strided_slice %359 {offsets = [0, 96], sizes = [16, 32], strides = [1, 1]} : vector<16x128xf32> to vector<16x32xf32>
    %371 = math.tanh %370 : vector<16x32xf32>
    %372 = arith.mulf %368, %360 : vector<16x32xf32>
    %373 = arith.mulf %367, %371 : vector<16x32xf32>
    %374 = arith.addf %372, %373 : vector<16x32xf32>
    %375 = math.tanh %374 : vector<16x32xf32>
    %376 = arith.mulf %369, %375 : vector<16x32xf32>
    %c0_171 = arith.constant 0 : index
    %c0_172 = arith.constant 0 : index
    %377 = vector.load %arg9[%c0_171, %c0_172] : memref<16x32xf32, #tpu.memory_space<vmem>>, vector<16x32xf32>
    tpu.vector_store %arg9[%c0_171, %c0_172], %376 {strides = array<i32>} : memref<16x32xf32, #tpu.memory_space<vmem>>, vector<16x32xf32>,
    %c0_173 = arith.constant 0 : index
    %c0_174 = arith.constant 0 : index
    %378 = vector.load %arg10[%c0_173, %c0_174] : memref<16x32xf32, #tpu.memory_space<vmem>>, vector<16x32xf32>
    tpu.vector_store %arg10[%c0_173, %c0_174], %374 {strides = array<i32>} : memref<16x32xf32, #tpu.memory_space<vmem>>, vector<16x32xf32>,
    %379 = arith.index_cast %351 : i32 to index
    %c0_175 = arith.constant 0 : index
    %c0_176 = arith.constant 0 : index
    %380 = vector.load %arg6[%379, %c0_175, %c0_176] : memref<8x16x32xf32, #tpu.memory_space<vmem>>, vector<1x16x32xf32>
    %381 = vector.shape_cast %380 : vector<1x16x32xf32> to vector<16x32xf32>
    %382 = vector.shape_cast %376 : vector<16x32xf32> to vector<1x16x32xf32>
    tpu.vector_store %arg6[%379, %c0_175, %c0_176], %382 {strides = array<i32>} : memref<8x16x32xf32, #tpu.memory_space<vmem>>, vector<1x16x32xf32>,
    %c6_i32 = arith.constant 6 : i32
    %c0_177 = arith.constant 0 : index
    %c0_178 = arith.constant 0 : index
    %383 = vector.load %arg7[%c0_177, %c0_178] : memref<16x32xf32, #tpu.memory_space<vmem>>, vector<16x32xf32>
    %384 = arith.truncf %383 : vector<16x32xf32> to vector<16x32xbf16>
    %cst_179 = arith.constant dense<0.000000e+00> : vector<16x128xf32>
    %385 = tpu.matmul %384, %3, %cst_179 {dimension_numbers = #tpu.dot_dimension_numbers<[1], [0], [0], [1], [0, 0, 1, 1], [], []>} : vector<16x32xbf16>, vector<32x128xbf16>, vector<16x128xf32> -> vector<16x128xf32>
    %386 = arith.index_cast %c6_i32 : i32 to index
    %c0_180 = arith.constant 0 : index
    %c0_181 = arith.constant 0 : index
    %387 = vector.load %arg1[%386, %c0_180, %c0_181] : memref<8x16x128xbf16, #tpu.memory_space<vmem>>, vector<1x16x128xbf16>
    %388 = vector.shape_cast %387 : vector<1x16x128xbf16> to vector<16x128xbf16>
    %389 = arith.extf %388 : vector<16x128xbf16> to vector<16x128xf32>
    %390 = arith.addf %389, %385 : vector<16x128xf32>
    %c0_182 = arith.constant 0 : index
    %c0_183 = arith.constant 0 : index
    %391 = vector.load %arg8[%c0_182, %c0_183] : memref<16x32xf32, #tpu.memory_space<vmem>>, vector<16x32xf32>
    %392 = vector.extract_strided_slice %390 {offsets = [0, 0], sizes = [16, 96], strides = [1, 1]} : vector<16x128xf32> to vector<16x96xf32>
    %393 = arith.negf %392 : vector<16x96xf32>
    %394 = math.exp %393 : vector<16x96xf32>
    %cst_184 = arith.constant 1.000000e+00 : f32
    %395 = vector.broadcast %cst_184 : f32 to vector<16x96xf32>
    %396 = arith.addf %395, %394 : vector<16x96xf32>
    %397 = arith.divf %395, %396 : vector<16x96xf32>
    %398 = vector.extract_strided_slice %397 {offsets = [0, 0], sizes = [16, 32], strides = [1, 1]} : vector<16x96xf32> to vector<16x32xf32>
    %399 = vector.extract_strided_slice %397 {offsets = [0, 32], sizes = [16, 32], strides = [1, 1]} : vector<16x96xf32> to vector<16x32xf32>
    %400 = vector.extract_strided_slice %397 {offsets = [0, 64], sizes = [16, 32], strides = [1, 1]} : vector<16x96xf32> to vector<16x32xf32>
    %401 = vector.extract_strided_slice %390 {offsets = [0, 96], sizes = [16, 32], strides = [1, 1]} : vector<16x128xf32> to vector<16x32xf32>
    %402 = math.tanh %401 : vector<16x32xf32>
    %403 = arith.mulf %399, %391 : vector<16x32xf32>
    %404 = arith.mulf %398, %402 : vector<16x32xf32>
    %405 = arith.addf %403, %404 : vector<16x32xf32>
    %406 = math.tanh %405 : vector<16x32xf32>
    %407 = arith.mulf %400, %406 : vector<16x32xf32>
    %c0_185 = arith.constant 0 : index
    %c0_186 = arith.constant 0 : index
    %408 = vector.load %arg7[%c0_185, %c0_186] : memref<16x32xf32, #tpu.memory_space<vmem>>, vector<16x32xf32>
    tpu.vector_store %arg7[%c0_185, %c0_186], %407 {strides = array<i32>} : memref<16x32xf32, #tpu.memory_space<vmem>>, vector<16x32xf32>,
    %c0_187 = arith.constant 0 : index
    %c0_188 = arith.constant 0 : index
    %409 = vector.load %arg8[%c0_187, %c0_188] : memref<16x32xf32, #tpu.memory_space<vmem>>, vector<16x32xf32>
    tpu.vector_store %arg8[%c0_187, %c0_188], %405 {strides = array<i32>} : memref<16x32xf32, #tpu.memory_space<vmem>>, vector<16x32xf32>,
    %410 = arith.index_cast %c6_i32 : i32 to index
    %c0_189 = arith.constant 0 : index
    %c0_190 = arith.constant 0 : index
    %411 = vector.load %arg5[%410, %c0_189, %c0_190] : memref<8x16x32xf32, #tpu.memory_space<vmem>>, vector<1x16x32xf32>
    %412 = vector.shape_cast %411 : vector<1x16x32xf32> to vector<16x32xf32>
    %413 = vector.shape_cast %407 : vector<16x32xf32> to vector<1x16x32xf32>
    tpu.vector_store %arg5[%410, %c0_189, %c0_190], %413 {strides = array<i32>} : memref<8x16x32xf32, #tpu.memory_space<vmem>>, vector<1x16x32xf32>,
    %c7_i32_191 = arith.constant 7 : i32
    %414 = arith.subi %c7_i32_191, %c6_i32 : i32
    %c0_192 = arith.constant 0 : index
    %c0_193 = arith.constant 0 : index
    %415 = vector.load %arg9[%c0_192, %c0_193] : memref<16x32xf32, #tpu.memory_space<vmem>>, vector<16x32xf32>
    %416 = arith.truncf %415 : vector<16x32xf32> to vector<16x32xbf16>
    %cst_194 = arith.constant dense<0.000000e+00> : vector<16x128xf32>
    %417 = tpu.matmul %416, %4, %cst_194 {dimension_numbers = #tpu.dot_dimension_numbers<[1], [0], [0], [1], [0, 0, 1, 1], [], []>} : vector<16x32xbf16>, vector<32x128xbf16>, vector<16x128xf32> -> vector<16x128xf32>
    %418 = arith.index_cast %414 : i32 to index
    %c0_195 = arith.constant 0 : index
    %c0_196 = arith.constant 0 : index
    %419 = vector.load %arg2[%418, %c0_195, %c0_196] : memref<8x16x128xbf16, #tpu.memory_space<vmem>>, vector<1x16x128xbf16>
    %420 = vector.shape_cast %419 : vector<1x16x128xbf16> to vector<16x128xbf16>
    %421 = arith.extf %420 : vector<16x128xbf16> to vector<16x128xf32>
    %422 = arith.addf %421, %417 : vector<16x128xf32>
    %c0_197 = arith.constant 0 : index
    %c0_198 = arith.constant 0 : index
    %423 = vector.load %arg10[%c0_197, %c0_198] : memref<16x32xf32, #tpu.memory_space<vmem>>, vector<16x32xf32>
    %424 = vector.extract_strided_slice %422 {offsets = [0, 0], sizes = [16, 96], strides = [1, 1]} : vector<16x128xf32> to vector<16x96xf32>
    %425 = arith.negf %424 : vector<16x96xf32>
    %426 = math.exp %425 : vector<16x96xf32>
    %cst_199 = arith.constant 1.000000e+00 : f32
    %427 = vector.broadcast %cst_199 : f32 to vector<16x96xf32>
    %428 = arith.addf %427, %426 : vector<16x96xf32>
    %429 = arith.divf %427, %428 : vector<16x96xf32>
    %430 = vector.extract_strided_slice %429 {offsets = [0, 0], sizes = [16, 32], strides = [1, 1]} : vector<16x96xf32> to vector<16x32xf32>
    %431 = vector.extract_strided_slice %429 {offsets = [0, 32], sizes = [16, 32], strides = [1, 1]} : vector<16x96xf32> to vector<16x32xf32>
    %432 = vector.extract_strided_slice %429 {offsets = [0, 64], sizes = [16, 32], strides = [1, 1]} : vector<16x96xf32> to vector<16x32xf32>
    %433 = vector.extract_strided_slice %422 {offsets = [0, 96], sizes = [16, 32], strides = [1, 1]} : vector<16x128xf32> to vector<16x32xf32>
    %434 = math.tanh %433 : vector<16x32xf32>
    %435 = arith.mulf %431, %423 : vector<16x32xf32>
    %436 = arith.mulf %430, %434 : vector<16x32xf32>
    %437 = arith.addf %435, %436 : vector<16x32xf32>
    %438 = math.tanh %437 : vector<16x32xf32>
    %439 = arith.mulf %432, %438 : vector<16x32xf32>
    %c0_200 = arith.constant 0 : index
    %c0_201 = arith.constant 0 : index
    %440 = vector.load %arg9[%c0_200, %c0_201] : memref<16x32xf32, #tpu.memory_space<vmem>>, vector<16x32xf32>
    tpu.vector_store %arg9[%c0_200, %c0_201], %439 {strides = array<i32>} : memref<16x32xf32, #tpu.memory_space<vmem>>, vector<16x32xf32>,
    %c0_202 = arith.constant 0 : index
    %c0_203 = arith.constant 0 : index
    %441 = vector.load %arg10[%c0_202, %c0_203] : memref<16x32xf32, #tpu.memory_space<vmem>>, vector<16x32xf32>
    tpu.vector_store %arg10[%c0_202, %c0_203], %437 {strides = array<i32>} : memref<16x32xf32, #tpu.memory_space<vmem>>, vector<16x32xf32>,
    %442 = arith.index_cast %414 : i32 to index
    %c0_204 = arith.constant 0 : index
    %c0_205 = arith.constant 0 : index
    %443 = vector.load %arg6[%442, %c0_204, %c0_205] : memref<8x16x32xf32, #tpu.memory_space<vmem>>, vector<1x16x32xf32>
    %444 = vector.shape_cast %443 : vector<1x16x32xf32> to vector<16x32xf32>
    %445 = vector.shape_cast %439 : vector<16x32xf32> to vector<1x16x32xf32>
    tpu.vector_store %arg6[%442, %c0_204, %c0_205], %445 {strides = array<i32>} : memref<8x16x32xf32, #tpu.memory_space<vmem>>, vector<1x16x32xf32>,
    %c7_i32_206 = arith.constant 7 : i32
    %c0_207 = arith.constant 0 : index
    %c0_208 = arith.constant 0 : index
    %446 = vector.load %arg7[%c0_207, %c0_208] : memref<16x32xf32, #tpu.memory_space<vmem>>, vector<16x32xf32>
    %447 = arith.truncf %446 : vector<16x32xf32> to vector<16x32xbf16>
    %cst_209 = arith.constant dense<0.000000e+00> : vector<16x128xf32>
    %448 = tpu.matmul %447, %3, %cst_209 {dimension_numbers = #tpu.dot_dimension_numbers<[1], [0], [0], [1], [0, 0, 1, 1], [], []>} : vector<16x32xbf16>, vector<32x128xbf16>, vector<16x128xf32> -> vector<16x128xf32>
    %449 = arith.index_cast %c7_i32_206 : i32 to index
    %c0_210 = arith.constant 0 : index
    %c0_211 = arith.constant 0 : index
    %450 = vector.load %arg1[%449, %c0_210, %c0_211] : memref<8x16x128xbf16, #tpu.memory_space<vmem>>, vector<1x16x128xbf16>
    %451 = vector.shape_cast %450 : vector<1x16x128xbf16> to vector<16x128xbf16>
    %452 = arith.extf %451 : vector<16x128xbf16> to vector<16x128xf32>
    %453 = arith.addf %452, %448 : vector<16x128xf32>
    %c0_212 = arith.constant 0 : index
    %c0_213 = arith.constant 0 : index
    %454 = vector.load %arg8[%c0_212, %c0_213] : memref<16x32xf32, #tpu.memory_space<vmem>>, vector<16x32xf32>
    %455 = vector.extract_strided_slice %453 {offsets = [0, 0], sizes = [16, 96], strides = [1, 1]} : vector<16x128xf32> to vector<16x96xf32>
    %456 = arith.negf %455 : vector<16x96xf32>
    %457 = math.exp %456 : vector<16x96xf32>
    %cst_214 = arith.constant 1.000000e+00 : f32
    %458 = vector.broadcast %cst_214 : f32 to vector<16x96xf32>
    %459 = arith.addf %458, %457 : vector<16x96xf32>
    %460 = arith.divf %458, %459 : vector<16x96xf32>
    %461 = vector.extract_strided_slice %460 {offsets = [0, 0], sizes = [16, 32], strides = [1, 1]} : vector<16x96xf32> to vector<16x32xf32>
    %462 = vector.extract_strided_slice %460 {offsets = [0, 32], sizes = [16, 32], strides = [1, 1]} : vector<16x96xf32> to vector<16x32xf32>
    %463 = vector.extract_strided_slice %460 {offsets = [0, 64], sizes = [16, 32], strides = [1, 1]} : vector<16x96xf32> to vector<16x32xf32>
    %464 = vector.extract_strided_slice %453 {offsets = [0, 96], sizes = [16, 32], strides = [1, 1]} : vector<16x128xf32> to vector<16x32xf32>
    %465 = math.tanh %464 : vector<16x32xf32>
    %466 = arith.mulf %462, %454 : vector<16x32xf32>
    %467 = arith.mulf %461, %465 : vector<16x32xf32>
    %468 = arith.addf %466, %467 : vector<16x32xf32>
    %469 = math.tanh %468 : vector<16x32xf32>
    %470 = arith.mulf %463, %469 : vector<16x32xf32>
    %c0_215 = arith.constant 0 : index
    %c0_216 = arith.constant 0 : index
    %471 = vector.load %arg7[%c0_215, %c0_216] : memref<16x32xf32, #tpu.memory_space<vmem>>, vector<16x32xf32>
    tpu.vector_store %arg7[%c0_215, %c0_216], %470 {strides = array<i32>} : memref<16x32xf32, #tpu.memory_space<vmem>>, vector<16x32xf32>,
    %c0_217 = arith.constant 0 : index
    %c0_218 = arith.constant 0 : index
    %472 = vector.load %arg8[%c0_217, %c0_218] : memref<16x32xf32, #tpu.memory_space<vmem>>, vector<16x32xf32>
    tpu.vector_store %arg8[%c0_217, %c0_218], %468 {strides = array<i32>} : memref<16x32xf32, #tpu.memory_space<vmem>>, vector<16x32xf32>,
    %473 = arith.index_cast %c7_i32_206 : i32 to index
    %c0_219 = arith.constant 0 : index
    %c0_220 = arith.constant 0 : index
    %474 = vector.load %arg5[%473, %c0_219, %c0_220] : memref<8x16x32xf32, #tpu.memory_space<vmem>>, vector<1x16x32xf32>
    %475 = vector.shape_cast %474 : vector<1x16x32xf32> to vector<16x32xf32>
    %476 = vector.shape_cast %470 : vector<16x32xf32> to vector<1x16x32xf32>
    tpu.vector_store %arg5[%473, %c0_219, %c0_220], %476 {strides = array<i32>} : memref<8x16x32xf32, #tpu.memory_space<vmem>>, vector<1x16x32xf32>,
    %c7_i32_221 = arith.constant 7 : i32
    %477 = arith.subi %c7_i32_221, %c7_i32_206 : i32
    %c0_222 = arith.constant 0 : index
    %c0_223 = arith.constant 0 : index
    %478 = vector.load %arg9[%c0_222, %c0_223] : memref<16x32xf32, #tpu.memory_space<vmem>>, vector<16x32xf32>
    %479 = arith.truncf %478 : vector<16x32xf32> to vector<16x32xbf16>
    %cst_224 = arith.constant dense<0.000000e+00> : vector<16x128xf32>
    %480 = tpu.matmul %479, %4, %cst_224 {dimension_numbers = #tpu.dot_dimension_numbers<[1], [0], [0], [1], [0, 0, 1, 1], [], []>} : vector<16x32xbf16>, vector<32x128xbf16>, vector<16x128xf32> -> vector<16x128xf32>
    %481 = arith.index_cast %477 : i32 to index
    %c0_225 = arith.constant 0 : index
    %c0_226 = arith.constant 0 : index
    %482 = vector.load %arg2[%481, %c0_225, %c0_226] : memref<8x16x128xbf16, #tpu.memory_space<vmem>>, vector<1x16x128xbf16>
    %483 = vector.shape_cast %482 : vector<1x16x128xbf16> to vector<16x128xbf16>
    %484 = arith.extf %483 : vector<16x128xbf16> to vector<16x128xf32>
    %485 = arith.addf %484, %480 : vector<16x128xf32>
    %c0_227 = arith.constant 0 : index
    %c0_228 = arith.constant 0 : index
    %486 = vector.load %arg10[%c0_227, %c0_228] : memref<16x32xf32, #tpu.memory_space<vmem>>, vector<16x32xf32>
    %487 = vector.extract_strided_slice %485 {offsets = [0, 0], sizes = [16, 96], strides = [1, 1]} : vector<16x128xf32> to vector<16x96xf32>
    %488 = arith.negf %487 : vector<16x96xf32>
    %489 = math.exp %488 : vector<16x96xf32>
    %cst_229 = arith.constant 1.000000e+00 : f32
    %490 = vector.broadcast %cst_229 : f32 to vector<16x96xf32>
    %491 = arith.addf %490, %489 : vector<16x96xf32>
    %492 = arith.divf %490, %491 : vector<16x96xf32>
    %493 = vector.extract_strided_slice %492 {offsets = [0, 0], sizes = [16, 32], strides = [1, 1]} : vector<16x96xf32> to vector<16x32xf32>
    %494 = vector.extract_strided_slice %492 {offsets = [0, 32], sizes = [16, 32], strides = [1, 1]} : vector<16x96xf32> to vector<16x32xf32>
    %495 = vector.extract_strided_slice %492 {offsets = [0, 64], sizes = [16, 32], strides = [1, 1]} : vector<16x96xf32> to vector<16x32xf32>
    %496 = vector.extract_strided_slice %485 {offsets = [0, 96], sizes = [16, 32], strides = [1, 1]} : vector<16x128xf32> to vector<16x32xf32>
    %497 = math.tanh %496 : vector<16x32xf32>
    %498 = arith.mulf %494, %486 : vector<16x32xf32>
    %499 = arith.mulf %493, %497 : vector<16x32xf32>
    %500 = arith.addf %498, %499 : vector<16x32xf32>
    %501 = math.tanh %500 : vector<16x32xf32>
    %502 = arith.mulf %495, %501 : vector<16x32xf32>
    %c0_230 = arith.constant 0 : index
    %c0_231 = arith.constant 0 : index
    %503 = vector.load %arg9[%c0_230, %c0_231] : memref<16x32xf32, #tpu.memory_space<vmem>>, vector<16x32xf32>
    tpu.vector_store %arg9[%c0_230, %c0_231], %502 {strides = array<i32>} : memref<16x32xf32, #tpu.memory_space<vmem>>, vector<16x32xf32>,
    %c0_232 = arith.constant 0 : index
    %c0_233 = arith.constant 0 : index
    %504 = vector.load %arg10[%c0_232, %c0_233] : memref<16x32xf32, #tpu.memory_space<vmem>>, vector<16x32xf32>
    tpu.vector_store %arg10[%c0_232, %c0_233], %500 {strides = array<i32>} : memref<16x32xf32, #tpu.memory_space<vmem>>, vector<16x32xf32>,
    %505 = arith.index_cast %477 : i32 to index
    %c0_234 = arith.constant 0 : index
    %c0_235 = arith.constant 0 : index
    %506 = vector.load %arg6[%505, %c0_234, %c0_235] : memref<8x16x32xf32, #tpu.memory_space<vmem>>, vector<1x16x32xf32>
    %507 = vector.shape_cast %506 : vector<1x16x32xf32> to vector<16x32xf32>
    %508 = vector.shape_cast %502 : vector<16x32xf32> to vector<1x16x32xf32>
    tpu.vector_store %arg6[%505, %c0_234, %c0_235], %508 {strides = array<i32>} : memref<8x16x32xf32, #tpu.memory_space<vmem>>, vector<1x16x32xf32>,
    %c8_i32 = arith.constant 8 : i32
    return
  }
  func.func @transform_0(%arg0: i32) -> (i32, i32, i32) {
    %c0_i32 = arith.constant 0 : i32
    %c0_i32_0 = arith.constant 0 : i32
    %c0_i32_1 = arith.constant 0 : i32
    return %arg0, %c0_i32, %c0_i32_0 : i32, i32, i32
  }
  func.func @transform_1(%arg0: i32) -> (i32, i32, i32) {
    %c0_i32 = arith.constant 0 : i32
    %0 = arith.subi %c0_i32, %arg0 : i32
    %c0_i32_0 = arith.constant 0 : i32
    %c0_i32_1 = arith.constant 0 : i32
    %c0_i32_2 = arith.constant 0 : i32
    return %0, %c0_i32_0, %c0_i32_1 : i32, i32, i32
  }
  func.func @transform_2(%arg0: i32) -> (i32, i32) {
    %c0_i32 = arith.constant 0 : i32
    %c0_i32_0 = arith.constant 0 : i32
    %c0_i32_1 = arith.constant 0 : i32
    return %c0_i32, %c0_i32_0 : i32, i32
  }
  func.func @transform_3(%arg0: i32) -> (i32, i32) {
    %c0_i32 = arith.constant 0 : i32
    %c0_i32_0 = arith.constant 0 : i32
    %c0_i32_1 = arith.constant 0 : i32
    return %c0_i32, %c0_i32_0 : i32, i32
  }
  func.func @transform_4(%arg0: i32) -> (i32, i32, i32) {
    %c0_i32 = arith.constant 0 : i32
    %c0_i32_0 = arith.constant 0 : i32
    %c0_i32_1 = arith.constant 0 : i32
    return %arg0, %c0_i32, %c0_i32_0 : i32, i32, i32
  }
  func.func @transform_5(%arg0: i32) -> (i32, i32, i32) {
    %c0_i32 = arith.constant 0 : i32
    %0 = arith.subi %c0_i32, %arg0 : i32
    %c0_i32_0 = arith.constant 0 : i32
    %c0_i32_1 = arith.constant 0 : i32
    %c0_i32_2 = arith.constant 0 : i32
    return %0, %c0_i32_0, %c0_i32_1 : i32, i32, i32
  }
}

</mosaic_0001>

<bundles_post_ra>
// kernel: bilstm_forward.4
= control target key start
LH: loop header
LB: loop body
LE: loop exit
PB: predicated region body
PF: predicated region fallthrough
CT: control target
= control target key end

     0   :  { %v577_v1 = vmov 0   ;;  %vm54_vm0 = vcmask 130048   ;;  %v193_v27 = vlaneseq  ;;  %s752_s1 = inlined_call_operand.vmem [shape: bf16[16,256], index: 1, kind: input, shape index: {}]   ;;  %s753_s0 = inlined_call_operand.vmem [shape: f32[128,16], index: 0, kind: input, shape index: {}]   ;;  %s754_s2 = inlined_call_operand.vmem [shape: f32[1,256], index: 2, kind: input, shape index: {}]   ;;  %s755_s3 = inlined_call_operand.vmem [shape: bf16[128,128], index: 3, kind: output, shape index: {0}]   ;;  %s756_s4 = inlined_call_operand.vmem [shape: bf16[128,128], index: 4, kind: output, shape index: {1}]  }
   0x1   :  { %v574_v0 = vld [vmem:[%s752_s1 + $0x4] ss:$8 sps:$4 sm:$0xff]   ;;  %111 = vmatprep.mubr.bf16.mxu0 %v577_v1  ;;  %151 = vmatprep.mubr.bf16.mxu1 %v577_v1  ;;  %v576_v2 = vld [vmem:[%s752_s1] ss:$8 sps:$4 sm:$0xff]   ;;  %v20_v9 = vld [vmem:[%s753_s0 + $0x10] sm:$0xff] }
   0x2   :  { %v18_v3 = vld [vmem:[%s753_s0] sm:$0xff]  ;;  %v19_v4 = vld [vmem:[%s753_s0 + $0x8] sm:$0xff]  ;;  %93 = vmatprep.subr.bf16.mxu0 %v574_v0  ;;  %571 = vmatprep.subr.bf16.mxu1 %v574_v0  ;;  %v21_v10 = vld [vmem:[%s753_s0 + $0x18] sm:$0xff]  ;;  %v194_v28 = vshrl.u32 %v193_v27, 7 }
   0x3   :  { %v34_v5 = vpack.c.bf16 %v19_v4, %v18_v3  ;;  %v26_v6 = vld [vmem:[%s753_s0 + $0x40] sm:$0xff]  ;;  %v27_v7 = vld [vmem:[%s753_s0 + $0x48] sm:$0xff]  ;;  %94 = vmatpush1.bf16.msra.mxu0 %v576_v2  ;;  %572 = vmatpush1.bf16.msra.mxu1 %v576_v2  ;;  %v28_v11 = vld [vmem:[%s753_s0 + $0x50] sm:$0xff]  ;;  %v35_v13 = vpack.c.bf16 %v21_v10, %v20_v9 }
   0x4   :  { %v38_v8 = vpack.c.bf16 %v27_v7, %v26_v6  ;;  %v29_v12 = vld [vmem:[%s753_s0 + $0x58] sm:$0xff]  ;;  %v22_v15 = vld [vmem:[%s753_s0 + $0x20] sm:$0xff]  ;;  %v23_v16 = vld [vmem:[%s753_s0 + $0x28] sm:$0xff]  ;;  %v195_v29 = vsub.s32 0, %v194_v28  ;;  %v199_v31 = vsub.s32 1, %v194_v28 }
   0x5   :  { %v39_v14 = vpack.c.bf16 %v29_v12, %v28_v11  ;;  %v30_v17 = vld [vmem:[%s753_s0 + $0x60] sm:$0xff]  ;;  %v31_v18 = vld [vmem:[%s753_s0 + $0x68] sm:$0xff]  ;;  %v36_v19 = vpack.c.bf16 %v23_v16, %v22_v15  ;;  %v24_v21 = vld [vmem:[%s753_s0 + $0x30] sm:$0xff] }
   0x6   :  { %405 = vmatmul.mubr.msk.bf16.vlgmr.msra.gmra.mxu0 %vm54_vm0, %v34_v5  ;;  %409 = vmatmul.mubr.msk.bf16.vlgmr.msra.gmra.mxu1 %vm54_vm0, %v38_v8  ;;  %v40_v20 = vpack.c.bf16 %v31_v18, %v30_v17  ;;  %v25_v22 = vld [vmem:[%s753_s0 + $0x38] sm:$0xff]  ;;  %v32_v23 = vld [vmem:[%s753_s0 + $0x70] sm:$0xff]  ;;  %v17_v30 = vld [vmem:[%s754_s2] sm:$0x3] }
   0x7   :  { %121 = vmatprep.mubr.bf16.mxu0 %v577_v1  ;;  %161 = vmatprep.mubr.bf16.mxu1 %v577_v1  ;;  %v33_v24 = vld [vmem:[%s753_s0 + $0x78] sm:$0xff]  ;;  %v37_v25 = vpack.c.bf16 %v25_v22, %v24_v21  ;;  %v668_v34 = vrot.slane %v17_v30, %v195_v29  ;;  %v670_v36 = vrot.slane %v17_v30, %v199_v31 }
   0x8   :  { %v41_v26 = vpack.c.bf16 %v33_v24, %v32_v23 }
   0xe   :  { %406 = vmatmul.mubr.msk.bf16.gmra.mxu0 %vm54_vm0, %v35_v13  ;;  %410 = vmatmul.mubr.msk.bf16.gmra.mxu1 %vm54_vm0, %v39_v14 }
   0xf   :  { %131 = vmatprep.mubr.bf16.mxu0 %v577_v1  ;;  %171 = vmatprep.mubr.bf16.mxu1 %v577_v1 }
  0x16   :  { %407 = vmatmul.mubr.msk.bf16.gmra.mxu0 %vm54_vm0, %v36_v19  ;;  %411 = vmatmul.mubr.msk.bf16.gmra.mxu1 %vm54_vm0, %v40_v20 }
  0x17   :  { %141 = vmatprep.mubr.bf16.mxu0 %v577_v1  ;;  %181 = vmatprep.mubr.bf16.mxu1 %v577_v1 }
  0x1e   :  { %408 = vmatmul.mubr.msk.bf16.gmra.mxu0 %vm54_vm0, %v37_v25  ;;  %412 = vmatmul.mubr.msk.bf16.gmra.mxu1 %vm54_vm0, %v41_v26 }
  0xc6   :  { %v113_v32 = vpop.f32.mrf.mxu0  ;;  %v153_v33 = vpop.f32.mrf.mxu1 }
  0xc7   :  { %v203_v40 = vadd.f32 %v668_v34, %v113_v32  ;;  %v219_v41 = vadd.f32 %v668_v34, %v153_v33 }
  0xc8   :  { %v115_v35 = vpop.f32.mrf.mxu0  ;;  %v155_v37 = vpop.f32.mrf.mxu1 }
  0xc9   :  { %v204_v44 = vadd.f32 %v670_v36, %v115_v35  ;;  %v220_v45 = vadd.f32 %v670_v36, %v155_v37 }
  0xca   :  { %v117_v38 = vpop.f32.mrf.mxu0  ;;  %v157_v39 = vpop.f32.mrf.mxu1 }
  0xcb   :  { %v205_v42 = vadd.f32 %v668_v34, %v117_v38  ;;  %v221_v43 = vadd.f32 %v668_v34, %v157_v39 }
  0xcc   :  { %v119_v46 = vpop.f32.mrf.mxu0  ;;  %v159_v47 = vpop.f32.mrf.mxu1 }
  0xcd   :  { %v480_v48 = vpack.c.bf16 %v205_v42, %v203_v40  ;;  %v500_v49 = vpack.c.bf16 %v221_v43, %v219_v41  ;;  %v206_v50 = vadd.f32 %v670_v36, %v119_v46  ;;  %v222_v51 = vadd.f32 %v670_v36, %v159_v47 }
  0xce   :  { %v123_v52 = vpop.f32.mrf.mxu0  ;;  %v163_v53 = vpop.f32.mrf.mxu1 }
  0xcf   :  { %481 = vst [vmem:[%s755_s3] sm:$0xff] %v480_v48   ;;  %560 = vst [vmem:[%s755_s3 + $0x20] sm:$0xff] %v500_v49   ;;  %v520_v54 = vpack.c.bf16 %v206_v50, %v204_v44  ;;  %v540_v55 = vpack.c.bf16 %v222_v51, %v220_v45  ;;  %v207_v60 = vadd.f32 %v668_v34, %v123_v52 }
  0xd0   :  { %v125_v56 = vpop.f32.mrf.mxu0  ;;  %v165_v57 = vpop.f32.mrf.mxu1  ;;  %v223_v61 = vadd.f32 %v668_v34, %v163_v53 }
  0xd1   :  { %521 = vst [vmem:[%s756_s4] sm:$0xff] %v520_v54   ;;  %567 = vst [vmem:[%s756_s4 + $0x20] sm:$0xff] %v540_v55   ;;  %v208_v0 = vadd.f32 %v670_v36, %v125_v56  ;;  %v224_v1 = vadd.f32 %v670_v36, %v165_v57 }
  0xd2   :  { %v127_v58 = vpop.f32.mrf.mxu0  ;;  %v167_v59 = vpop.f32.mrf.mxu1 }
  0xd3   :  { %v209_v62 = vadd.f32 %v668_v34, %v127_v58  ;;  %v225_v63 = vadd.f32 %v668_v34, %v167_v59 }
  0xd4   :  { %v129_v2 = vpop.f32.mrf.mxu0  ;;  %v169_v3 = vpop.f32.mrf.mxu1 }
  0xd5   :  { %v485_v4 = vpack.c.bf16 %v209_v62, %v207_v60  ;;  %v505_v5 = vpack.c.bf16 %v225_v63, %v223_v61  ;;  %v210_v6 = vadd.f32 %v670_v36, %v129_v2  ;;  %v226_v7 = vadd.f32 %v670_v36, %v169_v3 }
  0xd6   :  { %v133_v8 = vpop.f32.mrf.mxu0  ;;  %v173_v9 = vpop.f32.mrf.mxu1 }
  0xd7   :  { %557 = vst [vmem:[%s755_s3 + $0x8] sm:$0xff] %v485_v4   ;;  %561 = vst [vmem:[%s755_s3 + $0x28] sm:$0xff] %v505_v5   ;;  %v525_v10 = vpack.c.bf16 %v210_v6, %v208_v0  ;;  %v545_v11 = vpack.c.bf16 %v226_v7, %v224_v1  ;;  %v211_v16 = vadd.f32 %v668_v34, %v133_v8 }
  0xd8   :  { %v135_v12 = vpop.f32.mrf.mxu0  ;;  %v175_v13 = vpop.f32.mrf.mxu1  ;;  %v227_v17 = vadd.f32 %v668_v34, %v173_v9 }
  0xd9   :  { %564 = vst [vmem:[%s756_s4 + $0x8] sm:$0xff] %v525_v10   ;;  %568 = vst [vmem:[%s756_s4 + $0x28] sm:$0xff] %v545_v11   ;;  %v212_v20 = vadd.f32 %v670_v36, %v135_v12  ;;  %v228_v21 = vadd.f32 %v670_v36, %v175_v13 }
  0xda   :  { %v137_v14 = vpop.f32.mrf.mxu0  ;;  %v177_v15 = vpop.f32.mrf.mxu1 }
  0xdb   :  { %v213_v18 = vadd.f32 %v668_v34, %v137_v14  ;;  %v229_v19 = vadd.f32 %v668_v34, %v177_v15 }
  0xdc   :  { %v139_v22 = vpop.f32.mrf.mxu0  ;;  %v179_v23 = vpop.f32.mrf.mxu1 }
  0xdd   :  { %v490_v24 = vpack.c.bf16 %v213_v18, %v211_v16  ;;  %v510_v25 = vpack.c.bf16 %v229_v19, %v227_v17  ;;  %v214_v26 = vadd.f32 %v670_v36, %v139_v22  ;;  %v230_v27 = vadd.f32 %v670_v36, %v179_v23 }
  0xde   :  { %v143_v28 = vpop.f32.mrf.mxu0  ;;  %v183_v29 = vpop.f32.mrf.mxu1 }
  0xdf   :  { %558 = vst [vmem:[%s755_s3 + $0x10] sm:$0xff] %v490_v24   ;;  %562 = vst [vmem:[%s755_s3 + $0x30] sm:$0xff] %v510_v25   ;;  %v530_v30 = vpack.c.bf16 %v214_v26, %v212_v20  ;;  %v550_v31 = vpack.c.bf16 %v230_v27, %v228_v21  ;;  %v215_v38 = vadd.f32 %v668_v34, %v143_v28 }
  0xe0   :  { %v145_v32 = vpop.f32.mrf.mxu0  ;;  %v185_v33 = vpop.f32.mrf.mxu1  ;;  %v231_v39 = vadd.f32 %v668_v34, %v183_v29 }
  0xe1   :  { %565 = vst [vmem:[%s756_s4 + $0x10] sm:$0xff] %v530_v30   ;;  %569 = vst [vmem:[%s756_s4 + $0x30] sm:$0xff] %v550_v31   ;;  %v216_v42 = vadd.f32 %v670_v36, %v145_v32  ;;  %v232_v43 = vadd.f32 %v670_v36, %v185_v33 }
  0xe2   :  { %v147_v35 = vpop.f32.mrf.mxu0  ;;  %v187_v37 = vpop.f32.mrf.mxu1 }
  0xe3   :  { %v217_v40 = vadd.f32 %v668_v34, %v147_v35  ;;  %v233_v41 = vadd.f32 %v668_v34, %v187_v37 }
  0xe4   :  { %v149_v44 = vpop.f32.mrf.mxu0  ;;  %v189_v45 = vpop.f32.mrf.mxu1 }
  0xe5   :  { %v495_v46 = vpack.c.bf16 %v217_v40, %v215_v38  ;;  %v515_v47 = vpack.c.bf16 %v233_v41, %v231_v39  ;;  %v218_v48 = vadd.f32 %v670_v36, %v149_v44  ;;  %v234_v49 = vadd.f32 %v670_v36, %v189_v45 }
  0xe7   :  { %559 = vst [vmem:[%s755_s3 + $0x18] sm:$0xff] %v495_v46   ;;  %563 = vst [vmem:[%s755_s3 + $0x38] sm:$0xff] %v515_v47   ;;  %v535_v34 = vpack.c.bf16 %v218_v48, %v216_v42  ;;  %v555_v50 = vpack.c.bf16 %v234_v49, %v232_v43 }
  0xe9   :  { %566 = vst [vmem:[%s756_s4 + $0x18] sm:$0xff] %v535_v34   ;;  %570 = vst [vmem:[%s756_s4 + $0x38] sm:$0xff] %v555_v50  }

// kernel: bilstm_forward.6
= control target key start
LH: loop header
LB: loop body
LE: loop exit
PB: predicated region body
PF: predicated region fallthrough
CT: control target
= control target key end

     0   :  { %v929_v1 = vmov 0   ;;  %vm104_vm0 = vcmask 261120   ;;  %v243_v25 = vlaneseq  ;;  %s1140_s2 = inlined_call_operand.vmem [shape: bf16[32,256], index: 2, kind: input, shape index: {}]   ;;  %s1141_s3 = inlined_call_operand.vmem [shape: bf16[32,256], index: 3, kind: input, shape index: {}]   ;;  %s1142_s0 = inlined_call_operand.vmem [shape: bf16[128,32], index: 0, kind: input, shape index: {}]   ;;  %s1143_s1 = inlined_call_operand.vmem [shape: bf16[128,32], index: 1, kind: input, shape index: {}]   ;;  %s1144_s4 = inlined_call_operand.vmem [shape: f32[1,256], index: 4, kind: input, shape index: {}]   ;;  %s1145_s5 = inlined_call_operand.vmem [shape: bf16[128,128], index: 5, kind: output, shape index: {0}]   ;;  %s1146_s6 = inlined_call_operand.vmem [shape: bf16[128,128], index: 6, kind: output, shape index: {1}]  }
   0x1   :  { %v901_v0 = vld [vmem:[%s1140_s2 + $0x14] ss:$8 sps:$4 sm:$0xff]   ;;  %161 = vmatprep.mubr.bf16.mxu0 %v929_v1  ;;  %421 = vmatprep.mubr.bf16.mxu1 %v929_v1  ;;  %v905_v3 = vld [vmem:[%s1140_s2 + $0x10] ss:$8 sps:$4 sm:$0xff]   ;;  %v907_v5 = vld [vmem:[%s1140_s2 + $0x4] ss:$8 sps:$4 sm:$0xff]  }
   0x2   :  { %v903_v2 = vld [vmem:[%s1141_s3 + $0x14] ss:$8 sps:$4 sm:$0xff]   ;;  %141 = vmatprep.subr.bf16.mxu0 %v901_v0  ;;  %v906_v4 = vld [vmem:[%s1141_s3 + $0x10] ss:$8 sps:$4 sm:$0xff]   ;;  %v909_v6 = vld [vmem:[%s1141_s3 + $0x4] ss:$8 sps:$4 sm:$0xff]  }
   0x3   :  { %401 = vmatprep.subr.bf16.mxu1 %v903_v2  ;;  %142 = vmatpush1.bf16.msra.mxu0 %v905_v3  ;;  %v911_v7 = vld [vmem:[%s1140_s2] ss:$8 sps:$4 sm:$0xff]   ;;  %v917_v13 = vld [vmem:[%s1142_s0 + $0x10] sm:$0xff]   ;;  %v919_v15 = vld [vmem:[%s1142_s0 + $0x18] sm:$0xff]   ;;  %v244_v26 = vshrl.u32 %v243_v25, 7 }
   0x4   :  { %402 = vmatpush1.bf16.msra.mxu1 %v906_v4  ;;  %143 = vmatprep.subr.bf16.mxu0 %v907_v5  ;;  %v912_v8 = vld [vmem:[%s1141_s3] ss:$8 sps:$4 sm:$0xff]   ;;  %v918_v14 = vld [vmem:[%s1143_s1 + $0x10] sm:$0xff]   ;;  %v920_v16 = vld [vmem:[%s1143_s1 + $0x18] sm:$0xff]  }
   0x5   :  { %403 = vmatprep.subr.bf16.mxu1 %v909_v6  ;;  %v913_v9 = vld [vmem:[%s1142_s0] sm:$0xff]   ;;  %v915_v11 = vld [vmem:[%s1142_s0 + $0x8] sm:$0xff]   ;;  %v925_v21 = vld [vmem:[%s1142_s0 + $0x30] sm:$0xff]   ;;  %v245_v27 = vsub.s32 0, %v244_v26  ;;  %v249_v29 = vsub.s32 1, %v244_v26 }
   0x6   :  { %v914_v10 = vld [vmem:[%s1143_s1] sm:$0xff]   ;;  %v916_v12 = vld [vmem:[%s1143_s1 + $0x8] sm:$0xff]   ;;  %v926_v22 = vld [vmem:[%s1143_s1 + $0x30] sm:$0xff]  }
   0x7   :  { %144 = vmatpush1.bf16.msra.mxu0 %v911_v7  ;;  %v921_v17 = vld [vmem:[%s1142_s0 + $0x20] sm:$0xff]   ;;  %v923_v19 = vld [vmem:[%s1142_s0 + $0x28] sm:$0xff]   ;;  %v927_v23 = vld [vmem:[%s1142_s0 + $0x38] sm:$0xff]  }
   0x8   :  { %404 = vmatpush1.bf16.msra.mxu1 %v912_v8  ;;  %v922_v18 = vld [vmem:[%s1143_s1 + $0x20] sm:$0xff]   ;;  %v924_v20 = vld [vmem:[%s1143_s1 + $0x28] sm:$0xff]   ;;  %v928_v24 = vld [vmem:[%s1143_s1 + $0x38] sm:$0xff]  }
   0x9   :  { %v23_v28 = vld [vmem:[%s1144_s4] sm:$0x3] }
   0xa   :  { %714 = vmatmul.mubr.msk.bf16.vlgmr.msra.gmra.mxu0 %vm104_vm0, %v913_v9  ;;  %v1056_v30 = vrot.slane %v23_v28, %v245_v27  ;;  %v1058_v33 = vrot.slane %v23_v28, %v249_v29 }
   0xb   :  { %734 = vmatmul.mubr.msk.bf16.vlgmr.msra.gmra.mxu1 %vm104_vm0, %v914_v10  ;;  %171 = vmatprep.mubr.bf16.mxu0 %v929_v1 }
   0xc   :  { %431 = vmatprep.mubr.bf16.mxu1 %v929_v1 }
  0x12   :  { %715 = vmatmul.mubr.msk.bf16.gmra.mxu0 %vm104_vm0, %v915_v11 }
  0x13   :  { %735 = vmatmul.mubr.msk.bf16.gmra.mxu1 %vm104_vm0, %v916_v12  ;;  %181 = vmatprep.mubr.bf16.mxu0 %v929_v1 }
  0x14   :  { %441 = vmatprep.mubr.bf16.mxu1 %v929_v1 }
  0x1a   :  { %716 = vmatmul.mubr.msk.bf16.gmra.mxu0 %vm104_vm0, %v917_v13 }
  0x1b   :  { %736 = vmatmul.mubr.msk.bf16.gmra.mxu1 %vm104_vm0, %v918_v14  ;;  %191 = vmatprep.mubr.bf16.mxu0 %v929_v1 }
  0x1c   :  { %451 = vmatprep.mubr.bf16.mxu1 %v929_v1 }
  0x22   :  { %717 = vmatmul.mubr.msk.bf16.gmra.mxu0 %vm104_vm0, %v919_v15 }
  0x23   :  { %737 = vmatmul.mubr.msk.bf16.gmra.mxu1 %vm104_vm0, %v920_v16  ;;  %201 = vmatprep.mubr.bf16.mxu0 %v929_v1 }
  0x24   :  { %461 = vmatprep.mubr.bf16.mxu1 %v929_v1 }
  0x2a   :  { %718 = vmatmul.mubr.msk.bf16.gmra.mxu0 %vm104_vm0, %v921_v17 }
  0x2b   :  { %738 = vmatmul.mubr.msk.bf16.gmra.mxu1 %vm104_vm0, %v922_v18  ;;  %211 = vmatprep.mubr.bf16.mxu0 %v929_v1 }
  0x2c   :  { %471 = vmatprep.mubr.bf16.mxu1 %v929_v1 }
  0x32   :  { %719 = vmatmul.mubr.msk.bf16.gmra.mxu0 %vm104_vm0, %v923_v19 }
  0x33   :  { %739 = vmatmul.mubr.msk.bf16.gmra.mxu1 %vm104_vm0, %v924_v20  ;;  %221 = vmatprep.mubr.bf16.mxu0 %v929_v1 }
  0x34   :  { %481 = vmatprep.mubr.bf16.mxu1 %v929_v1 }
  0x3a   :  { %720 = vmatmul.mubr.msk.bf16.gmra.mxu0 %vm104_vm0, %v925_v21 }
  0x3b   :  { %740 = vmatmul.mubr.msk.bf16.gmra.mxu1 %vm104_vm0, %v926_v22  ;;  %231 = vmatprep.mubr.bf16.mxu0 %v929_v1 }
  0x3c   :  { %491 = vmatprep.mubr.bf16.mxu1 %v929_v1 }
  0x42   :  { %721 = vmatmul.mubr.msk.bf16.gmra.mxu0 %vm104_vm0, %v927_v23 }
  0x43   :  { %741 = vmatmul.mubr.msk.bf16.gmra.mxu1 %vm104_vm0, %v928_v24 }
  0xca   :  { %v163_v31 = vpop.f32.mrf.mxu0 }
  0xcb   :  { %v423_v32 = vpop.f32.mrf.mxu1  ;;  %v253_v36 = vadd.f32 %v1056_v30, %v163_v31 }
  0xcc   :  { %v165_v34 = vpop.f32.mrf.mxu0 }
  0xcd   :  { %v425_v35 = vpop.f32.mrf.mxu1  ;;  %v254_v39 = vadd.f32 %v1058_v33, %v165_v34  ;;  %v502_v43 = vadd.f32 %v423_v32, %v253_v36 }
  0xce   :  { %v167_v37 = vpop.f32.mrf.mxu0 }
  0xcf   :  { %v427_v38 = vpop.f32.mrf.mxu1  ;;  %v255_v40 = vadd.f32 %v1056_v30, %v167_v37  ;;  %v503_v48 = vadd.f32 %v425_v35, %v254_v39 }
  0xd0   :  { %v169_v41 = vpop.f32.mrf.mxu0 }
  0xd1   :  { %v429_v42 = vpop.f32.mrf.mxu1  ;;  %v504_v44 = vadd.f32 %v427_v38, %v255_v40  ;;  %v256_v45 = vadd.f32 %v1058_v33, %v169_v41 }
  0xd2   :  { %v173_v46 = vpop.f32.mrf.mxu0 }
  0xd3   :  { %v433_v47 = vpop.f32.mrf.mxu1  ;;  %v809_v49 = vpack.c.bf16 %v504_v44, %v502_v43  ;;  %v505_v50 = vadd.f32 %v429_v42, %v256_v45  ;;  %v257_v54 = vadd.f32 %v1056_v30, %v173_v46 }
  0xd4   :  { %v175_v51 = vpop.f32.mrf.mxu0 }
  0xd5   :  { %v435_v52 = vpop.f32.mrf.mxu1  ;;  %810 = vst [vmem:[%s1145_s5] sm:$0xff] %v809_v49   ;;  %v849_v53 = vpack.c.bf16 %v505_v50, %v503_v48  ;;  %v258_v57 = vadd.f32 %v1058_v33, %v175_v51  ;;  %v506_v61 = vadd.f32 %v433_v47, %v257_v54 }
  0xd6   :  { %v177_v55 = vpop.f32.mrf.mxu0 }
  0xd7   :  { %v437_v56 = vpop.f32.mrf.mxu1  ;;  %850 = vst [vmem:[%s1146_s6] sm:$0xff] %v849_v53   ;;  %v259_v58 = vadd.f32 %v1056_v30, %v177_v55  ;;  %v507_v2 = vadd.f32 %v435_v52, %v258_v57 }
  0xd8   :  { %v179_v59 = vpop.f32.mrf.mxu0 }
  0xd9   :  { %v439_v60 = vpop.f32.mrf.mxu1  ;;  %v508_v62 = vadd.f32 %v437_v56, %v259_v58  ;;  %v260_v63 = vadd.f32 %v1058_v33, %v179_v59 }
  0xda   :  { %v183_v0 = vpop.f32.mrf.mxu0 }
  0xdb   :  { %v443_v1 = vpop.f32.mrf.mxu1  ;;  %v814_v3 = vpack.c.bf16 %v508_v62, %v506_v61  ;;  %v509_v4 = vadd.f32 %v439_v60, %v260_v63  ;;  %v261_v8 = vadd.f32 %v1056_v30, %v183_v0 }
  0xdc   :  { %v185_v5 = vpop.f32.mrf.mxu0 }
  0xdd   :  { %v445_v6 = vpop.f32.mrf.mxu1  ;;  %886 = vst [vmem:[%s1145_s5 + $0x8] sm:$0xff] %v814_v3   ;;  %v854_v7 = vpack.c.bf16 %v509_v4, %v507_v2  ;;  %v262_v11 = vadd.f32 %v1058_v33, %v185_v5  ;;  %v510_v15 = vadd.f32 %v443_v1, %v261_v8 }
  0xde   :  { %v187_v9 = vpop.f32.mrf.mxu0 }
  0xdf   :  { %v447_v10 = vpop.f32.mrf.mxu1  ;;  %893 = vst [vmem:[%s1146_s6 + $0x8] sm:$0xff] %v854_v7   ;;  %v263_v12 = vadd.f32 %v1056_v30, %v187_v9  ;;  %v511_v20 = vadd.f32 %v445_v6, %v262_v11 }
  0xe0   :  { %v189_v13 = vpop.f32.mrf.mxu0 }
  0xe1   :  { %v449_v14 = vpop.f32.mrf.mxu1  ;;  %v512_v16 = vadd.f32 %v447_v10, %v263_v12  ;;  %v264_v17 = vadd.f32 %v1058_v33, %v189_v13 }
  0xe2   :  { %v193_v18 = vpop.f32.mrf.mxu0 }
  0xe3   :  { %v453_v19 = vpop.f32.mrf.mxu1  ;;  %v819_v21 = vpack.c.bf16 %v512_v16, %v510_v15  ;;  %v513_v22 = vadd.f32 %v449_v14, %v264_v17  ;;  %v265_v26 = vadd.f32 %v1056_v30, %v193_v18 }
  0xe4   :  { %v195_v23 = vpop.f32.mrf.mxu0 }
  0xe5   :  { %v455_v24 = vpop.f32.mrf.mxu1  ;;  %887 = vst [vmem:[%s1145_s5 + $0x10] sm:$0xff] %v819_v21   ;;  %v859_v25 = vpack.c.bf16 %v513_v22, %v511_v20  ;;  %v266_v29 = vadd.f32 %v1058_v33, %v195_v23  ;;  %v514_v35 = vadd.f32 %v453_v19, %v265_v26 }
  0xe6   :  { %v197_v27 = vpop.f32.mrf.mxu0 }
  0xe7   :  { %v457_v28 = vpop.f32.mrf.mxu1  ;;  %894 = vst [vmem:[%s1146_s6 + $0x10] sm:$0xff] %v859_v25   ;;  %v267_v31 = vadd.f32 %v1056_v30, %v197_v27  ;;  %v515_v40 = vadd.f32 %v455_v24, %v266_v29 }
  0xe8   :  { %v199_v32 = vpop.f32.mrf.mxu0 }
  0xe9   :  { %v459_v34 = vpop.f32.mrf.mxu1  ;;  %v516_v36 = vadd.f32 %v457_v28, %v267_v31  ;;  %v268_v37 = vadd.f32 %v1058_v33, %v199_v32 }
  0xea   :  { %v203_v38 = vpop.f32.mrf.mxu0 }
  0xeb   :  { %v463_v39 = vpop.f32.mrf.mxu1  ;;  %v824_v41 = vpack.c.bf16 %v516_v36, %v514_v35  ;;  %v517_v42 = vadd.f32 %v459_v34, %v268_v37  ;;  %v269_v46 = vadd.f32 %v1056_v30, %v203_v38 }
  0xec   :  { %v205_v43 = vpop.f32.mrf.mxu0 }
  0xed   :  { %v465_v44 = vpop.f32.mrf.mxu1  ;;  %888 = vst [vmem:[%s1145_s5 + $0x18] sm:$0xff] %v824_v41   ;;  %v864_v45 = vpack.c.bf16 %v517_v42, %v515_v40  ;;  %v270_v49 = vadd.f32 %v1058_v33, %v205_v43  ;;  %v518_v53 = vadd.f32 %v463_v39, %v269_v46 }
  0xee   :  { %v207_v47 = vpop.f32.mrf.mxu0 }
  0xef   :  { %v467_v48 = vpop.f32.mrf.mxu1  ;;  %895 = vst [vmem:[%s1146_s6 + $0x18] sm:$0xff] %v864_v45   ;;  %v271_v50 = vadd.f32 %v1056_v30, %v207_v47  ;;  %v519_v58 = vadd.f32 %v465_v44, %v270_v49 }
  0xf0   :  { %v209_v51 = vpop.f32.mrf.mxu0 }
  0xf1   :  { %v469_v52 = vpop.f32.mrf.mxu1  ;;  %v520_v54 = vadd.f32 %v467_v48, %v271_v50  ;;  %v272_v55 = vadd.f32 %v1058_v33, %v209_v51 }
  0xf2   :  { %v213_v56 = vpop.f32.mrf.mxu0 }
  0xf3   :  { %v473_v57 = vpop.f32.mrf.mxu1  ;;  %v829_v59 = vpack.c.bf16 %v520_v54, %v518_v53  ;;  %v521_v60 = vadd.f32 %v469_v52, %v272_v55  ;;  %v273_v0 = vadd.f32 %v1056_v30, %v213_v56 }
  0xf4   :  { %v215_v61 = vpop.f32.mrf.mxu0 }
  0xf5   :  { %v475_v62 = vpop.f32.mrf.mxu1  ;;  %889 = vst [vmem:[%s1145_s5 + $0x20] sm:$0xff] %v829_v59   ;;  %v869_v63 = vpack.c.bf16 %v521_v60, %v519_v58  ;;  %v274_v3 = vadd.f32 %v1058_v33, %v215_v61  ;;  %v522_v7 = vadd.f32 %v473_v57, %v273_v0 }
  0xf6   :  { %v217_v1 = vpop.f32.mrf.mxu0 }
  0xf7   :  { %v477_v2 = vpop.f32.mrf.mxu1  ;;  %896 = vst [vmem:[%s1146_s6 + $0x20] sm:$0xff] %v869_v63   ;;  %v275_v4 = vadd.f32 %v1056_v30, %v217_v1  ;;  %v523_v12 = vadd.f32 %v475_v62, %v274_v3 }
  0xf8   :  { %v219_v5 = vpop.f32.mrf.mxu0 }
  0xf9   :  { %v479_v6 = vpop.f32.mrf.mxu1  ;;  %v524_v8 = vadd.f32 %v477_v2, %v275_v4  ;;  %v276_v9 = vadd.f32 %v1058_v33, %v219_v5 }
  0xfa   :  { %v223_v10 = vpop.f32.mrf.mxu0 }
  0xfb   :  { %v483_v11 = vpop.f32.mrf.mxu1  ;;  %v834_v13 = vpack.c.bf16 %v524_v8, %v522_v7  ;;  %v525_v14 = vadd.f32 %v479_v6, %v276_v9  ;;  %v277_v18 = vadd.f32 %v1056_v30, %v223_v10 }
  0xfc   :  { %v225_v15 = vpop.f32.mrf.mxu0 }
  0xfd   :  { %v485_v16 = vpop.f32.mrf.mxu1  ;;  %890 = vst [vmem:[%s1145_s5 + $0x28] sm:$0xff] %v834_v13   ;;  %v874_v17 = vpack.c.bf16 %v525_v14, %v523_v12  ;;  %v278_v21 = vadd.f32 %v1058_v33, %v225_v15  ;;  %v526_v25 = vadd.f32 %v483_v11, %v277_v18 }
  0xfe   :  { %v227_v19 = vpop.f32.mrf.mxu0 }
  0xff   :  { %v487_v20 = vpop.f32.mrf.mxu1  ;;  %897 = vst [vmem:[%s1146_s6 + $0x28] sm:$0xff] %v874_v17   ;;  %v279_v22 = vadd.f32 %v1056_v30, %v227_v19  ;;  %v527_v31 = vadd.f32 %v485_v16, %v278_v21 }
 0x100   :  { %v229_v23 = vpop.f32.mrf.mxu0 }
 0x101   :  { %v489_v24 = vpop.f32.mrf.mxu1  ;;  %v528_v26 = vadd.f32 %v487_v20, %v279_v22  ;;  %v280_v27 = vadd.f32 %v1058_v33, %v229_v23 }
 0x102   :  { %v233_v28 = vpop.f32.mrf.mxu0 }
 0x103   :  { %v493_v29 = vpop.f32.mrf.mxu1  ;;  %v839_v32 = vpack.c.bf16 %v528_v26, %v526_v25  ;;  %v529_v34 = vadd.f32 %v489_v24, %v280_v27  ;;  %v281_v38 = vadd.f32 %v1056_v30, %v233_v28 }
 0x104   :  { %v235_v35 = vpop.f32.mrf.mxu0 }
 0x105   :  { %v495_v36 = vpop.f32.mrf.mxu1  ;;  %891 = vst [vmem:[%s1145_s5 + $0x30] sm:$0xff] %v839_v32   ;;  %v879_v37 = vpack.c.bf16 %v529_v34, %v527_v31  ;;  %v282_v41 = vadd.f32 %v1058_v33, %v235_v35  ;;  %v530_v44 = vadd.f32 %v493_v29, %v281_v38 }
 0x106   :  { %v237_v39 = vpop.f32.mrf.mxu0 }
 0x107   :  { %v497_v40 = vpop.f32.mrf.mxu1  ;;  %898 = vst [vmem:[%s1146_s6 + $0x30] sm:$0xff] %v879_v37   ;;  %v283_v42 = vadd.f32 %v1056_v30, %v237_v39  ;;  %v531_v48 = vadd.f32 %v495_v36, %v282_v41 }
 0x108   :  { %v239_v43 = vpop.f32.mrf.mxu0 }
 0x109   :  { %v532_v45 = vadd.f32 %v497_v40, %v283_v42  ;;  %v284_v46 = vadd.f32 %v1058_v33, %v239_v43  ;;  %v499_v47 = vpop.f32.mrf.mxu1 }
 0x10b   :  { %v844_v49 = vpack.c.bf16 %v532_v45, %v530_v44  ;;  %v533_v50 = vadd.f32 %v499_v47, %v284_v46 }
 0x10d   :  { %892 = vst [vmem:[%s1145_s5 + $0x38] sm:$0xff] %v844_v49   ;;  %v884_v51 = vpack.c.bf16 %v533_v50, %v531_v48 }
 0x10f   :  { %899 = vst [vmem:[%s1146_s6 + $0x38] sm:$0xff] %v884_v51  }

// kernel: bilstm_forward.5
= control target key start
LH: loop header
LB: loop body
LE: loop exit
PB: predicated region body
PF: predicated region fallthrough
CT: control target
= control target key end

     0   :  { %vm65_vm0 = vcmask 261120   ;;  %v3189_v0 = vmov 0.0   ;;  %vm3190_vm1 = vmmov 0   ;;  %s3191_s30 = smov 32   ;;  %s3192_s6 = smov 64   ;;  %vm238_vm2 = vcmask 257024   ;;  %s4032_s2 = inlined_call_operand.vmem [shape: bf16[32,128], index: 2, kind: input, shape index: {}]   ;;  %s4033_s3 = inlined_call_operand.vmem [shape: bf16[32,128], index: 3, kind: input, shape index: {}]   ;;  %s4034_s0 = inlined_call_operand.vmem [shape: bf16[8,16,128], index: 0, kind: input, shape index: {}]   ;;  %s4035_s1 = inlined_call_operand.vmem [shape: bf16[8,16,128], index: 1, kind: input, shape index: {}]   ;;  %s4036_s4 = inlined_call_operand.vmem [shape: bf16[8,16,32], index: 4, kind: output, shape index: {0}]   ;;  %s4037_s5 = inlined_call_operand.vmem [shape: bf16[8,16,32], index: 5, kind: output, shape index: {1}]  }
   0x1   :  { %2792 = vmatprep.subr.bf16.mxu0 %v3189_v0  ;;  %2800 = vmatprep.subr.bf16.mxu1 %v3189_v0  ;;  %v3229_v1 = vld [vmem:[%s4032_s2 + $0x8] sm:$0xff]   ;;  %66 = vst.msk [vmem:[#allocation2] sm:$0xff] %vm65_vm0, %v3189_v0  ;;  %67 = vst.msk [vmem:[#allocation2 + $0x8] sm:$0xff] %vm65_vm0, %v3189_v0  ;;  %v3260_v3 = vld [vmem:[%s4032_s2] sm:$0xff]   ;;  %s3193_s7 = smov 96  }
   0x2   :  { %68 = vst.msk [vmem:[#allocation3] sm:$0xff] %vm65_vm0, %v3189_v0  ;;  %69 = vst.msk [vmem:[#allocation3 + $0x8] sm:$0xff] %vm65_vm0, %v3189_v0  ;;  %v3250_v2 = vld [vmem:[%s4033_s3 + $0x8] sm:$0xff]   ;;  %2796 = vmatprep.mubr.msk.bf16.mxu0 %vm3190_vm1, %v3189_v0  ;;  %2804 = vmatprep.mubr.msk.bf16.mxu1 %vm3190_vm1, %v3189_v0  ;;  %v3267_v4 = vld [vmem:[%s4033_s3] sm:$0xff]  }
   0x3   :  { %70 = vst.msk [vmem:[#allocation4] sm:$0xff] %vm65_vm0, %v3189_v0  ;;  %71 = vst.msk [vmem:[#allocation4 + $0x8] sm:$0xff] %vm65_vm0, %v3189_v0  ;;  %2793 = vmatpush3.bf16.msra.mxu0 %v3229_v1  ;;  %2801 = vmatpush3.bf16.msra.mxu1 %v3250_v2  ;;  %v2667_v11 = vld [vmem:[%s4034_s0] sm:$0xff]   ;;  %v2730_v12 = vld [vmem:[%s4035_s1 + $0x38] sm:$0xff]  }
   0x4   :  { %72 = vst.msk [vmem:[#allocation5] sm:$0xff] %vm65_vm0, %v3189_v0  ;;  %73 = vst.msk [vmem:[#allocation5 + $0x8] sm:$0xff] %vm65_vm0, %v3189_v0  ;;  %2794 = vmatprep.subr.bf16.mxu0 %v3189_v0  ;;  %2802 = vmatprep.subr.bf16.mxu1 %v3189_v0  ;;  %v2668_v13 = vunpack.c.l.bf16 %v2667_v11  ;;  %v2672_v14 = vunpack.c.l.bf16 %v2730_v12  ;;  %v2669_v18 = vunpack.c.h.bf16 %v2667_v11  ;;  %v2673_v21 = vunpack.c.h.bf16 %v2730_v12 }
   0x7   :  { %2795 = vmatpush3.bf16.msra.mxu0 %v3260_v3  ;;  %2803 = vmatpush3.bf16.msra.mxu1 %v3267_v4 }
   0x8   :  { %v82_v5 = vld [vmem:[#allocation2] sm:$0xff]  ;;  %v83_v6 = vld [vmem:[#allocation2 + $0x8] sm:$0xff]  ;;  %2808 = vmatprep.subr.bf16.mxu0 %v3189_v0  ;;  %2816 = vmatprep.subr.bf16.mxu1 %v3189_v0 }
   0x9   :  { %v84_v8 = vpack.c.bf16 %v83_v6, %v82_v5  ;;  %v148_v33 = vld [vmem:[#allocation3] sm:$0xff]  ;;  %v149_v34 = vld [vmem:[#allocation3 + $0x8] sm:$0xff] }
   0xa   :  { %v241_v7 = vld [vmem:[#allocation4] sm:$0xff]  ;;  %v242_v9 = vld [vmem:[#allocation4 + $0x8] sm:$0xff] }
   0xb   :  { %v243_v10 = vpack.c.bf16 %v242_v9, %v241_v7  ;;  %2797 = vmatmul.mubr.msk.bf16.vlgmr.msra.gmra.mxu0 %vm65_vm0, %v84_v8  ;;  %v307_v35 = vld [vmem:[#allocation5] sm:$0xff]  ;;  %v308_v36 = vld [vmem:[#allocation5 + $0x8] sm:$0xff] }
   0xc   :  { %2809 = vmatpush3.bf16.msra.mxu0 %v3229_v1  ;;  %2812 = vmatprep.mubr.msk.bf16.mxu0 %vm3190_vm1, %v3189_v0 }
   0xd   :  { %2805 = vmatmul.mubr.msk.bf16.vlgmr.msra.gmra.mxu1 %vm65_vm0, %v243_v10  ;;  %2810 = vmatprep.subr.bf16.mxu0 %v3189_v0 }
   0xe   :  { %2817 = vmatpush3.bf16.msra.mxu1 %v3250_v2  ;;  %2820 = vmatprep.mubr.msk.bf16.mxu1 %vm3190_vm1, %v3189_v0 }
   0xf   :  { %2818 = vmatprep.subr.bf16.mxu1 %v3189_v0 }
  0x10   :  { %2811 = vmatpush3.bf16.msra.mxu0 %v3260_v3 }
  0x11   :  { %2824 = vmatprep.subr.bf16.mxu0 %v3189_v0 }
  0x12   :  { %2819 = vmatpush3.bf16.msra.mxu1 %v3267_v4 }
  0x13   :  { %2832 = vmatprep.subr.bf16.mxu1 %v3189_v0 }
  0xcb   :  { %v135_v15 = vpop.f32.mrf.mxu0 }
  0xcc   :  { %v146_v16 = vadd.f32 %v2668_v13, %v135_v15 }
  0xcd   :  { %v293_v17 = vpop.f32.mrf.mxu1  ;;  %v2798_v20 = vpop.f32.mrf.mxu0 }
  0xce   :  { %v305_v19 = vadd.f32 %v2672_v14, %v293_v17  ;;  %2929 = vtanh.f32 %v146_v16  ;;  %v2497_v37 = vmul.f32 -1.442695, %v146_v16 }
  0xcf   :  { %v2806_v22 = vpop.f32.mrf.mxu1  ;;  %v138_v23 = vpop.f32.mrf.mxu0 }
  0xd0   :  { %2931 = vtanh.f32 %v305_v19  ;;  %v147_v24 = vadd.f32 %v2669_v18, %v138_v23  ;;  %v2506_v38 = vmul.f32 -1.442695, %v305_v19 }
  0xd1   :  { %v296_v25 = vpop.f32.mrf.mxu1  ;;  %v2799_v27 = vpop.f32.mrf.mxu0 }
  0xd2   :  { %v306_v26 = vadd.f32 %v2673_v21, %v296_v25  ;;  %2933 = vtanh.f32 %v147_v24  ;;  %v2498_v39 = vmul.f32 -1.442695, %v147_v24 }
  0xd3   :  { %v2807_v28 = vpop.f32.mrf.mxu1 }
  0xd4   :  { %2935 = vtanh.f32 %v306_v26  ;;  %v2507_v40 = vmul.f32 -1.442695, %v306_v26 }
  0xd5   :  { %2937 = vpow2.f32 %v2497_v37 }
  0xd6   :  { %2939 = vpow2.f32 %v2506_v38 }
  0xd7   :  { %2941 = vpow2.f32 %v2498_v39 }
  0xd8   :  { %2943 = vpow2.f32 %v2507_v40 }
  0xdb   :  { %v2930_v29 = vpop.eup %2929 }
  0xdc   :  { %176 = vrot.lane.b32.xlu0 %v2930_v29, %s3191_s30 }
  0xdd   :  { %v2932_v30 = vpop.eup %2931 }
  0xde   :  { %335 = vrot.lane.b32.xlu1 %v2932_v30, %s3191_s30 }
  0xdf   :  { %v2934_v31 = vpop.eup %2933 }
  0xe0   :  { %178 = vrot.lane.b32.xlu0 %v2934_v31, %s3191_s30 }
  0xe1   :  { %v2936_v32 = vpop.eup %2935 }
  0xe2   :  { %337 = vrot.lane.b32.xlu1 %v2936_v32, %s3191_s30  ;;  %v2938_v41 = vpop.eup %2937 }
  0xe3   :  { %v2940_v42 = vpop.eup %2939  ;;  %v156_v43 = vadd.f32 1.0, %v2938_v41 }
  0xe4   :  { %166 = vrot.lane.b32.xlu0 %v148_v33, %s3191_s30  ;;  %v2942_v44 = vpop.eup %2941  ;;  %v315_v45 = vadd.f32 1.0, %v2940_v42 }
  0xe5   :  { %2945 = vrcp.f32 %v156_v43  ;;  %v157_v46 = vadd.f32 1.0, %v2942_v44  ;;  %v2944_v47 = vpop.eup %2943  ;;  %v2731_v44 = vld [vmem:[%s4034_s0 + $0x8] sm:$0xff]  }
  0xe6   :  { %168 = vrot.lane.b32.xlu1 %v149_v34, %s3191_s30  ;;  %2947 = vrcp.f32 %v315_v45  ;;  %v316_v48 = vadd.f32 1.0, %v2944_v47  ;;  %v2676_v45 = vunpack.c.l.bf16 %v2731_v44 }
  0xe7   :  { %2949 = vrcp.f32 %v157_v46  ;;  %v2732_v46 = vld [vmem:[%s4035_s1 + $0x30] sm:$0xff]  }
  0xe8   :  { %325 = vrot.lane.b32.xlu0 %v307_v35, %s3191_s30  ;;  %2951 = vrcp.f32 %v316_v48 }
  0xea   :  { %327 = vrot.lane.b32.xlu1 %v308_v36, %s3191_s30 }
  0xf2   :  { %v2946_v49 = vpop.eup %2945 }
  0xf3   :  { %v2948_v53 = vpop.eup %2947 }
  0xf4   :  { %v2950_v54 = vpop.eup %2949 }
  0xf5   :  { %v2952_v59 = vpop.eup %2951 }
 0x14e   :  { %v177_v50 = vpop.permute.xlu0 %176 }
 0x14f   :  { %v182_v52 = vmul.f32 %v2946_v49, %v177_v50  ;;  %v2680_v50 = vunpack.c.l.bf16 %v2732_v46 }
 0x150   :  { %v336_v51 = vpop.permute.xlu1 %335 }
 0x151   :  { %186 = vrot.lane.b32.xlu0 %v182_v52, %s3191_s30  ;;  %v341_v56 = vmul.f32 %v2948_v53, %v336_v51 }
 0x152   :  { %v179_v55 = vpop.permute.xlu0 %178 }
 0x153   :  { %v183_v57 = vmul.f32 %v2950_v54, %v179_v55 }
 0x154   :  { %v338_v58 = vpop.permute.xlu1 %337 }
 0x155   :  { %188 = vrot.lane.b32.xlu1 %v183_v57, %s3191_s30  ;;  %345 = vrot.lane.b32.xlu0 %v341_v56, %s3191_s30  ;;  %v342_v60 = vmul.f32 %v2952_v59, %v338_v58  ;;  %v2681_v56 = vunpack.c.h.bf16 %v2732_v46 }
 0x156   :  { %v167_v61 = vpop.permute.xlu0 %166 }
 0x157   :  { %v172_v5 = vmul.f32 %v2946_v49, %v167_v61 }
 0x158   :  { %v169_v62 = vpop.permute.xlu1 %168 }
 0x159   :  { %347 = vrot.lane.b32.xlu1 %v342_v60, %s3191_s30  ;;  %v173_v9 = vmul.f32 %v2950_v54, %v169_v62 }
 0x15a   :  { %v326_v63 = vpop.permute.xlu0 %325 }
 0x15b   :  { %v331_v10 = vmul.f32 %v2948_v53, %v326_v63 }
 0x15c   :  { %v328_v6 = vpop.permute.xlu1 %327 }
 0x15d   :  { %v332_v15 = vmul.f32 %v2952_v59, %v328_v6 }
 0x1c3   :  { %v187_v7 = vpop.permute.xlu0 %186 }
 0x1c4   :  { %v192_v8 = vadd.f32 %v187_v7, %v172_v5 }
 0x1c6   :  { %2953 = vtanh.f32 %v192_v8 }
 0x1c7   :  { %v189_v11 = vpop.permute.xlu1 %188  ;;  %v346_v12 = vpop.permute.xlu0 %345 }
 0x1c8   :  { %v193_v13 = vadd.f32 %v189_v11, %v173_v9  ;;  %v351_v14 = vadd.f32 %v346_v12, %v331_v10 }
 0x1ca   :  { %2955 = vtanh.f32 %v193_v13 }
 0x1cb   :  { %2957 = vtanh.f32 %v351_v14  ;;  %v348_v16 = vpop.permute.xlu1 %347 }
 0x1cc   :  { %v352_v17 = vadd.f32 %v348_v16, %v332_v15 }
 0x1ce   :  { %2959 = vtanh.f32 %v352_v17 }
 0x1d3   :  { %v2954_v18 = vpop.eup %2953 }
 0x1d4   :  { %198 = vrot.lane.b32.xlu0 %v2954_v18, %s3191_s30 }
 0x1d7   :  { %v2956_v19 = vpop.eup %2955 }
 0x1d8   :  { %v2958_v20 = vpop.eup %2957  ;;  %200 = vrot.lane.b32.xlu1 %v2956_v19, %s3191_s30 }
 0x1d9   :  { %357 = vrot.lane.b32.xlu0 %v2958_v20, %s3191_s30 }
 0x1db   :  { %v2960_v21 = vpop.eup %2959 }
 0x1dc   :  { %359 = vrot.lane.b32.xlu1 %v2960_v21, %s3191_s30 }
 0x246   :  { %v199_v22 = vpop.permute.xlu0 %198 }
 0x247   :  { %v3310_v23 = vmul.f32 %v2946_v49, %v199_v22  ;;  %v2677_v49 = vunpack.c.h.bf16 %v2731_v44 }
 0x249   :  { %208 = vrot.lane.b32.xlu0 %v3310_v23, %s3192_s6 }
 0x24a   :  { %v201_v24 = vpop.permute.xlu1 %200 }
 0x24b   :  { %v3314_v25 = vmul.f32 %v2950_v54, %v201_v24  ;;  %v358_v26 = vpop.permute.xlu0 %357 }
 0x24c   :  { %v3316_v27 = vmul.f32 %v2948_v53, %v358_v26 }
 0x24d   :  { %210 = vrot.lane.b32.xlu1 %v3314_v25, %s3192_s6 }
 0x24e   :  { %367 = vrot.lane.b32.xlu0 %v3316_v27, %s3192_s6  ;;  %v360_v28 = vpop.permute.xlu1 %359 }
 0x24f   :  { %v3322_v29 = vmul.f32 %v2952_v59, %v360_v28 }
 0x251   :  { %369 = vrot.lane.b32.xlu1 %v3322_v29, %s3192_s6 }
 0x252   :  { %218 = vrot.lane.b32.xlu0 %v192_v8, %s3193_s7 }
 0x255   :  { %220 = vrot.lane.b32.xlu1 %v193_v13, %s3193_s7 }
 0x256   :  { %377 = vrot.lane.b32.xlu0 %v351_v14, %s3193_s7 }
 0x259   :  { %379 = vrot.lane.b32.xlu1 %v352_v17, %s3193_s7 }
 0x2bb   :  { %v209_v30 = vpop.permute.xlu0 %208 }
 0x2bc   :  { %214 = vst.msk [vmem:[#allocation2] sm:$0xff] %vm65_vm0, %v209_v30 }
 0x2bf   :  { %v211_v31 = vpop.permute.xlu1 %210 }
 0x2c0   :  { %215 = vst.msk [vmem:[#allocation2 + $0x8] sm:$0xff] %vm65_vm0, %v211_v31  ;;  %v368_v32 = vpop.permute.xlu0 %367 }
 0x2c1   :  { %373 = vst.msk [vmem:[#allocation4] sm:$0xff] %vm65_vm0, %v368_v32 }
 0x2c3   :  { %v370_v33 = vpop.permute.xlu1 %369  ;;  %v400_v36 = vld [vmem:[#allocation2] sm:$0xff] }
 0x2c4   :  { %374 = vst.msk [vmem:[#allocation4 + $0x8] sm:$0xff] %vm65_vm0, %v370_v33  ;;  %v219_v34 = vpop.permute.xlu0 %218 }
 0x2c5   :  { %224 = vst.msk [vmem:[#allocation3] sm:$0xff] %vm65_vm0, %v219_v34 }
 0x2c7   :  { %v221_v35 = vpop.permute.xlu1 %220  ;;  %v401_v37 = vld [vmem:[#allocation2 + $0x8] sm:$0xff] }
 0x2c8   :  { %225 = vst.msk [vmem:[#allocation3 + $0x8] sm:$0xff] %vm65_vm0, %v221_v35  ;;  %v378_v38 = vpop.permute.xlu0 %377  ;;  %v402_v39 = vpack.c.bf16 %v401_v37, %v400_v36  ;;  %v547_v41 = vld [vmem:[#allocation4] sm:$0xff] }
 0x2c9   :  { %383 = vst.msk [vmem:[#allocation5] sm:$0xff] %vm65_vm0, %v378_v38 }
 0x2ca   :  { %2813 = vmatmul.mubr.msk.bf16.vlgmr.msra.gmra.mxu0 %vm65_vm0, %v402_v39 }
 0x2cb   :  { %v380_v40 = vpop.permute.xlu1 %379  ;;  %v548_v42 = vld [vmem:[#allocation4 + $0x8] sm:$0xff]  ;;  %2825 = vmatpush3.bf16.msra.mxu0 %v3229_v1  ;;  %2828 = vmatprep.mubr.msk.bf16.mxu0 %vm3190_vm1, %v3189_v0 }
 0x2cc   :  { %384 = vst.msk [vmem:[#allocation5 + $0x8] sm:$0xff] %vm65_vm0, %v380_v40  ;;  %v549_v43 = vpack.c.bf16 %v548_v42, %v547_v41  ;;  %2826 = vmatprep.subr.bf16.mxu0 %v3189_v0  ;;  %v454_v7 = vld [vmem:[#allocation3] sm:$0xff] }
 0x2ce   :  { %2821 = vmatmul.mubr.msk.bf16.vlgmr.msra.gmra.mxu1 %vm65_vm0, %v549_v43 }
 0x2cf   :  { %2827 = vmatpush3.bf16.msra.mxu0 %v3260_v3  ;;  %2833 = vmatpush3.bf16.msra.mxu1 %v3250_v2  ;;  %v455_v8 = vld [vmem:[#allocation3 + $0x8] sm:$0xff] }
 0x2d0   :  { %2834 = vmatprep.subr.bf16.mxu1 %v3189_v0  ;;  %2836 = vmatprep.mubr.msk.bf16.mxu1 %vm3190_vm1, %v3189_v0  ;;  %v601_v9 = vld [vmem:[#allocation5] sm:$0xff] }
 0x2d1   :  { %2840 = vmatprep.subr.bf16.mxu0 %v3189_v0 }
 0x2d3   :  { %2835 = vmatpush3.bf16.msra.mxu1 %v3267_v4  ;;  %v602_v10 = vld [vmem:[#allocation5 + $0x8] sm:$0xff] }
 0x2d4   :  { %2848 = vmatprep.subr.bf16.mxu1 %v3189_v0 }
 0x38a   :  { %v440_v47 = vpop.f32.mrf.mxu0 }
 0x38b   :  { %v452_v48 = vadd.f32 %v2676_v45, %v440_v47 }
 0x38c   :  { %v2814_v51 = vpop.f32.mrf.mxu0 }
 0x38d   :  { %2961 = vtanh.f32 %v452_v48  ;;  %v2515_v11 = vmul.f32 -1.442695, %v452_v48 }
 0x38e   :  { %v443_v52 = vpop.f32.mrf.mxu0  ;;  %v587_v53 = vpop.f32.mrf.mxu1 }
 0x38f   :  { %v453_v54 = vadd.f32 %v2677_v49, %v443_v52  ;;  %v599_v55 = vadd.f32 %v2680_v50, %v587_v53 }
 0x390   :  { %v2815_v57 = vpop.f32.mrf.mxu0  ;;  %v2822_v58 = vpop.f32.mrf.mxu1 }
 0x391   :  { %2963 = vtanh.f32 %v453_v54  ;;  %v2516_v12 = vmul.f32 -1.442695, %v453_v54  ;;  %v2524_v13 = vmul.f32 -1.442695, %v599_v55 }
 0x392   :  { %2965 = vtanh.f32 %v599_v55  ;;  %v590_v59 = vpop.f32.mrf.mxu1 }
 0x393   :  { %v600_v60 = vadd.f32 %v2681_v56, %v590_v59 }
 0x394   :  { %v2823_v61 = vpop.f32.mrf.mxu1 }
 0x395   :  { %2967 = vtanh.f32 %v600_v60  ;;  %v2525_v14 = vmul.f32 -1.442695, %v600_v60 }
 0x396   :  { %2969 = vpow2.f32 %v2515_v11 }
 0x397   :  { %2971 = vpow2.f32 %v2516_v12 }
 0x398   :  { %2973 = vpow2.f32 %v2524_v13 }
 0x399   :  { %2975 = vpow2.f32 %v2525_v14 }
 0x39a   :  { %v2962_v62 = vpop.eup %2961 }
 0x39b   :  { %482 = vrot.lane.b32.xlu0 %v2962_v62, %s3191_s30 }
 0x39e   :  { %v2964_v63 = vpop.eup %2963 }
 0x39f   :  { %v2966_v5 = vpop.eup %2965  ;;  %484 = vrot.lane.b32.xlu1 %v2964_v63, %s3191_s30 }
 0x3a0   :  { %629 = vrot.lane.b32.xlu0 %v2966_v5, %s3191_s30 }
 0x3a2   :  { %v2968_v6 = vpop.eup %2967 }
 0x3a3   :  { %631 = vrot.lane.b32.xlu1 %v2968_v6, %s3191_s30  ;;  %v2970_v15 = vpop.eup %2969 }
 0x3a4   :  { %472 = vrot.lane.b32.xlu0 %v454_v7, %s3191_s30  ;;  %v462_v16 = vadd.f32 1.0, %v2970_v15  ;;  %v2972_v17 = vpop.eup %2971 }
 0x3a5   :  { %v2974_v18 = vpop.eup %2973  ;;  %v463_v19 = vadd.f32 1.0, %v2972_v17 }
 0x3a6   :  { %2977 = vrcp.f32 %v462_v16  ;;  %v2976_v20 = vpop.eup %2975  ;;  %v609_v21 = vadd.f32 1.0, %v2974_v18 }
 0x3a7   :  { %474 = vrot.lane.b32.xlu1 %v455_v8, %s3191_s30  ;;  %2979 = vrcp.f32 %v463_v19  ;;  %v610_v22 = vadd.f32 1.0, %v2976_v20 }
 0x3a8   :  { %619 = vrot.lane.b32.xlu0 %v601_v9, %s3191_s30  ;;  %2981 = vrcp.f32 %v609_v21 }
 0x3a9   :  { %2983 = vrcp.f32 %v610_v22  ;;  %v2733_v22 = vld [vmem:[%s4034_s0 + $0x10] sm:$0xff]  }
 0x3ab   :  { %621 = vrot.lane.b32.xlu1 %v602_v10, %s3191_s30 }
 0x3b3   :  { %v2978_v24 = vpop.eup %2977 }
 0x3b4   :  { %v2980_v30 = vpop.eup %2979 }
 0x3b5   :  { %v2982_v32 = vpop.eup %2981 }
 0x3b6   :  { %v2984_v36 = vpop.eup %2983 }
 0x40d   :  { %v483_v26 = vpop.permute.xlu0 %482 }
 0x40e   :  { %v488_v28 = vmul.f32 %v2978_v24, %v483_v26  ;;  %v2734_v26 = vld [vmem:[%s4035_s1 + $0x28] sm:$0xff]  }
 0x410   :  { %492 = vrot.lane.b32.xlu0 %v488_v28, %s3191_s30 }
 0x411   :  { %v485_v31 = vpop.permute.xlu1 %484 }
 0x412   :  { %v489_v33 = vmul.f32 %v2980_v30, %v485_v31  ;;  %v630_v34 = vpop.permute.xlu0 %629  ;;  %v2685_v31 = vunpack.c.h.bf16 %v2733_v22 }
 0x413   :  { %v635_v35 = vmul.f32 %v2982_v32, %v630_v34 }
 0x414   :  { %494 = vrot.lane.b32.xlu1 %v489_v33, %s3191_s30 }
 0x415   :  { %639 = vrot.lane.b32.xlu0 %v635_v35, %s3191_s30  ;;  %v632_v37 = vpop.permute.xlu1 %631 }
 0x416   :  { %v636_v38 = vmul.f32 %v2984_v36, %v632_v37  ;;  %v473_v39 = vpop.permute.xlu0 %472 }
 0x417   :  { %v478_v42 = vmul.f32 %v2978_v24, %v473_v39 }
 0x418   :  { %641 = vrot.lane.b32.xlu1 %v636_v38, %s3191_s30  ;;  %v2689_v38 = vunpack.c.h.bf16 %v2734_v26 }
 0x419   :  { %v475_v40 = vpop.permute.xlu1 %474 }
 0x41a   :  { %v620_v41 = vpop.permute.xlu0 %619  ;;  %v479_v46 = vmul.f32 %v2980_v30, %v475_v40 }
 0x41b   :  { %v625_v47 = vmul.f32 %v2982_v32, %v620_v41 }
 0x41d   :  { %v622_v43 = vpop.permute.xlu1 %621 }
 0x41e   :  { %v626_v52 = vmul.f32 %v2984_v36, %v622_v43 }
 0x482   :  { %v493_v44 = vpop.permute.xlu0 %492 }
 0x483   :  { %v498_v45 = vadd.f32 %v493_v44, %v478_v42 }
 0x485   :  { %2985 = vtanh.f32 %v498_v45 }
 0x486   :  { %v495_v48 = vpop.permute.xlu1 %494 }
 0x487   :  { %v499_v49 = vadd.f32 %v495_v48, %v479_v46  ;;  %v640_v50 = vpop.permute.xlu0 %639 }
 0x488   :  { %v645_v51 = vadd.f32 %v640_v50, %v625_v47 }
 0x489   :  { %2987 = vtanh.f32 %v499_v49 }
 0x48a   :  { %2989 = vtanh.f32 %v645_v51  ;;  %v642_v53 = vpop.permute.xlu1 %641 }
 0x48b   :  { %v646_v54 = vadd.f32 %v642_v53, %v626_v52 }
 0x48d   :  { %2991 = vtanh.f32 %v646_v54 }
 0x492   :  { %v2986_v55 = vpop.eup %2985 }
 0x493   :  { %504 = vrot.lane.b32.xlu0 %v2986_v55, %s3191_s30 }
 0x496   :  { %v2988_v56 = vpop.eup %2987 }
 0x497   :  { %v2990_v57 = vpop.eup %2989  ;;  %506 = vrot.lane.b32.xlu1 %v2988_v56, %s3191_s30 }
 0x498   :  { %651 = vrot.lane.b32.xlu0 %v2990_v57, %s3191_s30 }
 0x49a   :  { %v2992_v58 = vpop.eup %2991 }
 0x49b   :  { %653 = vrot.lane.b32.xlu1 %v2992_v58, %s3191_s30 }
 0x505   :  { %v505_v59 = vpop.permute.xlu0 %504 }
 0x506   :  { %v3374_v60 = vmul.f32 %v2978_v24, %v505_v59  ;;  %v2684_v24 = vunpack.c.l.bf16 %v2733_v22 }
 0x508   :  { %514 = vrot.lane.b32.xlu0 %v3374_v60, %s3192_s6 }
 0x509   :  { %v507_v61 = vpop.permute.xlu1 %506 }
 0x50a   :  { %v3378_v62 = vmul.f32 %v2980_v30, %v507_v61  ;;  %v652_v63 = vpop.permute.xlu0 %651 }
 0x50b   :  { %v3380_v5 = vmul.f32 %v2982_v32, %v652_v63  ;;  %v2688_v32 = vunpack.c.l.bf16 %v2734_v26 }
 0x50c   :  { %516 = vrot.lane.b32.xlu1 %v3378_v62, %s3192_s6 }
 0x50d   :  { %661 = vrot.lane.b32.xlu0 %v3380_v5, %s3192_s6  ;;  %v654_v6 = vpop.permute.xlu1 %653 }
 0x50e   :  { %v3386_v7 = vmul.f32 %v2984_v36, %v654_v6 }
 0x510   :  { %663 = vrot.lane.b32.xlu1 %v3386_v7, %s3192_s6 }
 0x511   :  { %524 = vrot.lane.b32.xlu0 %v498_v45, %s3193_s7 }
 0x514   :  { %526 = vrot.lane.b32.xlu1 %v499_v49, %s3193_s7 }
 0x515   :  { %671 = vrot.lane.b32.xlu0 %v645_v51, %s3193_s7 }
 0x518   :  { %673 = vrot.lane.b32.xlu1 %v646_v54, %s3193_s7 }
 0x57a   :  { %v515_v8 = vpop.permute.xlu0 %514 }
 0x57b   :  { %520 = vst.msk [vmem:[#allocation2] sm:$0xff] %vm65_vm0, %v515_v8 }
 0x57e   :  { %v517_v9 = vpop.permute.xlu1 %516 }
 0x57f   :  { %521 = vst.msk [vmem:[#allocation2 + $0x8] sm:$0xff] %vm65_vm0, %v517_v9  ;;  %v662_v10 = vpop.permute.xlu0 %661 }
 0x580   :  { %667 = vst.msk [vmem:[#allocation4] sm:$0xff] %vm65_vm0, %v662_v10 }
 0x582   :  { %v664_v11 = vpop.permute.xlu1 %663  ;;  %v694_v14 = vld [vmem:[#allocation2] sm:$0xff] }
 0x583   :  { %668 = vst.msk [vmem:[#allocation4 + $0x8] sm:$0xff] %vm65_vm0, %v664_v11  ;;  %v525_v12 = vpop.permute.xlu0 %524 }
 0x584   :  { %530 = vst.msk [vmem:[#allocation3] sm:$0xff] %vm65_vm0, %v525_v12 }
 0x586   :  { %v527_v13 = vpop.permute.xlu1 %526  ;;  %v695_v15 = vld [vmem:[#allocation2 + $0x8] sm:$0xff] }
 0x587   :  { %531 = vst.msk [vmem:[#allocation3 + $0x8] sm:$0xff] %vm65_vm0, %v527_v13  ;;  %v672_v16 = vpop.permute.xlu0 %671  ;;  %v696_v17 = vpack.c.bf16 %v695_v15, %v694_v14  ;;  %v841_v19 = vld [vmem:[#allocation4] sm:$0xff] }
 0x588   :  { %677 = vst.msk [vmem:[#allocation5] sm:$0xff] %vm65_vm0, %v672_v16 }
 0x589   :  { %2829 = vmatmul.mubr.msk.bf16.vlgmr.msra.gmra.mxu0 %vm65_vm0, %v696_v17 }
 0x58a   :  { %v674_v18 = vpop.permute.xlu1 %673  ;;  %v842_v20 = vld [vmem:[#allocation4 + $0x8] sm:$0xff]  ;;  %2841 = vmatpush3.bf16.msra.mxu0 %v3229_v1  ;;  %2844 = vmatprep.mubr.msk.bf16.mxu0 %vm3190_vm1, %v3189_v0 }
 0x58b   :  { %678 = vst.msk [vmem:[#allocation5 + $0x8] sm:$0xff] %vm65_vm0, %v674_v18  ;;  %v843_v21 = vpack.c.bf16 %v842_v20, %v841_v19  ;;  %2842 = vmatprep.subr.bf16.mxu0 %v3189_v0  ;;  %v748_v48 = vld [vmem:[#allocation3] sm:$0xff] }
 0x58d   :  { %2837 = vmatmul.mubr.msk.bf16.vlgmr.msra.gmra.mxu1 %vm65_vm0, %v843_v21 }
 0x58e   :  { %2843 = vmatpush3.bf16.msra.mxu0 %v3260_v3  ;;  %2849 = vmatpush3.bf16.msra.mxu1 %v3250_v2  ;;  %v749_v49 = vld [vmem:[#allocation3 + $0x8] sm:$0xff] }
 0x58f   :  { %2850 = vmatprep.subr.bf16.mxu1 %v3189_v0  ;;  %2852 = vmatprep.mubr.msk.bf16.mxu1 %vm3190_vm1, %v3189_v0  ;;  %v895_v50 = vld [vmem:[#allocation5] sm:$0xff] }
 0x590   :  { %2856 = vmatprep.subr.bf16.mxu0 %v3189_v0 }
 0x592   :  { %2851 = vmatpush3.bf16.msra.mxu1 %v3267_v4  ;;  %v896_v51 = vld [vmem:[#allocation5 + $0x8] sm:$0xff] }
 0x593   :  { %2864 = vmatprep.subr.bf16.mxu1 %v3189_v0 }
 0x649   :  { %v734_v28 = vpop.f32.mrf.mxu0 }
 0x64a   :  { %v746_v30 = vadd.f32 %v2684_v24, %v734_v28 }
 0x64b   :  { %v2830_v33 = vpop.f32.mrf.mxu0 }
 0x64c   :  { %2993 = vtanh.f32 %v746_v30  ;;  %v2533_v52 = vmul.f32 -1.442695, %v746_v30 }
 0x64d   :  { %v737_v34 = vpop.f32.mrf.mxu0  ;;  %v881_v35 = vpop.f32.mrf.mxu1 }
 0x64e   :  { %v747_v36 = vadd.f32 %v2685_v31, %v737_v34  ;;  %v893_v37 = vadd.f32 %v2688_v32, %v881_v35 }
 0x64f   :  { %v2831_v39 = vpop.f32.mrf.mxu0  ;;  %v2838_v40 = vpop.f32.mrf.mxu1 }
 0x650   :  { %2995 = vtanh.f32 %v747_v36  ;;  %v2534_v53 = vmul.f32 -1.442695, %v747_v36  ;;  %v2542_v54 = vmul.f32 -1.442695, %v893_v37 }
 0x651   :  { %2997 = vtanh.f32 %v893_v37  ;;  %v884_v41 = vpop.f32.mrf.mxu1 }
 0x652   :  { %v894_v42 = vadd.f32 %v2689_v38, %v884_v41 }
 0x653   :  { %v2839_v43 = vpop.f32.mrf.mxu1 }
 0x654   :  { %2999 = vtanh.f32 %v894_v42  ;;  %v2543_v55 = vmul.f32 -1.442695, %v894_v42 }
 0x655   :  { %3001 = vpow2.f32 %v2533_v52 }
 0x656   :  { %3003 = vpow2.f32 %v2534_v53 }
 0x657   :  { %3005 = vpow2.f32 %v2542_v54 }
 0x658   :  { %3007 = vpow2.f32 %v2543_v55 }
 0x659   :  { %v2994_v44 = vpop.eup %2993 }
 0x65a   :  { %776 = vrot.lane.b32.xlu0 %v2994_v44, %s3191_s30 }
 0x65d   :  { %v2996_v45 = vpop.eup %2995 }
 0x65e   :  { %v2998_v46 = vpop.eup %2997  ;;  %778 = vrot.lane.b32.xlu1 %v2996_v45, %s3191_s30 }
 0x65f   :  { %923 = vrot.lane.b32.xlu0 %v2998_v46, %s3191_s30 }
 0x661   :  { %v3000_v47 = vpop.eup %2999 }
 0x662   :  { %925 = vrot.lane.b32.xlu1 %v3000_v47, %s3191_s30  ;;  %v3002_v56 = vpop.eup %3001 }
 0x663   :  { %766 = vrot.lane.b32.xlu0 %v748_v48, %s3191_s30  ;;  %v756_v57 = vadd.f32 1.0, %v3002_v56  ;;  %v3004_v58 = vpop.eup %3003 }
 0x664   :  { %v3006_v59 = vpop.eup %3005  ;;  %v757_v61 = vadd.f32 1.0, %v3004_v58 }
 0x665   :  { %3009 = vrcp.f32 %v756_v57  ;;  %v3008_v63 = vpop.eup %3007  ;;  %v903_v6 = vadd.f32 1.0, %v3006_v59 }
 0x666   :  { %768 = vrot.lane.b32.xlu1 %v749_v49, %s3191_s30  ;;  %3011 = vrcp.f32 %v757_v61  ;;  %v904_v8 = vadd.f32 1.0, %v3008_v63 }
 0x667   :  { %913 = vrot.lane.b32.xlu0 %v895_v50, %s3191_s30  ;;  %3013 = vrcp.f32 %v903_v6 }
 0x668   :  { %3015 = vrcp.f32 %v904_v8 }
 0x66a   :  { %915 = vrot.lane.b32.xlu1 %v896_v51, %s3191_s30 }
 0x672   :  { %v3010_v9 = vpop.eup %3009 }
 0x673   :  { %v3012_v12 = vpop.eup %3011 }
 0x674   :  { %v3014_v14 = vpop.eup %3013 }
 0x675   :  { %v3016_v18 = vpop.eup %3015 }
 0x6cc   :  { %v777_v10 = vpop.permute.xlu0 %776 }
 0x6cd   :  { %v782_v11 = vmul.f32 %v3010_v9, %v777_v10 }
 0x6cf   :  { %786 = vrot.lane.b32.xlu0 %v782_v11, %s3191_s30 }
 0x6d0   :  { %v779_v13 = vpop.permute.xlu1 %778 }
 0x6d1   :  { %v783_v15 = vmul.f32 %v3012_v12, %v779_v13  ;;  %v924_v16 = vpop.permute.xlu0 %923 }
 0x6d2   :  { %v929_v17 = vmul.f32 %v3014_v14, %v924_v16 }
 0x6d3   :  { %788 = vrot.lane.b32.xlu1 %v783_v15, %s3191_s30 }
 0x6d4   :  { %933 = vrot.lane.b32.xlu0 %v929_v17, %s3191_s30  ;;  %v926_v19 = vpop.permute.xlu1 %925 }
 0x6d5   :  { %v930_v20 = vmul.f32 %v3016_v18, %v926_v19  ;;  %v767_v21 = vpop.permute.xlu0 %766 }
 0x6d6   :  { %v772_v26 = vmul.f32 %v3010_v9, %v767_v21 }
 0x6d7   :  { %935 = vrot.lane.b32.xlu1 %v930_v20, %s3191_s30 }
 0x6d8   :  { %v769_v22 = vpop.permute.xlu1 %768 }
 0x6d9   :  { %v914_v24 = vpop.permute.xlu0 %913  ;;  %v773_v32 = vmul.f32 %v3012_v12, %v769_v22 }
 0x6da   :  { %v919_v33 = vmul.f32 %v3014_v14, %v914_v24 }
 0x6dc   :  { %v916_v28 = vpop.permute.xlu1 %915 }
 0x6dd   :  { %v920_v38 = vmul.f32 %v3016_v18, %v916_v28 }
 0x741   :  { %v787_v30 = vpop.permute.xlu0 %786 }
 0x742   :  { %v792_v31 = vadd.f32 %v787_v30, %v772_v26 }
 0x744   :  { %3017 = vtanh.f32 %v792_v31 }
 0x745   :  { %v789_v34 = vpop.permute.xlu1 %788 }
 0x746   :  { %v793_v35 = vadd.f32 %v789_v34, %v773_v32  ;;  %v934_v36 = vpop.permute.xlu0 %933 }
 0x747   :  { %v939_v37 = vadd.f32 %v934_v36, %v919_v33 }
 0x748   :  { %3019 = vtanh.f32 %v793_v35 }
 0x749   :  { %3021 = vtanh.f32 %v939_v37  ;;  %v936_v39 = vpop.permute.xlu1 %935 }
 0x74a   :  { %v940_v40 = vadd.f32 %v936_v39, %v920_v38 }
 0x74c   :  { %3023 = vtanh.f32 %v940_v40 }
 0x751   :  { %v3018_v41 = vpop.eup %3017 }
 0x752   :  { %798 = vrot.lane.b32.xlu0 %v3018_v41, %s3191_s30 }
 0x755   :  { %v3020_v42 = vpop.eup %3019 }
 0x756   :  { %v3022_v43 = vpop.eup %3021  ;;  %800 = vrot.lane.b32.xlu1 %v3020_v42, %s3191_s30 }
 0x757   :  { %945 = vrot.lane.b32.xlu0 %v3022_v43, %s3191_s30 }
 0x759   :  { %v3024_v44 = vpop.eup %3023 }
 0x75a   :  { %947 = vrot.lane.b32.xlu1 %v3024_v44, %s3191_s30 }
 0x7c4   :  { %v799_v45 = vpop.permute.xlu0 %798 }
 0x7c5   :  { %v3438_v46 = vmul.f32 %v3010_v9, %v799_v45 }
 0x7c7   :  { %808 = vrot.lane.b32.xlu0 %v3438_v46, %s3192_s6 }
 0x7c8   :  { %v801_v47 = vpop.permute.xlu1 %800 }
 0x7c9   :  { %v3442_v48 = vmul.f32 %v3012_v12, %v801_v47  ;;  %v946_v49 = vpop.permute.xlu0 %945 }
 0x7ca   :  { %v3444_v50 = vmul.f32 %v3014_v14, %v946_v49 }
 0x7cb   :  { %810 = vrot.lane.b32.xlu1 %v3442_v48, %s3192_s6 }
 0x7cc   :  { %955 = vrot.lane.b32.xlu0 %v3444_v50, %s3192_s6  ;;  %v948_v51 = vpop.permute.xlu1 %947 }
 0x7cd   :  { %v3450_v52 = vmul.f32 %v3016_v18, %v948_v51 }
 0x7cf   :  { %957 = vrot.lane.b32.xlu1 %v3450_v52, %s3192_s6 }
 0x7d0   :  { %818 = vrot.lane.b32.xlu0 %v792_v31, %s3193_s7 }
 0x7d3   :  { %820 = vrot.lane.b32.xlu1 %v793_v35, %s3193_s7 }
 0x7d4   :  { %965 = vrot.lane.b32.xlu0 %v939_v37, %s3193_s7 }
 0x7d7   :  { %967 = vrot.lane.b32.xlu1 %v940_v40, %s3193_s7 }
 0x839   :  { %v809_v53 = vpop.permute.xlu0 %808 }
 0x83a   :  { %814 = vst.msk [vmem:[#allocation2] sm:$0xff] %vm65_vm0, %v809_v53 }
 0x83d   :  { %v811_v54 = vpop.permute.xlu1 %810 }
 0x83e   :  { %815 = vst.msk [vmem:[#allocation2 + $0x8] sm:$0xff] %vm65_vm0, %v811_v54  ;;  %v956_v55 = vpop.permute.xlu0 %955 }
 0x83f   :  { %961 = vst.msk [vmem:[#allocation4] sm:$0xff] %vm65_vm0, %v956_v55 }
 0x841   :  { %v958_v56 = vpop.permute.xlu1 %957  ;;  %v988_v59 = vld [vmem:[#allocation2] sm:$0xff] }
 0x842   :  { %962 = vst.msk [vmem:[#allocation4 + $0x8] sm:$0xff] %vm65_vm0, %v958_v56  ;;  %v819_v57 = vpop.permute.xlu0 %818 }
 0x843   :  { %824 = vst.msk [vmem:[#allocation3] sm:$0xff] %vm65_vm0, %v819_v57 }
 0x845   :  { %v821_v58 = vpop.permute.xlu1 %820  ;;  %v989_v61 = vld [vmem:[#allocation2 + $0x8] sm:$0xff] }
 0x846   :  { %825 = vst.msk [vmem:[#allocation3 + $0x8] sm:$0xff] %vm65_vm0, %v821_v58  ;;  %v966_v63 = vpop.permute.xlu0 %965  ;;  %v990_v6 = vpack.c.bf16 %v989_v61, %v988_v59  ;;  %v1135_v9 = vld [vmem:[#allocation4] sm:$0xff] }
 0x847   :  { %971 = vst.msk [vmem:[#allocation5] sm:$0xff] %vm65_vm0, %v966_v63 }
 0x848   :  { %2845 = vmatmul.mubr.msk.bf16.vlgmr.msra.gmra.mxu0 %vm65_vm0, %v990_v6 }
 0x849   :  { %v968_v8 = vpop.permute.xlu1 %967  ;;  %v1136_v10 = vld [vmem:[#allocation4 + $0x8] sm:$0xff]  ;;  %2857 = vmatpush3.bf16.msra.mxu0 %v3229_v1  ;;  %2860 = vmatprep.mubr.msk.bf16.mxu0 %vm3190_vm1, %v3189_v0  ;;  %v2735_v1 = vld [vmem:[%s4034_s0 + $0x18] sm:$0xff]  }
 0x84a   :  { %972 = vst.msk [vmem:[#allocation5 + $0x8] sm:$0xff] %vm65_vm0, %v968_v8  ;;  %v1137_v11 = vpack.c.bf16 %v1136_v10, %v1135_v9  ;;  %2858 = vmatprep.subr.bf16.mxu0 %v3189_v0  ;;  %v2692_v12 = vunpack.c.l.bf16 %v2735_v1  ;;  %v2693_v14 = vunpack.c.h.bf16 %v2735_v1  ;;  %v1042_v34 = vld [vmem:[#allocation3] sm:$0xff] }
 0x84c   :  { %2853 = vmatmul.mubr.msk.bf16.vlgmr.msra.gmra.mxu1 %vm65_vm0, %v1137_v11 }
 0x84d   :  { %2859 = vmatpush3.bf16.msra.mxu0 %v3260_v3  ;;  %2865 = vmatpush3.bf16.msra.mxu1 %v3250_v2  ;;  %v2736_v2 = vld [vmem:[%s4035_s1 + $0x20] sm:$0xff]   ;;  %v1043_v35 = vld [vmem:[#allocation3 + $0x8] sm:$0xff] }
 0x84e   :  { %2866 = vmatprep.subr.bf16.mxu1 %v3189_v0  ;;  %2868 = vmatprep.mubr.msk.bf16.mxu1 %vm3190_vm1, %v3189_v0  ;;  %v2696_v15 = vunpack.c.l.bf16 %v2736_v2  ;;  %v2697_v20 = vunpack.c.h.bf16 %v2736_v2  ;;  %v1189_v36 = vld [vmem:[#allocation5] sm:$0xff] }
 0x84f   :  { %2872 = vmatprep.subr.bf16.mxu0 %v3189_v0 }
 0x851   :  { %2867 = vmatpush3.bf16.msra.mxu1 %v3267_v4  ;;  %v1190_v37 = vld [vmem:[#allocation5 + $0x8] sm:$0xff] }
 0x852   :  { %2880 = vmatprep.subr.bf16.mxu1 %v3189_v0 }
 0x908   :  { %v1028_v3 = vpop.f32.mrf.mxu0 }
 0x909   :  { %v1040_v13 = vadd.f32 %v2692_v12, %v1028_v3 }
 0x90a   :  { %v2846_v16 = vpop.f32.mrf.mxu0 }
 0x90b   :  { %3025 = vtanh.f32 %v1040_v13  ;;  %v2551_v38 = vmul.f32 -1.442695, %v1040_v13 }
 0x90c   :  { %v1031_v17 = vpop.f32.mrf.mxu0  ;;  %v1175_v18 = vpop.f32.mrf.mxu1 }
 0x90d   :  { %v1041_v4 = vadd.f32 %v2693_v14, %v1031_v17  ;;  %v1187_v19 = vadd.f32 %v2696_v15, %v1175_v18 }
 0x90e   :  { %v2847_v21 = vpop.f32.mrf.mxu0  ;;  %v2854_v22 = vpop.f32.mrf.mxu1 }
 0x90f   :  { %3027 = vtanh.f32 %v1041_v4  ;;  %v2552_v39 = vmul.f32 -1.442695, %v1041_v4  ;;  %v2560_v40 = vmul.f32 -1.442695, %v1187_v19 }
 0x910   :  { %3029 = vtanh.f32 %v1187_v19  ;;  %v1178_v24 = vpop.f32.mrf.mxu1 }
 0x911   :  { %v1188_v26 = vadd.f32 %v2697_v20, %v1178_v24 }
 0x912   :  { %v2855_v28 = vpop.f32.mrf.mxu1 }
 0x913   :  { %3031 = vtanh.f32 %v1188_v26  ;;  %v2561_v41 = vmul.f32 -1.442695, %v1188_v26 }
 0x914   :  { %3033 = vpow2.f32 %v2551_v38 }
 0x915   :  { %3035 = vpow2.f32 %v2552_v39 }
 0x916   :  { %3037 = vpow2.f32 %v2560_v40 }
 0x917   :  { %3039 = vpow2.f32 %v2561_v41 }
 0x918   :  { %v3026_v30 = vpop.eup %3025 }
 0x919   :  { %1070 = vrot.lane.b32.xlu0 %v3026_v30, %s3191_s30 }
 0x91c   :  { %v3028_v31 = vpop.eup %3027 }
 0x91d   :  { %v3030_v32 = vpop.eup %3029  ;;  %1072 = vrot.lane.b32.xlu1 %v3028_v31, %s3191_s30 }
 0x91e   :  { %1217 = vrot.lane.b32.xlu0 %v3030_v32, %s3191_s30 }
 0x920   :  { %v3032_v33 = vpop.eup %3031 }
 0x921   :  { %1219 = vrot.lane.b32.xlu1 %v3032_v33, %s3191_s30  ;;  %v3034_v42 = vpop.eup %3033 }
 0x922   :  { %1060 = vrot.lane.b32.xlu0 %v1042_v34, %s3191_s30  ;;  %v1050_v43 = vadd.f32 1.0, %v3034_v42  ;;  %v3036_v44 = vpop.eup %3035 }
 0x923   :  { %v3038_v45 = vpop.eup %3037  ;;  %v1051_v47 = vadd.f32 1.0, %v3036_v44 }
 0x924   :  { %3041 = vrcp.f32 %v1050_v43  ;;  %v3040_v49 = vpop.eup %3039  ;;  %v1197_v51 = vadd.f32 1.0, %v3038_v45 }
 0x925   :  { %1062 = vrot.lane.b32.xlu1 %v1043_v35, %s3191_s30  ;;  %3043 = vrcp.f32 %v1051_v47  ;;  %v1198_v53 = vadd.f32 1.0, %v3040_v49 }
 0x926   :  { %1207 = vrot.lane.b32.xlu0 %v1189_v36, %s3191_s30  ;;  %3045 = vrcp.f32 %v1197_v51 }
 0x927   :  { %3047 = vrcp.f32 %v1198_v53 }
 0x929   :  { %1209 = vrot.lane.b32.xlu1 %v1190_v37, %s3191_s30 }
 0x931   :  { %v3042_v54 = vpop.eup %3041 }
 0x932   :  { %v3044_v57 = vpop.eup %3043 }
 0x933   :  { %v3046_v59 = vpop.eup %3045 }
 0x934   :  { %v3048_v8 = vpop.eup %3047 }
 0x98b   :  { %v1071_v55 = vpop.permute.xlu0 %1070 }
 0x98c   :  { %v1076_v56 = vmul.f32 %v3042_v54, %v1071_v55 }
 0x98e   :  { %1080 = vrot.lane.b32.xlu0 %v1076_v56, %s3191_s30  ;;  %v3533_v56 = vld [vmem:[%s4032_s2 + $0x8] sm:$0xff]  }
 0x98f   :  { %v1073_v58 = vpop.permute.xlu1 %1072 }
 0x990   :  { %v1077_v61 = vmul.f32 %v3044_v57, %v1073_v58  ;;  %v1218_v63 = vpop.permute.xlu0 %1217  ;;  %v3544_v58 = vld [vmem:[%s4032_s2] sm:$0xff]  }
 0x991   :  { %v1223_v6 = vmul.f32 %v3046_v59, %v1218_v63  ;;  %v2737_v63 = vld [vmem:[%s4034_s0 + $0x20] sm:$0xff]  }
 0x992   :  { %1082 = vrot.lane.b32.xlu1 %v1077_v61, %s3191_s30  ;;  %v3560_v61 = vld [vmem:[%s4033_s3] sm:$0xff]  }
 0x993   :  { %1227 = vrot.lane.b32.xlu0 %v1223_v6, %s3191_s30  ;;  %v1220_v9 = vpop.permute.xlu1 %1219  ;;  %v2700_v6 = vunpack.c.l.bf16 %v2737_v63 }
 0x994   :  { %v1224_v10 = vmul.f32 %v3048_v8, %v1220_v9  ;;  %v1061_v11 = vpop.permute.xlu0 %1060 }
 0x995   :  { %v1066_v2 = vmul.f32 %v3042_v54, %v1061_v11  ;;  %v2701_v11 = vunpack.c.h.bf16 %v2737_v63 }
 0x996   :  { %1229 = vrot.lane.b32.xlu1 %v1224_v10, %s3191_s30 }
 0x997   :  { %v1063_v1 = vpop.permute.xlu1 %1062 }
 0x998   :  { %v1208_v12 = vpop.permute.xlu0 %1207  ;;  %v1067_v15 = vmul.f32 %v3044_v57, %v1063_v1 }
 0x999   :  { %v1213_v16 = vmul.f32 %v3046_v59, %v1208_v12 }
 0x99b   :  { %v1210_v3 = vpop.permute.xlu1 %1209 }
 0x99c   :  { %v1214_v20 = vmul.f32 %v3048_v8, %v1210_v3 }
 0xa00   :  { %v1081_v13 = vpop.permute.xlu0 %1080 }
 0xa01   :  { %v1086_v14 = vadd.f32 %v1081_v13, %v1066_v2 }
 0xa03   :  { %3049 = vtanh.f32 %v1086_v14 }
 0xa04   :  { %v1083_v17 = vpop.permute.xlu1 %1082 }
 0xa05   :  { %v1087_v18 = vadd.f32 %v1083_v17, %v1067_v15  ;;  %v1228_v4 = vpop.permute.xlu0 %1227 }
 0xa06   :  { %v1233_v19 = vadd.f32 %v1228_v4, %v1213_v16 }
 0xa07   :  { %3051 = vtanh.f32 %v1087_v18 }
 0xa08   :  { %3053 = vtanh.f32 %v1233_v19  ;;  %v1230_v21 = vpop.permute.xlu1 %1229 }
 0xa09   :  { %v1234_v22 = vadd.f32 %v1230_v21, %v1214_v20 }
 0xa0b   :  { %3055 = vtanh.f32 %v1234_v22 }
 0xa10   :  { %v3050_v24 = vpop.eup %3049 }
 0xa11   :  { %1092 = vrot.lane.b32.xlu0 %v3050_v24, %s3191_s30 }
 0xa14   :  { %v3052_v26 = vpop.eup %3051 }
 0xa15   :  { %v3054_v28 = vpop.eup %3053  ;;  %1094 = vrot.lane.b32.xlu1 %v3052_v26, %s3191_s30 }
 0xa16   :  { %1239 = vrot.lane.b32.xlu0 %v3054_v28, %s3191_s30 }
 0xa18   :  { %v3056_v30 = vpop.eup %3055 }
 0xa19   :  { %1241 = vrot.lane.b32.xlu1 %v3056_v30, %s3191_s30 }
 0xa83   :  { %v1093_v31 = vpop.permute.xlu0 %1092 }
 0xa84   :  { %v3502_v32 = vmul.f32 %v3042_v54, %v1093_v31 }
 0xa86   :  { %1102 = vrot.lane.b32.xlu0 %v3502_v32, %s3192_s6 }
 0xa87   :  { %v1095_v33 = vpop.permute.xlu1 %1094 }
 0xa88   :  { %v3506_v34 = vmul.f32 %v3044_v57, %v1095_v33  ;;  %v1240_v35 = vpop.permute.xlu0 %1239 }
 0xa89   :  { %v3508_v36 = vmul.f32 %v3046_v59, %v1240_v35  ;;  %v3550_v59 = vld [vmem:[%s4033_s3 + $0x8] sm:$0xff]  }
 0xa8a   :  { %1104 = vrot.lane.b32.xlu1 %v3506_v34, %s3192_s6 }
 0xa8b   :  { %1249 = vrot.lane.b32.xlu0 %v3508_v36, %s3192_s6  ;;  %v1242_v37 = vpop.permute.xlu1 %1241 }
 0xa8c   :  { %v3514_v38 = vmul.f32 %v3048_v8, %v1242_v37  ;;  %v2738_v8 = vld [vmem:[%s4035_s1 + $0x18] sm:$0xff]  }
 0xa8d   :  { %v2704_v1 = vunpack.c.l.bf16 %v2738_v8  ;;  %v2705_v15 = vunpack.c.h.bf16 %v2738_v8 }
 0xa8e   :  { %1251 = vrot.lane.b32.xlu1 %v3514_v38, %s3192_s6 }
 0xa8f   :  { %1112 = vrot.lane.b32.xlu0 %v1086_v14, %s3193_s7 }
 0xa92   :  { %1114 = vrot.lane.b32.xlu1 %v1087_v18, %s3193_s7 }
 0xa93   :  { %1259 = vrot.lane.b32.xlu0 %v1233_v19, %s3193_s7 }
 0xa96   :  { %1261 = vrot.lane.b32.xlu1 %v1234_v22, %s3193_s7 }
 0xaf8   :  { %v1103_v39 = vpop.permute.xlu0 %1102 }
 0xaf9   :  { %1108 = vst.msk [vmem:[#allocation2] sm:$0xff] %vm65_vm0, %v1103_v39 }
 0xafc   :  { %v1105_v40 = vpop.permute.xlu1 %1104 }
 0xafd   :  { %1109 = vst.msk [vmem:[#allocation2 + $0x8] sm:$0xff] %vm65_vm0, %v1105_v40  ;;  %v1250_v41 = vpop.permute.xlu0 %1249 }
 0xafe   :  { %1255 = vst.msk [vmem:[#allocation4] sm:$0xff] %vm65_vm0, %v1250_v41 }
 0xb00   :  { %v1252_v42 = vpop.permute.xlu1 %1251  ;;  %v1282_v45 = vld [vmem:[#allocation2] sm:$0xff] }
 0xb01   :  { %1256 = vst.msk [vmem:[#allocation4 + $0x8] sm:$0xff] %vm65_vm0, %v1252_v42  ;;  %v1113_v43 = vpop.permute.xlu0 %1112 }
 0xb02   :  { %1118 = vst.msk [vmem:[#allocation3] sm:$0xff] %vm65_vm0, %v1113_v43 }
 0xb04   :  { %v1115_v44 = vpop.permute.xlu1 %1114  ;;  %v1283_v47 = vld [vmem:[#allocation2 + $0x8] sm:$0xff] }
 0xb05   :  { %1119 = vst.msk [vmem:[#allocation3 + $0x8] sm:$0xff] %vm65_vm0, %v1115_v44  ;;  %v1260_v49 = vpop.permute.xlu0 %1259  ;;  %v1284_v51 = vpack.c.bf16 %v1283_v47, %v1282_v45  ;;  %v1429_v54 = vld [vmem:[#allocation4] sm:$0xff] }
 0xb06   :  { %1265 = vst.msk [vmem:[#allocation5] sm:$0xff] %vm65_vm0, %v1260_v49 }
 0xb07   :  { %2861 = vmatmul.mubr.msk.bf16.vlgmr.msra.gmra.mxu0 %vm65_vm0, %v1284_v51 }
 0xb08   :  { %v1262_v53 = vpop.permute.xlu1 %1261  ;;  %v1430_v55 = vld [vmem:[#allocation4 + $0x8] sm:$0xff]  ;;  %2873 = vmatpush3.bf16.msra.mxu0 %v3533_v56  ;;  %2876 = vmatprep.mubr.msk.bf16.mxu0 %vm3190_vm1, %v3189_v0 }
 0xb09   :  { %1266 = vst.msk [vmem:[#allocation5 + $0x8] sm:$0xff] %vm65_vm0, %v1262_v53  ;;  %v1431_v57 = vpack.c.bf16 %v1430_v55, %v1429_v54  ;;  %2874 = vmatprep.subr.bf16.mxu0 %v3189_v0  ;;  %v1336_v26 = vld [vmem:[#allocation3] sm:$0xff] }
 0xb0b   :  { %2869 = vmatmul.mubr.msk.bf16.vlgmr.msra.gmra.mxu1 %vm65_vm0, %v1431_v57 }
 0xb0c   :  { %2875 = vmatpush3.bf16.msra.mxu0 %v3544_v58  ;;  %2881 = vmatpush3.bf16.msra.mxu1 %v3550_v59  ;;  %v1337_v28 = vld [vmem:[#allocation3 + $0x8] sm:$0xff] }
 0xb0d   :  { %2882 = vmatprep.subr.bf16.mxu1 %v3189_v0  ;;  %2884 = vmatprep.mubr.msk.bf16.mxu1 %vm3190_vm1, %v3189_v0  ;;  %v1483_v30 = vld [vmem:[#allocation5] sm:$0xff] }
 0xb0e   :  { %2888 = vmatprep.subr.bf16.mxu0 %v3189_v0 }
 0xb10   :  { %2883 = vmatpush3.bf16.msra.mxu1 %v3560_v61  ;;  %v1484_v31 = vld [vmem:[#allocation5 + $0x8] sm:$0xff] }
 0xb11   :  { %2896 = vmatprep.subr.bf16.mxu1 %v3189_v0 }
 0xbc7   :  { %v1322_v9 = vpop.f32.mrf.mxu0 }
 0xbc8   :  { %v1334_v10 = vadd.f32 %v2700_v6, %v1322_v9 }
 0xbc9   :  { %v2862_v12 = vpop.f32.mrf.mxu0 }
 0xbca   :  { %3057 = vtanh.f32 %v1334_v10  ;;  %v2569_v33 = vmul.f32 -1.442695, %v1334_v10 }
 0xbcb   :  { %v1325_v2 = vpop.f32.mrf.mxu0  ;;  %v1469_v3 = vpop.f32.mrf.mxu1 }
 0xbcc   :  { %v1335_v13 = vadd.f32 %v2701_v11, %v1325_v2  ;;  %v1481_v14 = vadd.f32 %v2704_v1, %v1469_v3 }
 0xbcd   :  { %v2863_v16 = vpop.f32.mrf.mxu0  ;;  %v2870_v17 = vpop.f32.mrf.mxu1 }
 0xbce   :  { %3059 = vtanh.f32 %v1335_v13  ;;  %v2570_v35 = vmul.f32 -1.442695, %v1335_v13  ;;  %v2578_v37 = vmul.f32 -1.442695, %v1481_v14 }
 0xbcf   :  { %3061 = vtanh.f32 %v1481_v14  ;;  %v1472_v18 = vpop.f32.mrf.mxu1 }
 0xbd0   :  { %v1482_v4 = vadd.f32 %v2705_v15, %v1472_v18 }
 0xbd1   :  { %v2871_v19 = vpop.f32.mrf.mxu1 }
 0xbd2   :  { %3063 = vtanh.f32 %v1482_v4  ;;  %v2579_v39 = vmul.f32 -1.442695, %v1482_v4 }
 0xbd3   :  { %3065 = vpow2.f32 %v2569_v33 }
 0xbd4   :  { %3067 = vpow2.f32 %v2570_v35 }
 0xbd5   :  { %3069 = vpow2.f32 %v2578_v37 }
 0xbd6   :  { %3071 = vpow2.f32 %v2579_v39 }
 0xbd7   :  { %v3058_v20 = vpop.eup %3057 }
 0xbd8   :  { %1364 = vrot.lane.b32.xlu0 %v3058_v20, %s3191_s30 }
 0xbdb   :  { %v3060_v21 = vpop.eup %3059 }
 0xbdc   :  { %v3062_v22 = vpop.eup %3061  ;;  %1366 = vrot.lane.b32.xlu1 %v3060_v21, %s3191_s30 }
 0xbdd   :  { %1511 = vrot.lane.b32.xlu0 %v3062_v22, %s3191_s30 }
 0xbdf   :  { %v3064_v24 = vpop.eup %3063 }
 0xbe0   :  { %1513 = vrot.lane.b32.xlu1 %v3064_v24, %s3191_s30  ;;  %v3066_v40 = vpop.eup %3065 }
 0xbe1   :  { %1354 = vrot.lane.b32.xlu0 %v1336_v26, %s3191_s30  ;;  %v1344_v41 = vadd.f32 1.0, %v3066_v40  ;;  %v3068_v42 = vpop.eup %3067 }
 0xbe2   :  { %v3070_v43 = vpop.eup %3069  ;;  %v1345_v44 = vadd.f32 1.0, %v3068_v42 }
 0xbe3   :  { %3073 = vrcp.f32 %v1344_v41  ;;  %v3072_v45 = vpop.eup %3071  ;;  %v1491_v47 = vadd.f32 1.0, %v3070_v43 }
 0xbe4   :  { %1356 = vrot.lane.b32.xlu1 %v1337_v28, %s3191_s30  ;;  %3075 = vrcp.f32 %v1345_v44  ;;  %v1492_v49 = vadd.f32 1.0, %v3072_v45 }
 0xbe5   :  { %1501 = vrot.lane.b32.xlu0 %v1483_v30, %s3191_s30  ;;  %3077 = vrcp.f32 %v1491_v47 }
 0xbe6   :  { %3079 = vrcp.f32 %v1492_v49 }
 0xbe8   :  { %1503 = vrot.lane.b32.xlu1 %v1484_v31, %s3191_s30 }
 0xbf0   :  { %v3074_v51 = vpop.eup %3073 }
 0xbf1   :  { %v3076_v55 = vpop.eup %3075 }
 0xbf2   :  { %v3078_v63 = vpop.eup %3077 }
 0xbf3   :  { %v3080_v10 = vpop.eup %3079 }
 0xc4a   :  { %v1365_v53 = vpop.permute.xlu0 %1364 }
 0xc4b   :  { %v1370_v54 = vmul.f32 %v3074_v51, %v1365_v53 }
 0xc4d   :  { %1374 = vrot.lane.b32.xlu0 %v1370_v54, %s3191_s30 }
 0xc4e   :  { %v1367_v57 = vpop.permute.xlu1 %1366 }
 0xc4f   :  { %v1371_v6 = vmul.f32 %v3076_v55, %v1367_v57  ;;  %v1512_v8 = vpop.permute.xlu0 %1511 }
 0xc50   :  { %v1517_v9 = vmul.f32 %v3078_v63, %v1512_v8 }
 0xc51   :  { %1376 = vrot.lane.b32.xlu1 %v1371_v6, %s3191_s30 }
 0xc52   :  { %1521 = vrot.lane.b32.xlu0 %v1517_v9, %s3191_s30  ;;  %v1514_v11 = vpop.permute.xlu1 %1513 }
 0xc53   :  { %v1518_v1 = vmul.f32 %v3080_v10, %v1514_v11  ;;  %v1355_v12 = vpop.permute.xlu0 %1354 }
 0xc54   :  { %v1360_v13 = vmul.f32 %v3074_v51, %v1355_v12 }
 0xc55   :  { %1523 = vrot.lane.b32.xlu1 %v1518_v1, %s3191_s30  ;;  %v2739_v1 = vld [vmem:[%s4034_s0 + $0x28] sm:$0xff]  }
 0xc56   :  { %v1357_v2 = vpop.permute.xlu1 %1356  ;;  %v2708_v12 = vunpack.c.l.bf16 %v2739_v1 }
 0xc57   :  { %v1502_v3 = vpop.permute.xlu0 %1501  ;;  %v1361_v17 = vmul.f32 %v3076_v55, %v1357_v2  ;;  %v2740_v2 = vld [vmem:[%s4035_s1 + $0x10] sm:$0xff]  }
 0xc58   :  { %v1507_v18 = vmul.f32 %v3078_v63, %v1502_v3 }
 0xc5a   :  { %v1504_v14 = vpop.permute.xlu1 %1503 }
 0xc5b   :  { %v1508_v22 = vmul.f32 %v3080_v10, %v1504_v14  ;;  %v2709_v14 = vunpack.c.h.bf16 %v2739_v1 }
 0xcbf   :  { %v1375_v15 = vpop.permute.xlu0 %1374 }
 0xcc0   :  { %v1380_v16 = vadd.f32 %v1375_v15, %v1360_v13  ;;  %v2712_v15 = vunpack.c.l.bf16 %v2740_v2 }
 0xcc2   :  { %3081 = vtanh.f32 %v1380_v16 }
 0xcc3   :  { %v1377_v4 = vpop.permute.xlu1 %1376 }
 0xcc4   :  { %v1381_v19 = vadd.f32 %v1377_v4, %v1361_v17  ;;  %v1522_v20 = vpop.permute.xlu0 %1521 }
 0xcc5   :  { %v1527_v21 = vadd.f32 %v1522_v20, %v1507_v18  ;;  %v2713_v20 = vunpack.c.h.bf16 %v2740_v2 }
 0xcc6   :  { %3083 = vtanh.f32 %v1381_v19 }
 0xcc7   :  { %3085 = vtanh.f32 %v1527_v21  ;;  %v1524_v24 = vpop.permute.xlu1 %1523 }
 0xcc8   :  { %v1528_v26 = vadd.f32 %v1524_v24, %v1508_v22 }
 0xcca   :  { %3087 = vtanh.f32 %v1528_v26 }
 0xccf   :  { %v3082_v28 = vpop.eup %3081 }
 0xcd0   :  { %1386 = vrot.lane.b32.xlu0 %v3082_v28, %s3191_s30 }
 0xcd3   :  { %v3084_v30 = vpop.eup %3083 }
 0xcd4   :  { %v3086_v31 = vpop.eup %3085  ;;  %1388 = vrot.lane.b32.xlu1 %v3084_v30, %s3191_s30 }
 0xcd5   :  { %1533 = vrot.lane.b32.xlu0 %v3086_v31, %s3191_s30 }
 0xcd7   :  { %v3088_v33 = vpop.eup %3087 }
 0xcd8   :  { %1535 = vrot.lane.b32.xlu1 %v3088_v33, %s3191_s30 }
 0xd42   :  { %v1387_v35 = vpop.permute.xlu0 %1386 }
 0xd43   :  { %v3586_v37 = vmul.f32 %v3074_v51, %v1387_v35 }
 0xd45   :  { %1396 = vrot.lane.b32.xlu0 %v3586_v37, %s3192_s6 }
 0xd46   :  { %v1389_v39 = vpop.permute.xlu1 %1388 }
 0xd47   :  { %v3590_v40 = vmul.f32 %v3076_v55, %v1389_v39  ;;  %v1534_v41 = vpop.permute.xlu0 %1533 }
 0xd48   :  { %v3592_v42 = vmul.f32 %v3078_v63, %v1534_v41 }
 0xd49   :  { %1398 = vrot.lane.b32.xlu1 %v3590_v40, %s3192_s6 }
 0xd4a   :  { %1543 = vrot.lane.b32.xlu0 %v3592_v42, %s3192_s6  ;;  %v1536_v43 = vpop.permute.xlu1 %1535 }
 0xd4b   :  { %v3598_v44 = vmul.f32 %v3080_v10, %v1536_v43 }
 0xd4d   :  { %1545 = vrot.lane.b32.xlu1 %v3598_v44, %s3192_s6 }
 0xd4e   :  { %1406 = vrot.lane.b32.xlu0 %v1380_v16, %s3193_s7 }
 0xd51   :  { %1408 = vrot.lane.b32.xlu1 %v1381_v19, %s3193_s7 }
 0xd52   :  { %1553 = vrot.lane.b32.xlu0 %v1527_v21, %s3193_s7 }
 0xd55   :  { %1555 = vrot.lane.b32.xlu1 %v1528_v26, %s3193_s7 }
 0xdb7   :  { %v1397_v45 = vpop.permute.xlu0 %1396 }
 0xdb8   :  { %1402 = vst.msk [vmem:[#allocation2] sm:$0xff] %vm65_vm0, %v1397_v45 }
 0xdbb   :  { %v1399_v47 = vpop.permute.xlu1 %1398 }
 0xdbc   :  { %1403 = vst.msk [vmem:[#allocation2 + $0x8] sm:$0xff] %vm65_vm0, %v1399_v47  ;;  %v1544_v49 = vpop.permute.xlu0 %1543 }
 0xdbd   :  { %1549 = vst.msk [vmem:[#allocation4] sm:$0xff] %vm65_vm0, %v1544_v49 }
 0xdbf   :  { %v1546_v51 = vpop.permute.xlu1 %1545  ;;  %v1576_v55 = vld [vmem:[#allocation2] sm:$0xff] }
 0xdc0   :  { %1550 = vst.msk [vmem:[#allocation4 + $0x8] sm:$0xff] %vm65_vm0, %v1546_v51  ;;  %v1407_v53 = vpop.permute.xlu0 %1406 }
 0xdc1   :  { %1412 = vst.msk [vmem:[#allocation3] sm:$0xff] %vm65_vm0, %v1407_v53 }
 0xdc3   :  { %v1409_v54 = vpop.permute.xlu1 %1408  ;;  %v1577_v57 = vld [vmem:[#allocation2 + $0x8] sm:$0xff] }
 0xdc4   :  { %1413 = vst.msk [vmem:[#allocation3 + $0x8] sm:$0xff] %vm65_vm0, %v1409_v54  ;;  %v1554_v63 = vpop.permute.xlu0 %1553  ;;  %v1578_v6 = vpack.c.bf16 %v1577_v57, %v1576_v55  ;;  %v1723_v9 = vld [vmem:[#allocation4] sm:$0xff] }
 0xdc5   :  { %1559 = vst.msk [vmem:[#allocation5] sm:$0xff] %vm65_vm0, %v1554_v63 }
 0xdc6   :  { %2877 = vmatmul.mubr.msk.bf16.vlgmr.msra.gmra.mxu0 %vm65_vm0, %v1578_v6 }
 0xdc7   :  { %v1556_v8 = vpop.permute.xlu1 %1555  ;;  %v1724_v10 = vld [vmem:[#allocation4 + $0x8] sm:$0xff]  ;;  %2889 = vmatpush3.bf16.msra.mxu0 %v3533_v56  ;;  %2892 = vmatprep.mubr.msk.bf16.mxu0 %vm3190_vm1, %v3189_v0 }
 0xdc8   :  { %1560 = vst.msk [vmem:[#allocation5 + $0x8] sm:$0xff] %vm65_vm0, %v1556_v8  ;;  %v1725_v11 = vpack.c.bf16 %v1724_v10, %v1723_v9  ;;  %2890 = vmatprep.subr.bf16.mxu0 %v3189_v0  ;;  %v1630_v39 = vld [vmem:[#allocation3] sm:$0xff] }
 0xdca   :  { %2885 = vmatmul.mubr.msk.bf16.vlgmr.msra.gmra.mxu1 %vm65_vm0, %v1725_v11 }
 0xdcb   :  { %2891 = vmatpush3.bf16.msra.mxu0 %v3544_v58  ;;  %2897 = vmatpush3.bf16.msra.mxu1 %v3550_v59  ;;  %v1631_v41 = vld [vmem:[#allocation3 + $0x8] sm:$0xff] }
 0xdcc   :  { %2898 = vmatprep.subr.bf16.mxu1 %v3189_v0  ;;  %2900 = vmatprep.mubr.msk.bf16.mxu1 %vm3190_vm1, %v3189_v0  ;;  %v1777_v43 = vld [vmem:[#allocation5] sm:$0xff] }
 0xdcd   :  { %2904 = vmatprep.subr.bf16.mxu0 %v3189_v0 }
 0xdcf   :  { %2899 = vmatpush3.bf16.msra.mxu1 %v3560_v61  ;;  %v1778_v45 = vld [vmem:[#allocation5 + $0x8] sm:$0xff] }
 0xdd0   :  { %2912 = vmatprep.subr.bf16.mxu1 %v3189_v0 }
 0xe86   :  { %v1616_v3 = vpop.f32.mrf.mxu0 }
 0xe87   :  { %v1628_v13 = vadd.f32 %v2708_v12, %v1616_v3 }
 0xe88   :  { %v2878_v16 = vpop.f32.mrf.mxu0 }
 0xe89   :  { %3089 = vtanh.f32 %v1628_v13  ;;  %v2587_v47 = vmul.f32 -1.442695, %v1628_v13 }
 0xe8a   :  { %v1619_v17 = vpop.f32.mrf.mxu0  ;;  %v1763_v18 = vpop.f32.mrf.mxu1 }
 0xe8b   :  { %v1629_v4 = vadd.f32 %v2709_v14, %v1619_v17  ;;  %v1775_v19 = vadd.f32 %v2712_v15, %v1763_v18 }
 0xe8c   :  { %v2879_v21 = vpop.f32.mrf.mxu0  ;;  %v2886_v22 = vpop.f32.mrf.mxu1 }
 0xe8d   :  { %3091 = vtanh.f32 %v1629_v4  ;;  %v2588_v49 = vmul.f32 -1.442695, %v1629_v4  ;;  %v2596_v51 = vmul.f32 -1.442695, %v1775_v19 }
 0xe8e   :  { %3093 = vtanh.f32 %v1775_v19  ;;  %v1766_v24 = vpop.f32.mrf.mxu1 }
 0xe8f   :  { %v1776_v26 = vadd.f32 %v2713_v20, %v1766_v24 }
 0xe90   :  { %v2887_v28 = vpop.f32.mrf.mxu1 }
 0xe91   :  { %3095 = vtanh.f32 %v1776_v26  ;;  %v2597_v53 = vmul.f32 -1.442695, %v1776_v26 }
 0xe92   :  { %3097 = vpow2.f32 %v2587_v47 }
 0xe93   :  { %3099 = vpow2.f32 %v2588_v49 }
 0xe94   :  { %3101 = vpow2.f32 %v2596_v51 }
 0xe95   :  { %3103 = vpow2.f32 %v2597_v53 }
 0xe96   :  { %v3090_v30 = vpop.eup %3089 }
 0xe97   :  { %1658 = vrot.lane.b32.xlu0 %v3090_v30, %s3191_s30 }
 0xe9a   :  { %v3092_v31 = vpop.eup %3091 }
 0xe9b   :  { %v3094_v33 = vpop.eup %3093  ;;  %1660 = vrot.lane.b32.xlu1 %v3092_v31, %s3191_s30 }
 0xe9c   :  { %1805 = vrot.lane.b32.xlu0 %v3094_v33, %s3191_s30 }
 0xe9e   :  { %v3096_v35 = vpop.eup %3095 }
 0xe9f   :  { %1807 = vrot.lane.b32.xlu1 %v3096_v35, %s3191_s30  ;;  %v3098_v54 = vpop.eup %3097 }
 0xea0   :  { %1648 = vrot.lane.b32.xlu0 %v1630_v39, %s3191_s30  ;;  %v1638_v55 = vadd.f32 1.0, %v3098_v54  ;;  %v3100_v57 = vpop.eup %3099 }
 0xea1   :  { %v3102_v63 = vpop.eup %3101  ;;  %v1639_v6 = vadd.f32 1.0, %v3100_v57 }
 0xea2   :  { %3105 = vrcp.f32 %v1638_v55  ;;  %v3104_v8 = vpop.eup %3103  ;;  %v1785_v9 = vadd.f32 1.0, %v3102_v63 }
 0xea3   :  { %1650 = vrot.lane.b32.xlu1 %v1631_v41, %s3191_s30  ;;  %3107 = vrcp.f32 %v1639_v6  ;;  %v1786_v10 = vadd.f32 1.0, %v3104_v8 }
 0xea4   :  { %1795 = vrot.lane.b32.xlu0 %v1777_v43, %s3191_s30  ;;  %3109 = vrcp.f32 %v1785_v9 }
 0xea5   :  { %3111 = vrcp.f32 %v1786_v10 }
 0xea7   :  { %1797 = vrot.lane.b32.xlu1 %v1778_v45, %s3191_s30 }
 0xeaf   :  { %v3106_v11 = vpop.eup %3105 }
 0xeb0   :  { %v3108_v2 = vpop.eup %3107 }
 0xeb1   :  { %v3110_v13 = vpop.eup %3109 }
 0xeb2   :  { %v3112_v17 = vpop.eup %3111 }
 0xf09   :  { %v1659_v1 = vpop.permute.xlu0 %1658 }
 0xf0a   :  { %v1664_v12 = vmul.f32 %v3106_v11, %v1659_v1 }
 0xf0c   :  { %1668 = vrot.lane.b32.xlu0 %v1664_v12, %s3191_s30 }
 0xf0d   :  { %v1661_v3 = vpop.permute.xlu1 %1660 }
 0xf0e   :  { %v1665_v14 = vmul.f32 %v3108_v2, %v1661_v3  ;;  %v1806_v15 = vpop.permute.xlu0 %1805 }
 0xf0f   :  { %v1811_v16 = vmul.f32 %v3110_v13, %v1806_v15 }
 0xf10   :  { %1670 = vrot.lane.b32.xlu1 %v1665_v14, %s3191_s30 }
 0xf11   :  { %1815 = vrot.lane.b32.xlu0 %v1811_v16, %s3191_s30  ;;  %v1808_v18 = vpop.permute.xlu1 %1807 }
 0xf12   :  { %v1812_v4 = vmul.f32 %v3112_v17, %v1808_v18  ;;  %v1649_v19 = vpop.permute.xlu0 %1648 }
 0xf13   :  { %v1654_v22 = vmul.f32 %v3106_v11, %v1649_v19 }
 0xf14   :  { %1817 = vrot.lane.b32.xlu1 %v1812_v4, %s3191_s30 }
 0xf15   :  { %v1651_v20 = vpop.permute.xlu1 %1650 }
 0xf16   :  { %v1796_v21 = vpop.permute.xlu0 %1795  ;;  %v1655_v30 = vmul.f32 %v3108_v2, %v1651_v20 }
 0xf17   :  { %v1801_v31 = vmul.f32 %v3110_v13, %v1796_v21 }
 0xf19   :  { %v1798_v24 = vpop.permute.xlu1 %1797 }
 0xf1a   :  { %v1802_v43 = vmul.f32 %v3112_v17, %v1798_v24  ;;  %v2742_v24 = vld [vmem:[%s4035_s1 + $0x8] sm:$0xff]  }
 0xf7e   :  { %v1669_v26 = vpop.permute.xlu0 %1668 }
 0xf7f   :  { %v1674_v28 = vadd.f32 %v1669_v26, %v1654_v22 }
 0xf81   :  { %3113 = vtanh.f32 %v1674_v28 }
 0xf82   :  { %v1671_v33 = vpop.permute.xlu1 %1670 }
 0xf83   :  { %v1675_v35 = vadd.f32 %v1671_v33, %v1655_v30  ;;  %v1816_v39 = vpop.permute.xlu0 %1815 }
 0xf84   :  { %v1821_v41 = vadd.f32 %v1816_v39, %v1801_v31 }
 0xf85   :  { %3115 = vtanh.f32 %v1675_v35 }
 0xf86   :  { %3117 = vtanh.f32 %v1821_v41  ;;  %v1818_v45 = vpop.permute.xlu1 %1817 }
 0xf87   :  { %v1822_v47 = vadd.f32 %v1818_v45, %v1802_v43 }
 0xf89   :  { %3119 = vtanh.f32 %v1822_v47 }
 0xf8e   :  { %v3114_v49 = vpop.eup %3113 }
 0xf8f   :  { %1680 = vrot.lane.b32.xlu0 %v3114_v49, %s3191_s30 }
 0xf92   :  { %v3116_v51 = vpop.eup %3115 }
 0xf93   :  { %v3118_v53 = vpop.eup %3117  ;;  %1682 = vrot.lane.b32.xlu1 %v3116_v51, %s3191_s30 }
 0xf94   :  { %1827 = vrot.lane.b32.xlu0 %v3118_v53, %s3191_s30 }
 0xf96   :  { %v3120_v54 = vpop.eup %3119 }
 0xf97   :  { %1829 = vrot.lane.b32.xlu1 %v3120_v54, %s3191_s30 }
0x1001   :  { %v1681_v55 = vpop.permute.xlu0 %1680 }
0x1002   :  { %v3650_v57 = vmul.f32 %v3106_v11, %v1681_v55 }
0x1004   :  { %1690 = vrot.lane.b32.xlu0 %v3650_v57, %s3192_s6 }
0x1005   :  { %v1683_v63 = vpop.permute.xlu1 %1682 }
0x1006   :  { %v3654_v6 = vmul.f32 %v3108_v2, %v1683_v63  ;;  %v1828_v8 = vpop.permute.xlu0 %1827 }
0x1007   :  { %v3656_v9 = vmul.f32 %v3110_v13, %v1828_v8 }
0x1008   :  { %1692 = vrot.lane.b32.xlu1 %v3654_v6, %s3192_s6 }
0x1009   :  { %1837 = vrot.lane.b32.xlu0 %v3656_v9, %s3192_s6  ;;  %v1830_v10 = vpop.permute.xlu1 %1829 }
0x100a   :  { %v3662_v1 = vmul.f32 %v3112_v17, %v1830_v10 }
0x100c   :  { %1839 = vrot.lane.b32.xlu1 %v3662_v1, %s3192_s6 }
0x100d   :  { %1700 = vrot.lane.b32.xlu0 %v1674_v28, %s3193_s7 }
0x1010   :  { %1702 = vrot.lane.b32.xlu1 %v1675_v35, %s3193_s7 }
0x1011   :  { %1847 = vrot.lane.b32.xlu0 %v1821_v41, %s3193_s7 }
0x1014   :  { %1849 = vrot.lane.b32.xlu1 %v1822_v47, %s3193_s7 }
0x1076   :  { %v1691_v11 = vpop.permute.xlu0 %1690 }
0x1077   :  { %1696 = vst.msk [vmem:[#allocation2] sm:$0xff] %vm65_vm0, %v1691_v11 }
0x107a   :  { %v1693_v12 = vpop.permute.xlu1 %1692 }
0x107b   :  { %1697 = vst.msk [vmem:[#allocation2 + $0x8] sm:$0xff] %vm65_vm0, %v1693_v12  ;;  %v1838_v2 = vpop.permute.xlu0 %1837 }
0x107c   :  { %1843 = vst.msk [vmem:[#allocation4] sm:$0xff] %vm65_vm0, %v1838_v2 }
0x107e   :  { %v1840_v3 = vpop.permute.xlu1 %1839  ;;  %v1870_v15 = vld [vmem:[#allocation2] sm:$0xff] }
0x107f   :  { %1844 = vst.msk [vmem:[#allocation4 + $0x8] sm:$0xff] %vm65_vm0, %v1840_v3  ;;  %v1701_v13 = vpop.permute.xlu0 %1700 }
0x1080   :  { %1706 = vst.msk [vmem:[#allocation3] sm:$0xff] %vm65_vm0, %v1701_v13 }
0x1082   :  { %v1703_v14 = vpop.permute.xlu1 %1702  ;;  %v1871_v16 = vld [vmem:[#allocation2 + $0x8] sm:$0xff] }
0x1083   :  { %1707 = vst.msk [vmem:[#allocation3 + $0x8] sm:$0xff] %vm65_vm0, %v1703_v14  ;;  %v1848_v17 = vpop.permute.xlu0 %1847  ;;  %v1872_v18 = vpack.c.bf16 %v1871_v16, %v1870_v15  ;;  %v2017_v19 = vld [vmem:[#allocation4] sm:$0xff] }
0x1084   :  { %1853 = vst.msk [vmem:[#allocation5] sm:$0xff] %vm65_vm0, %v1848_v17 }
0x1085   :  { %2893 = vmatmul.mubr.msk.bf16.vlgmr.msra.gmra.mxu0 %vm65_vm0, %v1872_v18 }
0x1086   :  { %v1850_v4 = vpop.permute.xlu1 %1849  ;;  %v2018_v20 = vld [vmem:[#allocation4 + $0x8] sm:$0xff]  ;;  %2905 = vmatpush3.bf16.msra.mxu0 %v3533_v56  ;;  %2908 = vmatprep.mubr.msk.bf16.mxu0 %vm3190_vm1, %v3189_v0  ;;  %v2741_v56 = vld [vmem:[%s4034_s0 + $0x30] sm:$0xff]  }
0x1087   :  { %1854 = vst.msk [vmem:[#allocation5 + $0x8] sm:$0xff] %vm65_vm0, %v1850_v4  ;;  %v2019_v21 = vpack.c.bf16 %v2018_v20, %v2017_v19  ;;  %2906 = vmatprep.subr.bf16.mxu0 %v3189_v0  ;;  %v2716_v22 = vunpack.c.l.bf16 %v2741_v56  ;;  %v2717_v28 = vunpack.c.h.bf16 %v2741_v56  ;;  %v1924_v55 = vld [vmem:[#allocation3] sm:$0xff] }
0x1089   :  { %2901 = vmatmul.mubr.msk.bf16.vlgmr.msra.gmra.mxu1 %vm65_vm0, %v2019_v21 }
0x108a   :  { %2907 = vmatpush3.bf16.msra.mxu0 %v3544_v58  ;;  %2913 = vmatpush3.bf16.msra.mxu1 %v3550_v59  ;;  %v2720_v59 = vunpack.c.l.bf16 %v2742_v24  ;;  %v1925_v63 = vld [vmem:[#allocation3 + $0x8] sm:$0xff] }
0x108b   :  { %2914 = vmatprep.subr.bf16.mxu1 %v3189_v0  ;;  %2916 = vmatprep.mubr.msk.bf16.mxu1 %vm3190_vm1, %v3189_v0  ;;  %v2071_v8 = vld [vmem:[#allocation5] sm:$0xff] }
0x108e   :  { %2915 = vmatpush3.bf16.msra.mxu1 %v3560_v61  ;;  %v2721_v61 = vunpack.c.h.bf16 %v2742_v24  ;;  %v2072_v10 = vld [vmem:[#allocation5 + $0x8] sm:$0xff] }
0x1145   :  { %v1910_v26 = vpop.f32.mrf.mxu0 }
0x1146   :  { %v1922_v58 = vadd.f32 %v2716_v22, %v1910_v26 }
0x1147   :  { %v2894_v30 = vpop.f32.mrf.mxu0 }
0x1148   :  { %3121 = vtanh.f32 %v1922_v58  ;;  %v2605_v11 = vmul.f32 -1.442695, %v1922_v58 }
0x1149   :  { %v1913_v31 = vpop.f32.mrf.mxu0  ;;  %v2057_v33 = vpop.f32.mrf.mxu1 }
0x114a   :  { %v1923_v0 = vadd.f32 %v2717_v28, %v1913_v31  ;;  %v2069_v35 = vadd.f32 %v2720_v59, %v2057_v33 }
0x114b   :  { %v2895_v39 = vpop.f32.mrf.mxu0  ;;  %v2902_v41 = vpop.f32.mrf.mxu1 }
0x114c   :  { %3123 = vtanh.f32 %v1923_v0  ;;  %v2606_v12 = vmul.f32 -1.442695, %v1923_v0  ;;  %v2614_v2 = vmul.f32 -1.442695, %v2069_v35 }
0x114d   :  { %3125 = vtanh.f32 %v2069_v35  ;;  %v2060_v43 = vpop.f32.mrf.mxu1 }
0x114e   :  { %v2070_v45 = vadd.f32 %v2721_v61, %v2060_v43 }
0x114f   :  { %v2903_v47 = vpop.f32.mrf.mxu1 }
0x1150   :  { %3127 = vtanh.f32 %v2070_v45  ;;  %v2615_v3 = vmul.f32 -1.442695, %v2070_v45 }
0x1151   :  { %3129 = vpow2.f32 %v2605_v11 }
0x1152   :  { %3131 = vpow2.f32 %v2606_v12 }
0x1153   :  { %3133 = vpow2.f32 %v2614_v2 }
0x1154   :  { %3135 = vpow2.f32 %v2615_v3 }
0x1155   :  { %v3122_v49 = vpop.eup %3121 }
0x1156   :  { %1952 = vrot.lane.b32.xlu0 %v3122_v49, %s3191_s30 }
0x1159   :  { %v3124_v51 = vpop.eup %3123 }
0x115a   :  { %v3126_v53 = vpop.eup %3125  ;;  %1954 = vrot.lane.b32.xlu1 %v3124_v51, %s3191_s30 }
0x115b   :  { %2099 = vrot.lane.b32.xlu0 %v3126_v53, %s3191_s30 }
0x115d   :  { %v3128_v54 = vpop.eup %3127 }
0x115e   :  { %2101 = vrot.lane.b32.xlu1 %v3128_v54, %s3191_s30  ;;  %v3130_v13 = vpop.eup %3129 }
0x115f   :  { %1942 = vrot.lane.b32.xlu0 %v1924_v55, %s3191_s30  ;;  %v1932_v14 = vadd.f32 1.0, %v3130_v13  ;;  %v3132_v15 = vpop.eup %3131 }
0x1160   :  { %v3134_v16 = vpop.eup %3133  ;;  %v1933_v17 = vadd.f32 1.0, %v3132_v15 }
0x1161   :  { %3137 = vrcp.f32 %v1932_v14  ;;  %v3136_v18 = vpop.eup %3135  ;;  %v2079_v4 = vadd.f32 1.0, %v3134_v16 }
0x1162   :  { %1944 = vrot.lane.b32.xlu1 %v1925_v63, %s3191_s30  ;;  %3139 = vrcp.f32 %v1933_v17  ;;  %v2080_v19 = vadd.f32 1.0, %v3136_v18 }
0x1163   :  { %2089 = vrot.lane.b32.xlu0 %v2071_v8, %s3191_s30  ;;  %3141 = vrcp.f32 %v2079_v4 }
0x1164   :  { %3143 = vrcp.f32 %v2080_v19 }
0x1166   :  { %2091 = vrot.lane.b32.xlu1 %v2072_v10, %s3191_s30 }
0x116e   :  { %v3138_v20 = vpop.eup %3137 }
0x116f   :  { %v3140_v22 = vpop.eup %3139 }
0x1170   :  { %v3142_v26 = vpop.eup %3141 }
0x1171   :  { %v3144_v30 = vpop.eup %3143 }
0x11c8   :  { %v1953_v21 = vpop.permute.xlu0 %1952 }
0x11c9   :  { %v1958_v56 = vmul.f32 %v3138_v20, %v1953_v21 }
0x11cb   :  { %1962 = vrot.lane.b32.xlu0 %v1958_v56, %s3191_s30 }
0x11cc   :  { %v1955_v24 = vpop.permute.xlu1 %1954 }
0x11cd   :  { %v1959_v58 = vmul.f32 %v3140_v22, %v1955_v24  ;;  %v2100_v28 = vpop.permute.xlu0 %2099 }
0x11ce   :  { %v2105_v59 = vmul.f32 %v3142_v26, %v2100_v28 }
0x11cf   :  { %1964 = vrot.lane.b32.xlu1 %v1959_v58, %s3191_s30 }
0x11d0   :  { %2109 = vrot.lane.b32.xlu0 %v2105_v59, %s3191_s30  ;;  %v2102_v31 = vpop.permute.xlu1 %2101 }
0x11d1   :  { %v2106_v33 = vmul.f32 %v3144_v30, %v2102_v31  ;;  %v1943_v0 = vpop.permute.xlu0 %1942 }
0x11d2   :  { %v1948_v39 = vmul.f32 %v3138_v20, %v1943_v0 }
0x11d3   :  { %2111 = vrot.lane.b32.xlu1 %v2106_v33, %s3191_s30 }
0x11d4   :  { %v1945_v35 = vpop.permute.xlu1 %1944 }
0x11d5   :  { %v2090_v61 = vpop.permute.xlu0 %2089  ;;  %v1949_v47 = vmul.f32 %v3140_v22, %v1945_v35 }
0x11d6   :  { %v2095_v49 = vmul.f32 %v3142_v26, %v2090_v61  ;;  %v2743_v61 = vld [vmem:[%s4034_s0 + $0x38] sm:$0xff]  }
0x11d8   :  { %v2092_v41 = vpop.permute.xlu1 %2091 }
0x11d9   :  { %v2096_v63 = vmul.f32 %v3144_v30, %v2092_v41  ;;  %v2727_v41 = vld [vmem:[%s4035_s1] sm:$0xff]  }
0x123d   :  { %v1963_v43 = vpop.permute.xlu0 %1962 }
0x123e   :  { %v1968_v45 = vadd.f32 %v1963_v43, %v1948_v39  ;;  %v2724_v39 = vunpack.c.l.bf16 %v2743_v61 }
0x1240   :  { %3145 = vtanh.f32 %v1968_v45 }
0x1241   :  { %v1965_v51 = vpop.permute.xlu1 %1964 }
0x1242   :  { %v1969_v53 = vadd.f32 %v1965_v51, %v1949_v47  ;;  %v2110_v54 = vpop.permute.xlu0 %2109  ;;  %v2725_v47 = vunpack.c.h.bf16 %v2743_v61 }
0x1243   :  { %v2115_v55 = vadd.f32 %v2110_v54, %v2095_v49  ;;  %v2728_v49 = vunpack.c.l.bf16 %v2727_v41 }
0x1244   :  { %3147 = vtanh.f32 %v1969_v53 }
0x1245   :  { %3149 = vtanh.f32 %v2115_v55  ;;  %v2112_v8 = vpop.permute.xlu1 %2111 }
0x1246   :  { %v2116_v10 = vadd.f32 %v2112_v8, %v2096_v63  ;;  %v2729_v8 = vunpack.c.h.bf16 %v2727_v41 }
0x1248   :  { %3151 = vtanh.f32 %v2116_v10 }
0x124d   :  { %v3146_v11 = vpop.eup %3145 }
0x124e   :  { %1974 = vrot.lane.b32.xlu0 %v3146_v11, %s3191_s30 }
0x1251   :  { %v3148_v12 = vpop.eup %3147 }
0x1252   :  { %v3150_v2 = vpop.eup %3149  ;;  %1976 = vrot.lane.b32.xlu1 %v3148_v12, %s3191_s30 }
0x1253   :  { %2121 = vrot.lane.b32.xlu0 %v3150_v2, %s3191_s30 }
0x1255   :  { %v3152_v3 = vpop.eup %3151 }
0x1256   :  { %2123 = vrot.lane.b32.xlu1 %v3152_v3, %s3191_s30 }
0x12c0   :  { %v1975_v13 = vpop.permute.xlu0 %1974 }
0x12c1   :  { %v3712_v14 = vmul.f32 %v3138_v20, %v1975_v13 }
0x12c3   :  { %1984 = vrot.lane.b32.xlu0 %v3712_v14, %s3192_s6 }
0x12c4   :  { %v1977_v15 = vpop.permute.xlu1 %1976 }
0x12c5   :  { %v3716_v16 = vmul.f32 %v3140_v22, %v1977_v15  ;;  %v2122_v17 = vpop.permute.xlu0 %2121 }
0x12c6   :  { %v3718_v18 = vmul.f32 %v3142_v26, %v2122_v17 }
0x12c7   :  { %1986 = vrot.lane.b32.xlu1 %v3716_v16, %s3192_s6 }
0x12c8   :  { %2131 = vrot.lane.b32.xlu0 %v3718_v18, %s3192_s6  ;;  %v2124_v4 = vpop.permute.xlu1 %2123 }
0x12c9   :  { %v3724_v19 = vmul.f32 %v3144_v30, %v2124_v4 }
0x12cb   :  { %2133 = vrot.lane.b32.xlu1 %v3724_v19, %s3192_s6 }
0x12cc   :  { %1994 = vrot.lane.b32.xlu0 %v1968_v45, %s3193_s7 }
0x12cf   :  { %1996 = vrot.lane.b32.xlu1 %v1969_v53, %s3193_s7 }
0x12d0   :  { %2141 = vrot.lane.b32.xlu0 %v2115_v55, %s3193_s7 }
0x12d3   :  { %2143 = vrot.lane.b32.xlu1 %v2116_v10, %s3193_s7 }
0x1335   :  { %v1985_v20 = vpop.permute.xlu0 %1984 }
0x1336   :  { %1990 = vst.msk [vmem:[#allocation2] sm:$0xff] %vm65_vm0, %v1985_v20 }
0x1339   :  { %v1987_v21 = vpop.permute.xlu1 %1986 }
0x133a   :  { %1991 = vst.msk [vmem:[#allocation2 + $0x8] sm:$0xff] %vm65_vm0, %v1987_v21  ;;  %v2132_v56 = vpop.permute.xlu0 %2131 }
0x133b   :  { %2137 = vst.msk [vmem:[#allocation4] sm:$0xff] %vm65_vm0, %v2132_v56 }
0x133d   :  { %v2134_v22 = vpop.permute.xlu1 %2133  ;;  %v2164_v58 = vld [vmem:[#allocation2] sm:$0xff] }
0x133e   :  { %2138 = vst.msk [vmem:[#allocation4 + $0x8] sm:$0xff] %vm65_vm0, %v2134_v22  ;;  %v1995_v24 = vpop.permute.xlu0 %1994 }
0x133f   :  { %2000 = vst.msk [vmem:[#allocation3] sm:$0xff] %vm65_vm0, %v1995_v24 }
0x1341   :  { %v1997_v26 = vpop.permute.xlu1 %1996  ;;  %v2165_v28 = vld [vmem:[#allocation2 + $0x8] sm:$0xff] }
0x1342   :  { %2001 = vst.msk [vmem:[#allocation3 + $0x8] sm:$0xff] %vm65_vm0, %v1997_v26  ;;  %v2142_v59 = vpop.permute.xlu0 %2141  ;;  %v2166_v30 = vpack.c.bf16 %v2165_v28, %v2164_v58  ;;  %v2311_v33 = vld [vmem:[#allocation4] sm:$0xff] }
0x1343   :  { %2147 = vst.msk [vmem:[#allocation5] sm:$0xff] %vm65_vm0, %v2142_v59 }
0x1344   :  { %2909 = vmatmul.mubr.msk.bf16.vlgmr.msra.gmra.mxu0 %vm65_vm0, %v2166_v30 }
0x1345   :  { %v2144_v31 = vpop.permute.xlu1 %2143  ;;  %v2312_v0 = vld [vmem:[#allocation4 + $0x8] sm:$0xff] }
0x1346   :  { %2148 = vst.msk [vmem:[#allocation5 + $0x8] sm:$0xff] %vm65_vm0, %v2144_v31  ;;  %v2313_v35 = vpack.c.bf16 %v2312_v0, %v2311_v33  ;;  %v2218_v20 = vld [vmem:[#allocation3] sm:$0xff] }
0x1348   :  { %2917 = vmatmul.mubr.msk.bf16.vlgmr.msra.gmra.mxu1 %vm65_vm0, %v2313_v35 }
0x1349   :  { %v2219_v21 = vld [vmem:[#allocation3 + $0x8] sm:$0xff] }
0x134a   :  { %v2364_v56 = vld [vmem:[#allocation5] sm:$0xff] }
0x134d   :  { %v2365_v22 = vld [vmem:[#allocation5 + $0x8] sm:$0xff] }
0x1404   :  { %v2204_v43 = vpop.f32.mrf.mxu0 }
0x1405   :  { %v2216_v45 = vadd.f32 %v2724_v39, %v2204_v43 }
0x1406   :  { %v2910_v51 = vpop.f32.mrf.mxu0 }
0x1407   :  { %3153 = vtanh.f32 %v2216_v45  ;;  %v2623_v24 = vmul.f32 -1.442695, %v2216_v45 }
0x1408   :  { %v2207_v53 = vpop.f32.mrf.mxu0  ;;  %v2351_v54 = vpop.f32.mrf.mxu1 }
0x1409   :  { %v2217_v55 = vadd.f32 %v2725_v47, %v2207_v53  ;;  %v2362_v63 = vadd.f32 %v2728_v49, %v2351_v54 }
0x140a   :  { %v2911_v10 = vpop.f32.mrf.mxu0  ;;  %v2918_v11 = vpop.f32.mrf.mxu1 }
0x140b   :  { %3155 = vtanh.f32 %v2217_v55  ;;  %v2624_v26 = vmul.f32 -1.442695, %v2217_v55  ;;  %v2630_v58 = vmul.f32 -1.442695, %v2362_v63  ;;  %v2634_v11 = vpack.c.bf16 %v3310_v23, %v3310_v23 }
0x140c   :  { %3157 = vtanh.f32 %v2362_v63  ;;  %v2354_v12 = vpop.f32.mrf.mxu1  ;;  %v2638_v23 = vpack.c.bf16 %v3374_v60, %v3374_v60 }
0x140d   :  { %v2363_v2 = vadd.f32 %v2729_v8, %v2354_v12  ;;  %v2635_v12 = vpack.c.bf16 %v3314_v25, %v3314_v25  ;;  %v2639_v25 = vpack.c.bf16 %v3378_v62, %v3378_v62 }
0x140e   :  { %v2919_v3 = vpop.f32.mrf.mxu1 }
0x140f   :  { %3159 = vtanh.f32 %v2363_v2  ;;  %v2631_v28 = vmul.f32 -1.442695, %v2363_v2  ;;  %v2636_v2 = vpack.c.bf16 %v3316_v27, %v3316_v27  ;;  %v2637_v3 = vpack.c.bf16 %v3322_v29, %v3322_v29 }
0x1410   :  { %3161 = vpow2.f32 %v2623_v24  ;;  %v2640_v27 = vpack.c.bf16 %v3380_v5, %v3380_v5  ;;  %v2641_v29 = vpack.c.bf16 %v3386_v7, %v3386_v7 }
0x1411   :  { %3163 = vpow2.f32 %v2624_v26 }
0x1412   :  { %3165 = vpow2.f32 %v2630_v58 }
0x1413   :  { %3167 = vpow2.f32 %v2631_v28 }
0x1414   :  { %v3154_v13 = vpop.eup %3153 }
0x1415   :  { %2246 = vrot.lane.b32.xlu0 %v3154_v13, %s3191_s30 }
0x1418   :  { %v3156_v15 = vpop.eup %3155 }
0x1419   :  { %v3158_v17 = vpop.eup %3157  ;;  %2248 = vrot.lane.b32.xlu1 %v3156_v15, %s3191_s30 }
0x141a   :  { %2392 = vrot.lane.b32.xlu0 %v3158_v17, %s3191_s30 }
0x141c   :  { %v3160_v4 = vpop.eup %3159 }
0x141d   :  { %2394 = vrot.lane.b32.xlu1 %v3160_v4, %s3191_s30  ;;  %v3162_v59 = vpop.eup %3161 }
0x141e   :  { %2236 = vrot.lane.b32.xlu0 %v2218_v20, %s3191_s30  ;;  %v2226_v30 = vadd.f32 1.0, %v3162_v59  ;;  %v3164_v31 = vpop.eup %3163 }
0x141f   :  { %v3166_v33 = vpop.eup %3165  ;;  %v2227_v0 = vadd.f32 1.0, %v3164_v31 }
0x1420   :  { %3169 = vrcp.f32 %v2226_v30  ;;  %v3168_v35 = vpop.eup %3167  ;;  %v2372_v61 = vadd.f32 1.0, %v3166_v33 }
0x1421   :  { %2238 = vrot.lane.b32.xlu1 %v2219_v21, %s3191_s30  ;;  %3171 = vrcp.f32 %v2227_v0  ;;  %v2373_v39 = vadd.f32 1.0, %v3168_v35 }
0x1422   :  { %2382 = vrot.lane.b32.xlu0 %v2364_v56, %s3191_s30  ;;  %3173 = vrcp.f32 %v2372_v61 }
0x1423   :  { %3175 = vrcp.f32 %v2373_v39 }
0x1425   :  { %2384 = vrot.lane.b32.xlu1 %v2365_v22, %s3191_s30 }
0x142d   :  { %v3756_v41 = vpop.eup %3169 }
0x142e   :  { %v3760_v47 = vpop.eup %3171 }
0x142f   :  { %v3762_v51 = vpop.eup %3173 }
0x1430   :  { %v3767_v63 = vpop.eup %3175 }
0x1487   :  { %v2247_v43 = vpop.permute.xlu0 %2246 }
0x1488   :  { %v2252_v45 = vmul.f32 %v3756_v41, %v2247_v43 }
0x148a   :  { %2256 = vrot.lane.b32.xlu0 %v2252_v45, %s3191_s30 }
0x148b   :  { %v2249_v49 = vpop.permute.xlu1 %2248 }
0x148c   :  { %v2253_v53 = vmul.f32 %v3760_v47, %v2249_v49  ;;  %v2393_v54 = vpop.permute.xlu0 %2392 }
0x148d   :  { %v2398_v55 = vmul.f32 %v3762_v51, %v2393_v54 }
0x148e   :  { %2258 = vrot.lane.b32.xlu1 %v2253_v53, %s3191_s30  ;;  %v2642_v53 = vpack.c.bf16 %v3438_v46, %v3438_v46  ;;  %v2645_v46 = vpack.c.bf16 %v3450_v52, %v3450_v52  ;;  %v2649_v52 = vpack.c.bf16 %v3514_v38, %v3514_v38  ;;  %v2653_v38 = vpack.c.bf16 %v3598_v44, %v3598_v44 }
0x148f   :  { %2402 = vrot.lane.b32.xlu0 %v2398_v55, %s3191_s30  ;;  %v2395_v8 = vpop.permute.xlu1 %2394  ;;  %v2643_v55 = vpack.c.bf16 %v3442_v48, %v3442_v48  ;;  %v2647_v48 = vpack.c.bf16 %v3506_v34, %v3506_v34  ;;  %v2651_v34 = vpack.c.bf16 %v3590_v40, %v3590_v40  ;;  %v2655_v40 = vpack.c.bf16 %v3654_v6, %v3654_v6 }
0x1490   :  { %v2399_v10 = vmul.f32 %v3767_v63, %v2395_v8  ;;  %v2237_v60 = vpop.permute.xlu0 %2236  ;;  %v2644_v8 = vpack.c.bf16 %v3444_v50, %v3444_v50  ;;  %v2648_v50 = vpack.c.bf16 %v3508_v36, %v3508_v36  ;;  %v2652_v36 = vpack.c.bf16 %v3592_v42, %v3592_v42 }
0x1491   :  { %v2242_v17 = vmul.f32 %v3756_v41, %v2237_v60  ;;  %v2656_v42 = vpack.c.bf16 %v3656_v9, %v3656_v9  ;;  %v2657_v44 = vpack.c.bf16 %v3662_v1, %v3662_v1  ;;  %v2659_v6 = vpack.c.bf16 %v3716_v16, %v3716_v16 }
0x1492   :  { %2404 = vrot.lane.b32.xlu1 %v2399_v10, %s3191_s30  ;;  %v2646_v10 = vpack.c.bf16 %v3502_v32, %v3502_v32  ;;  %v2650_v32 = vpack.c.bf16 %v3586_v37, %v3586_v37  ;;  %v2654_v37 = vpack.c.bf16 %v3650_v57, %v3650_v57  ;;  %v2658_v57 = vpack.c.bf16 %v3712_v14, %v3712_v14 }
0x1493   :  { %232 = vrot.lane.b32.xlu0 %v2634_v11, %s3192_s6  ;;  %v2239_v13 = vpop.permute.xlu1 %2238  ;;  %v2660_v9 = vpack.c.bf16 %v3718_v18, %v3718_v18  ;;  %v2661_v1 = vpack.c.bf16 %v3724_v19, %v3724_v19 }
0x1494   :  { %v2383_v15 = vpop.permute.xlu0 %2382  ;;  %v2243_v5 = vmul.f32 %v3760_v47, %v2239_v13 }
0x1495   :  { %v2388_v21 = vmul.f32 %v3762_v51, %v2383_v15 }
0x1496   :  { %234 = vrot.lane.b32.xlu1 %v2635_v12, %s3192_s6 }
0x1497   :  { %391 = vrot.lane.b32.xlu0 %v2636_v2, %s3192_s6  ;;  %v2385_v4 = vpop.permute.xlu1 %2384 }
0x1498   :  { %v2389_v26 = vmul.f32 %v3767_v63, %v2385_v4 }
0x149a   :  { %393 = vrot.lane.b32.xlu1 %v2637_v3, %s3192_s6 }
0x149b   :  { %538 = vrot.lane.b32.xlu0 %v2638_v23, %s3192_s6 }
0x149e   :  { %540 = vrot.lane.b32.xlu1 %v2639_v25, %s3192_s6 }
0x149f   :  { %685 = vrot.lane.b32.xlu0 %v2640_v27, %s3192_s6 }
0x14a2   :  { %687 = vrot.lane.b32.xlu1 %v2641_v29, %s3192_s6 }
0x14fc   :  { %v2257_v20 = vpop.permute.xlu0 %2256 }
0x14fd   :  { %v3797_v62 = vadd.f32 %v2257_v20, %v2242_v17 }
0x14ff   :  { %3177 = vtanh.f32 %v3797_v62 }
0x1500   :  { %v2259_v56 = vpop.permute.xlu1 %2258 }
0x1501   :  { %v3802_v22 = vadd.f32 %v2259_v56, %v2243_v5  ;;  %v2403_v7 = vpop.permute.xlu0 %2402 }
0x1502   :  { %v3804_v24 = vadd.f32 %v2403_v7, %v2388_v21 }
0x1503   :  { %3179 = vtanh.f32 %v3802_v22 }
0x1504   :  { %3181 = vtanh.f32 %v3804_v24  ;;  %v2405_v58 = vpop.permute.xlu1 %2404 }
0x1505   :  { %v3809_v28 = vadd.f32 %v2405_v58, %v2389_v26  ;;  %v233_v59 = vpop.permute.xlu0 %232 }
0x1506   :  { %239 = vst.msk [vmem:[%s4036_s4] sm:$0xf] %vm238_vm2, %v233_v59 }
0x1507   :  { %3183 = vtanh.f32 %v3809_v28 }
0x1508   :  { %v235_v30 = vpop.permute.xlu1 %234 }
0x1509   :  { %240 = vst.msk [vmem:[%s4036_s4 + $0x4] sm:$0xf] %vm238_vm2, %v235_v30  ;;  %v392_v31 = vpop.permute.xlu0 %391 }
0x150a   :  { %2510 = vst.msk [vmem:[%s4037_s5 + $0x38] sm:$0xf] %vm238_vm2, %v392_v31 }
0x150c   :  { %v3178_v33 = vpop.eup %3177  ;;  %v394_v0 = vpop.permute.xlu1 %393 }
0x150d   :  { %2511 = vst.msk [vmem:[%s4037_s5 + $0x3c] sm:$0xf] %vm238_vm2, %v394_v0  ;;  %v539_v35 = vpop.permute.xlu0 %538  ;;  %2268 = vrot.lane.b32.xlu0 %v3178_v33, %s3191_s30 }
0x150e   :  { %2519 = vst.msk [vmem:[%s4036_s4 + $0x8] sm:$0xf] %vm238_vm2, %v539_v35 }
0x1510   :  { %v3180_v61 = vpop.eup %3179  ;;  %v541_v39 = vpop.permute.xlu1 %540 }
0x1511   :  { %v3182_v43 = vpop.eup %3181  ;;  %2520 = vst.msk [vmem:[%s4036_s4 + $0xc] sm:$0xf] %vm238_vm2, %v541_v39  ;;  %v686_v45 = vpop.permute.xlu0 %685  ;;  %2270 = vrot.lane.b32.xlu1 %v3180_v61, %s3191_s30 }
0x1512   :  { %2528 = vst.msk [vmem:[%s4037_s5 + $0x30] sm:$0xf] %vm238_vm2, %v686_v45  ;;  %2414 = vrot.lane.b32.xlu0 %v3182_v43, %s3191_s30 }
0x1514   :  { %v3184_v49 = vpop.eup %3183  ;;  %v688_v54 = vpop.permute.xlu1 %687 }
0x1515   :  { %2529 = vst.msk [vmem:[%s4037_s5 + $0x34] sm:$0xf] %vm238_vm2, %v688_v54  ;;  %2416 = vrot.lane.b32.xlu1 %v3184_v49, %s3191_s30 }
0x1516   :  { %832 = vrot.lane.b32.xlu0 %v2642_v53, %s3192_s6 }
0x1519   :  { %834 = vrot.lane.b32.xlu1 %v2643_v55, %s3192_s6 }
0x151a   :  { %979 = vrot.lane.b32.xlu0 %v2644_v8, %s3192_s6 }
0x151d   :  { %981 = vrot.lane.b32.xlu1 %v2645_v46, %s3192_s6 }
0x151e   :  { %1126 = vrot.lane.b32.xlu0 %v2646_v10, %s3192_s6 }
0x1521   :  { %1128 = vrot.lane.b32.xlu1 %v2647_v48, %s3192_s6 }
0x1522   :  { %1273 = vrot.lane.b32.xlu0 %v2648_v50, %s3192_s6 }
0x1525   :  { %1275 = vrot.lane.b32.xlu1 %v2649_v52, %s3192_s6 }
0x1526   :  { %1420 = vrot.lane.b32.xlu0 %v2650_v32, %s3192_s6 }
0x1529   :  { %1422 = vrot.lane.b32.xlu1 %v2651_v34, %s3192_s6 }
0x152a   :  { %1567 = vrot.lane.b32.xlu0 %v2652_v36, %s3192_s6 }
0x152d   :  { %1569 = vrot.lane.b32.xlu1 %v2653_v38, %s3192_s6 }
0x152e   :  { %1714 = vrot.lane.b32.xlu0 %v2654_v37, %s3192_s6 }
0x1531   :  { %1716 = vrot.lane.b32.xlu1 %v2655_v40, %s3192_s6 }
0x1532   :  { %1861 = vrot.lane.b32.xlu0 %v2656_v42, %s3192_s6 }
0x1535   :  { %1863 = vrot.lane.b32.xlu1 %v2657_v44, %s3192_s6 }
0x1536   :  { %2008 = vrot.lane.b32.xlu0 %v2658_v57, %s3192_s6 }
0x1539   :  { %2010 = vrot.lane.b32.xlu1 %v2659_v6, %s3192_s6 }
0x153a   :  { %2155 = vrot.lane.b32.xlu0 %v2660_v9, %s3192_s6 }
0x153d   :  { %2157 = vrot.lane.b32.xlu1 %v2661_v1, %s3192_s6 }
0x153e   :  { %2288 = vrot.lane.b32.xlu0 %v3797_v62, %s3193_s7 }
0x1541   :  { %2290 = vrot.lane.b32.xlu1 %v3802_v22, %s3193_s7 }
0x1542   :  { %2434 = vrot.lane.b32.xlu0 %v3804_v24, %s3193_s7 }
0x1545   :  { %2436 = vrot.lane.b32.xlu1 %v3809_v28, %s3193_s7 }
0x157f   :  { %v2269_v14 = vpop.permute.xlu0 %2268 }
0x1580   :  { %v2274_v16 = vmul.f32 %v3756_v41, %v2269_v14 }
0x1582   :  { %2278 = vrot.lane.b32.xlu0 %v2274_v16, %s3192_s6  ;;  %v2662_v25 = vpack.c.bf16 %v2274_v16, %v2274_v16 }
0x1583   :  { %v2271_v18 = vpop.permute.xlu1 %2270 }
0x1584   :  { %v2275_v19 = vmul.f32 %v3760_v47, %v2271_v18  ;;  %v2415_v11 = vpop.permute.xlu0 %2414 }
0x1585   :  { %v2420_v12 = vmul.f32 %v3762_v51, %v2415_v11 }
0x1586   :  { %2280 = vrot.lane.b32.xlu1 %v2275_v19, %s3192_s6  ;;  %v2663_v47 = vpack.c.bf16 %v2275_v19, %v2275_v19 }
0x1587   :  { %2424 = vrot.lane.b32.xlu0 %v2420_v12, %s3192_s6  ;;  %v2417_v2 = vpop.permute.xlu1 %2416 }
0x1588   :  { %v2421_v3 = vmul.f32 %v3767_v63, %v2417_v2  ;;  %v833_v23 = vpop.permute.xlu0 %832  ;;  %v2664_v63 = vpack.c.bf16 %v2420_v12, %v2420_v12 }
0x1589   :  { %2537 = vst.msk [vmem:[%s4036_s4 + $0x10] sm:$0xf] %vm238_vm2, %v833_v23 }
0x158a   :  { %2426 = vrot.lane.b32.xlu1 %v2421_v3, %s3192_s6  ;;  %v2665_v29 = vpack.c.bf16 %v2421_v3, %v2421_v3 }
0x158b   :  { %2302 = vrot.lane.b32.xlu0 %v2662_v25, %s3192_s6  ;;  %v835_v41 = vpop.permute.xlu1 %834 }
0x158c   :  { %2538 = vst.msk [vmem:[%s4036_s4 + $0x14] sm:$0xf] %vm238_vm2, %v835_v41  ;;  %v980_v51 = vpop.permute.xlu0 %979 }
0x158d   :  { %2546 = vst.msk [vmem:[%s4037_s5 + $0x28] sm:$0xf] %vm238_vm2, %v980_v51 }
0x158e   :  { %2304 = vrot.lane.b32.xlu1 %v2663_v47, %s3192_s6 }
0x158f   :  { %2448 = vrot.lane.b32.xlu0 %v2664_v63, %s3192_s6  ;;  %v982_v27 = vpop.permute.xlu1 %981 }
0x1590   :  { %2547 = vst.msk [vmem:[%s4037_s5 + $0x2c] sm:$0xf] %vm238_vm2, %v982_v27  ;;  %v1127_v60 = vpop.permute.xlu0 %1126 }
0x1591   :  { %2555 = vst.msk [vmem:[%s4036_s4 + $0x18] sm:$0xf] %vm238_vm2, %v1127_v60 }
0x1592   :  { %2450 = vrot.lane.b32.xlu1 %v2665_v29, %s3192_s6 }
0x1593   :  { %v1129_v13 = vpop.permute.xlu1 %1128 }
0x1594   :  { %2556 = vst.msk [vmem:[%s4036_s4 + $0x1c] sm:$0xf] %vm238_vm2, %v1129_v13  ;;  %v1274_v15 = vpop.permute.xlu0 %1273 }
0x1595   :  { %2564 = vst.msk [vmem:[%s4037_s5 + $0x20] sm:$0xf] %vm238_vm2, %v1274_v15 }
0x1597   :  { %v1276_v17 = vpop.permute.xlu1 %1275 }
0x1598   :  { %2565 = vst.msk [vmem:[%s4037_s5 + $0x24] sm:$0xf] %vm238_vm2, %v1276_v17  ;;  %v1421_v4 = vpop.permute.xlu0 %1420 }
0x1599   :  { %2573 = vst.msk [vmem:[%s4036_s4 + $0x20] sm:$0xf] %vm238_vm2, %v1421_v4 }
0x159b   :  { %v1423_v20 = vpop.permute.xlu1 %1422 }
0x159c   :  { %2574 = vst.msk [vmem:[%s4036_s4 + $0x24] sm:$0xf] %vm238_vm2, %v1423_v20  ;;  %v1568_v62 = vpop.permute.xlu0 %1567 }
0x159d   :  { %2582 = vst.msk [vmem:[%s4037_s5 + $0x18] sm:$0xf] %vm238_vm2, %v1568_v62 }
0x159f   :  { %v1570_v5 = vpop.permute.xlu1 %1569 }
0x15a0   :  { %2583 = vst.msk [vmem:[%s4037_s5 + $0x1c] sm:$0xf] %vm238_vm2, %v1570_v5  ;;  %v1715_v21 = vpop.permute.xlu0 %1714 }
0x15a1   :  { %2591 = vst.msk [vmem:[%s4036_s4 + $0x28] sm:$0xf] %vm238_vm2, %v1715_v21 }
0x15a3   :  { %v1717_v56 = vpop.permute.xlu1 %1716 }
0x15a4   :  { %2592 = vst.msk [vmem:[%s4036_s4 + $0x2c] sm:$0xf] %vm238_vm2, %v1717_v56  ;;  %v1862_v22 = vpop.permute.xlu0 %1861 }
0x15a5   :  { %2600 = vst.msk [vmem:[%s4037_s5 + $0x10] sm:$0xf] %vm238_vm2, %v1862_v22 }
0x15a7   :  { %v1864_v7 = vpop.permute.xlu1 %1863 }
0x15a8   :  { %2601 = vst.msk [vmem:[%s4037_s5 + $0x14] sm:$0xf] %vm238_vm2, %v1864_v7  ;;  %v2009_v24 = vpop.permute.xlu0 %2008 }
0x15a9   :  { %2609 = vst.msk [vmem:[%s4036_s4 + $0x30] sm:$0xf] %vm238_vm2, %v2009_v24 }
0x15ab   :  { %v2011_v26 = vpop.permute.xlu1 %2010 }
0x15ac   :  { %2610 = vst.msk [vmem:[%s4036_s4 + $0x34] sm:$0xf] %vm238_vm2, %v2011_v26  ;;  %v2156_v58 = vpop.permute.xlu0 %2155 }
0x15ad   :  { %2618 = vst.msk [vmem:[%s4037_s5 + $0x8] sm:$0xf] %vm238_vm2, %v2156_v58 }
0x15af   :  { %v2158_v28 = vpop.permute.xlu1 %2157 }
0x15b0   :  { %2619 = vst.msk [vmem:[%s4037_s5 + $0xc] sm:$0xf] %vm238_vm2, %v2158_v28  ;;  %v2289_v59 = vpop.permute.xlu0 %2288 }
0x15b1   :  { %2294 = vst.msk [vmem:[#allocation3] sm:$0xff] %vm65_vm0, %v2289_v59 }
0x15b3   :  { %v2291_v30 = vpop.permute.xlu1 %2290 }
0x15b4   :  { %2295 = vst.msk [vmem:[#allocation3 + $0x8] sm:$0xff] %vm65_vm0, %v2291_v30  ;;  %v2435_v31 = vpop.permute.xlu0 %2434 }
0x15b5   :  { %2440 = vst.msk [vmem:[#allocation5] sm:$0xff] %vm65_vm0, %v2435_v31 }
0x15b7   :  { %v2437_v33 = vpop.permute.xlu1 %2436 }
0x15b8   :  { %2441 = vst.msk [vmem:[#allocation5 + $0x8] sm:$0xff] %vm65_vm0, %v2437_v33 }
0x15f4   :  { %v2279_v0 = vpop.permute.xlu0 %2278 }
0x15f5   :  { %2284 = vst.msk [vmem:[#allocation2] sm:$0xff] %vm65_vm0, %v2279_v0 }
0x15f8   :  { %v2281_v35 = vpop.permute.xlu1 %2280 }
0x15f9   :  { %2285 = vst.msk [vmem:[#allocation2 + $0x8] sm:$0xff] %vm65_vm0, %v2281_v35  ;;  %v2425_v61 = vpop.permute.xlu0 %2424 }
0x15fa   :  { %2430 = vst.msk [vmem:[#allocation4] sm:$0xff] %vm65_vm0, %v2425_v61 }
0x15fc   :  { %v2427_v39 = vpop.permute.xlu1 %2426 }
0x15fd   :  { %2431 = vst.msk [vmem:[#allocation4 + $0x8] sm:$0xff] %vm65_vm0, %v2427_v39  ;;  %v2303_v43 = vpop.permute.xlu0 %2302 }
0x15fe   :  { %2627 = vst.msk [vmem:[%s4036_s4 + $0x38] sm:$0xf] %vm238_vm2, %v2303_v43 }
0x1600   :  { %v2305_v45 = vpop.permute.xlu1 %2304 }
0x1601   :  { %2628 = vst.msk [vmem:[%s4036_s4 + $0x3c] sm:$0xf] %vm238_vm2, %v2305_v45  ;;  %v2449_v49 = vpop.permute.xlu0 %2448 }
0x1602   :  { %2454 = vst.msk [vmem:[%s4037_s5] sm:$0xf] %vm238_vm2, %v2449_v49 }
0x1604   :  { %v2451_v53 = vpop.permute.xlu1 %2450 }
0x1605   :  { %2455 = vst.msk [vmem:[%s4037_s5 + $0x4] sm:$0xf] %vm238_vm2, %v2451_v53 }

// kernel: bilstm_forward.7
= control target key start
LH: loop header
LB: loop body
LE: loop exit
PB: predicated region body
PF: predicated region fallthrough
CT: control target
= control target key end

     0   :  { %vm65_vm0 = vcmask 261120   ;;  %v2932_v0 = vmov 0.0   ;;  %vm2933_vm1 = vmmov 0   ;;  %s2934_s30 = smov 32   ;;  %s2935_s6 = smov 64   ;;  %s3567_s2 = inlined_call_operand.vmem [shape: bf16[32,128], index: 2, kind: input, shape index: {}]   ;;  %s3568_s3 = inlined_call_operand.vmem [shape: bf16[32,128], index: 3, kind: input, shape index: {}]   ;;  %s3569_s0 = inlined_call_operand.vmem [shape: bf16[8,16,128], index: 0, kind: input, shape index: {}]   ;;  %s3570_s1 = inlined_call_operand.vmem [shape: bf16[8,16,128], index: 1, kind: input, shape index: {}]   ;;  %s3571_s4 = inlined_call_operand.vmem [shape: f32[8,16,32], index: 4, kind: output, shape index: {0}]   ;;  %s3572_s5 = inlined_call_operand.vmem [shape: f32[8,16,32], index: 5, kind: output, shape index: {1}]  }
   0x1   :  { %2535 = vmatprep.subr.bf16.mxu0 %v2932_v0  ;;  %2543 = vmatprep.subr.bf16.mxu1 %v2932_v0  ;;  %v2972_v1 = vld [vmem:[%s3567_s2 + $0x8] sm:$0xff]   ;;  %66 = vst.msk [vmem:[#allocation2] sm:$0xff] %vm65_vm0, %v2932_v0  ;;  %67 = vst.msk [vmem:[#allocation2 + $0x8] sm:$0xff] %vm65_vm0, %v2932_v0  ;;  %v3003_v3 = vld [vmem:[%s3567_s2] sm:$0xff]   ;;  %s2936_s7 = smov 96  }
   0x2   :  { %68 = vst.msk [vmem:[#allocation3] sm:$0xff] %vm65_vm0, %v2932_v0  ;;  %69 = vst.msk [vmem:[#allocation3 + $0x8] sm:$0xff] %vm65_vm0, %v2932_v0  ;;  %v2993_v2 = vld [vmem:[%s3568_s3 + $0x8] sm:$0xff]   ;;  %2539 = vmatprep.mubr.msk.bf16.mxu0 %vm2933_vm1, %v2932_v0  ;;  %2547 = vmatprep.mubr.msk.bf16.mxu1 %vm2933_vm1, %v2932_v0  ;;  %v3010_v4 = vld [vmem:[%s3568_s3] sm:$0xff]  }
   0x3   :  { %70 = vst.msk [vmem:[#allocation4] sm:$0xff] %vm65_vm0, %v2932_v0  ;;  %71 = vst.msk [vmem:[#allocation4 + $0x8] sm:$0xff] %vm65_vm0, %v2932_v0  ;;  %2536 = vmatpush3.bf16.msra.mxu0 %v2972_v1  ;;  %2544 = vmatpush3.bf16.msra.mxu1 %v2993_v2  ;;  %v2410_v11 = vld [vmem:[%s3569_s0] sm:$0xff]   ;;  %v2473_v12 = vld [vmem:[%s3570_s1 + $0x38] sm:$0xff]  }
   0x4   :  { %72 = vst.msk [vmem:[#allocation5] sm:$0xff] %vm65_vm0, %v2932_v0  ;;  %73 = vst.msk [vmem:[#allocation5 + $0x8] sm:$0xff] %vm65_vm0, %v2932_v0  ;;  %2537 = vmatprep.subr.bf16.mxu0 %v2932_v0  ;;  %2545 = vmatprep.subr.bf16.mxu1 %v2932_v0  ;;  %v2411_v13 = vunpack.c.l.bf16 %v2410_v11  ;;  %v2415_v14 = vunpack.c.l.bf16 %v2473_v12  ;;  %v2412_v18 = vunpack.c.h.bf16 %v2410_v11  ;;  %v2416_v21 = vunpack.c.h.bf16 %v2473_v12 }
   0x7   :  { %2538 = vmatpush3.bf16.msra.mxu0 %v3003_v3  ;;  %2546 = vmatpush3.bf16.msra.mxu1 %v3010_v4 }
   0x8   :  { %v82_v5 = vld [vmem:[#allocation2] sm:$0xff]  ;;  %v83_v6 = vld [vmem:[#allocation2 + $0x8] sm:$0xff]  ;;  %2551 = vmatprep.subr.bf16.mxu0 %v2932_v0  ;;  %2559 = vmatprep.subr.bf16.mxu1 %v2932_v0 }
   0x9   :  { %v84_v8 = vpack.c.bf16 %v83_v6, %v82_v5  ;;  %v148_v33 = vld [vmem:[#allocation3] sm:$0xff]  ;;  %v149_v34 = vld [vmem:[#allocation3 + $0x8] sm:$0xff] }
   0xa   :  { %v228_v7 = vld [vmem:[#allocation4] sm:$0xff]  ;;  %v229_v9 = vld [vmem:[#allocation4 + $0x8] sm:$0xff] }
   0xb   :  { %v230_v10 = vpack.c.bf16 %v229_v9, %v228_v7  ;;  %2540 = vmatmul.mubr.msk.bf16.vlgmr.msra.gmra.mxu0 %vm65_vm0, %v84_v8  ;;  %v294_v35 = vld [vmem:[#allocation5] sm:$0xff]  ;;  %v295_v36 = vld [vmem:[#allocation5 + $0x8] sm:$0xff] }
   0xc   :  { %2552 = vmatpush3.bf16.msra.mxu0 %v2972_v1  ;;  %2555 = vmatprep.mubr.msk.bf16.mxu0 %vm2933_vm1, %v2932_v0 }
   0xd   :  { %2548 = vmatmul.mubr.msk.bf16.vlgmr.msra.gmra.mxu1 %vm65_vm0, %v230_v10  ;;  %2553 = vmatprep.subr.bf16.mxu0 %v2932_v0 }
   0xe   :  { %2560 = vmatpush3.bf16.msra.mxu1 %v2993_v2  ;;  %2563 = vmatprep.mubr.msk.bf16.mxu1 %vm2933_vm1, %v2932_v0 }
   0xf   :  { %2561 = vmatprep.subr.bf16.mxu1 %v2932_v0 }
  0x10   :  { %2554 = vmatpush3.bf16.msra.mxu0 %v3003_v3 }
  0x11   :  { %2567 = vmatprep.subr.bf16.mxu0 %v2932_v0 }
  0x12   :  { %2562 = vmatpush3.bf16.msra.mxu1 %v3010_v4 }
  0x13   :  { %2575 = vmatprep.subr.bf16.mxu1 %v2932_v0 }
  0xcb   :  { %v135_v15 = vpop.f32.mrf.mxu0 }
  0xcc   :  { %v146_v16 = vadd.f32 %v2411_v13, %v135_v15 }
  0xcd   :  { %v280_v17 = vpop.f32.mrf.mxu1  ;;  %v2541_v20 = vpop.f32.mrf.mxu0 }
  0xce   :  { %v292_v19 = vadd.f32 %v2415_v14, %v280_v17  ;;  %2672 = vtanh.f32 %v146_v16  ;;  %v2304_v37 = vmul.f32 -1.442695, %v146_v16 }
  0xcf   :  { %v2549_v22 = vpop.f32.mrf.mxu1  ;;  %v138_v23 = vpop.f32.mrf.mxu0 }
  0xd0   :  { %2674 = vtanh.f32 %v292_v19  ;;  %v147_v24 = vadd.f32 %v2412_v18, %v138_v23  ;;  %v2311_v38 = vmul.f32 -1.442695, %v292_v19 }
  0xd1   :  { %v283_v25 = vpop.f32.mrf.mxu1  ;;  %v2542_v27 = vpop.f32.mrf.mxu0 }
  0xd2   :  { %v293_v26 = vadd.f32 %v2416_v21, %v283_v25  ;;  %2676 = vtanh.f32 %v147_v24  ;;  %v2305_v39 = vmul.f32 -1.442695, %v147_v24 }
  0xd3   :  { %v2550_v28 = vpop.f32.mrf.mxu1 }
  0xd4   :  { %2678 = vtanh.f32 %v293_v26  ;;  %v2312_v40 = vmul.f32 -1.442695, %v293_v26 }
  0xd5   :  { %2680 = vpow2.f32 %v2304_v37 }
  0xd6   :  { %2682 = vpow2.f32 %v2311_v38 }
  0xd7   :  { %2684 = vpow2.f32 %v2305_v39 }
  0xd8   :  { %2686 = vpow2.f32 %v2312_v40 }
  0xdb   :  { %v2673_v29 = vpop.eup %2672 }
  0xdc   :  { %176 = vrot.lane.b32.xlu0 %v2673_v29, %s2934_s30 }
  0xdd   :  { %v2675_v30 = vpop.eup %2674 }
  0xde   :  { %322 = vrot.lane.b32.xlu1 %v2675_v30, %s2934_s30 }
  0xdf   :  { %v2677_v31 = vpop.eup %2676 }
  0xe0   :  { %178 = vrot.lane.b32.xlu0 %v2677_v31, %s2934_s30 }
  0xe1   :  { %v2679_v32 = vpop.eup %2678 }
  0xe2   :  { %324 = vrot.lane.b32.xlu1 %v2679_v32, %s2934_s30  ;;  %v2681_v41 = vpop.eup %2680 }
  0xe3   :  { %v2683_v42 = vpop.eup %2682  ;;  %v156_v43 = vadd.f32 1.0, %v2681_v41 }
  0xe4   :  { %166 = vrot.lane.b32.xlu0 %v148_v33, %s2934_s30  ;;  %v2685_v44 = vpop.eup %2684  ;;  %v302_v45 = vadd.f32 1.0, %v2683_v42 }
  0xe5   :  { %2688 = vrcp.f32 %v156_v43  ;;  %v157_v46 = vadd.f32 1.0, %v2685_v44  ;;  %v2687_v47 = vpop.eup %2686  ;;  %v2474_v44 = vld [vmem:[%s3569_s0 + $0x8] sm:$0xff]  }
  0xe6   :  { %168 = vrot.lane.b32.xlu1 %v149_v34, %s2934_s30  ;;  %2690 = vrcp.f32 %v302_v45  ;;  %v303_v48 = vadd.f32 1.0, %v2687_v47  ;;  %v2419_v45 = vunpack.c.l.bf16 %v2474_v44 }
  0xe7   :  { %2692 = vrcp.f32 %v157_v46  ;;  %v2475_v46 = vld [vmem:[%s3570_s1 + $0x30] sm:$0xff]  }
  0xe8   :  { %312 = vrot.lane.b32.xlu0 %v294_v35, %s2934_s30  ;;  %2694 = vrcp.f32 %v303_v48 }
  0xea   :  { %314 = vrot.lane.b32.xlu1 %v295_v36, %s2934_s30 }
  0xf2   :  { %v2689_v49 = vpop.eup %2688 }
  0xf3   :  { %v2691_v53 = vpop.eup %2690 }
  0xf4   :  { %v2693_v54 = vpop.eup %2692 }
  0xf5   :  { %v2695_v59 = vpop.eup %2694 }
 0x14e   :  { %v177_v50 = vpop.permute.xlu0 %176 }
 0x14f   :  { %v182_v52 = vmul.f32 %v2689_v49, %v177_v50  ;;  %v2423_v50 = vunpack.c.l.bf16 %v2475_v46 }
 0x150   :  { %v323_v51 = vpop.permute.xlu1 %322 }
 0x151   :  { %186 = vrot.lane.b32.xlu0 %v182_v52, %s2934_s30  ;;  %v328_v56 = vmul.f32 %v2691_v53, %v323_v51 }
 0x152   :  { %v179_v55 = vpop.permute.xlu0 %178 }
 0x153   :  { %v183_v57 = vmul.f32 %v2693_v54, %v179_v55 }
 0x154   :  { %v325_v58 = vpop.permute.xlu1 %324 }
 0x155   :  { %188 = vrot.lane.b32.xlu1 %v183_v57, %s2934_s30  ;;  %332 = vrot.lane.b32.xlu0 %v328_v56, %s2934_s30  ;;  %v329_v60 = vmul.f32 %v2695_v59, %v325_v58  ;;  %v2424_v56 = vunpack.c.h.bf16 %v2475_v46 }
 0x156   :  { %v167_v61 = vpop.permute.xlu0 %166 }
 0x157   :  { %v172_v5 = vmul.f32 %v2689_v49, %v167_v61 }
 0x158   :  { %v169_v62 = vpop.permute.xlu1 %168 }
 0x159   :  { %334 = vrot.lane.b32.xlu1 %v329_v60, %s2934_s30  ;;  %v173_v9 = vmul.f32 %v2693_v54, %v169_v62 }
 0x15a   :  { %v313_v63 = vpop.permute.xlu0 %312 }
 0x15b   :  { %v318_v10 = vmul.f32 %v2691_v53, %v313_v63 }
 0x15c   :  { %v315_v6 = vpop.permute.xlu1 %314 }
 0x15d   :  { %v319_v15 = vmul.f32 %v2695_v59, %v315_v6 }
 0x1c3   :  { %v187_v7 = vpop.permute.xlu0 %186 }
 0x1c4   :  { %v192_v8 = vadd.f32 %v187_v7, %v172_v5 }
 0x1c6   :  { %2696 = vtanh.f32 %v192_v8 }
 0x1c7   :  { %v189_v11 = vpop.permute.xlu1 %188  ;;  %v333_v12 = vpop.permute.xlu0 %332 }
 0x1c8   :  { %v193_v13 = vadd.f32 %v189_v11, %v173_v9  ;;  %v338_v14 = vadd.f32 %v333_v12, %v318_v10 }
 0x1ca   :  { %2698 = vtanh.f32 %v193_v13 }
 0x1cb   :  { %2700 = vtanh.f32 %v338_v14  ;;  %v335_v16 = vpop.permute.xlu1 %334 }
 0x1cc   :  { %v339_v17 = vadd.f32 %v335_v16, %v319_v15 }
 0x1ce   :  { %2702 = vtanh.f32 %v339_v17 }
 0x1d3   :  { %v2697_v18 = vpop.eup %2696 }
 0x1d4   :  { %198 = vrot.lane.b32.xlu0 %v2697_v18, %s2934_s30 }
 0x1d7   :  { %v2699_v19 = vpop.eup %2698 }
 0x1d8   :  { %v2701_v20 = vpop.eup %2700  ;;  %200 = vrot.lane.b32.xlu1 %v2699_v19, %s2934_s30 }
 0x1d9   :  { %344 = vrot.lane.b32.xlu0 %v2701_v20, %s2934_s30 }
 0x1db   :  { %v2703_v21 = vpop.eup %2702 }
 0x1dc   :  { %346 = vrot.lane.b32.xlu1 %v2703_v21, %s2934_s30 }
 0x246   :  { %v199_v22 = vpop.permute.xlu0 %198 }
 0x247   :  { %v204_v23 = vmul.f32 %v2689_v49, %v199_v22  ;;  %v2420_v49 = vunpack.c.h.bf16 %v2474_v44 }
 0x249   :  { %208 = vrot.lane.b32.xlu0 %v204_v23, %s2935_s6 }
 0x24a   :  { %v201_v24 = vpop.permute.xlu1 %200 }
 0x24b   :  { %v205_v25 = vmul.f32 %v2693_v54, %v201_v24  ;;  %v345_v26 = vpop.permute.xlu0 %344 }
 0x24c   :  { %v350_v27 = vmul.f32 %v2691_v53, %v345_v26 }
 0x24d   :  { %210 = vrot.lane.b32.xlu1 %v205_v25, %s2935_s6 }
 0x24e   :  { %354 = vrot.lane.b32.xlu0 %v350_v27, %s2935_s6  ;;  %v347_v28 = vpop.permute.xlu1 %346 }
 0x24f   :  { %v351_v29 = vmul.f32 %v2695_v59, %v347_v28 }
 0x251   :  { %356 = vrot.lane.b32.xlu1 %v351_v29, %s2935_s6 }
 0x252   :  { %218 = vrot.lane.b32.xlu0 %v192_v8, %s2936_s7 }
 0x255   :  { %220 = vrot.lane.b32.xlu1 %v193_v13, %s2936_s7 }
 0x256   :  { %364 = vrot.lane.b32.xlu0 %v338_v14, %s2936_s7 }
 0x259   :  { %366 = vrot.lane.b32.xlu1 %v339_v17, %s2936_s7 }
 0x2bb   :  { %v209_v30 = vpop.permute.xlu0 %208 }
 0x2bc   :  { %214 = vst.msk [vmem:[#allocation2] sm:$0xff] %vm65_vm0, %v209_v30  ;;  %226 = vst.msk [vmem:[%s3571_s4] sm:$0xff] %vm65_vm0, %v209_v30 }
 0x2bf   :  { %v211_v31 = vpop.permute.xlu1 %210 }
 0x2c0   :  { %215 = vst.msk [vmem:[#allocation2 + $0x8] sm:$0xff] %vm65_vm0, %v211_v31  ;;  %227 = vst.msk [vmem:[%s3571_s4 + $0x8] sm:$0xff] %vm65_vm0, %v211_v31  ;;  %v355_v32 = vpop.permute.xlu0 %354 }
 0x2c1   :  { %360 = vst.msk [vmem:[#allocation4] sm:$0xff] %vm65_vm0, %v355_v32  ;;  %2313 = vst.msk [vmem:[%s3572_s5 + $0x70] sm:$0xff] %vm65_vm0, %v355_v32 }
 0x2c3   :  { %v357_v33 = vpop.permute.xlu1 %356  ;;  %v375_v36 = vld [vmem:[#allocation2] sm:$0xff] }
 0x2c4   :  { %361 = vst.msk [vmem:[#allocation4 + $0x8] sm:$0xff] %vm65_vm0, %v357_v33  ;;  %2314 = vst.msk [vmem:[%s3572_s5 + $0x78] sm:$0xff] %vm65_vm0, %v357_v33  ;;  %v219_v34 = vpop.permute.xlu0 %218 }
 0x2c5   :  { %224 = vst.msk [vmem:[#allocation3] sm:$0xff] %vm65_vm0, %v219_v34 }
 0x2c7   :  { %v221_v35 = vpop.permute.xlu1 %220  ;;  %v376_v37 = vld [vmem:[#allocation2 + $0x8] sm:$0xff] }
 0x2c8   :  { %225 = vst.msk [vmem:[#allocation3 + $0x8] sm:$0xff] %vm65_vm0, %v221_v35  ;;  %v365_v38 = vpop.permute.xlu0 %364  ;;  %v377_v39 = vpack.c.bf16 %v376_v37, %v375_v36  ;;  %v510_v41 = vld [vmem:[#allocation4] sm:$0xff] }
 0x2c9   :  { %370 = vst.msk [vmem:[#allocation5] sm:$0xff] %vm65_vm0, %v365_v38 }
 0x2ca   :  { %2556 = vmatmul.mubr.msk.bf16.vlgmr.msra.gmra.mxu0 %vm65_vm0, %v377_v39 }
 0x2cb   :  { %v367_v40 = vpop.permute.xlu1 %366  ;;  %v511_v42 = vld [vmem:[#allocation4 + $0x8] sm:$0xff]  ;;  %2568 = vmatpush3.bf16.msra.mxu0 %v2972_v1  ;;  %2571 = vmatprep.mubr.msk.bf16.mxu0 %vm2933_vm1, %v2932_v0 }
 0x2cc   :  { %371 = vst.msk [vmem:[#allocation5 + $0x8] sm:$0xff] %vm65_vm0, %v367_v40  ;;  %v512_v43 = vpack.c.bf16 %v511_v42, %v510_v41  ;;  %2569 = vmatprep.subr.bf16.mxu0 %v2932_v0  ;;  %v429_v7 = vld [vmem:[#allocation3] sm:$0xff] }
 0x2ce   :  { %2564 = vmatmul.mubr.msk.bf16.vlgmr.msra.gmra.mxu1 %vm65_vm0, %v512_v43 }
 0x2cf   :  { %2570 = vmatpush3.bf16.msra.mxu0 %v3003_v3  ;;  %2576 = vmatpush3.bf16.msra.mxu1 %v2993_v2  ;;  %v430_v8 = vld [vmem:[#allocation3 + $0x8] sm:$0xff] }
 0x2d0   :  { %2577 = vmatprep.subr.bf16.mxu1 %v2932_v0  ;;  %2579 = vmatprep.mubr.msk.bf16.mxu1 %vm2933_vm1, %v2932_v0  ;;  %v564_v9 = vld [vmem:[#allocation5] sm:$0xff] }
 0x2d1   :  { %2583 = vmatprep.subr.bf16.mxu0 %v2932_v0 }
 0x2d3   :  { %2578 = vmatpush3.bf16.msra.mxu1 %v3010_v4  ;;  %v565_v10 = vld [vmem:[#allocation5 + $0x8] sm:$0xff] }
 0x2d4   :  { %2591 = vmatprep.subr.bf16.mxu1 %v2932_v0 }
 0x38a   :  { %v415_v47 = vpop.f32.mrf.mxu0 }
 0x38b   :  { %v427_v48 = vadd.f32 %v2419_v45, %v415_v47 }
 0x38c   :  { %v2557_v51 = vpop.f32.mrf.mxu0 }
 0x38d   :  { %2704 = vtanh.f32 %v427_v48  ;;  %v2318_v11 = vmul.f32 -1.442695, %v427_v48 }
 0x38e   :  { %v418_v52 = vpop.f32.mrf.mxu0  ;;  %v550_v53 = vpop.f32.mrf.mxu1 }
 0x38f   :  { %v428_v54 = vadd.f32 %v2420_v49, %v418_v52  ;;  %v562_v55 = vadd.f32 %v2423_v50, %v550_v53 }
 0x390   :  { %v2558_v57 = vpop.f32.mrf.mxu0  ;;  %v2565_v58 = vpop.f32.mrf.mxu1 }
 0x391   :  { %2706 = vtanh.f32 %v428_v54  ;;  %v2319_v12 = vmul.f32 -1.442695, %v428_v54  ;;  %v2325_v13 = vmul.f32 -1.442695, %v562_v55 }
 0x392   :  { %2708 = vtanh.f32 %v562_v55  ;;  %v553_v59 = vpop.f32.mrf.mxu1 }
 0x393   :  { %v563_v60 = vadd.f32 %v2424_v56, %v553_v59 }
 0x394   :  { %v2566_v61 = vpop.f32.mrf.mxu1 }
 0x395   :  { %2710 = vtanh.f32 %v563_v60  ;;  %v2326_v14 = vmul.f32 -1.442695, %v563_v60 }
 0x396   :  { %2712 = vpow2.f32 %v2318_v11 }
 0x397   :  { %2714 = vpow2.f32 %v2319_v12 }
 0x398   :  { %2716 = vpow2.f32 %v2325_v13 }
 0x399   :  { %2718 = vpow2.f32 %v2326_v14 }
 0x39a   :  { %v2705_v62 = vpop.eup %2704 }
 0x39b   :  { %457 = vrot.lane.b32.xlu0 %v2705_v62, %s2934_s30 }
 0x39e   :  { %v2707_v63 = vpop.eup %2706 }
 0x39f   :  { %v2709_v5 = vpop.eup %2708  ;;  %459 = vrot.lane.b32.xlu1 %v2707_v63, %s2934_s30 }
 0x3a0   :  { %592 = vrot.lane.b32.xlu0 %v2709_v5, %s2934_s30 }
 0x3a2   :  { %v2711_v6 = vpop.eup %2710 }
 0x3a3   :  { %594 = vrot.lane.b32.xlu1 %v2711_v6, %s2934_s30  ;;  %v2713_v15 = vpop.eup %2712 }
 0x3a4   :  { %447 = vrot.lane.b32.xlu0 %v429_v7, %s2934_s30  ;;  %v437_v16 = vadd.f32 1.0, %v2713_v15  ;;  %v2715_v17 = vpop.eup %2714 }
 0x3a5   :  { %v2717_v18 = vpop.eup %2716  ;;  %v438_v19 = vadd.f32 1.0, %v2715_v17 }
 0x3a6   :  { %2720 = vrcp.f32 %v437_v16  ;;  %v2719_v20 = vpop.eup %2718  ;;  %v572_v21 = vadd.f32 1.0, %v2717_v18  ;;  %v2476_v18 = vld [vmem:[%s3569_s0 + $0x10] sm:$0xff]  }
 0x3a7   :  { %449 = vrot.lane.b32.xlu1 %v430_v8, %s2934_s30  ;;  %2722 = vrcp.f32 %v438_v19  ;;  %v573_v22 = vadd.f32 1.0, %v2719_v20  ;;  %v2427_v19 = vunpack.c.l.bf16 %v2476_v18  ;;  %v2477_v20 = vld [vmem:[%s3570_s1 + $0x28] sm:$0xff]  }
 0x3a8   :  { %582 = vrot.lane.b32.xlu0 %v564_v9, %s2934_s30  ;;  %2724 = vrcp.f32 %v572_v21 }
 0x3a9   :  { %2726 = vrcp.f32 %v573_v22 }
 0x3ab   :  { %584 = vrot.lane.b32.xlu1 %v565_v10, %s2934_s30 }
 0x3b3   :  { %v2721_v23 = vpop.eup %2720 }
 0x3b4   :  { %v2723_v26 = vpop.eup %2722 }
 0x3b5   :  { %v2725_v28 = vpop.eup %2724 }
 0x3b6   :  { %v2727_v32 = vpop.eup %2726 }
 0x40d   :  { %v458_v24 = vpop.permute.xlu0 %457 }
 0x40e   :  { %v463_v25 = vmul.f32 %v2721_v23, %v458_v24  ;;  %v2431_v24 = vunpack.c.l.bf16 %v2477_v20 }
 0x410   :  { %467 = vrot.lane.b32.xlu0 %v463_v25, %s2934_s30 }
 0x411   :  { %v460_v27 = vpop.permute.xlu1 %459 }
 0x412   :  { %v464_v29 = vmul.f32 %v2723_v26, %v460_v27  ;;  %v593_v30 = vpop.permute.xlu0 %592 }
 0x413   :  { %v598_v31 = vmul.f32 %v2725_v28, %v593_v30  ;;  %v2432_v30 = vunpack.c.h.bf16 %v2477_v20 }
 0x414   :  { %469 = vrot.lane.b32.xlu1 %v464_v29, %s2934_s30 }
 0x415   :  { %602 = vrot.lane.b32.xlu0 %v598_v31, %s2934_s30  ;;  %v595_v33 = vpop.permute.xlu1 %594 }
 0x416   :  { %v599_v34 = vmul.f32 %v2727_v32, %v595_v33  ;;  %v448_v35 = vpop.permute.xlu0 %447 }
 0x417   :  { %v453_v38 = vmul.f32 %v2721_v23, %v448_v35 }
 0x418   :  { %604 = vrot.lane.b32.xlu1 %v599_v34, %s2934_s30 }
 0x419   :  { %v450_v36 = vpop.permute.xlu1 %449 }
 0x41a   :  { %v583_v37 = vpop.permute.xlu0 %582  ;;  %v454_v42 = vmul.f32 %v2723_v26, %v450_v36 }
 0x41b   :  { %v588_v43 = vmul.f32 %v2725_v28, %v583_v37 }
 0x41d   :  { %v585_v39 = vpop.permute.xlu1 %584 }
 0x41e   :  { %v589_v48 = vmul.f32 %v2727_v32, %v585_v39 }
 0x482   :  { %v468_v40 = vpop.permute.xlu0 %467 }
 0x483   :  { %v473_v41 = vadd.f32 %v468_v40, %v453_v38 }
 0x485   :  { %2728 = vtanh.f32 %v473_v41 }
 0x486   :  { %v470_v44 = vpop.permute.xlu1 %469 }
 0x487   :  { %v474_v45 = vadd.f32 %v470_v44, %v454_v42  ;;  %v603_v46 = vpop.permute.xlu0 %602 }
 0x488   :  { %v608_v47 = vadd.f32 %v603_v46, %v588_v43 }
 0x489   :  { %2730 = vtanh.f32 %v474_v45 }
 0x48a   :  { %2732 = vtanh.f32 %v608_v47  ;;  %v605_v49 = vpop.permute.xlu1 %604 }
 0x48b   :  { %v609_v50 = vadd.f32 %v605_v49, %v589_v48 }
 0x48d   :  { %2734 = vtanh.f32 %v609_v50 }
 0x492   :  { %v2729_v51 = vpop.eup %2728 }
 0x493   :  { %479 = vrot.lane.b32.xlu0 %v2729_v51, %s2934_s30 }
 0x496   :  { %v2731_v52 = vpop.eup %2730 }
 0x497   :  { %v2733_v53 = vpop.eup %2732  ;;  %481 = vrot.lane.b32.xlu1 %v2731_v52, %s2934_s30 }
 0x498   :  { %614 = vrot.lane.b32.xlu0 %v2733_v53, %s2934_s30 }
 0x49a   :  { %v2735_v54 = vpop.eup %2734 }
 0x49b   :  { %616 = vrot.lane.b32.xlu1 %v2735_v54, %s2934_s30 }
 0x505   :  { %v480_v55 = vpop.permute.xlu0 %479 }
 0x506   :  { %v485_v56 = vmul.f32 %v2721_v23, %v480_v55  ;;  %v2428_v23 = vunpack.c.h.bf16 %v2476_v18 }
 0x508   :  { %489 = vrot.lane.b32.xlu0 %v485_v56, %s2935_s6 }
 0x509   :  { %v482_v57 = vpop.permute.xlu1 %481 }
 0x50a   :  { %v486_v58 = vmul.f32 %v2723_v26, %v482_v57  ;;  %v615_v59 = vpop.permute.xlu0 %614 }
 0x50b   :  { %v620_v60 = vmul.f32 %v2725_v28, %v615_v59 }
 0x50c   :  { %491 = vrot.lane.b32.xlu1 %v486_v58, %s2935_s6 }
 0x50d   :  { %624 = vrot.lane.b32.xlu0 %v620_v60, %s2935_s6  ;;  %v617_v61 = vpop.permute.xlu1 %616 }
 0x50e   :  { %v621_v62 = vmul.f32 %v2727_v32, %v617_v61 }
 0x510   :  { %626 = vrot.lane.b32.xlu1 %v621_v62, %s2935_s6 }
 0x511   :  { %499 = vrot.lane.b32.xlu0 %v473_v41, %s2936_s7 }
 0x514   :  { %501 = vrot.lane.b32.xlu1 %v474_v45, %s2936_s7 }
 0x515   :  { %634 = vrot.lane.b32.xlu0 %v608_v47, %s2936_s7 }
 0x518   :  { %636 = vrot.lane.b32.xlu1 %v609_v50, %s2936_s7 }
 0x57a   :  { %v490_v63 = vpop.permute.xlu0 %489 }
 0x57b   :  { %495 = vst.msk [vmem:[#allocation2] sm:$0xff] %vm65_vm0, %v490_v63  ;;  %2320 = vst.msk [vmem:[%s3571_s4 + $0x10] sm:$0xff] %vm65_vm0, %v490_v63 }
 0x57e   :  { %v492_v5 = vpop.permute.xlu1 %491 }
 0x57f   :  { %496 = vst.msk [vmem:[#allocation2 + $0x8] sm:$0xff] %vm65_vm0, %v492_v5  ;;  %2321 = vst.msk [vmem:[%s3571_s4 + $0x18] sm:$0xff] %vm65_vm0, %v492_v5  ;;  %v625_v6 = vpop.permute.xlu0 %624 }
 0x580   :  { %630 = vst.msk [vmem:[#allocation4] sm:$0xff] %vm65_vm0, %v625_v6  ;;  %2327 = vst.msk [vmem:[%s3572_s5 + $0x60] sm:$0xff] %vm65_vm0, %v625_v6 }
 0x582   :  { %v627_v7 = vpop.permute.xlu1 %626  ;;  %v645_v10 = vld [vmem:[#allocation2] sm:$0xff] }
 0x583   :  { %631 = vst.msk [vmem:[#allocation4 + $0x8] sm:$0xff] %vm65_vm0, %v627_v7  ;;  %2328 = vst.msk [vmem:[%s3572_s5 + $0x68] sm:$0xff] %vm65_vm0, %v627_v7  ;;  %v500_v8 = vpop.permute.xlu0 %499 }
 0x584   :  { %505 = vst.msk [vmem:[#allocation3] sm:$0xff] %vm65_vm0, %v500_v8 }
 0x586   :  { %v502_v9 = vpop.permute.xlu1 %501  ;;  %v646_v11 = vld [vmem:[#allocation2 + $0x8] sm:$0xff] }
 0x587   :  { %506 = vst.msk [vmem:[#allocation3 + $0x8] sm:$0xff] %vm65_vm0, %v502_v9  ;;  %v635_v12 = vpop.permute.xlu0 %634  ;;  %v647_v13 = vpack.c.bf16 %v646_v11, %v645_v10  ;;  %v780_v15 = vld [vmem:[#allocation4] sm:$0xff] }
 0x588   :  { %640 = vst.msk [vmem:[#allocation5] sm:$0xff] %vm65_vm0, %v635_v12 }
 0x589   :  { %2572 = vmatmul.mubr.msk.bf16.vlgmr.msra.gmra.mxu0 %vm65_vm0, %v647_v13 }
 0x58a   :  { %v637_v14 = vpop.permute.xlu1 %636  ;;  %v781_v16 = vld [vmem:[#allocation4 + $0x8] sm:$0xff]  ;;  %2584 = vmatpush3.bf16.msra.mxu0 %v2972_v1  ;;  %2587 = vmatprep.mubr.msk.bf16.mxu0 %vm2933_vm1, %v2932_v0 }
 0x58b   :  { %641 = vst.msk [vmem:[#allocation5 + $0x8] sm:$0xff] %vm65_vm0, %v637_v14  ;;  %v782_v17 = vpack.c.bf16 %v781_v16, %v780_v15  ;;  %2585 = vmatprep.subr.bf16.mxu0 %v2932_v0  ;;  %v699_v40 = vld [vmem:[#allocation3] sm:$0xff] }
 0x58d   :  { %2580 = vmatmul.mubr.msk.bf16.vlgmr.msra.gmra.mxu1 %vm65_vm0, %v782_v17 }
 0x58e   :  { %2586 = vmatpush3.bf16.msra.mxu0 %v3003_v3  ;;  %2592 = vmatpush3.bf16.msra.mxu1 %v2993_v2  ;;  %v700_v41 = vld [vmem:[#allocation3 + $0x8] sm:$0xff] }
 0x58f   :  { %2593 = vmatprep.subr.bf16.mxu1 %v2932_v0  ;;  %2595 = vmatprep.mubr.msk.bf16.mxu1 %vm2933_vm1, %v2932_v0  ;;  %v834_v42 = vld [vmem:[#allocation5] sm:$0xff] }
 0x590   :  { %2599 = vmatprep.subr.bf16.mxu0 %v2932_v0 }
 0x592   :  { %2594 = vmatpush3.bf16.msra.mxu1 %v3010_v4  ;;  %v835_v43 = vld [vmem:[#allocation5 + $0x8] sm:$0xff] }
 0x593   :  { %2607 = vmatprep.subr.bf16.mxu1 %v2932_v0 }
 0x649   :  { %v685_v21 = vpop.f32.mrf.mxu0 }
 0x64a   :  { %v697_v22 = vadd.f32 %v2427_v19, %v685_v21 }
 0x64b   :  { %v2573_v25 = vpop.f32.mrf.mxu0 }
 0x64c   :  { %2736 = vtanh.f32 %v697_v22  ;;  %v2332_v44 = vmul.f32 -1.442695, %v697_v22 }
 0x64d   :  { %v688_v26 = vpop.f32.mrf.mxu0  ;;  %v820_v27 = vpop.f32.mrf.mxu1 }
 0x64e   :  { %v698_v28 = vadd.f32 %v2428_v23, %v688_v26  ;;  %v832_v29 = vadd.f32 %v2431_v24, %v820_v27 }
 0x64f   :  { %v2574_v31 = vpop.f32.mrf.mxu0  ;;  %v2581_v32 = vpop.f32.mrf.mxu1 }
 0x650   :  { %2738 = vtanh.f32 %v698_v28  ;;  %v2333_v45 = vmul.f32 -1.442695, %v698_v28  ;;  %v2339_v46 = vmul.f32 -1.442695, %v832_v29 }
 0x651   :  { %2740 = vtanh.f32 %v832_v29  ;;  %v823_v33 = vpop.f32.mrf.mxu1 }
 0x652   :  { %v833_v34 = vadd.f32 %v2432_v30, %v823_v33 }
 0x653   :  { %v2582_v35 = vpop.f32.mrf.mxu1 }
 0x654   :  { %2742 = vtanh.f32 %v833_v34  ;;  %v2340_v47 = vmul.f32 -1.442695, %v833_v34 }
 0x655   :  { %2744 = vpow2.f32 %v2332_v44 }
 0x656   :  { %2746 = vpow2.f32 %v2333_v45 }
 0x657   :  { %2748 = vpow2.f32 %v2339_v46 }
 0x658   :  { %2750 = vpow2.f32 %v2340_v47 }
 0x659   :  { %v2737_v36 = vpop.eup %2736 }
 0x65a   :  { %727 = vrot.lane.b32.xlu0 %v2737_v36, %s2934_s30 }
 0x65d   :  { %v2739_v37 = vpop.eup %2738 }
 0x65e   :  { %v2741_v38 = vpop.eup %2740  ;;  %729 = vrot.lane.b32.xlu1 %v2739_v37, %s2934_s30 }
 0x65f   :  { %862 = vrot.lane.b32.xlu0 %v2741_v38, %s2934_s30 }
 0x661   :  { %v2743_v39 = vpop.eup %2742 }
 0x662   :  { %864 = vrot.lane.b32.xlu1 %v2743_v39, %s2934_s30  ;;  %v2745_v48 = vpop.eup %2744 }
 0x663   :  { %717 = vrot.lane.b32.xlu0 %v699_v40, %s2934_s30  ;;  %v707_v49 = vadd.f32 1.0, %v2745_v48  ;;  %v2747_v50 = vpop.eup %2746 }
 0x664   :  { %v2749_v51 = vpop.eup %2748  ;;  %v708_v52 = vadd.f32 1.0, %v2747_v50 }
 0x665   :  { %2752 = vrcp.f32 %v707_v49  ;;  %v2751_v53 = vpop.eup %2750  ;;  %v842_v54 = vadd.f32 1.0, %v2749_v51 }
 0x666   :  { %719 = vrot.lane.b32.xlu1 %v700_v41, %s2934_s30  ;;  %2754 = vrcp.f32 %v708_v52  ;;  %v843_v55 = vadd.f32 1.0, %v2751_v53 }
 0x667   :  { %852 = vrot.lane.b32.xlu0 %v834_v42, %s2934_s30  ;;  %2756 = vrcp.f32 %v842_v54 }
 0x668   :  { %2758 = vrcp.f32 %v843_v55 }
 0x66a   :  { %854 = vrot.lane.b32.xlu1 %v835_v43, %s2934_s30 }
 0x672   :  { %v2753_v56 = vpop.eup %2752 }
 0x673   :  { %v2755_v59 = vpop.eup %2754 }
 0x674   :  { %v2757_v61 = vpop.eup %2756 }
 0x675   :  { %v2759_v6 = vpop.eup %2758 }
 0x6cc   :  { %v728_v57 = vpop.permute.xlu0 %727 }
 0x6cd   :  { %v733_v58 = vmul.f32 %v2753_v56, %v728_v57 }
 0x6cf   :  { %737 = vrot.lane.b32.xlu0 %v733_v58, %s2934_s30 }
 0x6d0   :  { %v730_v60 = vpop.permute.xlu1 %729 }
 0x6d1   :  { %v734_v62 = vmul.f32 %v2755_v59, %v730_v60  ;;  %v863_v63 = vpop.permute.xlu0 %862 }
 0x6d2   :  { %v868_v5 = vmul.f32 %v2757_v61, %v863_v63 }
 0x6d3   :  { %739 = vrot.lane.b32.xlu1 %v734_v62, %s2934_s30 }
 0x6d4   :  { %872 = vrot.lane.b32.xlu0 %v868_v5, %s2934_s30  ;;  %v865_v7 = vpop.permute.xlu1 %864 }
 0x6d5   :  { %v869_v8 = vmul.f32 %v2759_v6, %v865_v7  ;;  %v718_v9 = vpop.permute.xlu0 %717 }
 0x6d6   :  { %v723_v12 = vmul.f32 %v2753_v56, %v718_v9 }
 0x6d7   :  { %874 = vrot.lane.b32.xlu1 %v869_v8, %s2934_s30 }
 0x6d8   :  { %v720_v10 = vpop.permute.xlu1 %719 }
 0x6d9   :  { %v853_v11 = vpop.permute.xlu0 %852  ;;  %v724_v16 = vmul.f32 %v2755_v59, %v720_v10 }
 0x6da   :  { %v858_v17 = vmul.f32 %v2757_v61, %v853_v11 }
 0x6dc   :  { %v855_v13 = vpop.permute.xlu1 %854 }
 0x6dd   :  { %v859_v22 = vmul.f32 %v2759_v6, %v855_v13 }
 0x741   :  { %v738_v14 = vpop.permute.xlu0 %737 }
 0x742   :  { %v743_v15 = vadd.f32 %v738_v14, %v723_v12 }
 0x744   :  { %2760 = vtanh.f32 %v743_v15 }
 0x745   :  { %v740_v18 = vpop.permute.xlu1 %739 }
 0x746   :  { %v744_v19 = vadd.f32 %v740_v18, %v724_v16  ;;  %v873_v20 = vpop.permute.xlu0 %872 }
 0x747   :  { %v878_v21 = vadd.f32 %v873_v20, %v858_v17 }
 0x748   :  { %2762 = vtanh.f32 %v744_v19 }
 0x749   :  { %2764 = vtanh.f32 %v878_v21  ;;  %v875_v23 = vpop.permute.xlu1 %874 }
 0x74a   :  { %v879_v24 = vadd.f32 %v875_v23, %v859_v22 }
 0x74c   :  { %2766 = vtanh.f32 %v879_v24 }
 0x751   :  { %v2761_v25 = vpop.eup %2760 }
 0x752   :  { %749 = vrot.lane.b32.xlu0 %v2761_v25, %s2934_s30 }
 0x755   :  { %v2763_v26 = vpop.eup %2762 }
 0x756   :  { %v2765_v27 = vpop.eup %2764  ;;  %751 = vrot.lane.b32.xlu1 %v2763_v26, %s2934_s30 }
 0x757   :  { %884 = vrot.lane.b32.xlu0 %v2765_v27, %s2934_s30 }
 0x759   :  { %v2767_v28 = vpop.eup %2766 }
 0x75a   :  { %886 = vrot.lane.b32.xlu1 %v2767_v28, %s2934_s30 }
 0x7c4   :  { %v750_v29 = vpop.permute.xlu0 %749 }
 0x7c5   :  { %v755_v30 = vmul.f32 %v2753_v56, %v750_v29 }
 0x7c7   :  { %759 = vrot.lane.b32.xlu0 %v755_v30, %s2935_s6 }
 0x7c8   :  { %v752_v31 = vpop.permute.xlu1 %751 }
 0x7c9   :  { %v756_v32 = vmul.f32 %v2755_v59, %v752_v31  ;;  %v885_v33 = vpop.permute.xlu0 %884 }
 0x7ca   :  { %v890_v34 = vmul.f32 %v2757_v61, %v885_v33 }
 0x7cb   :  { %761 = vrot.lane.b32.xlu1 %v756_v32, %s2935_s6 }
 0x7cc   :  { %894 = vrot.lane.b32.xlu0 %v890_v34, %s2935_s6  ;;  %v887_v35 = vpop.permute.xlu1 %886 }
 0x7cd   :  { %v891_v36 = vmul.f32 %v2759_v6, %v887_v35 }
 0x7cf   :  { %896 = vrot.lane.b32.xlu1 %v891_v36, %s2935_s6 }
 0x7d0   :  { %769 = vrot.lane.b32.xlu0 %v743_v15, %s2936_s7 }
 0x7d3   :  { %771 = vrot.lane.b32.xlu1 %v744_v19, %s2936_s7 }
 0x7d4   :  { %904 = vrot.lane.b32.xlu0 %v878_v21, %s2936_s7 }
 0x7d7   :  { %906 = vrot.lane.b32.xlu1 %v879_v24, %s2936_s7 }
 0x839   :  { %v760_v37 = vpop.permute.xlu0 %759 }
 0x83a   :  { %765 = vst.msk [vmem:[#allocation2] sm:$0xff] %vm65_vm0, %v760_v37  ;;  %2334 = vst.msk [vmem:[%s3571_s4 + $0x20] sm:$0xff] %vm65_vm0, %v760_v37 }
 0x83d   :  { %v762_v38 = vpop.permute.xlu1 %761 }
 0x83e   :  { %766 = vst.msk [vmem:[#allocation2 + $0x8] sm:$0xff] %vm65_vm0, %v762_v38  ;;  %2335 = vst.msk [vmem:[%s3571_s4 + $0x28] sm:$0xff] %vm65_vm0, %v762_v38  ;;  %v895_v39 = vpop.permute.xlu0 %894 }
 0x83f   :  { %900 = vst.msk [vmem:[#allocation4] sm:$0xff] %vm65_vm0, %v895_v39  ;;  %2341 = vst.msk [vmem:[%s3572_s5 + $0x50] sm:$0xff] %vm65_vm0, %v895_v39 }
 0x841   :  { %v897_v40 = vpop.permute.xlu1 %896  ;;  %v915_v43 = vld [vmem:[#allocation2] sm:$0xff] }
 0x842   :  { %901 = vst.msk [vmem:[#allocation4 + $0x8] sm:$0xff] %vm65_vm0, %v897_v40  ;;  %2342 = vst.msk [vmem:[%s3572_s5 + $0x58] sm:$0xff] %vm65_vm0, %v897_v40  ;;  %v770_v41 = vpop.permute.xlu0 %769 }
 0x843   :  { %775 = vst.msk [vmem:[#allocation3] sm:$0xff] %vm65_vm0, %v770_v41 }
 0x845   :  { %v772_v42 = vpop.permute.xlu1 %771  ;;  %v916_v44 = vld [vmem:[#allocation2 + $0x8] sm:$0xff] }
 0x846   :  { %776 = vst.msk [vmem:[#allocation3 + $0x8] sm:$0xff] %vm65_vm0, %v772_v42  ;;  %v905_v45 = vpop.permute.xlu0 %904  ;;  %v917_v46 = vpack.c.bf16 %v916_v44, %v915_v43  ;;  %v1050_v48 = vld [vmem:[#allocation4] sm:$0xff] }
 0x847   :  { %910 = vst.msk [vmem:[#allocation5] sm:$0xff] %vm65_vm0, %v905_v45 }
 0x848   :  { %2588 = vmatmul.mubr.msk.bf16.vlgmr.msra.gmra.mxu0 %vm65_vm0, %v917_v46 }
 0x849   :  { %v907_v47 = vpop.permute.xlu1 %906  ;;  %v1051_v49 = vld [vmem:[#allocation4 + $0x8] sm:$0xff]  ;;  %2600 = vmatpush3.bf16.msra.mxu0 %v2972_v1  ;;  %2603 = vmatprep.mubr.msk.bf16.mxu0 %vm2933_vm1, %v2932_v0  ;;  %v2478_v1 = vld [vmem:[%s3569_s0 + $0x18] sm:$0xff]  }
 0x84a   :  { %911 = vst.msk [vmem:[#allocation5 + $0x8] sm:$0xff] %vm65_vm0, %v907_v47  ;;  %v1052_v50 = vpack.c.bf16 %v1051_v49, %v1050_v48  ;;  %2601 = vmatprep.subr.bf16.mxu0 %v2932_v0  ;;  %v2435_v51 = vunpack.c.l.bf16 %v2478_v1  ;;  %v2436_v53 = vunpack.c.h.bf16 %v2478_v1  ;;  %v969_v10 = vld [vmem:[#allocation3] sm:$0xff] }
 0x84c   :  { %2596 = vmatmul.mubr.msk.bf16.vlgmr.msra.gmra.mxu1 %vm65_vm0, %v1052_v50 }
 0x84d   :  { %2602 = vmatpush3.bf16.msra.mxu0 %v3003_v3  ;;  %2608 = vmatpush3.bf16.msra.mxu1 %v2993_v2  ;;  %v2479_v2 = vld [vmem:[%s3570_s1 + $0x20] sm:$0xff]   ;;  %v970_v11 = vld [vmem:[#allocation3 + $0x8] sm:$0xff] }
 0x84e   :  { %2609 = vmatprep.subr.bf16.mxu1 %v2932_v0  ;;  %2611 = vmatprep.mubr.msk.bf16.mxu1 %vm2933_vm1, %v2932_v0  ;;  %v2439_v54 = vunpack.c.l.bf16 %v2479_v2  ;;  %v2440_v59 = vunpack.c.h.bf16 %v2479_v2  ;;  %v1104_v12 = vld [vmem:[#allocation5] sm:$0xff] }
 0x84f   :  { %2615 = vmatprep.subr.bf16.mxu0 %v2932_v0 }
 0x851   :  { %2610 = vmatpush3.bf16.msra.mxu1 %v3010_v4  ;;  %v1105_v13 = vld [vmem:[#allocation5 + $0x8] sm:$0xff] }
 0x852   :  { %2623 = vmatprep.subr.bf16.mxu1 %v2932_v0 }
 0x908   :  { %v955_v3 = vpop.f32.mrf.mxu0 }
 0x909   :  { %v967_v52 = vadd.f32 %v2435_v51, %v955_v3 }
 0x90a   :  { %v2589_v55 = vpop.f32.mrf.mxu0 }
 0x90b   :  { %2768 = vtanh.f32 %v967_v52  ;;  %v2346_v14 = vmul.f32 -1.442695, %v967_v52 }
 0x90c   :  { %v958_v56 = vpop.f32.mrf.mxu0  ;;  %v1090_v57 = vpop.f32.mrf.mxu1 }
 0x90d   :  { %v968_v4 = vadd.f32 %v2436_v53, %v958_v56  ;;  %v1102_v58 = vadd.f32 %v2439_v54, %v1090_v57 }
 0x90e   :  { %v2590_v60 = vpop.f32.mrf.mxu0  ;;  %v2597_v61 = vpop.f32.mrf.mxu1 }
 0x90f   :  { %2770 = vtanh.f32 %v968_v4  ;;  %v2347_v15 = vmul.f32 -1.442695, %v968_v4  ;;  %v2353_v16 = vmul.f32 -1.442695, %v1102_v58 }
 0x910   :  { %2772 = vtanh.f32 %v1102_v58  ;;  %v1093_v62 = vpop.f32.mrf.mxu1 }
 0x911   :  { %v1103_v63 = vadd.f32 %v2440_v59, %v1093_v62 }
 0x912   :  { %v2598_v5 = vpop.f32.mrf.mxu1 }
 0x913   :  { %2774 = vtanh.f32 %v1103_v63  ;;  %v2354_v17 = vmul.f32 -1.442695, %v1103_v63 }
 0x914   :  { %2776 = vpow2.f32 %v2346_v14 }
 0x915   :  { %2778 = vpow2.f32 %v2347_v15 }
 0x916   :  { %2780 = vpow2.f32 %v2353_v16  ;;  %v3292_v16 = vld [vmem:[%s3567_s2 + $0x8] sm:$0xff]  }
 0x917   :  { %2782 = vpow2.f32 %v2354_v17 }
 0x918   :  { %v2769_v6 = vpop.eup %2768 }
 0x919   :  { %997 = vrot.lane.b32.xlu0 %v2769_v6, %s2934_s30 }
 0x91c   :  { %v2771_v7 = vpop.eup %2770 }
 0x91d   :  { %v2773_v8 = vpop.eup %2772  ;;  %999 = vrot.lane.b32.xlu1 %v2771_v7, %s2934_s30 }
 0x91e   :  { %1132 = vrot.lane.b32.xlu0 %v2773_v8, %s2934_s30 }
 0x920   :  { %v2775_v9 = vpop.eup %2774 }
 0x921   :  { %1134 = vrot.lane.b32.xlu1 %v2775_v9, %s2934_s30  ;;  %v2777_v18 = vpop.eup %2776 }
 0x922   :  { %987 = vrot.lane.b32.xlu0 %v969_v10, %s2934_s30  ;;  %v977_v19 = vadd.f32 1.0, %v2777_v18  ;;  %v2779_v20 = vpop.eup %2778  ;;  %v3303_v18 = vld [vmem:[%s3567_s2] sm:$0xff]  }
 0x923   :  { %v2781_v21 = vpop.eup %2780  ;;  %v978_v22 = vadd.f32 1.0, %v2779_v20  ;;  %v3319_v20 = vld [vmem:[%s3568_s3] sm:$0xff]  }
 0x924   :  { %2784 = vrcp.f32 %v977_v19  ;;  %v2783_v23 = vpop.eup %2782  ;;  %v1112_v24 = vadd.f32 1.0, %v2781_v21  ;;  %v3309_v19 = vld [vmem:[%s3568_s3 + $0x8] sm:$0xff]   ;;  %v2480_v21 = vld [vmem:[%s3569_s0 + $0x20] sm:$0xff]  }
 0x925   :  { %989 = vrot.lane.b32.xlu1 %v970_v11, %s2934_s30  ;;  %2786 = vrcp.f32 %v978_v22  ;;  %v1113_v25 = vadd.f32 1.0, %v2783_v23  ;;  %v2443_v22 = vunpack.c.l.bf16 %v2480_v21  ;;  %v2481_v23 = vld [vmem:[%s3570_s1 + $0x18] sm:$0xff]  }
 0x926   :  { %1122 = vrot.lane.b32.xlu0 %v1104_v12, %s2934_s30  ;;  %2788 = vrcp.f32 %v1112_v24 }
 0x927   :  { %2790 = vrcp.f32 %v1113_v25 }
 0x929   :  { %1124 = vrot.lane.b32.xlu1 %v1105_v13, %s2934_s30 }
 0x931   :  { %v2785_v26 = vpop.eup %2784 }
 0x932   :  { %v2787_v29 = vpop.eup %2786 }
 0x933   :  { %v2789_v31 = vpop.eup %2788 }
 0x934   :  { %v2791_v35 = vpop.eup %2790 }
 0x98b   :  { %v998_v27 = vpop.permute.xlu0 %997 }
 0x98c   :  { %v1003_v28 = vmul.f32 %v2785_v26, %v998_v27  ;;  %v2447_v27 = vunpack.c.l.bf16 %v2481_v23 }
 0x98e   :  { %1007 = vrot.lane.b32.xlu0 %v1003_v28, %s2934_s30 }
 0x98f   :  { %v1000_v30 = vpop.permute.xlu1 %999 }
 0x990   :  { %v1004_v32 = vmul.f32 %v2787_v29, %v1000_v30  ;;  %v1133_v33 = vpop.permute.xlu0 %1132 }
 0x991   :  { %v1138_v34 = vmul.f32 %v2789_v31, %v1133_v33  ;;  %v2448_v33 = vunpack.c.h.bf16 %v2481_v23 }
 0x992   :  { %1009 = vrot.lane.b32.xlu1 %v1004_v32, %s2934_s30 }
 0x993   :  { %1142 = vrot.lane.b32.xlu0 %v1138_v34, %s2934_s30  ;;  %v1135_v36 = vpop.permute.xlu1 %1134 }
 0x994   :  { %v1139_v37 = vmul.f32 %v2791_v35, %v1135_v36  ;;  %v988_v38 = vpop.permute.xlu0 %987 }
 0x995   :  { %v993_v41 = vmul.f32 %v2785_v26, %v988_v38 }
 0x996   :  { %1144 = vrot.lane.b32.xlu1 %v1139_v37, %s2934_s30 }
 0x997   :  { %v990_v39 = vpop.permute.xlu1 %989 }
 0x998   :  { %v1123_v40 = vpop.permute.xlu0 %1122  ;;  %v994_v45 = vmul.f32 %v2787_v29, %v990_v39 }
 0x999   :  { %v1128_v46 = vmul.f32 %v2789_v31, %v1123_v40 }
 0x99b   :  { %v1125_v42 = vpop.permute.xlu1 %1124 }
 0x99c   :  { %v1129_v1 = vmul.f32 %v2791_v35, %v1125_v42 }
 0xa00   :  { %v1008_v43 = vpop.permute.xlu0 %1007 }
 0xa01   :  { %v1013_v44 = vadd.f32 %v1008_v43, %v993_v41 }
 0xa03   :  { %2792 = vtanh.f32 %v1013_v44 }
 0xa04   :  { %v1010_v47 = vpop.permute.xlu1 %1009 }
 0xa05   :  { %v1014_v48 = vadd.f32 %v1010_v47, %v994_v45  ;;  %v1143_v49 = vpop.permute.xlu0 %1142 }
 0xa06   :  { %v1148_v50 = vadd.f32 %v1143_v49, %v1128_v46 }
 0xa07   :  { %2794 = vtanh.f32 %v1014_v48 }
 0xa08   :  { %2796 = vtanh.f32 %v1148_v50  ;;  %v1145_v51 = vpop.permute.xlu1 %1144 }
 0xa09   :  { %v1149_v2 = vadd.f32 %v1145_v51, %v1129_v1 }
 0xa0b   :  { %2798 = vtanh.f32 %v1149_v2 }
 0xa10   :  { %v2793_v3 = vpop.eup %2792 }
 0xa11   :  { %1019 = vrot.lane.b32.xlu0 %v2793_v3, %s2934_s30 }
 0xa14   :  { %v2795_v52 = vpop.eup %2794 }
 0xa15   :  { %v2797_v53 = vpop.eup %2796  ;;  %1021 = vrot.lane.b32.xlu1 %v2795_v52, %s2934_s30 }
 0xa16   :  { %1154 = vrot.lane.b32.xlu0 %v2797_v53, %s2934_s30 }
 0xa18   :  { %v2799_v54 = vpop.eup %2798 }
 0xa19   :  { %1156 = vrot.lane.b32.xlu1 %v2799_v54, %s2934_s30 }
 0xa83   :  { %v1020_v55 = vpop.permute.xlu0 %1019 }
 0xa84   :  { %v1025_v56 = vmul.f32 %v2785_v26, %v1020_v55  ;;  %v2444_v26 = vunpack.c.h.bf16 %v2480_v21 }
 0xa86   :  { %1029 = vrot.lane.b32.xlu0 %v1025_v56, %s2935_s6 }
 0xa87   :  { %v1022_v57 = vpop.permute.xlu1 %1021 }
 0xa88   :  { %v1026_v4 = vmul.f32 %v2787_v29, %v1022_v57  ;;  %v1155_v58 = vpop.permute.xlu0 %1154 }
 0xa89   :  { %v1160_v59 = vmul.f32 %v2789_v31, %v1155_v58 }
 0xa8a   :  { %1031 = vrot.lane.b32.xlu1 %v1026_v4, %s2935_s6 }
 0xa8b   :  { %1164 = vrot.lane.b32.xlu0 %v1160_v59, %s2935_s6  ;;  %v1157_v60 = vpop.permute.xlu1 %1156 }
 0xa8c   :  { %v1161_v61 = vmul.f32 %v2791_v35, %v1157_v60 }
 0xa8e   :  { %1166 = vrot.lane.b32.xlu1 %v1161_v61, %s2935_s6 }
 0xa8f   :  { %1039 = vrot.lane.b32.xlu0 %v1013_v44, %s2936_s7 }
 0xa92   :  { %1041 = vrot.lane.b32.xlu1 %v1014_v48, %s2936_s7 }
 0xa93   :  { %1174 = vrot.lane.b32.xlu0 %v1148_v50, %s2936_s7 }
 0xa96   :  { %1176 = vrot.lane.b32.xlu1 %v1149_v2, %s2936_s7 }
 0xaf8   :  { %v1030_v62 = vpop.permute.xlu0 %1029 }
 0xaf9   :  { %1035 = vst.msk [vmem:[#allocation2] sm:$0xff] %vm65_vm0, %v1030_v62  ;;  %2348 = vst.msk [vmem:[%s3571_s4 + $0x30] sm:$0xff] %vm65_vm0, %v1030_v62 }
 0xafc   :  { %v1032_v63 = vpop.permute.xlu1 %1031 }
 0xafd   :  { %1036 = vst.msk [vmem:[#allocation2 + $0x8] sm:$0xff] %vm65_vm0, %v1032_v63  ;;  %2349 = vst.msk [vmem:[%s3571_s4 + $0x38] sm:$0xff] %vm65_vm0, %v1032_v63  ;;  %v1165_v5 = vpop.permute.xlu0 %1164 }
 0xafe   :  { %1170 = vst.msk [vmem:[#allocation4] sm:$0xff] %vm65_vm0, %v1165_v5  ;;  %2355 = vst.msk [vmem:[%s3572_s5 + $0x40] sm:$0xff] %vm65_vm0, %v1165_v5 }
 0xb00   :  { %v1167_v6 = vpop.permute.xlu1 %1166  ;;  %v1185_v9 = vld [vmem:[#allocation2] sm:$0xff] }
 0xb01   :  { %1171 = vst.msk [vmem:[#allocation4 + $0x8] sm:$0xff] %vm65_vm0, %v1167_v6  ;;  %2356 = vst.msk [vmem:[%s3572_s5 + $0x48] sm:$0xff] %vm65_vm0, %v1167_v6  ;;  %v1040_v7 = vpop.permute.xlu0 %1039 }
 0xb02   :  { %1045 = vst.msk [vmem:[#allocation3] sm:$0xff] %vm65_vm0, %v1040_v7 }
 0xb04   :  { %v1042_v8 = vpop.permute.xlu1 %1041  ;;  %v1186_v10 = vld [vmem:[#allocation2 + $0x8] sm:$0xff] }
 0xb05   :  { %1046 = vst.msk [vmem:[#allocation3 + $0x8] sm:$0xff] %vm65_vm0, %v1042_v8  ;;  %v1175_v11 = vpop.permute.xlu0 %1174  ;;  %v1187_v12 = vpack.c.bf16 %v1186_v10, %v1185_v9  ;;  %v1320_v14 = vld [vmem:[#allocation4] sm:$0xff] }
 0xb06   :  { %1180 = vst.msk [vmem:[#allocation5] sm:$0xff] %vm65_vm0, %v1175_v11 }
 0xb07   :  { %2604 = vmatmul.mubr.msk.bf16.vlgmr.msra.gmra.mxu0 %vm65_vm0, %v1187_v12 }
 0xb08   :  { %v1177_v13 = vpop.permute.xlu1 %1176  ;;  %v1321_v15 = vld [vmem:[#allocation4 + $0x8] sm:$0xff]  ;;  %2616 = vmatpush3.bf16.msra.mxu0 %v3292_v16  ;;  %2619 = vmatprep.mubr.msk.bf16.mxu0 %vm2933_vm1, %v2932_v0 }
 0xb09   :  { %1181 = vst.msk [vmem:[#allocation5 + $0x8] sm:$0xff] %vm65_vm0, %v1177_v13  ;;  %v1322_v17 = vpack.c.bf16 %v1321_v15, %v1320_v14  ;;  %2617 = vmatprep.subr.bf16.mxu0 %v2932_v0  ;;  %v1239_v43 = vld [vmem:[#allocation3] sm:$0xff] }
 0xb0b   :  { %2612 = vmatmul.mubr.msk.bf16.vlgmr.msra.gmra.mxu1 %vm65_vm0, %v1322_v17 }
 0xb0c   :  { %2618 = vmatpush3.bf16.msra.mxu0 %v3303_v18  ;;  %2624 = vmatpush3.bf16.msra.mxu1 %v3309_v19  ;;  %v1240_v44 = vld [vmem:[#allocation3 + $0x8] sm:$0xff] }
 0xb0d   :  { %2625 = vmatprep.subr.bf16.mxu1 %v2932_v0  ;;  %2627 = vmatprep.mubr.msk.bf16.mxu1 %vm2933_vm1, %v2932_v0  ;;  %v1374_v45 = vld [vmem:[#allocation5] sm:$0xff] }
 0xb0e   :  { %2631 = vmatprep.subr.bf16.mxu0 %v2932_v0 }
 0xb10   :  { %2626 = vmatpush3.bf16.msra.mxu1 %v3319_v20  ;;  %v1375_v46 = vld [vmem:[#allocation5 + $0x8] sm:$0xff] }
 0xb11   :  { %2639 = vmatprep.subr.bf16.mxu1 %v2932_v0 }
 0xbc7   :  { %v1225_v24 = vpop.f32.mrf.mxu0 }
 0xbc8   :  { %v1237_v25 = vadd.f32 %v2443_v22, %v1225_v24 }
 0xbc9   :  { %v2605_v28 = vpop.f32.mrf.mxu0 }
 0xbca   :  { %2800 = vtanh.f32 %v1237_v25  ;;  %v2360_v47 = vmul.f32 -1.442695, %v1237_v25 }
 0xbcb   :  { %v1228_v29 = vpop.f32.mrf.mxu0  ;;  %v1360_v30 = vpop.f32.mrf.mxu1 }
 0xbcc   :  { %v1238_v31 = vadd.f32 %v2444_v26, %v1228_v29  ;;  %v1372_v32 = vadd.f32 %v2447_v27, %v1360_v30 }
 0xbcd   :  { %v2606_v34 = vpop.f32.mrf.mxu0  ;;  %v2613_v35 = vpop.f32.mrf.mxu1 }
 0xbce   :  { %2802 = vtanh.f32 %v1238_v31  ;;  %v2361_v48 = vmul.f32 -1.442695, %v1238_v31  ;;  %v2367_v49 = vmul.f32 -1.442695, %v1372_v32 }
 0xbcf   :  { %2804 = vtanh.f32 %v1372_v32  ;;  %v1363_v36 = vpop.f32.mrf.mxu1 }
 0xbd0   :  { %v1373_v37 = vadd.f32 %v2448_v33, %v1363_v36 }
 0xbd1   :  { %v2614_v38 = vpop.f32.mrf.mxu1 }
 0xbd2   :  { %2806 = vtanh.f32 %v1373_v37  ;;  %v2368_v50 = vmul.f32 -1.442695, %v1373_v37 }
 0xbd3   :  { %2808 = vpow2.f32 %v2360_v47 }
 0xbd4   :  { %2810 = vpow2.f32 %v2361_v48 }
 0xbd5   :  { %2812 = vpow2.f32 %v2367_v49 }
 0xbd6   :  { %2814 = vpow2.f32 %v2368_v50 }
 0xbd7   :  { %v2801_v39 = vpop.eup %2800 }
 0xbd8   :  { %1267 = vrot.lane.b32.xlu0 %v2801_v39, %s2934_s30 }
 0xbdb   :  { %v2803_v40 = vpop.eup %2802 }
 0xbdc   :  { %v2805_v41 = vpop.eup %2804  ;;  %1269 = vrot.lane.b32.xlu1 %v2803_v40, %s2934_s30 }
 0xbdd   :  { %1402 = vrot.lane.b32.xlu0 %v2805_v41, %s2934_s30 }
 0xbdf   :  { %v2807_v42 = vpop.eup %2806 }
 0xbe0   :  { %1404 = vrot.lane.b32.xlu1 %v2807_v42, %s2934_s30  ;;  %v2809_v1 = vpop.eup %2808 }
 0xbe1   :  { %1257 = vrot.lane.b32.xlu0 %v1239_v43, %s2934_s30  ;;  %v1247_v51 = vadd.f32 1.0, %v2809_v1  ;;  %v2811_v2 = vpop.eup %2810 }
 0xbe2   :  { %v2813_v3 = vpop.eup %2812  ;;  %v1248_v52 = vadd.f32 1.0, %v2811_v2 }
 0xbe3   :  { %2816 = vrcp.f32 %v1247_v51  ;;  %v2815_v53 = vpop.eup %2814  ;;  %v1382_v54 = vadd.f32 1.0, %v2813_v3  ;;  %v2482_v3 = vld [vmem:[%s3569_s0 + $0x28] sm:$0xff]  }
 0xbe4   :  { %1259 = vrot.lane.b32.xlu1 %v1240_v44, %s2934_s30  ;;  %2818 = vrcp.f32 %v1248_v52  ;;  %v1383_v55 = vadd.f32 1.0, %v2815_v53  ;;  %v2451_v52 = vunpack.c.l.bf16 %v2482_v3  ;;  %v2483_v53 = vld [vmem:[%s3570_s1 + $0x10] sm:$0xff]  }
 0xbe5   :  { %1392 = vrot.lane.b32.xlu0 %v1374_v45, %s2934_s30  ;;  %2820 = vrcp.f32 %v1382_v54 }
 0xbe6   :  { %2822 = vrcp.f32 %v1383_v55 }
 0xbe8   :  { %1394 = vrot.lane.b32.xlu1 %v1375_v46, %s2934_s30 }
 0xbf0   :  { %v2817_v56 = vpop.eup %2816 }
 0xbf1   :  { %v2819_v58 = vpop.eup %2818 }
 0xbf2   :  { %v2821_v60 = vpop.eup %2820 }
 0xbf3   :  { %v2823_v5 = vpop.eup %2822 }
 0xc4a   :  { %v1268_v57 = vpop.permute.xlu0 %1267 }
 0xc4b   :  { %v1273_v4 = vmul.f32 %v2817_v56, %v1268_v57  ;;  %v2455_v57 = vunpack.c.l.bf16 %v2483_v53 }
 0xc4d   :  { %1277 = vrot.lane.b32.xlu0 %v1273_v4, %s2934_s30 }
 0xc4e   :  { %v1270_v59 = vpop.permute.xlu1 %1269 }
 0xc4f   :  { %v1274_v61 = vmul.f32 %v2819_v58, %v1270_v59  ;;  %v1403_v62 = vpop.permute.xlu0 %1402 }
 0xc50   :  { %v1408_v63 = vmul.f32 %v2821_v60, %v1403_v62  ;;  %v2456_v62 = vunpack.c.h.bf16 %v2483_v53 }
 0xc51   :  { %1279 = vrot.lane.b32.xlu1 %v1274_v61, %s2934_s30 }
 0xc52   :  { %1412 = vrot.lane.b32.xlu0 %v1408_v63, %s2934_s30  ;;  %v1405_v6 = vpop.permute.xlu1 %1404 }
 0xc53   :  { %v1409_v7 = vmul.f32 %v2823_v5, %v1405_v6  ;;  %v1258_v8 = vpop.permute.xlu0 %1257 }
 0xc54   :  { %v1263_v11 = vmul.f32 %v2817_v56, %v1258_v8 }
 0xc55   :  { %1414 = vrot.lane.b32.xlu1 %v1409_v7, %s2934_s30 }
 0xc56   :  { %v1260_v9 = vpop.permute.xlu1 %1259 }
 0xc57   :  { %v1393_v10 = vpop.permute.xlu0 %1392  ;;  %v1264_v15 = vmul.f32 %v2819_v58, %v1260_v9 }
 0xc58   :  { %v1398_v17 = vmul.f32 %v2821_v60, %v1393_v10 }
 0xc5a   :  { %v1395_v12 = vpop.permute.xlu1 %1394 }
 0xc5b   :  { %v1399_v25 = vmul.f32 %v2823_v5, %v1395_v12 }
 0xcbf   :  { %v1278_v13 = vpop.permute.xlu0 %1277 }
 0xcc0   :  { %v1283_v14 = vadd.f32 %v1278_v13, %v1263_v11 }
 0xcc2   :  { %2824 = vtanh.f32 %v1283_v14 }
 0xcc3   :  { %v1280_v21 = vpop.permute.xlu1 %1279 }
 0xcc4   :  { %v1284_v22 = vadd.f32 %v1280_v21, %v1264_v15  ;;  %v1413_v23 = vpop.permute.xlu0 %1412 }
 0xcc5   :  { %v1418_v24 = vadd.f32 %v1413_v23, %v1398_v17 }
 0xcc6   :  { %2826 = vtanh.f32 %v1284_v22 }
 0xcc7   :  { %2828 = vtanh.f32 %v1418_v24  ;;  %v1415_v26 = vpop.permute.xlu1 %1414 }
 0xcc8   :  { %v1419_v27 = vadd.f32 %v1415_v26, %v1399_v25 }
 0xcca   :  { %2830 = vtanh.f32 %v1419_v27 }
 0xccf   :  { %v2825_v28 = vpop.eup %2824 }
 0xcd0   :  { %1289 = vrot.lane.b32.xlu0 %v2825_v28, %s2934_s30 }
 0xcd3   :  { %v2827_v29 = vpop.eup %2826 }
 0xcd4   :  { %v2829_v30 = vpop.eup %2828  ;;  %1291 = vrot.lane.b32.xlu1 %v2827_v29, %s2934_s30 }
 0xcd5   :  { %1424 = vrot.lane.b32.xlu0 %v2829_v30, %s2934_s30 }
 0xcd7   :  { %v2831_v31 = vpop.eup %2830 }
 0xcd8   :  { %1426 = vrot.lane.b32.xlu1 %v2831_v31, %s2934_s30 }
 0xd42   :  { %v1290_v32 = vpop.permute.xlu0 %1289 }
 0xd43   :  { %v1295_v33 = vmul.f32 %v2817_v56, %v1290_v32  ;;  %v2452_v56 = vunpack.c.h.bf16 %v2482_v3 }
 0xd45   :  { %1299 = vrot.lane.b32.xlu0 %v1295_v33, %s2935_s6 }
 0xd46   :  { %v1292_v34 = vpop.permute.xlu1 %1291 }
 0xd47   :  { %v1296_v35 = vmul.f32 %v2819_v58, %v1292_v34  ;;  %v1425_v36 = vpop.permute.xlu0 %1424 }
 0xd48   :  { %v1430_v37 = vmul.f32 %v2821_v60, %v1425_v36 }
 0xd49   :  { %1301 = vrot.lane.b32.xlu1 %v1296_v35, %s2935_s6 }
 0xd4a   :  { %1434 = vrot.lane.b32.xlu0 %v1430_v37, %s2935_s6  ;;  %v1427_v38 = vpop.permute.xlu1 %1426 }
 0xd4b   :  { %v1431_v39 = vmul.f32 %v2823_v5, %v1427_v38 }
 0xd4d   :  { %1436 = vrot.lane.b32.xlu1 %v1431_v39, %s2935_s6 }
 0xd4e   :  { %1309 = vrot.lane.b32.xlu0 %v1283_v14, %s2936_s7 }
 0xd51   :  { %1311 = vrot.lane.b32.xlu1 %v1284_v22, %s2936_s7 }
 0xd52   :  { %1444 = vrot.lane.b32.xlu0 %v1418_v24, %s2936_s7 }
 0xd55   :  { %1446 = vrot.lane.b32.xlu1 %v1419_v27, %s2936_s7 }
 0xdb7   :  { %v1300_v40 = vpop.permute.xlu0 %1299 }
 0xdb8   :  { %1305 = vst.msk [vmem:[#allocation2] sm:$0xff] %vm65_vm0, %v1300_v40  ;;  %2362 = vst.msk [vmem:[%s3571_s4 + $0x40] sm:$0xff] %vm65_vm0, %v1300_v40 }
 0xdbb   :  { %v1302_v41 = vpop.permute.xlu1 %1301 }
 0xdbc   :  { %1306 = vst.msk [vmem:[#allocation2 + $0x8] sm:$0xff] %vm65_vm0, %v1302_v41  ;;  %2363 = vst.msk [vmem:[%s3571_s4 + $0x48] sm:$0xff] %vm65_vm0, %v1302_v41  ;;  %v1435_v42 = vpop.permute.xlu0 %1434 }
 0xdbd   :  { %1440 = vst.msk [vmem:[#allocation4] sm:$0xff] %vm65_vm0, %v1435_v42  ;;  %2369 = vst.msk [vmem:[%s3572_s5 + $0x30] sm:$0xff] %vm65_vm0, %v1435_v42 }
 0xdbf   :  { %v1437_v43 = vpop.permute.xlu1 %1436  ;;  %v1455_v46 = vld [vmem:[#allocation2] sm:$0xff] }
 0xdc0   :  { %1441 = vst.msk [vmem:[#allocation4 + $0x8] sm:$0xff] %vm65_vm0, %v1437_v43  ;;  %2370 = vst.msk [vmem:[%s3572_s5 + $0x38] sm:$0xff] %vm65_vm0, %v1437_v43  ;;  %v1310_v44 = vpop.permute.xlu0 %1309 }
 0xdc1   :  { %1315 = vst.msk [vmem:[#allocation3] sm:$0xff] %vm65_vm0, %v1310_v44 }
 0xdc3   :  { %v1312_v45 = vpop.permute.xlu1 %1311  ;;  %v1456_v47 = vld [vmem:[#allocation2 + $0x8] sm:$0xff] }
 0xdc4   :  { %1316 = vst.msk [vmem:[#allocation3 + $0x8] sm:$0xff] %vm65_vm0, %v1312_v45  ;;  %v1445_v48 = vpop.permute.xlu0 %1444  ;;  %v1457_v49 = vpack.c.bf16 %v1456_v47, %v1455_v46  ;;  %v1590_v1 = vld [vmem:[#allocation4] sm:$0xff] }
 0xdc5   :  { %1450 = vst.msk [vmem:[#allocation5] sm:$0xff] %vm65_vm0, %v1445_v48 }
 0xdc6   :  { %2620 = vmatmul.mubr.msk.bf16.vlgmr.msra.gmra.mxu0 %vm65_vm0, %v1457_v49 }
 0xdc7   :  { %v1447_v50 = vpop.permute.xlu1 %1446  ;;  %v1591_v51 = vld [vmem:[#allocation4 + $0x8] sm:$0xff]  ;;  %2632 = vmatpush3.bf16.msra.mxu0 %v3292_v16  ;;  %2635 = vmatprep.mubr.msk.bf16.mxu0 %vm2933_vm1, %v2932_v0 }
 0xdc8   :  { %1451 = vst.msk [vmem:[#allocation5 + $0x8] sm:$0xff] %vm65_vm0, %v1447_v50  ;;  %v1592_v2 = vpack.c.bf16 %v1591_v51, %v1590_v1  ;;  %2633 = vmatprep.subr.bf16.mxu0 %v2932_v0  ;;  %v1509_v13 = vld [vmem:[#allocation3] sm:$0xff] }
 0xdca   :  { %2628 = vmatmul.mubr.msk.bf16.vlgmr.msra.gmra.mxu1 %vm65_vm0, %v1592_v2 }
 0xdcb   :  { %2634 = vmatpush3.bf16.msra.mxu0 %v3303_v18  ;;  %2640 = vmatpush3.bf16.msra.mxu1 %v3309_v19  ;;  %v1510_v14 = vld [vmem:[#allocation3 + $0x8] sm:$0xff] }
 0xdcc   :  { %2641 = vmatprep.subr.bf16.mxu1 %v2932_v0  ;;  %2643 = vmatprep.mubr.msk.bf16.mxu1 %vm2933_vm1, %v2932_v0  ;;  %v1644_v15 = vld [vmem:[#allocation5] sm:$0xff] }
 0xdcd   :  { %2647 = vmatprep.subr.bf16.mxu0 %v2932_v0 }
 0xdcf   :  { %2642 = vmatpush3.bf16.msra.mxu1 %v3319_v20  ;;  %v1645_v17 = vld [vmem:[#allocation5 + $0x8] sm:$0xff] }
 0xdd0   :  { %2655 = vmatprep.subr.bf16.mxu1 %v2932_v0 }
 0xe86   :  { %v1495_v54 = vpop.f32.mrf.mxu0 }
 0xe87   :  { %v1507_v55 = vadd.f32 %v2451_v52, %v1495_v54 }
 0xe88   :  { %v2621_v4 = vpop.f32.mrf.mxu0 }
 0xe89   :  { %2832 = vtanh.f32 %v1507_v55  ;;  %v2374_v21 = vmul.f32 -1.442695, %v1507_v55 }
 0xe8a   :  { %v1498_v58 = vpop.f32.mrf.mxu0  ;;  %v1630_v59 = vpop.f32.mrf.mxu1 }
 0xe8b   :  { %v1508_v60 = vadd.f32 %v2452_v56, %v1498_v58  ;;  %v1642_v61 = vadd.f32 %v2455_v57, %v1630_v59 }
 0xe8c   :  { %v2622_v63 = vpop.f32.mrf.mxu0  ;;  %v2629_v5 = vpop.f32.mrf.mxu1 }
 0xe8d   :  { %2834 = vtanh.f32 %v1508_v60  ;;  %v2375_v22 = vmul.f32 -1.442695, %v1508_v60  ;;  %v2381_v23 = vmul.f32 -1.442695, %v1642_v61 }
 0xe8e   :  { %2836 = vtanh.f32 %v1642_v61  ;;  %v1633_v6 = vpop.f32.mrf.mxu1 }
 0xe8f   :  { %v1643_v7 = vadd.f32 %v2456_v62, %v1633_v6 }
 0xe90   :  { %v2630_v8 = vpop.f32.mrf.mxu1 }
 0xe91   :  { %2838 = vtanh.f32 %v1643_v7  ;;  %v2382_v24 = vmul.f32 -1.442695, %v1643_v7 }
 0xe92   :  { %2840 = vpow2.f32 %v2374_v21 }
 0xe93   :  { %2842 = vpow2.f32 %v2375_v22 }
 0xe94   :  { %2844 = vpow2.f32 %v2381_v23 }
 0xe95   :  { %2846 = vpow2.f32 %v2382_v24 }
 0xe96   :  { %v2833_v9 = vpop.eup %2832 }
 0xe97   :  { %1537 = vrot.lane.b32.xlu0 %v2833_v9, %s2934_s30 }
 0xe9a   :  { %v2835_v10 = vpop.eup %2834 }
 0xe9b   :  { %v2837_v11 = vpop.eup %2836  ;;  %1539 = vrot.lane.b32.xlu1 %v2835_v10, %s2934_s30 }
 0xe9c   :  { %1672 = vrot.lane.b32.xlu0 %v2837_v11, %s2934_s30 }
 0xe9e   :  { %v2839_v12 = vpop.eup %2838 }
 0xe9f   :  { %1674 = vrot.lane.b32.xlu1 %v2839_v12, %s2934_s30  ;;  %v2841_v25 = vpop.eup %2840 }
 0xea0   :  { %1527 = vrot.lane.b32.xlu0 %v1509_v13, %s2934_s30  ;;  %v1517_v26 = vadd.f32 1.0, %v2841_v25  ;;  %v2843_v27 = vpop.eup %2842 }
 0xea1   :  { %v2845_v28 = vpop.eup %2844  ;;  %v1518_v29 = vadd.f32 1.0, %v2843_v27 }
 0xea2   :  { %2848 = vrcp.f32 %v1517_v26  ;;  %v2847_v30 = vpop.eup %2846  ;;  %v1652_v31 = vadd.f32 1.0, %v2845_v28 }
 0xea3   :  { %1529 = vrot.lane.b32.xlu1 %v1510_v14, %s2934_s30  ;;  %2850 = vrcp.f32 %v1518_v29  ;;  %v1653_v32 = vadd.f32 1.0, %v2847_v30  ;;  %v2485_v29 = vld [vmem:[%s3570_s1 + $0x8] sm:$0xff]  }
 0xea4   :  { %1662 = vrot.lane.b32.xlu0 %v1644_v15, %s2934_s30  ;;  %2852 = vrcp.f32 %v1652_v31 }
 0xea5   :  { %2854 = vrcp.f32 %v1653_v32 }
 0xea7   :  { %1664 = vrot.lane.b32.xlu1 %v1645_v17, %s2934_s30 }
 0xeaf   :  { %v2849_v33 = vpop.eup %2848 }
 0xeb0   :  { %v2851_v36 = vpop.eup %2850 }
 0xeb1   :  { %v2853_v38 = vpop.eup %2852 }
 0xeb2   :  { %v2855_v42 = vpop.eup %2854 }
 0xf09   :  { %v1538_v34 = vpop.permute.xlu0 %1537 }
 0xf0a   :  { %v1543_v35 = vmul.f32 %v2849_v33, %v1538_v34 }
 0xf0c   :  { %1547 = vrot.lane.b32.xlu0 %v1543_v35, %s2934_s30 }
 0xf0d   :  { %v1540_v37 = vpop.permute.xlu1 %1539 }
 0xf0e   :  { %v1544_v39 = vmul.f32 %v2851_v36, %v1540_v37  ;;  %v1673_v40 = vpop.permute.xlu0 %1672 }
 0xf0f   :  { %v1678_v41 = vmul.f32 %v2853_v38, %v1673_v40 }
 0xf10   :  { %1549 = vrot.lane.b32.xlu1 %v1544_v39, %s2934_s30 }
 0xf11   :  { %1682 = vrot.lane.b32.xlu0 %v1678_v41, %s2934_s30  ;;  %v1675_v43 = vpop.permute.xlu1 %1674 }
 0xf12   :  { %v1679_v44 = vmul.f32 %v2855_v42, %v1675_v43  ;;  %v1528_v45 = vpop.permute.xlu0 %1527 }
 0xf13   :  { %v1533_v48 = vmul.f32 %v2849_v33, %v1528_v45 }
 0xf14   :  { %1684 = vrot.lane.b32.xlu1 %v1679_v44, %s2934_s30 }
 0xf15   :  { %v1530_v46 = vpop.permute.xlu1 %1529 }
 0xf16   :  { %v1663_v47 = vpop.permute.xlu0 %1662  ;;  %v1534_v51 = vmul.f32 %v2851_v36, %v1530_v46 }
 0xf17   :  { %v1668_v2 = vmul.f32 %v2853_v38, %v1663_v47 }
 0xf19   :  { %v1665_v49 = vpop.permute.xlu1 %1664 }
 0xf1a   :  { %v1669_v55 = vmul.f32 %v2855_v42, %v1665_v49 }
 0xf7e   :  { %v1548_v50 = vpop.permute.xlu0 %1547 }
 0xf7f   :  { %v1553_v1 = vadd.f32 %v1548_v50, %v1533_v48 }
 0xf81   :  { %2856 = vtanh.f32 %v1553_v1 }
 0xf82   :  { %v1550_v3 = vpop.permute.xlu1 %1549 }
 0xf83   :  { %v1554_v52 = vadd.f32 %v1550_v3, %v1534_v51  ;;  %v1683_v53 = vpop.permute.xlu0 %1682 }
 0xf84   :  { %v1688_v54 = vadd.f32 %v1683_v53, %v1668_v2 }
 0xf85   :  { %2858 = vtanh.f32 %v1554_v52 }
 0xf86   :  { %2860 = vtanh.f32 %v1688_v54  ;;  %v1685_v56 = vpop.permute.xlu1 %1684 }
 0xf87   :  { %v1689_v57 = vadd.f32 %v1685_v56, %v1669_v55 }
 0xf89   :  { %2862 = vtanh.f32 %v1689_v57 }
 0xf8e   :  { %v2857_v4 = vpop.eup %2856 }
 0xf8f   :  { %1559 = vrot.lane.b32.xlu0 %v2857_v4, %s2934_s30 }
 0xf92   :  { %v2859_v58 = vpop.eup %2858 }
 0xf93   :  { %v2861_v59 = vpop.eup %2860  ;;  %1561 = vrot.lane.b32.xlu1 %v2859_v58, %s2934_s30 }
 0xf94   :  { %1694 = vrot.lane.b32.xlu0 %v2861_v59, %s2934_s30 }
 0xf96   :  { %v2863_v60 = vpop.eup %2862 }
 0xf97   :  { %1696 = vrot.lane.b32.xlu1 %v2863_v60, %s2934_s30 }
0x1001   :  { %v1560_v61 = vpop.permute.xlu0 %1559 }
0x1002   :  { %v1565_v62 = vmul.f32 %v2849_v33, %v1560_v61 }
0x1004   :  { %1569 = vrot.lane.b32.xlu0 %v1565_v62, %s2935_s6 }
0x1005   :  { %v1562_v63 = vpop.permute.xlu1 %1561 }
0x1006   :  { %v1566_v5 = vmul.f32 %v2851_v36, %v1562_v63  ;;  %v1695_v6 = vpop.permute.xlu0 %1694 }
0x1007   :  { %v1700_v7 = vmul.f32 %v2853_v38, %v1695_v6 }
0x1008   :  { %1571 = vrot.lane.b32.xlu1 %v1566_v5, %s2935_s6 }
0x1009   :  { %1704 = vrot.lane.b32.xlu0 %v1700_v7, %s2935_s6  ;;  %v1697_v8 = vpop.permute.xlu1 %1696 }
0x100a   :  { %v1701_v9 = vmul.f32 %v2855_v42, %v1697_v8 }
0x100c   :  { %1706 = vrot.lane.b32.xlu1 %v1701_v9, %s2935_s6 }
0x100d   :  { %1579 = vrot.lane.b32.xlu0 %v1553_v1, %s2936_s7 }
0x1010   :  { %1581 = vrot.lane.b32.xlu1 %v1554_v52, %s2936_s7 }
0x1011   :  { %1714 = vrot.lane.b32.xlu0 %v1688_v54, %s2936_s7 }
0x1014   :  { %1716 = vrot.lane.b32.xlu1 %v1689_v57, %s2936_s7 }
0x1076   :  { %v1570_v10 = vpop.permute.xlu0 %1569 }
0x1077   :  { %1575 = vst.msk [vmem:[#allocation2] sm:$0xff] %vm65_vm0, %v1570_v10  ;;  %2376 = vst.msk [vmem:[%s3571_s4 + $0x50] sm:$0xff] %vm65_vm0, %v1570_v10 }
0x107a   :  { %v1572_v11 = vpop.permute.xlu1 %1571 }
0x107b   :  { %1576 = vst.msk [vmem:[#allocation2 + $0x8] sm:$0xff] %vm65_vm0, %v1572_v11  ;;  %2377 = vst.msk [vmem:[%s3571_s4 + $0x58] sm:$0xff] %vm65_vm0, %v1572_v11  ;;  %v1705_v12 = vpop.permute.xlu0 %1704 }
0x107c   :  { %1710 = vst.msk [vmem:[#allocation4] sm:$0xff] %vm65_vm0, %v1705_v12  ;;  %2383 = vst.msk [vmem:[%s3572_s5 + $0x20] sm:$0xff] %vm65_vm0, %v1705_v12 }
0x107e   :  { %v1707_v13 = vpop.permute.xlu1 %1706  ;;  %v1725_v17 = vld [vmem:[#allocation2] sm:$0xff] }
0x107f   :  { %1711 = vst.msk [vmem:[#allocation4 + $0x8] sm:$0xff] %vm65_vm0, %v1707_v13  ;;  %2384 = vst.msk [vmem:[%s3572_s5 + $0x28] sm:$0xff] %vm65_vm0, %v1707_v13  ;;  %v1580_v14 = vpop.permute.xlu0 %1579 }
0x1080   :  { %1585 = vst.msk [vmem:[#allocation3] sm:$0xff] %vm65_vm0, %v1580_v14 }
0x1082   :  { %v1582_v15 = vpop.permute.xlu1 %1581  ;;  %v1726_v21 = vld [vmem:[#allocation2 + $0x8] sm:$0xff] }
0x1083   :  { %1586 = vst.msk [vmem:[#allocation3 + $0x8] sm:$0xff] %vm65_vm0, %v1582_v15  ;;  %v1715_v22 = vpop.permute.xlu0 %1714  ;;  %v1727_v23 = vpack.c.bf16 %v1726_v21, %v1725_v17  ;;  %v1860_v25 = vld [vmem:[#allocation4] sm:$0xff] }
0x1084   :  { %1720 = vst.msk [vmem:[#allocation5] sm:$0xff] %vm65_vm0, %v1715_v22 }
0x1085   :  { %2636 = vmatmul.mubr.msk.bf16.vlgmr.msra.gmra.mxu0 %vm65_vm0, %v1727_v23 }
0x1086   :  { %v1717_v24 = vpop.permute.xlu1 %1716  ;;  %v1861_v26 = vld [vmem:[#allocation4 + $0x8] sm:$0xff]  ;;  %2648 = vmatpush3.bf16.msra.mxu0 %v3292_v16  ;;  %2651 = vmatprep.mubr.msk.bf16.mxu0 %vm2933_vm1, %v2932_v0  ;;  %v2484_v16 = vld [vmem:[%s3569_s0 + $0x30] sm:$0xff]  }
0x1087   :  { %1721 = vst.msk [vmem:[#allocation5 + $0x8] sm:$0xff] %vm65_vm0, %v1717_v24  ;;  %v1862_v27 = vpack.c.bf16 %v1861_v26, %v1860_v25  ;;  %2649 = vmatprep.subr.bf16.mxu0 %v2932_v0  ;;  %v2459_v28 = vunpack.c.l.bf16 %v2484_v16  ;;  %v2460_v31 = vunpack.c.h.bf16 %v2484_v16  ;;  %v1779_v45 = vld [vmem:[#allocation3] sm:$0xff] }
0x1089   :  { %2644 = vmatmul.mubr.msk.bf16.vlgmr.msra.gmra.mxu1 %vm65_vm0, %v1862_v27 }
0x108a   :  { %2650 = vmatpush3.bf16.msra.mxu0 %v3303_v18  ;;  %2656 = vmatpush3.bf16.msra.mxu1 %v3309_v19  ;;  %v2463_v19 = vunpack.c.l.bf16 %v2485_v29  ;;  %v1780_v46 = vld [vmem:[#allocation3 + $0x8] sm:$0xff] }
0x108b   :  { %2657 = vmatprep.subr.bf16.mxu1 %v2932_v0  ;;  %2659 = vmatprep.mubr.msk.bf16.mxu1 %vm2933_vm1, %v2932_v0  ;;  %v1914_v47 = vld [vmem:[#allocation5] sm:$0xff] }
0x108e   :  { %2658 = vmatpush3.bf16.msra.mxu1 %v3319_v20  ;;  %v2464_v20 = vunpack.c.h.bf16 %v2485_v29  ;;  %v1915_v48 = vld [vmem:[#allocation5 + $0x8] sm:$0xff] }
0x1145   :  { %v1765_v30 = vpop.f32.mrf.mxu0 }
0x1146   :  { %v1777_v18 = vadd.f32 %v2459_v28, %v1765_v30 }
0x1147   :  { %v2637_v32 = vpop.f32.mrf.mxu0 }
0x1148   :  { %2864 = vtanh.f32 %v1777_v18  ;;  %v2388_v49 = vmul.f32 -1.442695, %v1777_v18 }
0x1149   :  { %v1768_v33 = vpop.f32.mrf.mxu0  ;;  %v1900_v34 = vpop.f32.mrf.mxu1 }
0x114a   :  { %v1778_v0 = vadd.f32 %v2460_v31, %v1768_v33  ;;  %v1912_v35 = vadd.f32 %v2463_v19, %v1900_v34 }
0x114b   :  { %v2638_v36 = vpop.f32.mrf.mxu0  ;;  %v2645_v37 = vpop.f32.mrf.mxu1 }
0x114c   :  { %2866 = vtanh.f32 %v1778_v0  ;;  %v2389_v50 = vmul.f32 -1.442695, %v1778_v0  ;;  %v2395_v1 = vmul.f32 -1.442695, %v1912_v35 }
0x114d   :  { %2868 = vtanh.f32 %v1912_v35  ;;  %v1903_v38 = vpop.f32.mrf.mxu1 }
0x114e   :  { %v1913_v39 = vadd.f32 %v2464_v20, %v1903_v38 }
0x114f   :  { %v2646_v40 = vpop.f32.mrf.mxu1 }
0x1150   :  { %2870 = vtanh.f32 %v1913_v39  ;;  %v2396_v51 = vmul.f32 -1.442695, %v1913_v39 }
0x1151   :  { %2872 = vpow2.f32 %v2388_v49 }
0x1152   :  { %2874 = vpow2.f32 %v2389_v50 }
0x1153   :  { %2876 = vpow2.f32 %v2395_v1  ;;  %v2486_v1 = vld [vmem:[%s3569_s0 + $0x38] sm:$0xff]  }
0x1154   :  { %2878 = vpow2.f32 %v2396_v51  ;;  %v2467_v51 = vunpack.c.l.bf16 %v2486_v1 }
0x1155   :  { %v2865_v41 = vpop.eup %2864 }
0x1156   :  { %1807 = vrot.lane.b32.xlu0 %v2865_v41, %s2934_s30 }
0x1159   :  { %v2867_v42 = vpop.eup %2866 }
0x115a   :  { %v2869_v43 = vpop.eup %2868  ;;  %1809 = vrot.lane.b32.xlu1 %v2867_v42, %s2934_s30 }
0x115b   :  { %1942 = vrot.lane.b32.xlu0 %v2869_v43, %s2934_s30 }
0x115d   :  { %v2871_v44 = vpop.eup %2870 }
0x115e   :  { %1944 = vrot.lane.b32.xlu1 %v2871_v44, %s2934_s30  ;;  %v2873_v2 = vpop.eup %2872 }
0x115f   :  { %1797 = vrot.lane.b32.xlu0 %v1779_v45, %s2934_s30  ;;  %v1787_v3 = vadd.f32 1.0, %v2873_v2  ;;  %v2875_v52 = vpop.eup %2874  ;;  %v2470_v2 = vld [vmem:[%s3570_s1] sm:$0xff]  }
0x1160   :  { %v2877_v53 = vpop.eup %2876  ;;  %v1788_v54 = vadd.f32 1.0, %v2875_v52 }
0x1161   :  { %2880 = vrcp.f32 %v1787_v3  ;;  %v2879_v55 = vpop.eup %2878  ;;  %v1922_v56 = vadd.f32 1.0, %v2877_v53  ;;  %v2468_v53 = vunpack.c.h.bf16 %v2486_v1 }
0x1162   :  { %1799 = vrot.lane.b32.xlu1 %v1780_v46, %s2934_s30  ;;  %2882 = vrcp.f32 %v1788_v54  ;;  %v1923_v57 = vadd.f32 1.0, %v2879_v55  ;;  %v2471_v54 = vunpack.c.l.bf16 %v2470_v2 }
0x1163   :  { %1932 = vrot.lane.b32.xlu0 %v1914_v47, %s2934_s30  ;;  %2884 = vrcp.f32 %v1922_v56 }
0x1164   :  { %2886 = vrcp.f32 %v1923_v57 }
0x1166   :  { %1934 = vrot.lane.b32.xlu1 %v1915_v48, %s2934_s30 }
0x116e   :  { %v2881_v4 = vpop.eup %2880 }
0x116f   :  { %v2883_v60 = vpop.eup %2882 }
0x1170   :  { %v2885_v62 = vpop.eup %2884 }
0x1171   :  { %v2887_v7 = vpop.eup %2886 }
0x11c8   :  { %v1808_v58 = vpop.permute.xlu0 %1807 }
0x11c9   :  { %v1813_v59 = vmul.f32 %v2881_v4, %v1808_v58 }
0x11cb   :  { %1817 = vrot.lane.b32.xlu0 %v1813_v59, %s2934_s30  ;;  %v2472_v59 = vunpack.c.h.bf16 %v2470_v2 }
0x11cc   :  { %v1810_v61 = vpop.permute.xlu1 %1809 }
0x11cd   :  { %v1814_v63 = vmul.f32 %v2883_v60, %v1810_v61  ;;  %v1943_v5 = vpop.permute.xlu0 %1942 }
0x11ce   :  { %v1948_v6 = vmul.f32 %v2885_v62, %v1943_v5 }
0x11cf   :  { %1819 = vrot.lane.b32.xlu1 %v1814_v63, %s2934_s30 }
0x11d0   :  { %1952 = vrot.lane.b32.xlu0 %v1948_v6, %s2934_s30  ;;  %v1945_v8 = vpop.permute.xlu1 %1944 }
0x11d1   :  { %v1949_v9 = vmul.f32 %v2887_v7, %v1945_v8  ;;  %v1798_v10 = vpop.permute.xlu0 %1797 }
0x11d2   :  { %v1803_v13 = vmul.f32 %v2881_v4, %v1798_v10 }
0x11d3   :  { %1954 = vrot.lane.b32.xlu1 %v1949_v9, %s2934_s30 }
0x11d4   :  { %v1800_v11 = vpop.permute.xlu1 %1799 }
0x11d5   :  { %v1933_v12 = vpop.permute.xlu0 %1932  ;;  %v1804_v21 = vmul.f32 %v2883_v60, %v1800_v11 }
0x11d6   :  { %v1938_v22 = vmul.f32 %v2885_v62, %v1933_v12 }
0x11d8   :  { %v1935_v14 = vpop.permute.xlu1 %1934 }
0x11d9   :  { %v1939_v27 = vmul.f32 %v2887_v7, %v1935_v14 }
0x123d   :  { %v1818_v15 = vpop.permute.xlu0 %1817 }
0x123e   :  { %v1823_v17 = vadd.f32 %v1818_v15, %v1803_v13 }
0x1240   :  { %2888 = vtanh.f32 %v1823_v17 }
0x1241   :  { %v1820_v23 = vpop.permute.xlu1 %1819 }
0x1242   :  { %v1824_v24 = vadd.f32 %v1820_v23, %v1804_v21  ;;  %v1953_v25 = vpop.permute.xlu0 %1952 }
0x1243   :  { %v1958_v26 = vadd.f32 %v1953_v25, %v1938_v22 }
0x1244   :  { %2890 = vtanh.f32 %v1824_v24 }
0x1245   :  { %2892 = vtanh.f32 %v1958_v26  ;;  %v1955_v16 = vpop.permute.xlu1 %1954 }
0x1246   :  { %v1959_v28 = vadd.f32 %v1955_v16, %v1939_v27 }
0x1248   :  { %2894 = vtanh.f32 %v1959_v28 }
0x124d   :  { %v2889_v29 = vpop.eup %2888 }
0x124e   :  { %1829 = vrot.lane.b32.xlu0 %v2889_v29, %s2934_s30 }
0x1251   :  { %v2891_v30 = vpop.eup %2890 }
0x1252   :  { %v2893_v18 = vpop.eup %2892  ;;  %1831 = vrot.lane.b32.xlu1 %v2891_v30, %s2934_s30 }
0x1253   :  { %1964 = vrot.lane.b32.xlu0 %v2893_v18, %s2934_s30 }
0x1255   :  { %v2895_v31 = vpop.eup %2894 }
0x1256   :  { %1966 = vrot.lane.b32.xlu1 %v2895_v31, %s2934_s30 }
0x12c0   :  { %v1830_v19 = vpop.permute.xlu0 %1829 }
0x12c1   :  { %v1835_v32 = vmul.f32 %v2881_v4, %v1830_v19 }
0x12c3   :  { %1839 = vrot.lane.b32.xlu0 %v1835_v32, %s2935_s6 }
0x12c4   :  { %v1832_v33 = vpop.permute.xlu1 %1831 }
0x12c5   :  { %v1836_v34 = vmul.f32 %v2883_v60, %v1832_v33  ;;  %v1965_v0 = vpop.permute.xlu0 %1964 }
0x12c6   :  { %v1970_v35 = vmul.f32 %v2885_v62, %v1965_v0 }
0x12c7   :  { %1841 = vrot.lane.b32.xlu1 %v1836_v34, %s2935_s6 }
0x12c8   :  { %1974 = vrot.lane.b32.xlu0 %v1970_v35, %s2935_s6  ;;  %v1967_v20 = vpop.permute.xlu1 %1966 }
0x12c9   :  { %v1971_v36 = vmul.f32 %v2887_v7, %v1967_v20 }
0x12cb   :  { %1976 = vrot.lane.b32.xlu1 %v1971_v36, %s2935_s6 }
0x12cc   :  { %1849 = vrot.lane.b32.xlu0 %v1823_v17, %s2936_s7 }
0x12cf   :  { %1851 = vrot.lane.b32.xlu1 %v1824_v24, %s2936_s7 }
0x12d0   :  { %1984 = vrot.lane.b32.xlu0 %v1958_v26, %s2936_s7 }
0x12d3   :  { %1986 = vrot.lane.b32.xlu1 %v1959_v28, %s2936_s7 }
0x1335   :  { %v1840_v37 = vpop.permute.xlu0 %1839 }
0x1336   :  { %1845 = vst.msk [vmem:[#allocation2] sm:$0xff] %vm65_vm0, %v1840_v37  ;;  %2390 = vst.msk [vmem:[%s3571_s4 + $0x60] sm:$0xff] %vm65_vm0, %v1840_v37 }
0x1339   :  { %v1842_v38 = vpop.permute.xlu1 %1841 }
0x133a   :  { %1846 = vst.msk [vmem:[#allocation2 + $0x8] sm:$0xff] %vm65_vm0, %v1842_v38  ;;  %2391 = vst.msk [vmem:[%s3571_s4 + $0x68] sm:$0xff] %vm65_vm0, %v1842_v38  ;;  %v1975_v39 = vpop.permute.xlu0 %1974 }
0x133b   :  { %1980 = vst.msk [vmem:[#allocation4] sm:$0xff] %vm65_vm0, %v1975_v39  ;;  %2397 = vst.msk [vmem:[%s3572_s5 + $0x10] sm:$0xff] %vm65_vm0, %v1975_v39 }
0x133d   :  { %v1977_v40 = vpop.permute.xlu1 %1976  ;;  %v1995_v43 = vld [vmem:[#allocation2] sm:$0xff] }
0x133e   :  { %1981 = vst.msk [vmem:[#allocation4 + $0x8] sm:$0xff] %vm65_vm0, %v1977_v40  ;;  %2398 = vst.msk [vmem:[%s3572_s5 + $0x18] sm:$0xff] %vm65_vm0, %v1977_v40  ;;  %v1850_v41 = vpop.permute.xlu0 %1849 }
0x133f   :  { %1855 = vst.msk [vmem:[#allocation3] sm:$0xff] %vm65_vm0, %v1850_v41 }
0x1341   :  { %v1852_v42 = vpop.permute.xlu1 %1851  ;;  %v1996_v44 = vld [vmem:[#allocation2 + $0x8] sm:$0xff] }
0x1342   :  { %1856 = vst.msk [vmem:[#allocation3 + $0x8] sm:$0xff] %vm65_vm0, %v1852_v42  ;;  %v1985_v45 = vpop.permute.xlu0 %1984  ;;  %v1997_v46 = vpack.c.bf16 %v1996_v44, %v1995_v43  ;;  %v2130_v48 = vld [vmem:[#allocation4] sm:$0xff] }
0x1343   :  { %1990 = vst.msk [vmem:[#allocation5] sm:$0xff] %vm65_vm0, %v1985_v45 }
0x1344   :  { %2652 = vmatmul.mubr.msk.bf16.vlgmr.msra.gmra.mxu0 %vm65_vm0, %v1997_v46 }
0x1345   :  { %v1987_v47 = vpop.permute.xlu1 %1986  ;;  %v2131_v49 = vld [vmem:[#allocation4 + $0x8] sm:$0xff] }
0x1346   :  { %1991 = vst.msk [vmem:[#allocation5 + $0x8] sm:$0xff] %vm65_vm0, %v1987_v47  ;;  %v2132_v50 = vpack.c.bf16 %v2131_v49, %v2130_v48  ;;  %v2049_v10 = vld [vmem:[#allocation3] sm:$0xff] }
0x1348   :  { %2660 = vmatmul.mubr.msk.bf16.vlgmr.msra.gmra.mxu1 %vm65_vm0, %v2132_v50 }
0x1349   :  { %v2050_v11 = vld [vmem:[#allocation3 + $0x8] sm:$0xff] }
0x134a   :  { %v2183_v12 = vld [vmem:[#allocation5] sm:$0xff] }
0x134d   :  { %v2184_v13 = vld [vmem:[#allocation5 + $0x8] sm:$0xff] }
0x1404   :  { %v2035_v3 = vpop.f32.mrf.mxu0 }
0x1405   :  { %v2047_v52 = vadd.f32 %v2467_v51, %v2035_v3 }
0x1406   :  { %v2653_v55 = vpop.f32.mrf.mxu0 }
0x1407   :  { %2896 = vtanh.f32 %v2047_v52  ;;  %v2402_v14 = vmul.f32 -1.442695, %v2047_v52 }
0x1408   :  { %v2038_v56 = vpop.f32.mrf.mxu0  ;;  %v2170_v57 = vpop.f32.mrf.mxu1 }
0x1409   :  { %v2048_v4 = vadd.f32 %v2468_v53, %v2038_v56  ;;  %v2181_v58 = vadd.f32 %v2471_v54, %v2170_v57 }
0x140a   :  { %v2654_v60 = vpop.f32.mrf.mxu0  ;;  %v2661_v61 = vpop.f32.mrf.mxu1 }
0x140b   :  { %2898 = vtanh.f32 %v2048_v4  ;;  %v2403_v15 = vmul.f32 -1.442695, %v2048_v4  ;;  %v2407_v17 = vmul.f32 -1.442695, %v2181_v58 }
0x140c   :  { %2900 = vtanh.f32 %v2181_v58  ;;  %v2173_v62 = vpop.f32.mrf.mxu1 }
0x140d   :  { %v2182_v63 = vadd.f32 %v2472_v59, %v2173_v62 }
0x140e   :  { %v2662_v5 = vpop.f32.mrf.mxu1 }
0x140f   :  { %2902 = vtanh.f32 %v2182_v63  ;;  %v2408_v21 = vmul.f32 -1.442695, %v2182_v63 }
0x1410   :  { %2904 = vpow2.f32 %v2402_v14 }
0x1411   :  { %2906 = vpow2.f32 %v2403_v15 }
0x1412   :  { %2908 = vpow2.f32 %v2407_v17 }
0x1413   :  { %2910 = vpow2.f32 %v2408_v21 }
0x1414   :  { %v2897_v6 = vpop.eup %2896 }
0x1415   :  { %2077 = vrot.lane.b32.xlu0 %v2897_v6, %s2934_s30 }
0x1418   :  { %v2899_v7 = vpop.eup %2898 }
0x1419   :  { %v2901_v8 = vpop.eup %2900  ;;  %2079 = vrot.lane.b32.xlu1 %v2899_v7, %s2934_s30 }
0x141a   :  { %2211 = vrot.lane.b32.xlu0 %v2901_v8, %s2934_s30 }
0x141c   :  { %v2903_v9 = vpop.eup %2902 }
0x141d   :  { %2213 = vrot.lane.b32.xlu1 %v2903_v9, %s2934_s30  ;;  %v2905_v22 = vpop.eup %2904 }
0x141e   :  { %2067 = vrot.lane.b32.xlu0 %v2049_v10, %s2934_s30  ;;  %v2057_v23 = vadd.f32 1.0, %v2905_v22  ;;  %v2907_v24 = vpop.eup %2906 }
0x141f   :  { %v2909_v25 = vpop.eup %2908  ;;  %v2058_v26 = vadd.f32 1.0, %v2907_v24 }
0x1420   :  { %2912 = vrcp.f32 %v2057_v23  ;;  %v2911_v27 = vpop.eup %2910  ;;  %v2191_v16 = vadd.f32 1.0, %v2909_v25 }
0x1421   :  { %2069 = vrot.lane.b32.xlu1 %v2050_v11, %s2934_s30  ;;  %2914 = vrcp.f32 %v2058_v26  ;;  %v2192_v28 = vadd.f32 1.0, %v2911_v27 }
0x1422   :  { %2201 = vrot.lane.b32.xlu0 %v2183_v12, %s2934_s30  ;;  %2916 = vrcp.f32 %v2191_v16 }
0x1423   :  { %2918 = vrcp.f32 %v2192_v28 }
0x1425   :  { %2203 = vrot.lane.b32.xlu1 %v2184_v13, %s2934_s30 }
0x142d   :  { %v2913_v29 = vpop.eup %2912 }
0x142e   :  { %v2915_v31 = vpop.eup %2914 }
0x142f   :  { %v2917_v32 = vpop.eup %2916 }
0x1430   :  { %v2919_v35 = vpop.eup %2918 }
0x1487   :  { %v2078_v30 = vpop.permute.xlu0 %2077 }
0x1488   :  { %v2083_v18 = vmul.f32 %v2913_v29, %v2078_v30 }
0x148a   :  { %2087 = vrot.lane.b32.xlu0 %v2083_v18, %s2934_s30 }
0x148b   :  { %v2080_v19 = vpop.permute.xlu1 %2079 }
0x148c   :  { %v2084_v33 = vmul.f32 %v2915_v31, %v2080_v19  ;;  %v2212_v34 = vpop.permute.xlu0 %2211 }
0x148d   :  { %v2217_v0 = vmul.f32 %v2917_v32, %v2212_v34 }
0x148e   :  { %2089 = vrot.lane.b32.xlu1 %v2084_v33, %s2934_s30 }
0x148f   :  { %2221 = vrot.lane.b32.xlu0 %v2217_v0, %s2934_s30  ;;  %v2214_v20 = vpop.permute.xlu1 %2213 }
0x1490   :  { %v2218_v36 = vmul.f32 %v2919_v35, %v2214_v20  ;;  %v2068_v37 = vpop.permute.xlu0 %2067 }
0x1491   :  { %v2073_v40 = vmul.f32 %v2913_v29, %v2068_v37 }
0x1492   :  { %2223 = vrot.lane.b32.xlu1 %v2218_v36, %s2934_s30 }
0x1493   :  { %v2070_v38 = vpop.permute.xlu1 %2069 }
0x1494   :  { %v2202_v39 = vpop.permute.xlu0 %2201  ;;  %v2074_v44 = vmul.f32 %v2915_v31, %v2070_v38 }
0x1495   :  { %v2207_v45 = vmul.f32 %v2917_v32, %v2202_v39 }
0x1497   :  { %v2204_v41 = vpop.permute.xlu1 %2203 }
0x1498   :  { %v2208_v50 = vmul.f32 %v2919_v35, %v2204_v41 }
0x14fc   :  { %v2088_v42 = vpop.permute.xlu0 %2087 }
0x14fd   :  { %v2093_v43 = vadd.f32 %v2088_v42, %v2073_v40 }
0x14ff   :  { %2920 = vtanh.f32 %v2093_v43 }
0x1500   :  { %v2090_v46 = vpop.permute.xlu1 %2089 }
0x1501   :  { %v2094_v47 = vadd.f32 %v2090_v46, %v2074_v44  ;;  %v2222_v48 = vpop.permute.xlu0 %2221 }
0x1502   :  { %v2227_v49 = vadd.f32 %v2222_v48, %v2207_v45 }
0x1503   :  { %2922 = vtanh.f32 %v2094_v47 }
0x1504   :  { %2924 = vtanh.f32 %v2227_v49  ;;  %v2224_v1 = vpop.permute.xlu1 %2223 }
0x1505   :  { %v2228_v51 = vadd.f32 %v2224_v1, %v2208_v50 }
0x1507   :  { %2926 = vtanh.f32 %v2228_v51 }
0x150c   :  { %v2921_v2 = vpop.eup %2920 }
0x150d   :  { %2099 = vrot.lane.b32.xlu0 %v2921_v2, %s2934_s30 }
0x1510   :  { %v2923_v3 = vpop.eup %2922 }
0x1511   :  { %v2925_v52 = vpop.eup %2924  ;;  %2101 = vrot.lane.b32.xlu1 %v2923_v3, %s2934_s30 }
0x1512   :  { %2233 = vrot.lane.b32.xlu0 %v2925_v52, %s2934_s30 }
0x1514   :  { %v2927_v53 = vpop.eup %2926 }
0x1515   :  { %2235 = vrot.lane.b32.xlu1 %v2927_v53, %s2934_s30 }
0x1516   :  { %2119 = vrot.lane.b32.xlu0 %v2093_v43, %s2936_s7 }
0x1519   :  { %2121 = vrot.lane.b32.xlu1 %v2094_v47, %s2936_s7 }
0x157f   :  { %v2100_v54 = vpop.permute.xlu0 %2099 }
0x1580   :  { %v2105_v55 = vmul.f32 %v2913_v29, %v2100_v54 }
0x1582   :  { %2109 = vrot.lane.b32.xlu0 %v2105_v55, %s2935_s6 }
0x1583   :  { %v2102_v56 = vpop.permute.xlu1 %2101 }
0x1584   :  { %v2106_v57 = vmul.f32 %v2915_v31, %v2102_v56  ;;  %v2234_v4 = vpop.permute.xlu0 %2233 }
0x1585   :  { %v2239_v58 = vmul.f32 %v2917_v32, %v2234_v4 }
0x1586   :  { %2111 = vrot.lane.b32.xlu1 %v2106_v57, %s2935_s6 }
0x1587   :  { %2243 = vrot.lane.b32.xlu0 %v2239_v58, %s2935_s6  ;;  %v2236_v59 = vpop.permute.xlu1 %2235 }
0x1588   :  { %v2240_v60 = vmul.f32 %v2919_v35, %v2236_v59  ;;  %v2120_v61 = vpop.permute.xlu0 %2119 }
0x1589   :  { %2125 = vst.msk [vmem:[#allocation3] sm:$0xff] %vm65_vm0, %v2120_v61 }
0x158a   :  { %2245 = vrot.lane.b32.xlu1 %v2240_v60, %s2935_s6 }
0x158b   :  { %2253 = vrot.lane.b32.xlu0 %v2227_v49, %s2936_s7  ;;  %v2122_v62 = vpop.permute.xlu1 %2121 }
0x158c   :  { %2126 = vst.msk [vmem:[#allocation3 + $0x8] sm:$0xff] %vm65_vm0, %v2122_v62 }
0x158e   :  { %2255 = vrot.lane.b32.xlu1 %v2228_v51, %s2936_s7 }
0x15f4   :  { %v2110_v63 = vpop.permute.xlu0 %2109 }
0x15f5   :  { %2115 = vst.msk [vmem:[#allocation2] sm:$0xff] %vm65_vm0, %v2110_v63  ;;  %2404 = vst.msk [vmem:[%s3571_s4 + $0x70] sm:$0xff] %vm65_vm0, %v2110_v63 }
0x15f8   :  { %v2112_v5 = vpop.permute.xlu1 %2111 }
0x15f9   :  { %2116 = vst.msk [vmem:[#allocation2 + $0x8] sm:$0xff] %vm65_vm0, %v2112_v5  ;;  %2405 = vst.msk [vmem:[%s3571_s4 + $0x78] sm:$0xff] %vm65_vm0, %v2112_v5  ;;  %v2244_v6 = vpop.permute.xlu0 %2243 }
0x15fa   :  { %2249 = vst.msk [vmem:[#allocation4] sm:$0xff] %vm65_vm0, %v2244_v6  ;;  %2261 = vst.msk [vmem:[%s3572_s5] sm:$0xff] %vm65_vm0, %v2244_v6 }
0x15fc   :  { %v2246_v7 = vpop.permute.xlu1 %2245 }
0x15fd   :  { %2250 = vst.msk [vmem:[#allocation4 + $0x8] sm:$0xff] %vm65_vm0, %v2246_v7  ;;  %2262 = vst.msk [vmem:[%s3572_s5 + $0x8] sm:$0xff] %vm65_vm0, %v2246_v7  ;;  %v2254_v8 = vpop.permute.xlu0 %2253 }
0x15fe   :  { %2259 = vst.msk [vmem:[#allocation5] sm:$0xff] %vm65_vm0, %v2254_v8 }
0x1600   :  { %v2256_v9 = vpop.permute.xlu1 %2255 }
0x1601   :  { %2260 = vst.msk [vmem:[#allocation5 + $0x8] sm:$0xff] %vm65_vm0, %v2256_v9 }

</bundles_post_ra>
